<compile_context>
chip_gen: v5e
topology: v5e:2x2
jax: 0.10.0
libtpu: 0.0.40
codegen_flags: <defaults>
</compile_context>

<pallas_src>
import functools

import jax
import jax.numpy as jnp
from jax.experimental import pallas as pl
from jax.experimental.pallas import tpu as pltpu


_NEG_BIG = -9000000000000000.0  # same constant as the PyTorch module
_LEAKY_SLOPE = 0.2              # nn.LeakyReLU(0.2)


def _gconv_bn_relu_attn_kernel(
    adj_ref, adjT_ref, node_ref, nodeT_ref, dist_ref,
    w_node_ref, w_nodeT_ref, w_e1_ref, w_e2T_ref,
    w_e3_ref, scale_ref, bias_ref,
    out_ref, *, dilation):
    """One batch element per grid step; all output channels handled in-kernel."""
    f32 = jnp.float32
    N = adj_ref.shape[-1]
    nout = w_node_ref.shape[0]
    edge_nin = dist_ref.shape[0]

    # Adjacency masks:  A[i, j] = (adj == dilation),  AT[i, j] = A[j, i]
    A = (adj_ref[...] == dilation).astype(f32)                       # (N, N)
    AT = (adjT_ref[...] == dilation).astype(f32)                     # (N, N)
    neg_add = jnp.where(A == 0.0, _NEG_BIG, 0.0)                     # (N, N)

    # NodeConvAttn 1x1 conv, factorized:  node_mat[o,i,j] = P[o,j] * A[i,j]
    P = jnp.dot(w_node_ref[...], node_ref[...],
                preferred_element_type=f32)                          # (nout, N)
    PT = jnp.dot(nodeT_ref[...], w_nodeT_ref[...],
                 preferred_element_type=f32)                         # (N, nout) == P^T
    # EdgeConvAttn 1x1 conv, split over its concatenated channel groups:
    #   pre[o,i,j] = A[i,j]*Q1[o,j] + A[j,i]*Q2[o,i] + sum_c W_e3[o,c]*dist[c,i,j]
    Q1 = jnp.dot(w_e1_ref[...], P, preferred_element_type=f32)       # (nout, N)
    Q2T = jnp.dot(PT, w_e2T_ref[...], preferred_element_type=f32)    # (N, nout), Q2T[i,o]=Q2[o,i]

    dist = [dist_ref[c] for c in range(edge_nin)]                    # hoisted (N, N) loads

    for o in range(nout):  # static unroll over output channels -- pure 2-D tile work
        d = dist[0] * w_e3_ref[o * edge_nin]
        for c in range(1, edge_nin):
            d = d + dist[c] * w_e3_ref[o * edge_nin + c]
        pre = A * Q1[o:o + 1, :] + AT * Q2T[:, o:o + 1] + d          # edge 1x1 conv
        pre = jnp.where(pre >= 0.0, pre, _LEAKY_SLOPE * pre)         # LeakyReLU(0.2)
        s = pre * A + neg_add                                        # mask non-edges
        m = jnp.max(s, axis=-1, keepdims=True)
        e = jnp.exp(s - m)
        z = jnp.sum(e, axis=-1, keepdims=True)
        attn = (e / z) * A                                           # softmax(dim=-1) * adj
        nm = P[o:o + 1, :] * A                                       # node_mat channel o
        r = jnp.sum(nm * attn, axis=-1, keepdims=True)               # (N, 1) sum over j
        y = r * scale_ref[o] + bias_ref[o]                           # folded BatchNorm1d
        out_ref[:, o:o + 1] = jnp.maximum(y, 0.0)                    # ReLU


def gconv_bn_relu_attn(adj, edge, node, w_node, w_edge, gamma, beta,
                       running_mean, running_var, *, dilation=1, eps=1e-5):
    """adj:(B,N,N), edge:(B,edge_nin,N,N), node:(B,node_nin,N) -> (B,nout,N) f32."""
    f32 = jnp.float32
    adj = adj.astype(f32)
    edge = edge.astype(f32)
    node = node.astype(f32)

    B, N, _ = adj.shape
    nout, node_nin = w_node.shape
    edge_nin = edge.shape[1]
    assert w_edge.shape == (nout, 2 * nout + edge_nin)
    assert node.shape == (B, node_nin, N) and edge.shape == (B, edge_nin, N, N)

    # Split the EdgeConvAttn 1x1-conv weight over its concatenated input groups.
    w_e1 = w_edge[:, :nout].astype(f32)           # applies to node_mat
    w_e2 = w_edge[:, nout:2 * nout]               # applies to node_mat^T
    w_e3 = w_edge[:, 2 * nout:]                   # applies to edge/dist
    # Tiny pre-transposed copies so the kernel never needs an in-kernel relayout.
    adjT = jnp.swapaxes(adj, 1, 2)
    nodeT = jnp.swapaxes(node, 1, 2)
    w_nodeT = w_node.T.astype(f32)
    w_e2T = w_e2.T.astype(f32)
    w_e3_flat = w_e3.reshape(-1).astype(f32)      # per-(o, c) scalars -> SMEM

    # Fold inference-mode BatchNorm1d into a per-channel scale/bias (scalars in SMEM).
    scale = (gamma / jnp.sqrt(running_var + eps)).astype(f32)
    bias = (beta - running_mean * scale).astype(f32)

    kernel = functools.partial(_gconv_bn_relu_attn_kernel, dilation=float(dilation))

    out_nhc = pl.pallas_call(
        kernel,
        out_shape=jax.ShapeDtypeStruct((B, N, nout), f32),
        grid_spec=pltpu.PrefetchScalarGridSpec(
            num_scalar_prefetch=0,
            grid=(B,),
            in_specs=[
                pl.BlockSpec((None, N, N), lambda b: (b, 0, 0)),               # adj
                pl.BlockSpec((None, N, N), lambda b: (b, 0, 0)),               # adj^T
                pl.BlockSpec((None, node_nin, N), lambda b: (b, 0, 0)),        # node
                pl.BlockSpec((None, N, node_nin), lambda b: (b, 0, 0)),        # node^T
                pl.BlockSpec((None, edge_nin, N, N), lambda b: (b, 0, 0, 0)),  # edge/dist
                pl.BlockSpec((nout, node_nin), lambda b: (0, 0)),              # W_node
                pl.BlockSpec((node_nin, nout), lambda b: (0, 0)),              # W_node^T
                pl.BlockSpec((nout, nout), lambda b: (0, 0)),                  # W_e1
                pl.BlockSpec((nout, nout), lambda b: (0, 0)),                  # W_e2^T
                pl.BlockSpec(memory_space=pltpu.MemorySpace.SMEM),             # W_e3 scalars
                pl.BlockSpec(memory_space=pltpu.MemorySpace.SMEM),             # BN scale
                pl.BlockSpec(memory_space=pltpu.MemorySpace.SMEM),             # BN bias
            ],
            out_specs=pl.BlockSpec((None, N, nout), lambda b: (b, 0, 0)),
        ),
        compiler_params=pltpu.CompilerParams(dimension_semantics=("parallel",)),
    )(adj, adjT, node, nodeT, edge, w_node.astype(f32), w_nodeT, w_e1, w_e2T,
      w_e3_flat, scale, bias)

    # (B, N, nout) -> (B, nout, N) to match the PyTorch layout (tiny transpose).
    return jnp.transpose(out_nhc, (0, 2, 1))


def gconv_bn_relu_attn_reference(adj, edge, node, w_node, w_edge, gamma, beta,
                                 running_mean, running_var, dilation=1, eps=1e-5):
    """Pure-JAX replica of the PyTorch forward (inference-mode BatchNorm), for checking."""
    f32 = jnp.float32
    hi = jax.lax.Precision.HIGHEST
    A = (adj.astype(f32) == float(dilation)).astype(f32)[:, None, :, :]      # (B,1,N,N)
    # NodeConvAttn
    node_exp = node.astype(f32)[:, :, None, :] * A                           # (B,nin,N,N)
    node_mat = jnp.einsum('oc,bcij->boij', w_node, node_exp, precision=hi)   # (B,nout,N,N)
    # EdgeConvAttn
    pairs = jnp.concatenate(
        [node_mat, jnp.swapaxes(node_mat, -1, -2), edge.astype(f32)], axis=1)
    pre = jnp.einsum('oc,bcij->boij', w_edge, pairs, precision=hi)
    pre = jnp.where(pre >= 0.0, pre, _LEAKY_SLOPE * pre)
    out = pre * A
    out = _NEG_BIG * (A == 0.0).astype(f32) + out
    out = jax.nn.softmax(out, axis=-1)
    out = out * A
    x = jnp.sum(node_mat * out, axis=-1)                                     # (B,nout,N)
    y = (x - running_mean[None, :, None]) / jnp.sqrt(running_var + eps)[None, :, None]
    y = y * gamma[None, :, None] + beta[None, :, None]
    return jnp.maximum(y, 0.0)


if __name__ == "__main__":
    key = jax.random.PRNGKey(0)
    ks = jax.random.split(key, 9)

    B, N = 2, 16                       # batch, number of graph nodes
    node_nin, edge_nin, nout = 8, 4, 32
    dilation = 1

    # Inputs/weights on a coarse dyadic grid so matmul-precision differences between the
    # MXU path and the XLA reference cannot affect the correctness comparison.
    adj = jax.random.randint(ks[0], (B, N, N), 0, 3).astype(jnp.float32)                 # labels 0..2
    edge = jax.random.randint(ks[1], (B, edge_nin, N, N), -2, 3).astype(jnp.float32) / 2.0
    node = jax.random.randint(ks[2], (B, node_nin, N), -2, 3).astype(jnp.float32) / 4.0
    w_node = jax.random.randint(ks[3], (nout, node_nin), -2, 3).astype(jnp.float32) / 4.0
    w_edge = jax.random.randint(ks[4], (nout, 2 * nout + edge_nin), -2, 3).astype(jnp.float32) / 4.0

    gamma = jax.random.uniform(ks[5], (nout,), minval=0.5, maxval=1.5, dtype=jnp.float32)
    beta = 0.1 * jax.random.normal(ks[6], (nout,), dtype=jnp.float32)
    running_mean = 0.1 * jax.random.normal(ks[7], (nout,), dtype=jnp.float32)
    running_var = jax.random.uniform(ks[8], (nout,), minval=0.5, maxval=1.5, dtype=jnp.float32)

    fwd = jax.jit(gconv_bn_relu_attn, static_argnames=("dilation",))
    out = fwd(adj, edge, node, w_node, w_edge, gamma, beta, running_mean,
              running_var, dilation=dilation)
    out = jax.block_until_ready(out)

    ref = gconv_bn_relu_attn_reference(adj, edge, node, w_node, w_edge, gamma, beta,
                                       running_mean, running_var, dilation=dilation)
    assert out.shape == (B, nout, N), out.shape
    max_err = float(jnp.max(jnp.abs(out - ref)))
    assert jnp.allclose(out, ref, atol=2e-4, rtol=2e-4), max_err

    print("KERNEL_OK")
</pallas_src>

<mosaic_0001>
module attributes {stable_mosaic.version = 11 : i64} {
  func.func @_gconv_bn_relu_attn_kernel(%arg0: i32, %arg1: memref<1x16x16xf32, #tpu.memory_space<vmem>>, %arg2: memref<1x16x16xf32, #tpu.memory_space<vmem>>, %arg3: memref<1x8x16xf32, #tpu.memory_space<vmem>>, %arg4: memref<1x16x8xf32, #tpu.memory_space<vmem>>, %arg5: memref<1x4x16x16xf32, #tpu.memory_space<vmem>>, %arg6: memref<32x8xf32, #tpu.memory_space<vmem>>, %arg7: memref<8x32xf32, #tpu.memory_space<vmem>>, %arg8: memref<32x32xf32, #tpu.memory_space<vmem>>, %arg9: memref<32x32xf32, #tpu.memory_space<vmem>>, %arg10: memref<128xf32, #tpu.memory_space<smem>>, %arg11: memref<32xf32, #tpu.memory_space<smem>>, %arg12: memref<32xf32, #tpu.memory_space<smem>>, %arg13: memref<1x16x32xf32, #tpu.memory_space<vmem>>) attributes {dimension_semantics = [#tpu.dimension_semantics<parallel>], iteration_bounds = array<i64: 2>, scalar_prefetch = 0 : i64, scratch_operands = 0 : i64, tpu.core_type = #tpu.core_type<tc>, window_params = [{transform_indices = @transform_0, window_bounds = array<i64: 1, 16, 16>}, {transform_indices = @transform_1, window_bounds = array<i64: 1, 16, 16>}, {transform_indices = @transform_2, window_bounds = array<i64: 1, 8, 16>}, {transform_indices = @transform_3, window_bounds = array<i64: 1, 16, 8>}, {transform_indices = @transform_4, window_bounds = array<i64: 1, 4, 16, 16>}, {pipeline_mode = #tpu.pipeline_mode<synchronous>, transform_indices = @transform_5, window_bounds = array<i64: 32, 8>}, {pipeline_mode = #tpu.pipeline_mode<synchronous>, transform_indices = @transform_6, window_bounds = array<i64: 8, 32>}, {pipeline_mode = #tpu.pipeline_mode<synchronous>, transform_indices = @transform_7, window_bounds = array<i64: 32, 32>}, {pipeline_mode = #tpu.pipeline_mode<synchronous>, transform_indices = @transform_8, window_bounds = array<i64: 32, 32>}, {transform_indices = @transform_9, window_bounds = array<i64: 128>}, {transform_indices = @transform_10, window_bounds = array<i64: 32>}, {transform_indices = @transform_11, window_bounds = array<i64: 32>}, {transform_indices = @transform_12, window_bounds = array<i64: 1, 16, 32>}]} {
    %c0 = arith.constant 0 : index
    %c0_0 = arith.constant 0 : index
    %c0_1 = arith.constant 0 : index
    %0 = vector.load %arg1[%c0, %c0_0, %c0_1] : memref<1x16x16xf32, #tpu.memory_space<vmem>>, vector<1x16x16xf32>
    %1 = vector.shape_cast %0 : vector<1x16x16xf32> to vector<16x16xf32>
    %cst = arith.constant 1.000000e+00 : f32
    %2 = vector.broadcast %cst : f32 to vector<16x16xf32>
    %3 = arith.cmpf oeq, %1, %2 : vector<16x16xf32>
    %4 = arith.extui %3 : vector<16x16xi1> to vector<16x16xi32>
    %5 = arith.sitofp %4 : vector<16x16xi32> to vector<16x16xf32>
    %c0_2 = arith.constant 0 : index
    %c0_3 = arith.constant 0 : index
    %c0_4 = arith.constant 0 : index
    %6 = vector.load %arg2[%c0_2, %c0_3, %c0_4] : memref<1x16x16xf32, #tpu.memory_space<vmem>>, vector<1x16x16xf32>
    %7 = vector.shape_cast %6 : vector<1x16x16xf32> to vector<16x16xf32>
    %cst_5 = arith.constant 1.000000e+00 : f32
    %8 = vector.broadcast %cst_5 : f32 to vector<16x16xf32>
    %9 = arith.cmpf oeq, %7, %8 : vector<16x16xf32>
    %10 = arith.extui %9 : vector<16x16xi1> to vector<16x16xi32>
    %11 = arith.sitofp %10 : vector<16x16xi32> to vector<16x16xf32>
    %cst_6 = arith.constant 0.000000e+00 : f32
    %12 = vector.broadcast %cst_6 : f32 to vector<16x16xf32>
    %13 = arith.cmpf oeq, %5, %12 : vector<16x16xf32>
    %cst_7 = arith.constant -9.000000e+15 : f32
    %cst_8 = arith.constant 0.000000e+00 : f32
    %14 = vector.broadcast %cst_7 : f32 to vector<16x16xf32>
    %15 = vector.broadcast %cst_8 : f32 to vector<16x16xf32>
    %16 = arith.select %13, %14, %15 : vector<16x16xi1>, vector<16x16xf32>
    %c0_9 = arith.constant 0 : index
    %c0_10 = arith.constant 0 : index
    %17 = vector.load %arg6[%c0_9, %c0_10] : memref<32x8xf32, #tpu.memory_space<vmem>>, vector<32x8xf32>
    %c0_11 = arith.constant 0 : index
    %c0_12 = arith.constant 0 : index
    %c0_13 = arith.constant 0 : index
    %18 = vector.load %arg3[%c0_11, %c0_12, %c0_13] : memref<1x8x16xf32, #tpu.memory_space<vmem>>, vector<1x8x16xf32>
    %19 = vector.shape_cast %18 : vector<1x8x16xf32> to vector<8x16xf32>
    %cst_14 = arith.constant dense<0.000000e+00> : vector<32x16xf32>
    %20 = tpu.matmul %17, %19, %cst_14 {dimension_numbers = #tpu.dot_dimension_numbers<[1], [0], [0], [1], [0, 0, 1, 1], [], []>} : vector<32x8xf32>, vector<8x16xf32>, vector<32x16xf32> -> vector<32x16xf32>
    %c0_15 = arith.constant 0 : index
    %c0_16 = arith.constant 0 : index
    %c0_17 = arith.constant 0 : index
    %21 = vector.load %arg4[%c0_15, %c0_16, %c0_17] : memref<1x16x8xf32, #tpu.memory_space<vmem>>, vector<1x16x8xf32>
    %22 = vector.shape_cast %21 : vector<1x16x8xf32> to vector<16x8xf32>
    %c0_18 = arith.constant 0 : index
    %c0_19 = arith.constant 0 : index
    %23 = vector.load %arg7[%c0_18, %c0_19] : memref<8x32xf32, #tpu.memory_space<vmem>>, vector<8x32xf32>
    %cst_20 = arith.constant dense<0.000000e+00> : vector<16x32xf32>
    %24 = tpu.matmul %22, %23, %cst_20 {dimension_numbers = #tpu.dot_dimension_numbers<[1], [0], [0], [1], [0, 0, 1, 1], [], []>} : vector<16x8xf32>, vector<8x32xf32>, vector<16x32xf32> -> vector<16x32xf32>
    %c0_21 = arith.constant 0 : index
    %c0_22 = arith.constant 0 : index
    %25 = vector.load %arg8[%c0_21, %c0_22] : memref<32x32xf32, #tpu.memory_space<vmem>>, vector<32x32xf32>
    %cst_23 = arith.constant dense<0.000000e+00> : vector<32x16xf32>
    %26 = tpu.matmul %25, %20, %cst_23 {dimension_numbers = #tpu.dot_dimension_numbers<[1], [0], [0], [1], [0, 0, 1, 1], [], []>} : vector<32x32xf32>, vector<32x16xf32>, vector<32x16xf32> -> vector<32x16xf32>
    %c0_24 = arith.constant 0 : index
    %c0_25 = arith.constant 0 : index
    %27 = vector.load %arg9[%c0_24, %c0_25] : memref<32x32xf32, #tpu.memory_space<vmem>>, vector<32x32xf32>
    %cst_26 = arith.constant dense<0.000000e+00> : vector<16x32xf32>
    %28 = tpu.matmul %24, %27, %cst_26 {dimension_numbers = #tpu.dot_dimension_numbers<[1], [0], [0], [1], [0, 0, 1, 1], [], []>} : vector<16x32xf32>, vector<32x32xf32>, vector<16x32xf32> -> vector<16x32xf32>
    %c0_27 = arith.constant 0 : index
    %c0_28 = arith.constant 0 : index
    %c0_29 = arith.constant 0 : index
    %c0_30 = arith.constant 0 : index
    %29 = vector.load %arg5[%c0_27, %c0_28, %c0_29, %c0_30] : memref<1x4x16x16xf32, #tpu.memory_space<vmem>>, vector<1x1x16x16xf32>
    %30 = vector.shape_cast %29 : vector<1x1x16x16xf32> to vector<16x16xf32>
    %c0_31 = arith.constant 0 : index
    %c1 = arith.constant 1 : index
    %c0_32 = arith.constant 0 : index
    %c0_33 = arith.constant 0 : index
    %31 = vector.load %arg5[%c0_31, %c1, %c0_32, %c0_33] : memref<1x4x16x16xf32, #tpu.memory_space<vmem>>, vector<1x1x16x16xf32>
    %32 = vector.shape_cast %31 : vector<1x1x16x16xf32> to vector<16x16xf32>
    %c0_34 = arith.constant 0 : index
    %c2 = arith.constant 2 : index
    %c0_35 = arith.constant 0 : index
    %c0_36 = arith.constant 0 : index
    %33 = vector.load %arg5[%c0_34, %c2, %c0_35, %c0_36] : memref<1x4x16x16xf32, #tpu.memory_space<vmem>>, vector<1x1x16x16xf32>
    %34 = vector.shape_cast %33 : vector<1x1x16x16xf32> to vector<16x16xf32>
    %c0_37 = arith.constant 0 : index
    %c3 = arith.constant 3 : index
    %c0_38 = arith.constant 0 : index
    %c0_39 = arith.constant 0 : index
    %35 = vector.load %arg5[%c0_37, %c3, %c0_38, %c0_39] : memref<1x4x16x16xf32, #tpu.memory_space<vmem>>, vector<1x1x16x16xf32>
    %36 = vector.shape_cast %35 : vector<1x1x16x16xf32> to vector<16x16xf32>
    %c0_40 = arith.constant 0 : index
    %37 = memref.load %arg10[%c0_40] : memref<128xf32, #tpu.memory_space<smem>>
    %38 = vector.broadcast %37 : f32 to vector<16x16xf32>
    %39 = arith.mulf %30, %38 : vector<16x16xf32>
    %c1_41 = arith.constant 1 : index
    %40 = memref.load %arg10[%c1_41] : memref<128xf32, #tpu.memory_space<smem>>
    %41 = vector.broadcast %40 : f32 to vector<16x16xf32>
    %42 = arith.mulf %32, %41 : vector<16x16xf32>
    %43 = arith.addf %39, %42 : vector<16x16xf32>
    %c2_42 = arith.constant 2 : index
    %44 = memref.load %arg10[%c2_42] : memref<128xf32, #tpu.memory_space<smem>>
    %45 = vector.broadcast %44 : f32 to vector<16x16xf32>
    %46 = arith.mulf %34, %45 : vector<16x16xf32>
    %47 = arith.addf %43, %46 : vector<16x16xf32>
    %c3_43 = arith.constant 3 : index
    %48 = memref.load %arg10[%c3_43] : memref<128xf32, #tpu.memory_space<smem>>
    %49 = vector.broadcast %48 : f32 to vector<16x16xf32>
    %50 = arith.mulf %36, %49 : vector<16x16xf32>
    %51 = arith.addf %47, %50 : vector<16x16xf32>
    %52 = vector.extract_strided_slice %26 {offsets = [0, 0], sizes = [1, 16], strides = [1, 1]} : vector<32x16xf32> to vector<1x16xf32>
    %53 = vector.broadcast %52 : vector<1x16xf32> to vector<16x16xf32>
    %54 = arith.mulf %5, %53 : vector<16x16xf32>
    %55 = vector.extract_strided_slice %28 {offsets = [0, 0], sizes = [16, 1], strides = [1, 1]} : vector<16x32xf32> to vector<16x1xf32>
    %56 = vector.broadcast %55 : vector<16x1xf32> to vector<16x16xf32>
    %57 = arith.mulf %11, %56 : vector<16x16xf32>
    %58 = arith.addf %54, %57 : vector<16x16xf32>
    %59 = arith.addf %58, %51 : vector<16x16xf32>
    %cst_44 = arith.constant 0.000000e+00 : f32
    %60 = vector.broadcast %cst_44 : f32 to vector<16x16xf32>
    %61 = arith.cmpf oge, %59, %60 : vector<16x16xf32>
    %cst_45 = arith.constant 2.000000e-01 : f32
    %62 = vector.broadcast %cst_45 : f32 to vector<16x16xf32>
    %63 = arith.mulf %62, %59 : vector<16x16xf32>
    %64 = arith.select %61, %59, %63 : vector<16x16xi1>, vector<16x16xf32>
    %65 = arith.mulf %64, %5 : vector<16x16xf32>
    %66 = arith.addf %65, %16 : vector<16x16xf32>
    %cst_46 = arith.constant dense<0xFF800000> : vector<16xf32>
    %67 = vector.multi_reduction <maximumf>, %66, %cst_46 [1] : vector<16x16xf32> to vector<16xf32>
    %68 = vector.shape_cast %67 : vector<16xf32> to vector<16x1xf32>
    %69 = vector.broadcast %68 : vector<16x1xf32> to vector<16x16xf32>
    %70 = arith.subf %66, %69 : vector<16x16xf32>
    %71 = math.exp %70 : vector<16x16xf32>
    %cst_47 = arith.constant dense<0.000000e+00> : vector<16xf32>
    %72 = vector.multi_reduction <add>, %71, %cst_47 [1] : vector<16x16xf32> to vector<16xf32>
    %73 = vector.shape_cast %72 : vector<16xf32> to vector<16x1xf32>
    %74 = vector.broadcast %73 : vector<16x1xf32> to vector<16x16xf32>
    %75 = arith.divf %71, %74 : vector<16x16xf32>
    %76 = arith.mulf %75, %5 : vector<16x16xf32>
    %77 = vector.extract_strided_slice %20 {offsets = [0, 0], sizes = [1, 16], strides = [1, 1]} : vector<32x16xf32> to vector<1x16xf32>
    %78 = vector.broadcast %77 : vector<1x16xf32> to vector<16x16xf32>
    %79 = arith.mulf %78, %5 : vector<16x16xf32>
    %80 = arith.mulf %79, %76 : vector<16x16xf32>
    %cst_48 = arith.constant dense<0.000000e+00> : vector<16xf32>
    %81 = vector.multi_reduction <add>, %80, %cst_48 [1] : vector<16x16xf32> to vector<16xf32>
    %82 = vector.shape_cast %81 : vector<16xf32> to vector<16x1xf32>
    %c0_49 = arith.constant 0 : index
    %83 = memref.load %arg11[%c0_49] : memref<32xf32, #tpu.memory_space<smem>>
    %84 = vector.broadcast %83 : f32 to vector<16x1xf32>
    %85 = arith.mulf %82, %84 : vector<16x1xf32>
    %c0_50 = arith.constant 0 : index
    %86 = memref.load %arg12[%c0_50] : memref<32xf32, #tpu.memory_space<smem>>
    %87 = vector.broadcast %86 : f32 to vector<16x1xf32>
    %88 = arith.addf %85, %87 : vector<16x1xf32>
    %cst_51 = arith.constant 0.000000e+00 : f32
    %89 = vector.broadcast %cst_51 : f32 to vector<16x1xf32>
    %90 = arith.maximumf %88, %89 : vector<16x1xf32>
    %c0_52 = arith.constant 0 : index
    %c0_53 = arith.constant 0 : index
    %c0_54 = arith.constant 0 : index
    %91 = vector.load %arg13[%c0_52, %c0_53, %c0_54] : memref<1x16x32xf32, #tpu.memory_space<vmem>>, vector<1x16x1xf32>
    %92 = vector.shape_cast %91 : vector<1x16x1xf32> to vector<16x1xf32>
    %93 = vector.shape_cast %90 : vector<16x1xf32> to vector<1x16x1xf32>
    tpu.vector_store %arg13[%c0_52, %c0_53, %c0_54], %93 {strides = array<i32>} : memref<1x16x32xf32, #tpu.memory_space<vmem>>, vector<1x16x1xf32>,
    %c4 = arith.constant 4 : index
    %94 = memref.load %arg10[%c4] : memref<128xf32, #tpu.memory_space<smem>>
    %95 = vector.broadcast %94 : f32 to vector<16x16xf32>
    %96 = arith.mulf %30, %95 : vector<16x16xf32>
    %c5 = arith.constant 5 : index
    %97 = memref.load %arg10[%c5] : memref<128xf32, #tpu.memory_space<smem>>
    %98 = vector.broadcast %97 : f32 to vector<16x16xf32>
    %99 = arith.mulf %32, %98 : vector<16x16xf32>
    %100 = arith.addf %96, %99 : vector<16x16xf32>
    %c6 = arith.constant 6 : index
    %101 = memref.load %arg10[%c6] : memref<128xf32, #tpu.memory_space<smem>>
    %102 = vector.broadcast %101 : f32 to vector<16x16xf32>
    %103 = arith.mulf %34, %102 : vector<16x16xf32>
    %104 = arith.addf %100, %103 : vector<16x16xf32>
    %c7 = arith.constant 7 : index
    %105 = memref.load %arg10[%c7] : memref<128xf32, #tpu.memory_space<smem>>
    %106 = vector.broadcast %105 : f32 to vector<16x16xf32>
    %107 = arith.mulf %36, %106 : vector<16x16xf32>
    %108 = arith.addf %104, %107 : vector<16x16xf32>
    %109 = vector.extract_strided_slice %26 {offsets = [1, 0], sizes = [1, 16], strides = [1, 1]} : vector<32x16xf32> to vector<1x16xf32>
    %110 = vector.broadcast %109 : vector<1x16xf32> to vector<16x16xf32>
    %111 = arith.mulf %5, %110 : vector<16x16xf32>
    %112 = vector.extract_strided_slice %28 {offsets = [0, 1], sizes = [16, 1], strides = [1, 1]} : vector<16x32xf32> to vector<16x1xf32>
    %113 = vector.broadcast %112 : vector<16x1xf32> to vector<16x16xf32>
    %114 = arith.mulf %11, %113 : vector<16x16xf32>
    %115 = arith.addf %111, %114 : vector<16x16xf32>
    %116 = arith.addf %115, %108 : vector<16x16xf32>
    %cst_55 = arith.constant 0.000000e+00 : f32
    %117 = vector.broadcast %cst_55 : f32 to vector<16x16xf32>
    %118 = arith.cmpf oge, %116, %117 : vector<16x16xf32>
    %cst_56 = arith.constant 2.000000e-01 : f32
    %119 = vector.broadcast %cst_56 : f32 to vector<16x16xf32>
    %120 = arith.mulf %119, %116 : vector<16x16xf32>
    %121 = arith.select %118, %116, %120 : vector<16x16xi1>, vector<16x16xf32>
    %122 = arith.mulf %121, %5 : vector<16x16xf32>
    %123 = arith.addf %122, %16 : vector<16x16xf32>
    %cst_57 = arith.constant dense<0xFF800000> : vector<16xf32>
    %124 = vector.multi_reduction <maximumf>, %123, %cst_57 [1] : vector<16x16xf32> to vector<16xf32>
    %125 = vector.shape_cast %124 : vector<16xf32> to vector<16x1xf32>
    %126 = vector.broadcast %125 : vector<16x1xf32> to vector<16x16xf32>
    %127 = arith.subf %123, %126 : vector<16x16xf32>
    %128 = math.exp %127 : vector<16x16xf32>
    %cst_58 = arith.constant dense<0.000000e+00> : vector<16xf32>
    %129 = vector.multi_reduction <add>, %128, %cst_58 [1] : vector<16x16xf32> to vector<16xf32>
    %130 = vector.shape_cast %129 : vector<16xf32> to vector<16x1xf32>
    %131 = vector.broadcast %130 : vector<16x1xf32> to vector<16x16xf32>
    %132 = arith.divf %128, %131 : vector<16x16xf32>
    %133 = arith.mulf %132, %5 : vector<16x16xf32>
    %134 = vector.extract_strided_slice %20 {offsets = [1, 0], sizes = [1, 16], strides = [1, 1]} : vector<32x16xf32> to vector<1x16xf32>
    %135 = vector.broadcast %134 : vector<1x16xf32> to vector<16x16xf32>
    %136 = arith.mulf %135, %5 : vector<16x16xf32>
    %137 = arith.mulf %136, %133 : vector<16x16xf32>
    %cst_59 = arith.constant dense<0.000000e+00> : vector<16xf32>
    %138 = vector.multi_reduction <add>, %137, %cst_59 [1] : vector<16x16xf32> to vector<16xf32>
    %139 = vector.shape_cast %138 : vector<16xf32> to vector<16x1xf32>
    %c1_60 = arith.constant 1 : index
    %140 = memref.load %arg11[%c1_60] : memref<32xf32, #tpu.memory_space<smem>>
    %141 = vector.broadcast %140 : f32 to vector<16x1xf32>
    %142 = arith.mulf %139, %141 : vector<16x1xf32>
    %c1_61 = arith.constant 1 : index
    %143 = memref.load %arg12[%c1_61] : memref<32xf32, #tpu.memory_space<smem>>
    %144 = vector.broadcast %143 : f32 to vector<16x1xf32>
    %145 = arith.addf %142, %144 : vector<16x1xf32>
    %cst_62 = arith.constant 0.000000e+00 : f32
    %146 = vector.broadcast %cst_62 : f32 to vector<16x1xf32>
    %147 = arith.maximumf %145, %146 : vector<16x1xf32>
    %c0_63 = arith.constant 0 : index
    %c0_64 = arith.constant 0 : index
    %c1_65 = arith.constant 1 : index
    %148 = vector.load %arg13[%c0_63, %c0_64, %c1_65] : memref<1x16x32xf32, #tpu.memory_space<vmem>>, vector<1x16x1xf32>
    %149 = vector.shape_cast %148 : vector<1x16x1xf32> to vector<16x1xf32>
    %150 = vector.shape_cast %147 : vector<16x1xf32> to vector<1x16x1xf32>
    tpu.vector_store %arg13[%c0_63, %c0_64, %c1_65], %150 {strides = array<i32>} : memref<1x16x32xf32, #tpu.memory_space<vmem>>, vector<1x16x1xf32>,
    %c8 = arith.constant 8 : index
    %151 = memref.load %arg10[%c8] : memref<128xf32, #tpu.memory_space<smem>>
    %152 = vector.broadcast %151 : f32 to vector<16x16xf32>
    %153 = arith.mulf %30, %152 : vector<16x16xf32>
    %c9 = arith.constant 9 : index
    %154 = memref.load %arg10[%c9] : memref<128xf32, #tpu.memory_space<smem>>
    %155 = vector.broadcast %154 : f32 to vector<16x16xf32>
    %156 = arith.mulf %32, %155 : vector<16x16xf32>
    %157 = arith.addf %153, %156 : vector<16x16xf32>
    %c10 = arith.constant 10 : index
    %158 = memref.load %arg10[%c10] : memref<128xf32, #tpu.memory_space<smem>>
    %159 = vector.broadcast %158 : f32 to vector<16x16xf32>
    %160 = arith.mulf %34, %159 : vector<16x16xf32>
    %161 = arith.addf %157, %160 : vector<16x16xf32>
    %c11 = arith.constant 11 : index
    %162 = memref.load %arg10[%c11] : memref<128xf32, #tpu.memory_space<smem>>
    %163 = vector.broadcast %162 : f32 to vector<16x16xf32>
    %164 = arith.mulf %36, %163 : vector<16x16xf32>
    %165 = arith.addf %161, %164 : vector<16x16xf32>
    %166 = vector.extract_strided_slice %26 {offsets = [2, 0], sizes = [1, 16], strides = [1, 1]} : vector<32x16xf32> to vector<1x16xf32>
    %167 = vector.broadcast %166 : vector<1x16xf32> to vector<16x16xf32>
    %168 = arith.mulf %5, %167 : vector<16x16xf32>
    %169 = vector.extract_strided_slice %28 {offsets = [0, 2], sizes = [16, 1], strides = [1, 1]} : vector<16x32xf32> to vector<16x1xf32>
    %170 = vector.broadcast %169 : vector<16x1xf32> to vector<16x16xf32>
    %171 = arith.mulf %11, %170 : vector<16x16xf32>
    %172 = arith.addf %168, %171 : vector<16x16xf32>
    %173 = arith.addf %172, %165 : vector<16x16xf32>
    %cst_66 = arith.constant 0.000000e+00 : f32
    %174 = vector.broadcast %cst_66 : f32 to vector<16x16xf32>
    %175 = arith.cmpf oge, %173, %174 : vector<16x16xf32>
    %cst_67 = arith.constant 2.000000e-01 : f32
    %176 = vector.broadcast %cst_67 : f32 to vector<16x16xf32>
    %177 = arith.mulf %176, %173 : vector<16x16xf32>
    %178 = arith.select %175, %173, %177 : vector<16x16xi1>, vector<16x16xf32>
    %179 = arith.mulf %178, %5 : vector<16x16xf32>
    %180 = arith.addf %179, %16 : vector<16x16xf32>
    %cst_68 = arith.constant dense<0xFF800000> : vector<16xf32>
    %181 = vector.multi_reduction <maximumf>, %180, %cst_68 [1] : vector<16x16xf32> to vector<16xf32>
    %182 = vector.shape_cast %181 : vector<16xf32> to vector<16x1xf32>
    %183 = vector.broadcast %182 : vector<16x1xf32> to vector<16x16xf32>
    %184 = arith.subf %180, %183 : vector<16x16xf32>
    %185 = math.exp %184 : vector<16x16xf32>
    %cst_69 = arith.constant dense<0.000000e+00> : vector<16xf32>
    %186 = vector.multi_reduction <add>, %185, %cst_69 [1] : vector<16x16xf32> to vector<16xf32>
    %187 = vector.shape_cast %186 : vector<16xf32> to vector<16x1xf32>
    %188 = vector.broadcast %187 : vector<16x1xf32> to vector<16x16xf32>
    %189 = arith.divf %185, %188 : vector<16x16xf32>
    %190 = arith.mulf %189, %5 : vector<16x16xf32>
    %191 = vector.extract_strided_slice %20 {offsets = [2, 0], sizes = [1, 16], strides = [1, 1]} : vector<32x16xf32> to vector<1x16xf32>
    %192 = vector.broadcast %191 : vector<1x16xf32> to vector<16x16xf32>
    %193 = arith.mulf %192, %5 : vector<16x16xf32>
    %194 = arith.mulf %193, %190 : vector<16x16xf32>
    %cst_70 = arith.constant dense<0.000000e+00> : vector<16xf32>
    %195 = vector.multi_reduction <add>, %194, %cst_70 [1] : vector<16x16xf32> to vector<16xf32>
    %196 = vector.shape_cast %195 : vector<16xf32> to vector<16x1xf32>
    %c2_71 = arith.constant 2 : index
    %197 = memref.load %arg11[%c2_71] : memref<32xf32, #tpu.memory_space<smem>>
    %198 = vector.broadcast %197 : f32 to vector<16x1xf32>
    %199 = arith.mulf %196, %198 : vector<16x1xf32>
    %c2_72 = arith.constant 2 : index
    %200 = memref.load %arg12[%c2_72] : memref<32xf32, #tpu.memory_space<smem>>
    %201 = vector.broadcast %200 : f32 to vector<16x1xf32>
    %202 = arith.addf %199, %201 : vector<16x1xf32>
    %cst_73 = arith.constant 0.000000e+00 : f32
    %203 = vector.broadcast %cst_73 : f32 to vector<16x1xf32>
    %204 = arith.maximumf %202, %203 : vector<16x1xf32>
    %c0_74 = arith.constant 0 : index
    %c0_75 = arith.constant 0 : index
    %c2_76 = arith.constant 2 : index
    %205 = vector.load %arg13[%c0_74, %c0_75, %c2_76] : memref<1x16x32xf32, #tpu.memory_space<vmem>>, vector<1x16x1xf32>
    %206 = vector.shape_cast %205 : vector<1x16x1xf32> to vector<16x1xf32>
    %207 = vector.shape_cast %204 : vector<16x1xf32> to vector<1x16x1xf32>
    tpu.vector_store %arg13[%c0_74, %c0_75, %c2_76], %207 {strides = array<i32>} : memref<1x16x32xf32, #tpu.memory_space<vmem>>, vector<1x16x1xf32>,
    %c12 = arith.constant 12 : index
    %208 = memref.load %arg10[%c12] : memref<128xf32, #tpu.memory_space<smem>>
    %209 = vector.broadcast %208 : f32 to vector<16x16xf32>
    %210 = arith.mulf %30, %209 : vector<16x16xf32>
    %c13 = arith.constant 13 : index
    %211 = memref.load %arg10[%c13] : memref<128xf32, #tpu.memory_space<smem>>
    %212 = vector.broadcast %211 : f32 to vector<16x16xf32>
    %213 = arith.mulf %32, %212 : vector<16x16xf32>
    %214 = arith.addf %210, %213 : vector<16x16xf32>
    %c14 = arith.constant 14 : index
    %215 = memref.load %arg10[%c14] : memref<128xf32, #tpu.memory_space<smem>>
    %216 = vector.broadcast %215 : f32 to vector<16x16xf32>
    %217 = arith.mulf %34, %216 : vector<16x16xf32>
    %218 = arith.addf %214, %217 : vector<16x16xf32>
    %c15 = arith.constant 15 : index
    %219 = memref.load %arg10[%c15] : memref<128xf32, #tpu.memory_space<smem>>
    %220 = vector.broadcast %219 : f32 to vector<16x16xf32>
    %221 = arith.mulf %36, %220 : vector<16x16xf32>
    %222 = arith.addf %218, %221 : vector<16x16xf32>
    %223 = vector.extract_strided_slice %26 {offsets = [3, 0], sizes = [1, 16], strides = [1, 1]} : vector<32x16xf32> to vector<1x16xf32>
    %224 = vector.broadcast %223 : vector<1x16xf32> to vector<16x16xf32>
    %225 = arith.mulf %5, %224 : vector<16x16xf32>
    %226 = vector.extract_strided_slice %28 {offsets = [0, 3], sizes = [16, 1], strides = [1, 1]} : vector<16x32xf32> to vector<16x1xf32>
    %227 = vector.broadcast %226 : vector<16x1xf32> to vector<16x16xf32>
    %228 = arith.mulf %11, %227 : vector<16x16xf32>
    %229 = arith.addf %225, %228 : vector<16x16xf32>
    %230 = arith.addf %229, %222 : vector<16x16xf32>
    %cst_77 = arith.constant 0.000000e+00 : f32
    %231 = vector.broadcast %cst_77 : f32 to vector<16x16xf32>
    %232 = arith.cmpf oge, %230, %231 : vector<16x16xf32>
    %cst_78 = arith.constant 2.000000e-01 : f32
    %233 = vector.broadcast %cst_78 : f32 to vector<16x16xf32>
    %234 = arith.mulf %233, %230 : vector<16x16xf32>
    %235 = arith.select %232, %230, %234 : vector<16x16xi1>, vector<16x16xf32>
    %236 = arith.mulf %235, %5 : vector<16x16xf32>
    %237 = arith.addf %236, %16 : vector<16x16xf32>
    %cst_79 = arith.constant dense<0xFF800000> : vector<16xf32>
    %238 = vector.multi_reduction <maximumf>, %237, %cst_79 [1] : vector<16x16xf32> to vector<16xf32>
    %239 = vector.shape_cast %238 : vector<16xf32> to vector<16x1xf32>
    %240 = vector.broadcast %239 : vector<16x1xf32> to vector<16x16xf32>
    %241 = arith.subf %237, %240 : vector<16x16xf32>
    %242 = math.exp %241 : vector<16x16xf32>
    %cst_80 = arith.constant dense<0.000000e+00> : vector<16xf32>
    %243 = vector.multi_reduction <add>, %242, %cst_80 [1] : vector<16x16xf32> to vector<16xf32>
    %244 = vector.shape_cast %243 : vector<16xf32> to vector<16x1xf32>
    %245 = vector.broadcast %244 : vector<16x1xf32> to vector<16x16xf32>
    %246 = arith.divf %242, %245 : vector<16x16xf32>
    %247 = arith.mulf %246, %5 : vector<16x16xf32>
    %248 = vector.extract_strided_slice %20 {offsets = [3, 0], sizes = [1, 16], strides = [1, 1]} : vector<32x16xf32> to vector<1x16xf32>
    %249 = vector.broadcast %248 : vector<1x16xf32> to vector<16x16xf32>
    %250 = arith.mulf %249, %5 : vector<16x16xf32>
    %251 = arith.mulf %250, %247 : vector<16x16xf32>
    %cst_81 = arith.constant dense<0.000000e+00> : vector<16xf32>
    %252 = vector.multi_reduction <add>, %251, %cst_81 [1] : vector<16x16xf32> to vector<16xf32>
    %253 = vector.shape_cast %252 : vector<16xf32> to vector<16x1xf32>
    %c3_82 = arith.constant 3 : index
    %254 = memref.load %arg11[%c3_82] : memref<32xf32, #tpu.memory_space<smem>>
    %255 = vector.broadcast %254 : f32 to vector<16x1xf32>
    %256 = arith.mulf %253, %255 : vector<16x1xf32>
    %c3_83 = arith.constant 3 : index
    %257 = memref.load %arg12[%c3_83] : memref<32xf32, #tpu.memory_space<smem>>
    %258 = vector.broadcast %257 : f32 to vector<16x1xf32>
    %259 = arith.addf %256, %258 : vector<16x1xf32>
    %cst_84 = arith.constant 0.000000e+00 : f32
    %260 = vector.broadcast %cst_84 : f32 to vector<16x1xf32>
    %261 = arith.maximumf %259, %260 : vector<16x1xf32>
    %c0_85 = arith.constant 0 : index
    %c0_86 = arith.constant 0 : index
    %c3_87 = arith.constant 3 : index
    %262 = vector.load %arg13[%c0_85, %c0_86, %c3_87] : memref<1x16x32xf32, #tpu.memory_space<vmem>>, vector<1x16x1xf32>
    %263 = vector.shape_cast %262 : vector<1x16x1xf32> to vector<16x1xf32>
    %264 = vector.shape_cast %261 : vector<16x1xf32> to vector<1x16x1xf32>
    tpu.vector_store %arg13[%c0_85, %c0_86, %c3_87], %264 {strides = array<i32>} : memref<1x16x32xf32, #tpu.memory_space<vmem>>, vector<1x16x1xf32>,
    %c16 = arith.constant 16 : index
    %265 = memref.load %arg10[%c16] : memref<128xf32, #tpu.memory_space<smem>>
    %266 = vector.broadcast %265 : f32 to vector<16x16xf32>
    %267 = arith.mulf %30, %266 : vector<16x16xf32>
    %c17 = arith.constant 17 : index
    %268 = memref.load %arg10[%c17] : memref<128xf32, #tpu.memory_space<smem>>
    %269 = vector.broadcast %268 : f32 to vector<16x16xf32>
    %270 = arith.mulf %32, %269 : vector<16x16xf32>
    %271 = arith.addf %267, %270 : vector<16x16xf32>
    %c18 = arith.constant 18 : index
    %272 = memref.load %arg10[%c18] : memref<128xf32, #tpu.memory_space<smem>>
    %273 = vector.broadcast %272 : f32 to vector<16x16xf32>
    %274 = arith.mulf %34, %273 : vector<16x16xf32>
    %275 = arith.addf %271, %274 : vector<16x16xf32>
    %c19 = arith.constant 19 : index
    %276 = memref.load %arg10[%c19] : memref<128xf32, #tpu.memory_space<smem>>
    %277 = vector.broadcast %276 : f32 to vector<16x16xf32>
    %278 = arith.mulf %36, %277 : vector<16x16xf32>
    %279 = arith.addf %275, %278 : vector<16x16xf32>
    %280 = vector.extract_strided_slice %26 {offsets = [4, 0], sizes = [1, 16], strides = [1, 1]} : vector<32x16xf32> to vector<1x16xf32>
    %281 = vector.broadcast %280 : vector<1x16xf32> to vector<16x16xf32>
    %282 = arith.mulf %5, %281 : vector<16x16xf32>
    %283 = vector.extract_strided_slice %28 {offsets = [0, 4], sizes = [16, 1], strides = [1, 1]} : vector<16x32xf32> to vector<16x1xf32>
    %284 = vector.broadcast %283 : vector<16x1xf32> to vector<16x16xf32>
    %285 = arith.mulf %11, %284 : vector<16x16xf32>
    %286 = arith.addf %282, %285 : vector<16x16xf32>
    %287 = arith.addf %286, %279 : vector<16x16xf32>
    %cst_88 = arith.constant 0.000000e+00 : f32
    %288 = vector.broadcast %cst_88 : f32 to vector<16x16xf32>
    %289 = arith.cmpf oge, %287, %288 : vector<16x16xf32>
    %cst_89 = arith.constant 2.000000e-01 : f32
    %290 = vector.broadcast %cst_89 : f32 to vector<16x16xf32>
    %291 = arith.mulf %290, %287 : vector<16x16xf32>
    %292 = arith.select %289, %287, %291 : vector<16x16xi1>, vector<16x16xf32>
    %293 = arith.mulf %292, %5 : vector<16x16xf32>
    %294 = arith.addf %293, %16 : vector<16x16xf32>
    %cst_90 = arith.constant dense<0xFF800000> : vector<16xf32>
    %295 = vector.multi_reduction <maximumf>, %294, %cst_90 [1] : vector<16x16xf32> to vector<16xf32>
    %296 = vector.shape_cast %295 : vector<16xf32> to vector<16x1xf32>
    %297 = vector.broadcast %296 : vector<16x1xf32> to vector<16x16xf32>
    %298 = arith.subf %294, %297 : vector<16x16xf32>
    %299 = math.exp %298 : vector<16x16xf32>
    %cst_91 = arith.constant dense<0.000000e+00> : vector<16xf32>
    %300 = vector.multi_reduction <add>, %299, %cst_91 [1] : vector<16x16xf32> to vector<16xf32>
    %301 = vector.shape_cast %300 : vector<16xf32> to vector<16x1xf32>
    %302 = vector.broadcast %301 : vector<16x1xf32> to vector<16x16xf32>
    %303 = arith.divf %299, %302 : vector<16x16xf32>
    %304 = arith.mulf %303, %5 : vector<16x16xf32>
    %305 = vector.extract_strided_slice %20 {offsets = [4, 0], sizes = [1, 16], strides = [1, 1]} : vector<32x16xf32> to vector<1x16xf32>
    %306 = vector.broadcast %305 : vector<1x16xf32> to vector<16x16xf32>
    %307 = arith.mulf %306, %5 : vector<16x16xf32>
    %308 = arith.mulf %307, %304 : vector<16x16xf32>
    %cst_92 = arith.constant dense<0.000000e+00> : vector<16xf32>
    %309 = vector.multi_reduction <add>, %308, %cst_92 [1] : vector<16x16xf32> to vector<16xf32>
    %310 = vector.shape_cast %309 : vector<16xf32> to vector<16x1xf32>
    %c4_93 = arith.constant 4 : index
    %311 = memref.load %arg11[%c4_93] : memref<32xf32, #tpu.memory_space<smem>>
    %312 = vector.broadcast %311 : f32 to vector<16x1xf32>
    %313 = arith.mulf %310, %312 : vector<16x1xf32>
    %c4_94 = arith.constant 4 : index
    %314 = memref.load %arg12[%c4_94] : memref<32xf32, #tpu.memory_space<smem>>
    %315 = vector.broadcast %314 : f32 to vector<16x1xf32>
    %316 = arith.addf %313, %315 : vector<16x1xf32>
    %cst_95 = arith.constant 0.000000e+00 : f32
    %317 = vector.broadcast %cst_95 : f32 to vector<16x1xf32>
    %318 = arith.maximumf %316, %317 : vector<16x1xf32>
    %c0_96 = arith.constant 0 : index
    %c0_97 = arith.constant 0 : index
    %c4_98 = arith.constant 4 : index
    %319 = vector.load %arg13[%c0_96, %c0_97, %c4_98] : memref<1x16x32xf32, #tpu.memory_space<vmem>>, vector<1x16x1xf32>
    %320 = vector.shape_cast %319 : vector<1x16x1xf32> to vector<16x1xf32>
    %321 = vector.shape_cast %318 : vector<16x1xf32> to vector<1x16x1xf32>
    tpu.vector_store %arg13[%c0_96, %c0_97, %c4_98], %321 {strides = array<i32>} : memref<1x16x32xf32, #tpu.memory_space<vmem>>, vector<1x16x1xf32>,
    %c20 = arith.constant 20 : index
    %322 = memref.load %arg10[%c20] : memref<128xf32, #tpu.memory_space<smem>>
    %323 = vector.broadcast %322 : f32 to vector<16x16xf32>
    %324 = arith.mulf %30, %323 : vector<16x16xf32>
    %c21 = arith.constant 21 : index
    %325 = memref.load %arg10[%c21] : memref<128xf32, #tpu.memory_space<smem>>
    %326 = vector.broadcast %325 : f32 to vector<16x16xf32>
    %327 = arith.mulf %32, %326 : vector<16x16xf32>
    %328 = arith.addf %324, %327 : vector<16x16xf32>
    %c22 = arith.constant 22 : index
    %329 = memref.load %arg10[%c22] : memref<128xf32, #tpu.memory_space<smem>>
    %330 = vector.broadcast %329 : f32 to vector<16x16xf32>
    %331 = arith.mulf %34, %330 : vector<16x16xf32>
    %332 = arith.addf %328, %331 : vector<16x16xf32>
    %c23 = arith.constant 23 : index
    %333 = memref.load %arg10[%c23] : memref<128xf32, #tpu.memory_space<smem>>
    %334 = vector.broadcast %333 : f32 to vector<16x16xf32>
    %335 = arith.mulf %36, %334 : vector<16x16xf32>
    %336 = arith.addf %332, %335 : vector<16x16xf32>
    %337 = vector.extract_strided_slice %26 {offsets = [5, 0], sizes = [1, 16], strides = [1, 1]} : vector<32x16xf32> to vector<1x16xf32>
    %338 = vector.broadcast %337 : vector<1x16xf32> to vector<16x16xf32>
    %339 = arith.mulf %5, %338 : vector<16x16xf32>
    %340 = vector.extract_strided_slice %28 {offsets = [0, 5], sizes = [16, 1], strides = [1, 1]} : vector<16x32xf32> to vector<16x1xf32>
    %341 = vector.broadcast %340 : vector<16x1xf32> to vector<16x16xf32>
    %342 = arith.mulf %11, %341 : vector<16x16xf32>
    %343 = arith.addf %339, %342 : vector<16x16xf32>
    %344 = arith.addf %343, %336 : vector<16x16xf32>
    %cst_99 = arith.constant 0.000000e+00 : f32
    %345 = vector.broadcast %cst_99 : f32 to vector<16x16xf32>
    %346 = arith.cmpf oge, %344, %345 : vector<16x16xf32>
    %cst_100 = arith.constant 2.000000e-01 : f32
    %347 = vector.broadcast %cst_100 : f32 to vector<16x16xf32>
    %348 = arith.mulf %347, %344 : vector<16x16xf32>
    %349 = arith.select %346, %344, %348 : vector<16x16xi1>, vector<16x16xf32>
    %350 = arith.mulf %349, %5 : vector<16x16xf32>
    %351 = arith.addf %350, %16 : vector<16x16xf32>
    %cst_101 = arith.constant dense<0xFF800000> : vector<16xf32>
    %352 = vector.multi_reduction <maximumf>, %351, %cst_101 [1] : vector<16x16xf32> to vector<16xf32>
    %353 = vector.shape_cast %352 : vector<16xf32> to vector<16x1xf32>
    %354 = vector.broadcast %353 : vector<16x1xf32> to vector<16x16xf32>
    %355 = arith.subf %351, %354 : vector<16x16xf32>
    %356 = math.exp %355 : vector<16x16xf32>
    %cst_102 = arith.constant dense<0.000000e+00> : vector<16xf32>
    %357 = vector.multi_reduction <add>, %356, %cst_102 [1] : vector<16x16xf32> to vector<16xf32>
    %358 = vector.shape_cast %357 : vector<16xf32> to vector<16x1xf32>
    %359 = vector.broadcast %358 : vector<16x1xf32> to vector<16x16xf32>
    %360 = arith.divf %356, %359 : vector<16x16xf32>
    %361 = arith.mulf %360, %5 : vector<16x16xf32>
    %362 = vector.extract_strided_slice %20 {offsets = [5, 0], sizes = [1, 16], strides = [1, 1]} : vector<32x16xf32> to vector<1x16xf32>
    %363 = vector.broadcast %362 : vector<1x16xf32> to vector<16x16xf32>
    %364 = arith.mulf %363, %5 : vector<16x16xf32>
    %365 = arith.mulf %364, %361 : vector<16x16xf32>
    %cst_103 = arith.constant dense<0.000000e+00> : vector<16xf32>
    %366 = vector.multi_reduction <add>, %365, %cst_103 [1] : vector<16x16xf32> to vector<16xf32>
    %367 = vector.shape_cast %366 : vector<16xf32> to vector<16x1xf32>
    %c5_104 = arith.constant 5 : index
    %368 = memref.load %arg11[%c5_104] : memref<32xf32, #tpu.memory_space<smem>>
    %369 = vector.broadcast %368 : f32 to vector<16x1xf32>
    %370 = arith.mulf %367, %369 : vector<16x1xf32>
    %c5_105 = arith.constant 5 : index
    %371 = memref.load %arg12[%c5_105] : memref<32xf32, #tpu.memory_space<smem>>
    %372 = vector.broadcast %371 : f32 to vector<16x1xf32>
    %373 = arith.addf %370, %372 : vector<16x1xf32>
    %cst_106 = arith.constant 0.000000e+00 : f32
    %374 = vector.broadcast %cst_106 : f32 to vector<16x1xf32>
    %375 = arith.maximumf %373, %374 : vector<16x1xf32>
    %c0_107 = arith.constant 0 : index
    %c0_108 = arith.constant 0 : index
    %c5_109 = arith.constant 5 : index
    %376 = vector.load %arg13[%c0_107, %c0_108, %c5_109] : memref<1x16x32xf32, #tpu.memory_space<vmem>>, vector<1x16x1xf32>
    %377 = vector.shape_cast %376 : vector<1x16x1xf32> to vector<16x1xf32>
    %378 = vector.shape_cast %375 : vector<16x1xf32> to vector<1x16x1xf32>
    tpu.vector_store %arg13[%c0_107, %c0_108, %c5_109], %378 {strides = array<i32>} : memref<1x16x32xf32, #tpu.memory_space<vmem>>, vector<1x16x1xf32>,
    %c24 = arith.constant 24 : index
    %379 = memref.load %arg10[%c24] : memref<128xf32, #tpu.memory_space<smem>>
    %380 = vector.broadcast %379 : f32 to vector<16x16xf32>
    %381 = arith.mulf %30, %380 : vector<16x16xf32>
    %c25 = arith.constant 25 : index
    %382 = memref.load %arg10[%c25] : memref<128xf32, #tpu.memory_space<smem>>
    %383 = vector.broadcast %382 : f32 to vector<16x16xf32>
    %384 = arith.mulf %32, %383 : vector<16x16xf32>
    %385 = arith.addf %381, %384 : vector<16x16xf32>
    %c26 = arith.constant 26 : index
    %386 = memref.load %arg10[%c26] : memref<128xf32, #tpu.memory_space<smem>>
    %387 = vector.broadcast %386 : f32 to vector<16x16xf32>
    %388 = arith.mulf %34, %387 : vector<16x16xf32>
    %389 = arith.addf %385, %388 : vector<16x16xf32>
    %c27 = arith.constant 27 : index
    %390 = memref.load %arg10[%c27] : memref<128xf32, #tpu.memory_space<smem>>
    %391 = vector.broadcast %390 : f32 to vector<16x16xf32>
    %392 = arith.mulf %36, %391 : vector<16x16xf32>
    %393 = arith.addf %389, %392 : vector<16x16xf32>
    %394 = vector.extract_strided_slice %26 {offsets = [6, 0], sizes = [1, 16], strides = [1, 1]} : vector<32x16xf32> to vector<1x16xf32>
    %395 = vector.broadcast %394 : vector<1x16xf32> to vector<16x16xf32>
    %396 = arith.mulf %5, %395 : vector<16x16xf32>
    %397 = vector.extract_strided_slice %28 {offsets = [0, 6], sizes = [16, 1], strides = [1, 1]} : vector<16x32xf32> to vector<16x1xf32>
    %398 = vector.broadcast %397 : vector<16x1xf32> to vector<16x16xf32>
    %399 = arith.mulf %11, %398 : vector<16x16xf32>
    %400 = arith.addf %396, %399 : vector<16x16xf32>
    %401 = arith.addf %400, %393 : vector<16x16xf32>
    %cst_110 = arith.constant 0.000000e+00 : f32
    %402 = vector.broadcast %cst_110 : f32 to vector<16x16xf32>
    %403 = arith.cmpf oge, %401, %402 : vector<16x16xf32>
    %cst_111 = arith.constant 2.000000e-01 : f32
    %404 = vector.broadcast %cst_111 : f32 to vector<16x16xf32>
    %405 = arith.mulf %404, %401 : vector<16x16xf32>
    %406 = arith.select %403, %401, %405 : vector<16x16xi1>, vector<16x16xf32>
    %407 = arith.mulf %406, %5 : vector<16x16xf32>
    %408 = arith.addf %407, %16 : vector<16x16xf32>
    %cst_112 = arith.constant dense<0xFF800000> : vector<16xf32>
    %409 = vector.multi_reduction <maximumf>, %408, %cst_112 [1] : vector<16x16xf32> to vector<16xf32>
    %410 = vector.shape_cast %409 : vector<16xf32> to vector<16x1xf32>
    %411 = vector.broadcast %410 : vector<16x1xf32> to vector<16x16xf32>
    %412 = arith.subf %408, %411 : vector<16x16xf32>
    %413 = math.exp %412 : vector<16x16xf32>
    %cst_113 = arith.constant dense<0.000000e+00> : vector<16xf32>
    %414 = vector.multi_reduction <add>, %413, %cst_113 [1] : vector<16x16xf32> to vector<16xf32>
    %415 = vector.shape_cast %414 : vector<16xf32> to vector<16x1xf32>
    %416 = vector.broadcast %415 : vector<16x1xf32> to vector<16x16xf32>
    %417 = arith.divf %413, %416 : vector<16x16xf32>
    %418 = arith.mulf %417, %5 : vector<16x16xf32>
    %419 = vector.extract_strided_slice %20 {offsets = [6, 0], sizes = [1, 16], strides = [1, 1]} : vector<32x16xf32> to vector<1x16xf32>
    %420 = vector.broadcast %419 : vector<1x16xf32> to vector<16x16xf32>
    %421 = arith.mulf %420, %5 : vector<16x16xf32>
    %422 = arith.mulf %421, %418 : vector<16x16xf32>
    %cst_114 = arith.constant dense<0.000000e+00> : vector<16xf32>
    %423 = vector.multi_reduction <add>, %422, %cst_114 [1] : vector<16x16xf32> to vector<16xf32>
    %424 = vector.shape_cast %423 : vector<16xf32> to vector<16x1xf32>
    %c6_115 = arith.constant 6 : index
    %425 = memref.load %arg11[%c6_115] : memref<32xf32, #tpu.memory_space<smem>>
    %426 = vector.broadcast %425 : f32 to vector<16x1xf32>
    %427 = arith.mulf %424, %426 : vector<16x1xf32>
    %c6_116 = arith.constant 6 : index
    %428 = memref.load %arg12[%c6_116] : memref<32xf32, #tpu.memory_space<smem>>
    %429 = vector.broadcast %428 : f32 to vector<16x1xf32>
    %430 = arith.addf %427, %429 : vector<16x1xf32>
    %cst_117 = arith.constant 0.000000e+00 : f32
    %431 = vector.broadcast %cst_117 : f32 to vector<16x1xf32>
    %432 = arith.maximumf %430, %431 : vector<16x1xf32>
    %c0_118 = arith.constant 0 : index
    %c0_119 = arith.constant 0 : index
    %c6_120 = arith.constant 6 : index
    %433 = vector.load %arg13[%c0_118, %c0_119, %c6_120] : memref<1x16x32xf32, #tpu.memory_space<vmem>>, vector<1x16x1xf32>
    %434 = vector.shape_cast %433 : vector<1x16x1xf32> to vector<16x1xf32>
    %435 = vector.shape_cast %432 : vector<16x1xf32> to vector<1x16x1xf32>
    tpu.vector_store %arg13[%c0_118, %c0_119, %c6_120], %435 {strides = array<i32>} : memref<1x16x32xf32, #tpu.memory_space<vmem>>, vector<1x16x1xf32>,
    %c28 = arith.constant 28 : index
    %436 = memref.load %arg10[%c28] : memref<128xf32, #tpu.memory_space<smem>>
    %437 = vector.broadcast %436 : f32 to vector<16x16xf32>
    %438 = arith.mulf %30, %437 : vector<16x16xf32>
    %c29 = arith.constant 29 : index
    %439 = memref.load %arg10[%c29] : memref<128xf32, #tpu.memory_space<smem>>
    %440 = vector.broadcast %439 : f32 to vector<16x16xf32>
    %441 = arith.mulf %32, %440 : vector<16x16xf32>
    %442 = arith.addf %438, %441 : vector<16x16xf32>
    %c30 = arith.constant 30 : index
    %443 = memref.load %arg10[%c30] : memref<128xf32, #tpu.memory_space<smem>>
    %444 = vector.broadcast %443 : f32 to vector<16x16xf32>
    %445 = arith.mulf %34, %444 : vector<16x16xf32>
    %446 = arith.addf %442, %445 : vector<16x16xf32>
    %c31 = arith.constant 31 : index
    %447 = memref.load %arg10[%c31] : memref<128xf32, #tpu.memory_space<smem>>
    %448 = vector.broadcast %447 : f32 to vector<16x16xf32>
    %449 = arith.mulf %36, %448 : vector<16x16xf32>
    %450 = arith.addf %446, %449 : vector<16x16xf32>
    %451 = vector.extract_strided_slice %26 {offsets = [7, 0], sizes = [1, 16], strides = [1, 1]} : vector<32x16xf32> to vector<1x16xf32>
    %452 = vector.broadcast %451 : vector<1x16xf32> to vector<16x16xf32>
    %453 = arith.mulf %5, %452 : vector<16x16xf32>
    %454 = vector.extract_strided_slice %28 {offsets = [0, 7], sizes = [16, 1], strides = [1, 1]} : vector<16x32xf32> to vector<16x1xf32>
    %455 = vector.broadcast %454 : vector<16x1xf32> to vector<16x16xf32>
    %456 = arith.mulf %11, %455 : vector<16x16xf32>
    %457 = arith.addf %453, %456 : vector<16x16xf32>
    %458 = arith.addf %457, %450 : vector<16x16xf32>
    %cst_121 = arith.constant 0.000000e+00 : f32
    %459 = vector.broadcast %cst_121 : f32 to vector<16x16xf32>
    %460 = arith.cmpf oge, %458, %459 : vector<16x16xf32>
    %cst_122 = arith.constant 2.000000e-01 : f32
    %461 = vector.broadcast %cst_122 : f32 to vector<16x16xf32>
    %462 = arith.mulf %461, %458 : vector<16x16xf32>
    %463 = arith.select %460, %458, %462 : vector<16x16xi1>, vector<16x16xf32>
    %464 = arith.mulf %463, %5 : vector<16x16xf32>
    %465 = arith.addf %464, %16 : vector<16x16xf32>
    %cst_123 = arith.constant dense<0xFF800000> : vector<16xf32>
    %466 = vector.multi_reduction <maximumf>, %465, %cst_123 [1] : vector<16x16xf32> to vector<16xf32>
    %467 = vector.shape_cast %466 : vector<16xf32> to vector<16x1xf32>
    %468 = vector.broadcast %467 : vector<16x1xf32> to vector<16x16xf32>
    %469 = arith.subf %465, %468 : vector<16x16xf32>
    %470 = math.exp %469 : vector<16x16xf32>
    %cst_124 = arith.constant dense<0.000000e+00> : vector<16xf32>
    %471 = vector.multi_reduction <add>, %470, %cst_124 [1] : vector<16x16xf32> to vector<16xf32>
    %472 = vector.shape_cast %471 : vector<16xf32> to vector<16x1xf32>
    %473 = vector.broadcast %472 : vector<16x1xf32> to vector<16x16xf32>
    %474 = arith.divf %470, %473 : vector<16x16xf32>
    %475 = arith.mulf %474, %5 : vector<16x16xf32>
    %476 = vector.extract_strided_slice %20 {offsets = [7, 0], sizes = [1, 16], strides = [1, 1]} : vector<32x16xf32> to vector<1x16xf32>
    %477 = vector.broadcast %476 : vector<1x16xf32> to vector<16x16xf32>
    %478 = arith.mulf %477, %5 : vector<16x16xf32>
    %479 = arith.mulf %478, %475 : vector<16x16xf32>
    %cst_125 = arith.constant dense<0.000000e+00> : vector<16xf32>
    %480 = vector.multi_reduction <add>, %479, %cst_125 [1] : vector<16x16xf32> to vector<16xf32>
    %481 = vector.shape_cast %480 : vector<16xf32> to vector<16x1xf32>
    %c7_126 = arith.constant 7 : index
    %482 = memref.load %arg11[%c7_126] : memref<32xf32, #tpu.memory_space<smem>>
    %483 = vector.broadcast %482 : f32 to vector<16x1xf32>
    %484 = arith.mulf %481, %483 : vector<16x1xf32>
    %c7_127 = arith.constant 7 : index
    %485 = memref.load %arg12[%c7_127] : memref<32xf32, #tpu.memory_space<smem>>
    %486 = vector.broadcast %485 : f32 to vector<16x1xf32>
    %487 = arith.addf %484, %486 : vector<16x1xf32>
    %cst_128 = arith.constant 0.000000e+00 : f32
    %488 = vector.broadcast %cst_128 : f32 to vector<16x1xf32>
    %489 = arith.maximumf %487, %488 : vector<16x1xf32>
    %c0_129 = arith.constant 0 : index
    %c0_130 = arith.constant 0 : index
    %c7_131 = arith.constant 7 : index
    %490 = vector.load %arg13[%c0_129, %c0_130, %c7_131] : memref<1x16x32xf32, #tpu.memory_space<vmem>>, vector<1x16x1xf32>
    %491 = vector.shape_cast %490 : vector<1x16x1xf32> to vector<16x1xf32>
    %492 = vector.shape_cast %489 : vector<16x1xf32> to vector<1x16x1xf32>
    tpu.vector_store %arg13[%c0_129, %c0_130, %c7_131], %492 {strides = array<i32>} : memref<1x16x32xf32, #tpu.memory_space<vmem>>, vector<1x16x1xf32>,
    %c32 = arith.constant 32 : index
    %493 = memref.load %arg10[%c32] : memref<128xf32, #tpu.memory_space<smem>>
    %494 = vector.broadcast %493 : f32 to vector<16x16xf32>
    %495 = arith.mulf %30, %494 : vector<16x16xf32>
    %c33 = arith.constant 33 : index
    %496 = memref.load %arg10[%c33] : memref<128xf32, #tpu.memory_space<smem>>
    %497 = vector.broadcast %496 : f32 to vector<16x16xf32>
    %498 = arith.mulf %32, %497 : vector<16x16xf32>
    %499 = arith.addf %495, %498 : vector<16x16xf32>
    %c34 = arith.constant 34 : index
    %500 = memref.load %arg10[%c34] : memref<128xf32, #tpu.memory_space<smem>>
    %501 = vector.broadcast %500 : f32 to vector<16x16xf32>
    %502 = arith.mulf %34, %501 : vector<16x16xf32>
    %503 = arith.addf %499, %502 : vector<16x16xf32>
    %c35 = arith.constant 35 : index
    %504 = memref.load %arg10[%c35] : memref<128xf32, #tpu.memory_space<smem>>
    %505 = vector.broadcast %504 : f32 to vector<16x16xf32>
    %506 = arith.mulf %36, %505 : vector<16x16xf32>
    %507 = arith.addf %503, %506 : vector<16x16xf32>
    %508 = vector.extract_strided_slice %26 {offsets = [8, 0], sizes = [1, 16], strides = [1, 1]} : vector<32x16xf32> to vector<1x16xf32>
    %509 = vector.broadcast %508 : vector<1x16xf32> to vector<16x16xf32>
    %510 = arith.mulf %5, %509 : vector<16x16xf32>
    %511 = vector.extract_strided_slice %28 {offsets = [0, 8], sizes = [16, 1], strides = [1, 1]} : vector<16x32xf32> to vector<16x1xf32>
    %512 = vector.broadcast %511 : vector<16x1xf32> to vector<16x16xf32>
    %513 = arith.mulf %11, %512 : vector<16x16xf32>
    %514 = arith.addf %510, %513 : vector<16x16xf32>
    %515 = arith.addf %514, %507 : vector<16x16xf32>
    %cst_132 = arith.constant 0.000000e+00 : f32
    %516 = vector.broadcast %cst_132 : f32 to vector<16x16xf32>
    %517 = arith.cmpf oge, %515, %516 : vector<16x16xf32>
    %cst_133 = arith.constant 2.000000e-01 : f32
    %518 = vector.broadcast %cst_133 : f32 to vector<16x16xf32>
    %519 = arith.mulf %518, %515 : vector<16x16xf32>
    %520 = arith.select %517, %515, %519 : vector<16x16xi1>, vector<16x16xf32>
    %521 = arith.mulf %520, %5 : vector<16x16xf32>
    %522 = arith.addf %521, %16 : vector<16x16xf32>
    %cst_134 = arith.constant dense<0xFF800000> : vector<16xf32>
    %523 = vector.multi_reduction <maximumf>, %522, %cst_134 [1] : vector<16x16xf32> to vector<16xf32>
    %524 = vector.shape_cast %523 : vector<16xf32> to vector<16x1xf32>
    %525 = vector.broadcast %524 : vector<16x1xf32> to vector<16x16xf32>
    %526 = arith.subf %522, %525 : vector<16x16xf32>
    %527 = math.exp %526 : vector<16x16xf32>
    %cst_135 = arith.constant dense<0.000000e+00> : vector<16xf32>
    %528 = vector.multi_reduction <add>, %527, %cst_135 [1] : vector<16x16xf32> to vector<16xf32>
    %529 = vector.shape_cast %528 : vector<16xf32> to vector<16x1xf32>
    %530 = vector.broadcast %529 : vector<16x1xf32> to vector<16x16xf32>
    %531 = arith.divf %527, %530 : vector<16x16xf32>
    %532 = arith.mulf %531, %5 : vector<16x16xf32>
    %533 = vector.extract_strided_slice %20 {offsets = [8, 0], sizes = [1, 16], strides = [1, 1]} : vector<32x16xf32> to vector<1x16xf32>
    %534 = vector.broadcast %533 : vector<1x16xf32> to vector<16x16xf32>
    %535 = arith.mulf %534, %5 : vector<16x16xf32>
    %536 = arith.mulf %535, %532 : vector<16x16xf32>
    %cst_136 = arith.constant dense<0.000000e+00> : vector<16xf32>
    %537 = vector.multi_reduction <add>, %536, %cst_136 [1] : vector<16x16xf32> to vector<16xf32>
    %538 = vector.shape_cast %537 : vector<16xf32> to vector<16x1xf32>
    %c8_137 = arith.constant 8 : index
    %539 = memref.load %arg11[%c8_137] : memref<32xf32, #tpu.memory_space<smem>>
    %540 = vector.broadcast %539 : f32 to vector<16x1xf32>
    %541 = arith.mulf %538, %540 : vector<16x1xf32>
    %c8_138 = arith.constant 8 : index
    %542 = memref.load %arg12[%c8_138] : memref<32xf32, #tpu.memory_space<smem>>
    %543 = vector.broadcast %542 : f32 to vector<16x1xf32>
    %544 = arith.addf %541, %543 : vector<16x1xf32>
    %cst_139 = arith.constant 0.000000e+00 : f32
    %545 = vector.broadcast %cst_139 : f32 to vector<16x1xf32>
    %546 = arith.maximumf %544, %545 : vector<16x1xf32>
    %c0_140 = arith.constant 0 : index
    %c0_141 = arith.constant 0 : index
    %c8_142 = arith.constant 8 : index
    %547 = vector.load %arg13[%c0_140, %c0_141, %c8_142] : memref<1x16x32xf32, #tpu.memory_space<vmem>>, vector<1x16x1xf32>
    %548 = vector.shape_cast %547 : vector<1x16x1xf32> to vector<16x1xf32>
    %549 = vector.shape_cast %546 : vector<16x1xf32> to vector<1x16x1xf32>
    tpu.vector_store %arg13[%c0_140, %c0_141, %c8_142], %549 {strides = array<i32>} : memref<1x16x32xf32, #tpu.memory_space<vmem>>, vector<1x16x1xf32>,
    %c36 = arith.constant 36 : index
    %550 = memref.load %arg10[%c36] : memref<128xf32, #tpu.memory_space<smem>>
    %551 = vector.broadcast %550 : f32 to vector<16x16xf32>
    %552 = arith.mulf %30, %551 : vector<16x16xf32>
    %c37 = arith.constant 37 : index
    %553 = memref.load %arg10[%c37] : memref<128xf32, #tpu.memory_space<smem>>
    %554 = vector.broadcast %553 : f32 to vector<16x16xf32>
    %555 = arith.mulf %32, %554 : vector<16x16xf32>
    %556 = arith.addf %552, %555 : vector<16x16xf32>
    %c38 = arith.constant 38 : index
    %557 = memref.load %arg10[%c38] : memref<128xf32, #tpu.memory_space<smem>>
    %558 = vector.broadcast %557 : f32 to vector<16x16xf32>
    %559 = arith.mulf %34, %558 : vector<16x16xf32>
    %560 = arith.addf %556, %559 : vector<16x16xf32>
    %c39 = arith.constant 39 : index
    %561 = memref.load %arg10[%c39] : memref<128xf32, #tpu.memory_space<smem>>
    %562 = vector.broadcast %561 : f32 to vector<16x16xf32>
    %563 = arith.mulf %36, %562 : vector<16x16xf32>
    %564 = arith.addf %560, %563 : vector<16x16xf32>
    %565 = vector.extract_strided_slice %26 {offsets = [9, 0], sizes = [1, 16], strides = [1, 1]} : vector<32x16xf32> to vector<1x16xf32>
    %566 = vector.broadcast %565 : vector<1x16xf32> to vector<16x16xf32>
    %567 = arith.mulf %5, %566 : vector<16x16xf32>
    %568 = vector.extract_strided_slice %28 {offsets = [0, 9], sizes = [16, 1], strides = [1, 1]} : vector<16x32xf32> to vector<16x1xf32>
    %569 = vector.broadcast %568 : vector<16x1xf32> to vector<16x16xf32>
    %570 = arith.mulf %11, %569 : vector<16x16xf32>
    %571 = arith.addf %567, %570 : vector<16x16xf32>
    %572 = arith.addf %571, %564 : vector<16x16xf32>
    %cst_143 = arith.constant 0.000000e+00 : f32
    %573 = vector.broadcast %cst_143 : f32 to vector<16x16xf32>
    %574 = arith.cmpf oge, %572, %573 : vector<16x16xf32>
    %cst_144 = arith.constant 2.000000e-01 : f32
    %575 = vector.broadcast %cst_144 : f32 to vector<16x16xf32>
    %576 = arith.mulf %575, %572 : vector<16x16xf32>
    %577 = arith.select %574, %572, %576 : vector<16x16xi1>, vector<16x16xf32>
    %578 = arith.mulf %577, %5 : vector<16x16xf32>
    %579 = arith.addf %578, %16 : vector<16x16xf32>
    %cst_145 = arith.constant dense<0xFF800000> : vector<16xf32>
    %580 = vector.multi_reduction <maximumf>, %579, %cst_145 [1] : vector<16x16xf32> to vector<16xf32>
    %581 = vector.shape_cast %580 : vector<16xf32> to vector<16x1xf32>
    %582 = vector.broadcast %581 : vector<16x1xf32> to vector<16x16xf32>
    %583 = arith.subf %579, %582 : vector<16x16xf32>
    %584 = math.exp %583 : vector<16x16xf32>
    %cst_146 = arith.constant dense<0.000000e+00> : vector<16xf32>
    %585 = vector.multi_reduction <add>, %584, %cst_146 [1] : vector<16x16xf32> to vector<16xf32>
    %586 = vector.shape_cast %585 : vector<16xf32> to vector<16x1xf32>
    %587 = vector.broadcast %586 : vector<16x1xf32> to vector<16x16xf32>
    %588 = arith.divf %584, %587 : vector<16x16xf32>
    %589 = arith.mulf %588, %5 : vector<16x16xf32>
    %590 = vector.extract_strided_slice %20 {offsets = [9, 0], sizes = [1, 16], strides = [1, 1]} : vector<32x16xf32> to vector<1x16xf32>
    %591 = vector.broadcast %590 : vector<1x16xf32> to vector<16x16xf32>
    %592 = arith.mulf %591, %5 : vector<16x16xf32>
    %593 = arith.mulf %592, %589 : vector<16x16xf32>
    %cst_147 = arith.constant dense<0.000000e+00> : vector<16xf32>
    %594 = vector.multi_reduction <add>, %593, %cst_147 [1] : vector<16x16xf32> to vector<16xf32>
    %595 = vector.shape_cast %594 : vector<16xf32> to vector<16x1xf32>
    %c9_148 = arith.constant 9 : index
    %596 = memref.load %arg11[%c9_148] : memref<32xf32, #tpu.memory_space<smem>>
    %597 = vector.broadcast %596 : f32 to vector<16x1xf32>
    %598 = arith.mulf %595, %597 : vector<16x1xf32>
    %c9_149 = arith.constant 9 : index
    %599 = memref.load %arg12[%c9_149] : memref<32xf32, #tpu.memory_space<smem>>
    %600 = vector.broadcast %599 : f32 to vector<16x1xf32>
    %601 = arith.addf %598, %600 : vector<16x1xf32>
    %cst_150 = arith.constant 0.000000e+00 : f32
    %602 = vector.broadcast %cst_150 : f32 to vector<16x1xf32>
    %603 = arith.maximumf %601, %602 : vector<16x1xf32>
    %c0_151 = arith.constant 0 : index
    %c0_152 = arith.constant 0 : index
    %c9_153 = arith.constant 9 : index
    %604 = vector.load %arg13[%c0_151, %c0_152, %c9_153] : memref<1x16x32xf32, #tpu.memory_space<vmem>>, vector<1x16x1xf32>
    %605 = vector.shape_cast %604 : vector<1x16x1xf32> to vector<16x1xf32>
    %606 = vector.shape_cast %603 : vector<16x1xf32> to vector<1x16x1xf32>
    tpu.vector_store %arg13[%c0_151, %c0_152, %c9_153], %606 {strides = array<i32>} : memref<1x16x32xf32, #tpu.memory_space<vmem>>, vector<1x16x1xf32>,
    %c40 = arith.constant 40 : index
    %607 = memref.load %arg10[%c40] : memref<128xf32, #tpu.memory_space<smem>>
    %608 = vector.broadcast %607 : f32 to vector<16x16xf32>
    %609 = arith.mulf %30, %608 : vector<16x16xf32>
    %c41 = arith.constant 41 : index
    %610 = memref.load %arg10[%c41] : memref<128xf32, #tpu.memory_space<smem>>
    %611 = vector.broadcast %610 : f32 to vector<16x16xf32>
    %612 = arith.mulf %32, %611 : vector<16x16xf32>
    %613 = arith.addf %609, %612 : vector<16x16xf32>
    %c42 = arith.constant 42 : index
    %614 = memref.load %arg10[%c42] : memref<128xf32, #tpu.memory_space<smem>>
    %615 = vector.broadcast %614 : f32 to vector<16x16xf32>
    %616 = arith.mulf %34, %615 : vector<16x16xf32>
    %617 = arith.addf %613, %616 : vector<16x16xf32>
    %c43 = arith.constant 43 : index
    %618 = memref.load %arg10[%c43] : memref<128xf32, #tpu.memory_space<smem>>
    %619 = vector.broadcast %618 : f32 to vector<16x16xf32>
    %620 = arith.mulf %36, %619 : vector<16x16xf32>
    %621 = arith.addf %617, %620 : vector<16x16xf32>
    %622 = vector.extract_strided_slice %26 {offsets = [10, 0], sizes = [1, 16], strides = [1, 1]} : vector<32x16xf32> to vector<1x16xf32>
    %623 = vector.broadcast %622 : vector<1x16xf32> to vector<16x16xf32>
    %624 = arith.mulf %5, %623 : vector<16x16xf32>
    %625 = vector.extract_strided_slice %28 {offsets = [0, 10], sizes = [16, 1], strides = [1, 1]} : vector<16x32xf32> to vector<16x1xf32>
    %626 = vector.broadcast %625 : vector<16x1xf32> to vector<16x16xf32>
    %627 = arith.mulf %11, %626 : vector<16x16xf32>
    %628 = arith.addf %624, %627 : vector<16x16xf32>
    %629 = arith.addf %628, %621 : vector<16x16xf32>
    %cst_154 = arith.constant 0.000000e+00 : f32
    %630 = vector.broadcast %cst_154 : f32 to vector<16x16xf32>
    %631 = arith.cmpf oge, %629, %630 : vector<16x16xf32>
    %cst_155 = arith.constant 2.000000e-01 : f32
    %632 = vector.broadcast %cst_155 : f32 to vector<16x16xf32>
    %633 = arith.mulf %632, %629 : vector<16x16xf32>
    %634 = arith.select %631, %629, %633 : vector<16x16xi1>, vector<16x16xf32>
    %635 = arith.mulf %634, %5 : vector<16x16xf32>
    %636 = arith.addf %635, %16 : vector<16x16xf32>
    %cst_156 = arith.constant dense<0xFF800000> : vector<16xf32>
    %637 = vector.multi_reduction <maximumf>, %636, %cst_156 [1] : vector<16x16xf32> to vector<16xf32>
    %638 = vector.shape_cast %637 : vector<16xf32> to vector<16x1xf32>
    %639 = vector.broadcast %638 : vector<16x1xf32> to vector<16x16xf32>
    %640 = arith.subf %636, %639 : vector<16x16xf32>
    %641 = math.exp %640 : vector<16x16xf32>
    %cst_157 = arith.constant dense<0.000000e+00> : vector<16xf32>
    %642 = vector.multi_reduction <add>, %641, %cst_157 [1] : vector<16x16xf32> to vector<16xf32>
    %643 = vector.shape_cast %642 : vector<16xf32> to vector<16x1xf32>
    %644 = vector.broadcast %643 : vector<16x1xf32> to vector<16x16xf32>
    %645 = arith.divf %641, %644 : vector<16x16xf32>
    %646 = arith.mulf %645, %5 : vector<16x16xf32>
    %647 = vector.extract_strided_slice %20 {offsets = [10, 0], sizes = [1, 16], strides = [1, 1]} : vector<32x16xf32> to vector<1x16xf32>
    %648 = vector.broadcast %647 : vector<1x16xf32> to vector<16x16xf32>
    %649 = arith.mulf %648, %5 : vector<16x16xf32>
    %650 = arith.mulf %649, %646 : vector<16x16xf32>
    %cst_158 = arith.constant dense<0.000000e+00> : vector<16xf32>
    %651 = vector.multi_reduction <add>, %650, %cst_158 [1] : vector<16x16xf32> to vector<16xf32>
    %652 = vector.shape_cast %651 : vector<16xf32> to vector<16x1xf32>
    %c10_159 = arith.constant 10 : index
    %653 = memref.load %arg11[%c10_159] : memref<32xf32, #tpu.memory_space<smem>>
    %654 = vector.broadcast %653 : f32 to vector<16x1xf32>
    %655 = arith.mulf %652, %654 : vector<16x1xf32>
    %c10_160 = arith.constant 10 : index
    %656 = memref.load %arg12[%c10_160] : memref<32xf32, #tpu.memory_space<smem>>
    %657 = vector.broadcast %656 : f32 to vector<16x1xf32>
    %658 = arith.addf %655, %657 : vector<16x1xf32>
    %cst_161 = arith.constant 0.000000e+00 : f32
    %659 = vector.broadcast %cst_161 : f32 to vector<16x1xf32>
    %660 = arith.maximumf %658, %659 : vector<16x1xf32>
    %c0_162 = arith.constant 0 : index
    %c0_163 = arith.constant 0 : index
    %c10_164 = arith.constant 10 : index
    %661 = vector.load %arg13[%c0_162, %c0_163, %c10_164] : memref<1x16x32xf32, #tpu.memory_space<vmem>>, vector<1x16x1xf32>
    %662 = vector.shape_cast %661 : vector<1x16x1xf32> to vector<16x1xf32>
    %663 = vector.shape_cast %660 : vector<16x1xf32> to vector<1x16x1xf32>
    tpu.vector_store %arg13[%c0_162, %c0_163, %c10_164], %663 {strides = array<i32>} : memref<1x16x32xf32, #tpu.memory_space<vmem>>, vector<1x16x1xf32>,
    %c44 = arith.constant 44 : index
    %664 = memref.load %arg10[%c44] : memref<128xf32, #tpu.memory_space<smem>>
    %665 = vector.broadcast %664 : f32 to vector<16x16xf32>
    %666 = arith.mulf %30, %665 : vector<16x16xf32>
    %c45 = arith.constant 45 : index
    %667 = memref.load %arg10[%c45] : memref<128xf32, #tpu.memory_space<smem>>
    %668 = vector.broadcast %667 : f32 to vector<16x16xf32>
    %669 = arith.mulf %32, %668 : vector<16x16xf32>
    %670 = arith.addf %666, %669 : vector<16x16xf32>
    %c46 = arith.constant 46 : index
    %671 = memref.load %arg10[%c46] : memref<128xf32, #tpu.memory_space<smem>>
    %672 = vector.broadcast %671 : f32 to vector<16x16xf32>
    %673 = arith.mulf %34, %672 : vector<16x16xf32>
    %674 = arith.addf %670, %673 : vector<16x16xf32>
    %c47 = arith.constant 47 : index
    %675 = memref.load %arg10[%c47] : memref<128xf32, #tpu.memory_space<smem>>
    %676 = vector.broadcast %675 : f32 to vector<16x16xf32>
    %677 = arith.mulf %36, %676 : vector<16x16xf32>
    %678 = arith.addf %674, %677 : vector<16x16xf32>
    %679 = vector.extract_strided_slice %26 {offsets = [11, 0], sizes = [1, 16], strides = [1, 1]} : vector<32x16xf32> to vector<1x16xf32>
    %680 = vector.broadcast %679 : vector<1x16xf32> to vector<16x16xf32>
    %681 = arith.mulf %5, %680 : vector<16x16xf32>
    %682 = vector.extract_strided_slice %28 {offsets = [0, 11], sizes = [16, 1], strides = [1, 1]} : vector<16x32xf32> to vector<16x1xf32>
    %683 = vector.broadcast %682 : vector<16x1xf32> to vector<16x16xf32>
    %684 = arith.mulf %11, %683 : vector<16x16xf32>
    %685 = arith.addf %681, %684 : vector<16x16xf32>
    %686 = arith.addf %685, %678 : vector<16x16xf32>
    %cst_165 = arith.constant 0.000000e+00 : f32
    %687 = vector.broadcast %cst_165 : f32 to vector<16x16xf32>
    %688 = arith.cmpf oge, %686, %687 : vector<16x16xf32>
    %cst_166 = arith.constant 2.000000e-01 : f32
    %689 = vector.broadcast %cst_166 : f32 to vector<16x16xf32>
    %690 = arith.mulf %689, %686 : vector<16x16xf32>
    %691 = arith.select %688, %686, %690 : vector<16x16xi1>, vector<16x16xf32>
    %692 = arith.mulf %691, %5 : vector<16x16xf32>
    %693 = arith.addf %692, %16 : vector<16x16xf32>
    %cst_167 = arith.constant dense<0xFF800000> : vector<16xf32>
    %694 = vector.multi_reduction <maximumf>, %693, %cst_167 [1] : vector<16x16xf32> to vector<16xf32>
    %695 = vector.shape_cast %694 : vector<16xf32> to vector<16x1xf32>
    %696 = vector.broadcast %695 : vector<16x1xf32> to vector<16x16xf32>
    %697 = arith.subf %693, %696 : vector<16x16xf32>
    %698 = math.exp %697 : vector<16x16xf32>
    %cst_168 = arith.constant dense<0.000000e+00> : vector<16xf32>
    %699 = vector.multi_reduction <add>, %698, %cst_168 [1] : vector<16x16xf32> to vector<16xf32>
    %700 = vector.shape_cast %699 : vector<16xf32> to vector<16x1xf32>
    %701 = vector.broadcast %700 : vector<16x1xf32> to vector<16x16xf32>
    %702 = arith.divf %698, %701 : vector<16x16xf32>
    %703 = arith.mulf %702, %5 : vector<16x16xf32>
    %704 = vector.extract_strided_slice %20 {offsets = [11, 0], sizes = [1, 16], strides = [1, 1]} : vector<32x16xf32> to vector<1x16xf32>
    %705 = vector.broadcast %704 : vector<1x16xf32> to vector<16x16xf32>
    %706 = arith.mulf %705, %5 : vector<16x16xf32>
    %707 = arith.mulf %706, %703 : vector<16x16xf32>
    %cst_169 = arith.constant dense<0.000000e+00> : vector<16xf32>
    %708 = vector.multi_reduction <add>, %707, %cst_169 [1] : vector<16x16xf32> to vector<16xf32>
    %709 = vector.shape_cast %708 : vector<16xf32> to vector<16x1xf32>
    %c11_170 = arith.constant 11 : index
    %710 = memref.load %arg11[%c11_170] : memref<32xf32, #tpu.memory_space<smem>>
    %711 = vector.broadcast %710 : f32 to vector<16x1xf32>
    %712 = arith.mulf %709, %711 : vector<16x1xf32>
    %c11_171 = arith.constant 11 : index
    %713 = memref.load %arg12[%c11_171] : memref<32xf32, #tpu.memory_space<smem>>
    %714 = vector.broadcast %713 : f32 to vector<16x1xf32>
    %715 = arith.addf %712, %714 : vector<16x1xf32>
    %cst_172 = arith.constant 0.000000e+00 : f32
    %716 = vector.broadcast %cst_172 : f32 to vector<16x1xf32>
    %717 = arith.maximumf %715, %716 : vector<16x1xf32>
    %c0_173 = arith.constant 0 : index
    %c0_174 = arith.constant 0 : index
    %c11_175 = arith.constant 11 : index
    %718 = vector.load %arg13[%c0_173, %c0_174, %c11_175] : memref<1x16x32xf32, #tpu.memory_space<vmem>>, vector<1x16x1xf32>
    %719 = vector.shape_cast %718 : vector<1x16x1xf32> to vector<16x1xf32>
    %720 = vector.shape_cast %717 : vector<16x1xf32> to vector<1x16x1xf32>
    tpu.vector_store %arg13[%c0_173, %c0_174, %c11_175], %720 {strides = array<i32>} : memref<1x16x32xf32, #tpu.memory_space<vmem>>, vector<1x16x1xf32>,
    %c48 = arith.constant 48 : index
    %721 = memref.load %arg10[%c48] : memref<128xf32, #tpu.memory_space<smem>>
    %722 = vector.broadcast %721 : f32 to vector<16x16xf32>
    %723 = arith.mulf %30, %722 : vector<16x16xf32>
    %c49 = arith.constant 49 : index
    %724 = memref.load %arg10[%c49] : memref<128xf32, #tpu.memory_space<smem>>
    %725 = vector.broadcast %724 : f32 to vector<16x16xf32>
    %726 = arith.mulf %32, %725 : vector<16x16xf32>
    %727 = arith.addf %723, %726 : vector<16x16xf32>
    %c50 = arith.constant 50 : index
    %728 = memref.load %arg10[%c50] : memref<128xf32, #tpu.memory_space<smem>>
    %729 = vector.broadcast %728 : f32 to vector<16x16xf32>
    %730 = arith.mulf %34, %729 : vector<16x16xf32>
    %731 = arith.addf %727, %730 : vector<16x16xf32>
    %c51 = arith.constant 51 : index
    %732 = memref.load %arg10[%c51] : memref<128xf32, #tpu.memory_space<smem>>
    %733 = vector.broadcast %732 : f32 to vector<16x16xf32>
    %734 = arith.mulf %36, %733 : vector<16x16xf32>
    %735 = arith.addf %731, %734 : vector<16x16xf32>
    %736 = vector.extract_strided_slice %26 {offsets = [12, 0], sizes = [1, 16], strides = [1, 1]} : vector<32x16xf32> to vector<1x16xf32>
    %737 = vector.broadcast %736 : vector<1x16xf32> to vector<16x16xf32>
    %738 = arith.mulf %5, %737 : vector<16x16xf32>
    %739 = vector.extract_strided_slice %28 {offsets = [0, 12], sizes = [16, 1], strides = [1, 1]} : vector<16x32xf32> to vector<16x1xf32>
    %740 = vector.broadcast %739 : vector<16x1xf32> to vector<16x16xf32>
    %741 = arith.mulf %11, %740 : vector<16x16xf32>
    %742 = arith.addf %738, %741 : vector<16x16xf32>
    %743 = arith.addf %742, %735 : vector<16x16xf32>
    %cst_176 = arith.constant 0.000000e+00 : f32
    %744 = vector.broadcast %cst_176 : f32 to vector<16x16xf32>
    %745 = arith.cmpf oge, %743, %744 : vector<16x16xf32>
    %cst_177 = arith.constant 2.000000e-01 : f32
    %746 = vector.broadcast %cst_177 : f32 to vector<16x16xf32>
    %747 = arith.mulf %746, %743 : vector<16x16xf32>
    %748 = arith.select %745, %743, %747 : vector<16x16xi1>, vector<16x16xf32>
    %749 = arith.mulf %748, %5 : vector<16x16xf32>
    %750 = arith.addf %749, %16 : vector<16x16xf32>
    %cst_178 = arith.constant dense<0xFF800000> : vector<16xf32>
    %751 = vector.multi_reduction <maximumf>, %750, %cst_178 [1] : vector<16x16xf32> to vector<16xf32>
    %752 = vector.shape_cast %751 : vector<16xf32> to vector<16x1xf32>
    %753 = vector.broadcast %752 : vector<16x1xf32> to vector<16x16xf32>
    %754 = arith.subf %750, %753 : vector<16x16xf32>
    %755 = math.exp %754 : vector<16x16xf32>
    %cst_179 = arith.constant dense<0.000000e+00> : vector<16xf32>
    %756 = vector.multi_reduction <add>, %755, %cst_179 [1] : vector<16x16xf32> to vector<16xf32>
    %757 = vector.shape_cast %756 : vector<16xf32> to vector<16x1xf32>
    %758 = vector.broadcast %757 : vector<16x1xf32> to vector<16x16xf32>
    %759 = arith.divf %755, %758 : vector<16x16xf32>
    %760 = arith.mulf %759, %5 : vector<16x16xf32>
    %761 = vector.extract_strided_slice %20 {offsets = [12, 0], sizes = [1, 16], strides = [1, 1]} : vector<32x16xf32> to vector<1x16xf32>
    %762 = vector.broadcast %761 : vector<1x16xf32> to vector<16x16xf32>
    %763 = arith.mulf %762, %5 : vector<16x16xf32>
    %764 = arith.mulf %763, %760 : vector<16x16xf32>
    %cst_180 = arith.constant dense<0.000000e+00> : vector<16xf32>
    %765 = vector.multi_reduction <add>, %764, %cst_180 [1] : vector<16x16xf32> to vector<16xf32>
    %766 = vector.shape_cast %765 : vector<16xf32> to vector<16x1xf32>
    %c12_181 = arith.constant 12 : index
    %767 = memref.load %arg11[%c12_181] : memref<32xf32, #tpu.memory_space<smem>>
    %768 = vector.broadcast %767 : f32 to vector<16x1xf32>
    %769 = arith.mulf %766, %768 : vector<16x1xf32>
    %c12_182 = arith.constant 12 : index
    %770 = memref.load %arg12[%c12_182] : memref<32xf32, #tpu.memory_space<smem>>
    %771 = vector.broadcast %770 : f32 to vector<16x1xf32>
    %772 = arith.addf %769, %771 : vector<16x1xf32>
    %cst_183 = arith.constant 0.000000e+00 : f32
    %773 = vector.broadcast %cst_183 : f32 to vector<16x1xf32>
    %774 = arith.maximumf %772, %773 : vector<16x1xf32>
    %c0_184 = arith.constant 0 : index
    %c0_185 = arith.constant 0 : index
    %c12_186 = arith.constant 12 : index
    %775 = vector.load %arg13[%c0_184, %c0_185, %c12_186] : memref<1x16x32xf32, #tpu.memory_space<vmem>>, vector<1x16x1xf32>
    %776 = vector.shape_cast %775 : vector<1x16x1xf32> to vector<16x1xf32>
    %777 = vector.shape_cast %774 : vector<16x1xf32> to vector<1x16x1xf32>
    tpu.vector_store %arg13[%c0_184, %c0_185, %c12_186], %777 {strides = array<i32>} : memref<1x16x32xf32, #tpu.memory_space<vmem>>, vector<1x16x1xf32>,
    %c52 = arith.constant 52 : index
    %778 = memref.load %arg10[%c52] : memref<128xf32, #tpu.memory_space<smem>>
    %779 = vector.broadcast %778 : f32 to vector<16x16xf32>
    %780 = arith.mulf %30, %779 : vector<16x16xf32>
    %c53 = arith.constant 53 : index
    %781 = memref.load %arg10[%c53] : memref<128xf32, #tpu.memory_space<smem>>
    %782 = vector.broadcast %781 : f32 to vector<16x16xf32>
    %783 = arith.mulf %32, %782 : vector<16x16xf32>
    %784 = arith.addf %780, %783 : vector<16x16xf32>
    %c54 = arith.constant 54 : index
    %785 = memref.load %arg10[%c54] : memref<128xf32, #tpu.memory_space<smem>>
    %786 = vector.broadcast %785 : f32 to vector<16x16xf32>
    %787 = arith.mulf %34, %786 : vector<16x16xf32>
    %788 = arith.addf %784, %787 : vector<16x16xf32>
    %c55 = arith.constant 55 : index
    %789 = memref.load %arg10[%c55] : memref<128xf32, #tpu.memory_space<smem>>
    %790 = vector.broadcast %789 : f32 to vector<16x16xf32>
    %791 = arith.mulf %36, %790 : vector<16x16xf32>
    %792 = arith.addf %788, %791 : vector<16x16xf32>
    %793 = vector.extract_strided_slice %26 {offsets = [13, 0], sizes = [1, 16], strides = [1, 1]} : vector<32x16xf32> to vector<1x16xf32>
    %794 = vector.broadcast %793 : vector<1x16xf32> to vector<16x16xf32>
    %795 = arith.mulf %5, %794 : vector<16x16xf32>
    %796 = vector.extract_strided_slice %28 {offsets = [0, 13], sizes = [16, 1], strides = [1, 1]} : vector<16x32xf32> to vector<16x1xf32>
    %797 = vector.broadcast %796 : vector<16x1xf32> to vector<16x16xf32>
    %798 = arith.mulf %11, %797 : vector<16x16xf32>
    %799 = arith.addf %795, %798 : vector<16x16xf32>
    %800 = arith.addf %799, %792 : vector<16x16xf32>
    %cst_187 = arith.constant 0.000000e+00 : f32
    %801 = vector.broadcast %cst_187 : f32 to vector<16x16xf32>
    %802 = arith.cmpf oge, %800, %801 : vector<16x16xf32>
    %cst_188 = arith.constant 2.000000e-01 : f32
    %803 = vector.broadcast %cst_188 : f32 to vector<16x16xf32>
    %804 = arith.mulf %803, %800 : vector<16x16xf32>
    %805 = arith.select %802, %800, %804 : vector<16x16xi1>, vector<16x16xf32>
    %806 = arith.mulf %805, %5 : vector<16x16xf32>
    %807 = arith.addf %806, %16 : vector<16x16xf32>
    %cst_189 = arith.constant dense<0xFF800000> : vector<16xf32>
    %808 = vector.multi_reduction <maximumf>, %807, %cst_189 [1] : vector<16x16xf32> to vector<16xf32>
    %809 = vector.shape_cast %808 : vector<16xf32> to vector<16x1xf32>
    %810 = vector.broadcast %809 : vector<16x1xf32> to vector<16x16xf32>
    %811 = arith.subf %807, %810 : vector<16x16xf32>
    %812 = math.exp %811 : vector<16x16xf32>
    %cst_190 = arith.constant dense<0.000000e+00> : vector<16xf32>
    %813 = vector.multi_reduction <add>, %812, %cst_190 [1] : vector<16x16xf32> to vector<16xf32>
    %814 = vector.shape_cast %813 : vector<16xf32> to vector<16x1xf32>
    %815 = vector.broadcast %814 : vector<16x1xf32> to vector<16x16xf32>
    %816 = arith.divf %812, %815 : vector<16x16xf32>
    %817 = arith.mulf %816, %5 : vector<16x16xf32>
    %818 = vector.extract_strided_slice %20 {offsets = [13, 0], sizes = [1, 16], strides = [1, 1]} : vector<32x16xf32> to vector<1x16xf32>
    %819 = vector.broadcast %818 : vector<1x16xf32> to vector<16x16xf32>
    %820 = arith.mulf %819, %5 : vector<16x16xf32>
    %821 = arith.mulf %820, %817 : vector<16x16xf32>
    %cst_191 = arith.constant dense<0.000000e+00> : vector<16xf32>
    %822 = vector.multi_reduction <add>, %821, %cst_191 [1] : vector<16x16xf32> to vector<16xf32>
    %823 = vector.shape_cast %822 : vector<16xf32> to vector<16x1xf32>
    %c13_192 = arith.constant 13 : index
    %824 = memref.load %arg11[%c13_192] : memref<32xf32, #tpu.memory_space<smem>>
    %825 = vector.broadcast %824 : f32 to vector<16x1xf32>
    %826 = arith.mulf %823, %825 : vector<16x1xf32>
    %c13_193 = arith.constant 13 : index
    %827 = memref.load %arg12[%c13_193] : memref<32xf32, #tpu.memory_space<smem>>
    %828 = vector.broadcast %827 : f32 to vector<16x1xf32>
    %829 = arith.addf %826, %828 : vector<16x1xf32>
    %cst_194 = arith.constant 0.000000e+00 : f32
    %830 = vector.broadcast %cst_194 : f32 to vector<16x1xf32>
    %831 = arith.maximumf %829, %830 : vector<16x1xf32>
    %c0_195 = arith.constant 0 : index
    %c0_196 = arith.constant 0 : index
    %c13_197 = arith.constant 13 : index
    %832 = vector.load %arg13[%c0_195, %c0_196, %c13_197] : memref<1x16x32xf32, #tpu.memory_space<vmem>>, vector<1x16x1xf32>
    %833 = vector.shape_cast %832 : vector<1x16x1xf32> to vector<16x1xf32>
    %834 = vector.shape_cast %831 : vector<16x1xf32> to vector<1x16x1xf32>
    tpu.vector_store %arg13[%c0_195, %c0_196, %c13_197], %834 {strides = array<i32>} : memref<1x16x32xf32, #tpu.memory_space<vmem>>, vector<1x16x1xf32>,
    %c56 = arith.constant 56 : index
    %835 = memref.load %arg10[%c56] : memref<128xf32, #tpu.memory_space<smem>>
    %836 = vector.broadcast %835 : f32 to vector<16x16xf32>
    %837 = arith.mulf %30, %836 : vector<16x16xf32>
    %c57 = arith.constant 57 : index
    %838 = memref.load %arg10[%c57] : memref<128xf32, #tpu.memory_space<smem>>
    %839 = vector.broadcast %838 : f32 to vector<16x16xf32>
    %840 = arith.mulf %32, %839 : vector<16x16xf32>
    %841 = arith.addf %837, %840 : vector<16x16xf32>
    %c58 = arith.constant 58 : index
    %842 = memref.load %arg10[%c58] : memref<128xf32, #tpu.memory_space<smem>>
    %843 = vector.broadcast %842 : f32 to vector<16x16xf32>
    %844 = arith.mulf %34, %843 : vector<16x16xf32>
    %845 = arith.addf %841, %844 : vector<16x16xf32>
    %c59 = arith.constant 59 : index
    %846 = memref.load %arg10[%c59] : memref<128xf32, #tpu.memory_space<smem>>
    %847 = vector.broadcast %846 : f32 to vector<16x16xf32>
    %848 = arith.mulf %36, %847 : vector<16x16xf32>
    %849 = arith.addf %845, %848 : vector<16x16xf32>
    %850 = vector.extract_strided_slice %26 {offsets = [14, 0], sizes = [1, 16], strides = [1, 1]} : vector<32x16xf32> to vector<1x16xf32>
    %851 = vector.broadcast %850 : vector<1x16xf32> to vector<16x16xf32>
    %852 = arith.mulf %5, %851 : vector<16x16xf32>
    %853 = vector.extract_strided_slice %28 {offsets = [0, 14], sizes = [16, 1], strides = [1, 1]} : vector<16x32xf32> to vector<16x1xf32>
    %854 = vector.broadcast %853 : vector<16x1xf32> to vector<16x16xf32>
    %855 = arith.mulf %11, %854 : vector<16x16xf32>
    %856 = arith.addf %852, %855 : vector<16x16xf32>
    %857 = arith.addf %856, %849 : vector<16x16xf32>
    %cst_198 = arith.constant 0.000000e+00 : f32
    %858 = vector.broadcast %cst_198 : f32 to vector<16x16xf32>
    %859 = arith.cmpf oge, %857, %858 : vector<16x16xf32>
    %cst_199 = arith.constant 2.000000e-01 : f32
    %860 = vector.broadcast %cst_199 : f32 to vector<16x16xf32>
    %861 = arith.mulf %860, %857 : vector<16x16xf32>
    %862 = arith.select %859, %857, %861 : vector<16x16xi1>, vector<16x16xf32>
    %863 = arith.mulf %862, %5 : vector<16x16xf32>
    %864 = arith.addf %863, %16 : vector<16x16xf32>
    %cst_200 = arith.constant dense<0xFF800000> : vector<16xf32>
    %865 = vector.multi_reduction <maximumf>, %864, %cst_200 [1] : vector<16x16xf32> to vector<16xf32>
    %866 = vector.shape_cast %865 : vector<16xf32> to vector<16x1xf32>
    %867 = vector.broadcast %866 : vector<16x1xf32> to vector<16x16xf32>
    %868 = arith.subf %864, %867 : vector<16x16xf32>
    %869 = math.exp %868 : vector<16x16xf32>
    %cst_201 = arith.constant dense<0.000000e+00> : vector<16xf32>
    %870 = vector.multi_reduction <add>, %869, %cst_201 [1] : vector<16x16xf32> to vector<16xf32>
    %871 = vector.shape_cast %870 : vector<16xf32> to vector<16x1xf32>
    %872 = vector.broadcast %871 : vector<16x1xf32> to vector<16x16xf32>
    %873 = arith.divf %869, %872 : vector<16x16xf32>
    %874 = arith.mulf %873, %5 : vector<16x16xf32>
    %875 = vector.extract_strided_slice %20 {offsets = [14, 0], sizes = [1, 16], strides = [1, 1]} : vector<32x16xf32> to vector<1x16xf32>
    %876 = vector.broadcast %875 : vector<1x16xf32> to vector<16x16xf32>
    %877 = arith.mulf %876, %5 : vector<16x16xf32>
    %878 = arith.mulf %877, %874 : vector<16x16xf32>
    %cst_202 = arith.constant dense<0.000000e+00> : vector<16xf32>
    %879 = vector.multi_reduction <add>, %878, %cst_202 [1] : vector<16x16xf32> to vector<16xf32>
    %880 = vector.shape_cast %879 : vector<16xf32> to vector<16x1xf32>
    %c14_203 = arith.constant 14 : index
    %881 = memref.load %arg11[%c14_203] : memref<32xf32, #tpu.memory_space<smem>>
    %882 = vector.broadcast %881 : f32 to vector<16x1xf32>
    %883 = arith.mulf %880, %882 : vector<16x1xf32>
    %c14_204 = arith.constant 14 : index
    %884 = memref.load %arg12[%c14_204] : memref<32xf32, #tpu.memory_space<smem>>
    %885 = vector.broadcast %884 : f32 to vector<16x1xf32>
    %886 = arith.addf %883, %885 : vector<16x1xf32>
    %cst_205 = arith.constant 0.000000e+00 : f32
    %887 = vector.broadcast %cst_205 : f32 to vector<16x1xf32>
    %888 = arith.maximumf %886, %887 : vector<16x1xf32>
    %c0_206 = arith.constant 0 : index
    %c0_207 = arith.constant 0 : index
    %c14_208 = arith.constant 14 : index
    %889 = vector.load %arg13[%c0_206, %c0_207, %c14_208] : memref<1x16x32xf32, #tpu.memory_space<vmem>>, vector<1x16x1xf32>
    %890 = vector.shape_cast %889 : vector<1x16x1xf32> to vector<16x1xf32>
    %891 = vector.shape_cast %888 : vector<16x1xf32> to vector<1x16x1xf32>
    tpu.vector_store %arg13[%c0_206, %c0_207, %c14_208], %891 {strides = array<i32>} : memref<1x16x32xf32, #tpu.memory_space<vmem>>, vector<1x16x1xf32>,
    %c60 = arith.constant 60 : index
    %892 = memref.load %arg10[%c60] : memref<128xf32, #tpu.memory_space<smem>>
    %893 = vector.broadcast %892 : f32 to vector<16x16xf32>
    %894 = arith.mulf %30, %893 : vector<16x16xf32>
    %c61 = arith.constant 61 : index
    %895 = memref.load %arg10[%c61] : memref<128xf32, #tpu.memory_space<smem>>
    %896 = vector.broadcast %895 : f32 to vector<16x16xf32>
    %897 = arith.mulf %32, %896 : vector<16x16xf32>
    %898 = arith.addf %894, %897 : vector<16x16xf32>
    %c62 = arith.constant 62 : index
    %899 = memref.load %arg10[%c62] : memref<128xf32, #tpu.memory_space<smem>>
    %900 = vector.broadcast %899 : f32 to vector<16x16xf32>
    %901 = arith.mulf %34, %900 : vector<16x16xf32>
    %902 = arith.addf %898, %901 : vector<16x16xf32>
    %c63 = arith.constant 63 : index
    %903 = memref.load %arg10[%c63] : memref<128xf32, #tpu.memory_space<smem>>
    %904 = vector.broadcast %903 : f32 to vector<16x16xf32>
    %905 = arith.mulf %36, %904 : vector<16x16xf32>
    %906 = arith.addf %902, %905 : vector<16x16xf32>
    %907 = vector.extract_strided_slice %26 {offsets = [15, 0], sizes = [1, 16], strides = [1, 1]} : vector<32x16xf32> to vector<1x16xf32>
    %908 = vector.broadcast %907 : vector<1x16xf32> to vector<16x16xf32>
    %909 = arith.mulf %5, %908 : vector<16x16xf32>
    %910 = vector.extract_strided_slice %28 {offsets = [0, 15], sizes = [16, 1], strides = [1, 1]} : vector<16x32xf32> to vector<16x1xf32>
    %911 = vector.broadcast %910 : vector<16x1xf32> to vector<16x16xf32>
    %912 = arith.mulf %11, %911 : vector<16x16xf32>
    %913 = arith.addf %909, %912 : vector<16x16xf32>
    %914 = arith.addf %913, %906 : vector<16x16xf32>
    %cst_209 = arith.constant 0.000000e+00 : f32
    %915 = vector.broadcast %cst_209 : f32 to vector<16x16xf32>
    %916 = arith.cmpf oge, %914, %915 : vector<16x16xf32>
    %cst_210 = arith.constant 2.000000e-01 : f32
    %917 = vector.broadcast %cst_210 : f32 to vector<16x16xf32>
    %918 = arith.mulf %917, %914 : vector<16x16xf32>
    %919 = arith.select %916, %914, %918 : vector<16x16xi1>, vector<16x16xf32>
    %920 = arith.mulf %919, %5 : vector<16x16xf32>
    %921 = arith.addf %920, %16 : vector<16x16xf32>
    %cst_211 = arith.constant dense<0xFF800000> : vector<16xf32>
    %922 = vector.multi_reduction <maximumf>, %921, %cst_211 [1] : vector<16x16xf32> to vector<16xf32>
    %923 = vector.shape_cast %922 : vector<16xf32> to vector<16x1xf32>
    %924 = vector.broadcast %923 : vector<16x1xf32> to vector<16x16xf32>
    %925 = arith.subf %921, %924 : vector<16x16xf32>
    %926 = math.exp %925 : vector<16x16xf32>
    %cst_212 = arith.constant dense<0.000000e+00> : vector<16xf32>
    %927 = vector.multi_reduction <add>, %926, %cst_212 [1] : vector<16x16xf32> to vector<16xf32>
    %928 = vector.shape_cast %927 : vector<16xf32> to vector<16x1xf32>
    %929 = vector.broadcast %928 : vector<16x1xf32> to vector<16x16xf32>
    %930 = arith.divf %926, %929 : vector<16x16xf32>
    %931 = arith.mulf %930, %5 : vector<16x16xf32>
    %932 = vector.extract_strided_slice %20 {offsets = [15, 0], sizes = [1, 16], strides = [1, 1]} : vector<32x16xf32> to vector<1x16xf32>
    %933 = vector.broadcast %932 : vector<1x16xf32> to vector<16x16xf32>
    %934 = arith.mulf %933, %5 : vector<16x16xf32>
    %935 = arith.mulf %934, %931 : vector<16x16xf32>
    %cst_213 = arith.constant dense<0.000000e+00> : vector<16xf32>
    %936 = vector.multi_reduction <add>, %935, %cst_213 [1] : vector<16x16xf32> to vector<16xf32>
    %937 = vector.shape_cast %936 : vector<16xf32> to vector<16x1xf32>
    %c15_214 = arith.constant 15 : index
    %938 = memref.load %arg11[%c15_214] : memref<32xf32, #tpu.memory_space<smem>>
    %939 = vector.broadcast %938 : f32 to vector<16x1xf32>
    %940 = arith.mulf %937, %939 : vector<16x1xf32>
    %c15_215 = arith.constant 15 : index
    %941 = memref.load %arg12[%c15_215] : memref<32xf32, #tpu.memory_space<smem>>
    %942 = vector.broadcast %941 : f32 to vector<16x1xf32>
    %943 = arith.addf %940, %942 : vector<16x1xf32>
    %cst_216 = arith.constant 0.000000e+00 : f32
    %944 = vector.broadcast %cst_216 : f32 to vector<16x1xf32>
    %945 = arith.maximumf %943, %944 : vector<16x1xf32>
    %c0_217 = arith.constant 0 : index
    %c0_218 = arith.constant 0 : index
    %c15_219 = arith.constant 15 : index
    %946 = vector.load %arg13[%c0_217, %c0_218, %c15_219] : memref<1x16x32xf32, #tpu.memory_space<vmem>>, vector<1x16x1xf32>
    %947 = vector.shape_cast %946 : vector<1x16x1xf32> to vector<16x1xf32>
    %948 = vector.shape_cast %945 : vector<16x1xf32> to vector<1x16x1xf32>
    tpu.vector_store %arg13[%c0_217, %c0_218, %c15_219], %948 {strides = array<i32>} : memref<1x16x32xf32, #tpu.memory_space<vmem>>, vector<1x16x1xf32>,
    %c64 = arith.constant 64 : index
    %949 = memref.load %arg10[%c64] : memref<128xf32, #tpu.memory_space<smem>>
    %950 = vector.broadcast %949 : f32 to vector<16x16xf32>
    %951 = arith.mulf %30, %950 : vector<16x16xf32>
    %c65 = arith.constant 65 : index
    %952 = memref.load %arg10[%c65] : memref<128xf32, #tpu.memory_space<smem>>
    %953 = vector.broadcast %952 : f32 to vector<16x16xf32>
    %954 = arith.mulf %32, %953 : vector<16x16xf32>
    %955 = arith.addf %951, %954 : vector<16x16xf32>
    %c66 = arith.constant 66 : index
    %956 = memref.load %arg10[%c66] : memref<128xf32, #tpu.memory_space<smem>>
    %957 = vector.broadcast %956 : f32 to vector<16x16xf32>
    %958 = arith.mulf %34, %957 : vector<16x16xf32>
    %959 = arith.addf %955, %958 : vector<16x16xf32>
    %c67 = arith.constant 67 : index
    %960 = memref.load %arg10[%c67] : memref<128xf32, #tpu.memory_space<smem>>
    %961 = vector.broadcast %960 : f32 to vector<16x16xf32>
    %962 = arith.mulf %36, %961 : vector<16x16xf32>
    %963 = arith.addf %959, %962 : vector<16x16xf32>
    %964 = vector.extract_strided_slice %26 {offsets = [16, 0], sizes = [1, 16], strides = [1, 1]} : vector<32x16xf32> to vector<1x16xf32>
    %965 = vector.broadcast %964 : vector<1x16xf32> to vector<16x16xf32>
    %966 = arith.mulf %5, %965 : vector<16x16xf32>
    %967 = vector.extract_strided_slice %28 {offsets = [0, 16], sizes = [16, 1], strides = [1, 1]} : vector<16x32xf32> to vector<16x1xf32>
    %968 = vector.broadcast %967 : vector<16x1xf32> to vector<16x16xf32>
    %969 = arith.mulf %11, %968 : vector<16x16xf32>
    %970 = arith.addf %966, %969 : vector<16x16xf32>
    %971 = arith.addf %970, %963 : vector<16x16xf32>
    %cst_220 = arith.constant 0.000000e+00 : f32
    %972 = vector.broadcast %cst_220 : f32 to vector<16x16xf32>
    %973 = arith.cmpf oge, %971, %972 : vector<16x16xf32>
    %cst_221 = arith.constant 2.000000e-01 : f32
    %974 = vector.broadcast %cst_221 : f32 to vector<16x16xf32>
    %975 = arith.mulf %974, %971 : vector<16x16xf32>
    %976 = arith.select %973, %971, %975 : vector<16x16xi1>, vector<16x16xf32>
    %977 = arith.mulf %976, %5 : vector<16x16xf32>
    %978 = arith.addf %977, %16 : vector<16x16xf32>
    %cst_222 = arith.constant dense<0xFF800000> : vector<16xf32>
    %979 = vector.multi_reduction <maximumf>, %978, %cst_222 [1] : vector<16x16xf32> to vector<16xf32>
    %980 = vector.shape_cast %979 : vector<16xf32> to vector<16x1xf32>
    %981 = vector.broadcast %980 : vector<16x1xf32> to vector<16x16xf32>
    %982 = arith.subf %978, %981 : vector<16x16xf32>
    %983 = math.exp %982 : vector<16x16xf32>
    %cst_223 = arith.constant dense<0.000000e+00> : vector<16xf32>
    %984 = vector.multi_reduction <add>, %983, %cst_223 [1] : vector<16x16xf32> to vector<16xf32>
    %985 = vector.shape_cast %984 : vector<16xf32> to vector<16x1xf32>
    %986 = vector.broadcast %985 : vector<16x1xf32> to vector<16x16xf32>
    %987 = arith.divf %983, %986 : vector<16x16xf32>
    %988 = arith.mulf %987, %5 : vector<16x16xf32>
    %989 = vector.extract_strided_slice %20 {offsets = [16, 0], sizes = [1, 16], strides = [1, 1]} : vector<32x16xf32> to vector<1x16xf32>
    %990 = vector.broadcast %989 : vector<1x16xf32> to vector<16x16xf32>
    %991 = arith.mulf %990, %5 : vector<16x16xf32>
    %992 = arith.mulf %991, %988 : vector<16x16xf32>
    %cst_224 = arith.constant dense<0.000000e+00> : vector<16xf32>
    %993 = vector.multi_reduction <add>, %992, %cst_224 [1] : vector<16x16xf32> to vector<16xf32>
    %994 = vector.shape_cast %993 : vector<16xf32> to vector<16x1xf32>
    %c16_225 = arith.constant 16 : index
    %995 = memref.load %arg11[%c16_225] : memref<32xf32, #tpu.memory_space<smem>>
    %996 = vector.broadcast %995 : f32 to vector<16x1xf32>
    %997 = arith.mulf %994, %996 : vector<16x1xf32>
    %c16_226 = arith.constant 16 : index
    %998 = memref.load %arg12[%c16_226] : memref<32xf32, #tpu.memory_space<smem>>
    %999 = vector.broadcast %998 : f32 to vector<16x1xf32>
    %1000 = arith.addf %997, %999 : vector<16x1xf32>
    %cst_227 = arith.constant 0.000000e+00 : f32
    %1001 = vector.broadcast %cst_227 : f32 to vector<16x1xf32>
    %1002 = arith.maximumf %1000, %1001 : vector<16x1xf32>
    %c0_228 = arith.constant 0 : index
    %c0_229 = arith.constant 0 : index
    %c16_230 = arith.constant 16 : index
    %1003 = vector.load %arg13[%c0_228, %c0_229, %c16_230] : memref<1x16x32xf32, #tpu.memory_space<vmem>>, vector<1x16x1xf32>
    %1004 = vector.shape_cast %1003 : vector<1x16x1xf32> to vector<16x1xf32>
    %1005 = vector.shape_cast %1002 : vector<16x1xf32> to vector<1x16x1xf32>
    tpu.vector_store %arg13[%c0_228, %c0_229, %c16_230], %1005 {strides = array<i32>} : memref<1x16x32xf32, #tpu.memory_space<vmem>>, vector<1x16x1xf32>,
    %c68 = arith.constant 68 : index
    %1006 = memref.load %arg10[%c68] : memref<128xf32, #tpu.memory_space<smem>>
    %1007 = vector.broadcast %1006 : f32 to vector<16x16xf32>
    %1008 = arith.mulf %30, %1007 : vector<16x16xf32>
    %c69 = arith.constant 69 : index
    %1009 = memref.load %arg10[%c69] : memref<128xf32, #tpu.memory_space<smem>>
    %1010 = vector.broadcast %1009 : f32 to vector<16x16xf32>
    %1011 = arith.mulf %32, %1010 : vector<16x16xf32>
    %1012 = arith.addf %1008, %1011 : vector<16x16xf32>
    %c70 = arith.constant 70 : index
    %1013 = memref.load %arg10[%c70] : memref<128xf32, #tpu.memory_space<smem>>
    %1014 = vector.broadcast %1013 : f32 to vector<16x16xf32>
    %1015 = arith.mulf %34, %1014 : vector<16x16xf32>
    %1016 = arith.addf %1012, %1015 : vector<16x16xf32>
    %c71 = arith.constant 71 : index
    %1017 = memref.load %arg10[%c71] : memref<128xf32, #tpu.memory_space<smem>>
    %1018 = vector.broadcast %1017 : f32 to vector<16x16xf32>
    %1019 = arith.mulf %36, %1018 : vector<16x16xf32>
    %1020 = arith.addf %1016, %1019 : vector<16x16xf32>
    %1021 = vector.extract_strided_slice %26 {offsets = [17, 0], sizes = [1, 16], strides = [1, 1]} : vector<32x16xf32> to vector<1x16xf32>
    %1022 = vector.broadcast %1021 : vector<1x16xf32> to vector<16x16xf32>
    %1023 = arith.mulf %5, %1022 : vector<16x16xf32>
    %1024 = vector.extract_strided_slice %28 {offsets = [0, 17], sizes = [16, 1], strides = [1, 1]} : vector<16x32xf32> to vector<16x1xf32>
    %1025 = vector.broadcast %1024 : vector<16x1xf32> to vector<16x16xf32>
    %1026 = arith.mulf %11, %1025 : vector<16x16xf32>
    %1027 = arith.addf %1023, %1026 : vector<16x16xf32>
    %1028 = arith.addf %1027, %1020 : vector<16x16xf32>
    %cst_231 = arith.constant 0.000000e+00 : f32
    %1029 = vector.broadcast %cst_231 : f32 to vector<16x16xf32>
    %1030 = arith.cmpf oge, %1028, %1029 : vector<16x16xf32>
    %cst_232 = arith.constant 2.000000e-01 : f32
    %1031 = vector.broadcast %cst_232 : f32 to vector<16x16xf32>
    %1032 = arith.mulf %1031, %1028 : vector<16x16xf32>
    %1033 = arith.select %1030, %1028, %1032 : vector<16x16xi1>, vector<16x16xf32>
    %1034 = arith.mulf %1033, %5 : vector<16x16xf32>
    %1035 = arith.addf %1034, %16 : vector<16x16xf32>
    %cst_233 = arith.constant dense<0xFF800000> : vector<16xf32>
    %1036 = vector.multi_reduction <maximumf>, %1035, %cst_233 [1] : vector<16x16xf32> to vector<16xf32>
    %1037 = vector.shape_cast %1036 : vector<16xf32> to vector<16x1xf32>
    %1038 = vector.broadcast %1037 : vector<16x1xf32> to vector<16x16xf32>
    %1039 = arith.subf %1035, %1038 : vector<16x16xf32>
    %1040 = math.exp %1039 : vector<16x16xf32>
    %cst_234 = arith.constant dense<0.000000e+00> : vector<16xf32>
    %1041 = vector.multi_reduction <add>, %1040, %cst_234 [1] : vector<16x16xf32> to vector<16xf32>
    %1042 = vector.shape_cast %1041 : vector<16xf32> to vector<16x1xf32>
    %1043 = vector.broadcast %1042 : vector<16x1xf32> to vector<16x16xf32>
    %1044 = arith.divf %1040, %1043 : vector<16x16xf32>
    %1045 = arith.mulf %1044, %5 : vector<16x16xf32>
    %1046 = vector.extract_strided_slice %20 {offsets = [17, 0], sizes = [1, 16], strides = [1, 1]} : vector<32x16xf32> to vector<1x16xf32>
    %1047 = vector.broadcast %1046 : vector<1x16xf32> to vector<16x16xf32>
    %1048 = arith.mulf %1047, %5 : vector<16x16xf32>
    %1049 = arith.mulf %1048, %1045 : vector<16x16xf32>
    %cst_235 = arith.constant dense<0.000000e+00> : vector<16xf32>
    %1050 = vector.multi_reduction <add>, %1049, %cst_235 [1] : vector<16x16xf32> to vector<16xf32>
    %1051 = vector.shape_cast %1050 : vector<16xf32> to vector<16x1xf32>
    %c17_236 = arith.constant 17 : index
    %1052 = memref.load %arg11[%c17_236] : memref<32xf32, #tpu.memory_space<smem>>
    %1053 = vector.broadcast %1052 : f32 to vector<16x1xf32>
    %1054 = arith.mulf %1051, %1053 : vector<16x1xf32>
    %c17_237 = arith.constant 17 : index
    %1055 = memref.load %arg12[%c17_237] : memref<32xf32, #tpu.memory_space<smem>>
    %1056 = vector.broadcast %1055 : f32 to vector<16x1xf32>
    %1057 = arith.addf %1054, %1056 : vector<16x1xf32>
    %cst_238 = arith.constant 0.000000e+00 : f32
    %1058 = vector.broadcast %cst_238 : f32 to vector<16x1xf32>
    %1059 = arith.maximumf %1057, %1058 : vector<16x1xf32>
    %c0_239 = arith.constant 0 : index
    %c0_240 = arith.constant 0 : index
    %c17_241 = arith.constant 17 : index
    %1060 = vector.load %arg13[%c0_239, %c0_240, %c17_241] : memref<1x16x32xf32, #tpu.memory_space<vmem>>, vector<1x16x1xf32>
    %1061 = vector.shape_cast %1060 : vector<1x16x1xf32> to vector<16x1xf32>
    %1062 = vector.shape_cast %1059 : vector<16x1xf32> to vector<1x16x1xf32>
    tpu.vector_store %arg13[%c0_239, %c0_240, %c17_241], %1062 {strides = array<i32>} : memref<1x16x32xf32, #tpu.memory_space<vmem>>, vector<1x16x1xf32>,
    %c72 = arith.constant 72 : index
    %1063 = memref.load %arg10[%c72] : memref<128xf32, #tpu.memory_space<smem>>
    %1064 = vector.broadcast %1063 : f32 to vector<16x16xf32>
    %1065 = arith.mulf %30, %1064 : vector<16x16xf32>
    %c73 = arith.constant 73 : index
    %1066 = memref.load %arg10[%c73] : memref<128xf32, #tpu.memory_space<smem>>
    %1067 = vector.broadcast %1066 : f32 to vector<16x16xf32>
    %1068 = arith.mulf %32, %1067 : vector<16x16xf32>
    %1069 = arith.addf %1065, %1068 : vector<16x16xf32>
    %c74 = arith.constant 74 : index
    %1070 = memref.load %arg10[%c74] : memref<128xf32, #tpu.memory_space<smem>>
    %1071 = vector.broadcast %1070 : f32 to vector<16x16xf32>
    %1072 = arith.mulf %34, %1071 : vector<16x16xf32>
    %1073 = arith.addf %1069, %1072 : vector<16x16xf32>
    %c75 = arith.constant 75 : index
    %1074 = memref.load %arg10[%c75] : memref<128xf32, #tpu.memory_space<smem>>
    %1075 = vector.broadcast %1074 : f32 to vector<16x16xf32>
    %1076 = arith.mulf %36, %1075 : vector<16x16xf32>
    %1077 = arith.addf %1073, %1076 : vector<16x16xf32>
    %1078 = vector.extract_strided_slice %26 {offsets = [18, 0], sizes = [1, 16], strides = [1, 1]} : vector<32x16xf32> to vector<1x16xf32>
    %1079 = vector.broadcast %1078 : vector<1x16xf32> to vector<16x16xf32>
    %1080 = arith.mulf %5, %1079 : vector<16x16xf32>
    %1081 = vector.extract_strided_slice %28 {offsets = [0, 18], sizes = [16, 1], strides = [1, 1]} : vector<16x32xf32> to vector<16x1xf32>
    %1082 = vector.broadcast %1081 : vector<16x1xf32> to vector<16x16xf32>
    %1083 = arith.mulf %11, %1082 : vector<16x16xf32>
    %1084 = arith.addf %1080, %1083 : vector<16x16xf32>
    %1085 = arith.addf %1084, %1077 : vector<16x16xf32>
    %cst_242 = arith.constant 0.000000e+00 : f32
    %1086 = vector.broadcast %cst_242 : f32 to vector<16x16xf32>
    %1087 = arith.cmpf oge, %1085, %1086 : vector<16x16xf32>
    %cst_243 = arith.constant 2.000000e-01 : f32
    %1088 = vector.broadcast %cst_243 : f32 to vector<16x16xf32>
    %1089 = arith.mulf %1088, %1085 : vector<16x16xf32>
    %1090 = arith.select %1087, %1085, %1089 : vector<16x16xi1>, vector<16x16xf32>
    %1091 = arith.mulf %1090, %5 : vector<16x16xf32>
    %1092 = arith.addf %1091, %16 : vector<16x16xf32>
    %cst_244 = arith.constant dense<0xFF800000> : vector<16xf32>
    %1093 = vector.multi_reduction <maximumf>, %1092, %cst_244 [1] : vector<16x16xf32> to vector<16xf32>
    %1094 = vector.shape_cast %1093 : vector<16xf32> to vector<16x1xf32>
    %1095 = vector.broadcast %1094 : vector<16x1xf32> to vector<16x16xf32>
    %1096 = arith.subf %1092, %1095 : vector<16x16xf32>
    %1097 = math.exp %1096 : vector<16x16xf32>
    %cst_245 = arith.constant dense<0.000000e+00> : vector<16xf32>
    %1098 = vector.multi_reduction <add>, %1097, %cst_245 [1] : vector<16x16xf32> to vector<16xf32>
    %1099 = vector.shape_cast %1098 : vector<16xf32> to vector<16x1xf32>
    %1100 = vector.broadcast %1099 : vector<16x1xf32> to vector<16x16xf32>
    %1101 = arith.divf %1097, %1100 : vector<16x16xf32>
    %1102 = arith.mulf %1101, %5 : vector<16x16xf32>
    %1103 = vector.extract_strided_slice %20 {offsets = [18, 0], sizes = [1, 16], strides = [1, 1]} : vector<32x16xf32> to vector<1x16xf32>
    %1104 = vector.broadcast %1103 : vector<1x16xf32> to vector<16x16xf32>
    %1105 = arith.mulf %1104, %5 : vector<16x16xf32>
    %1106 = arith.mulf %1105, %1102 : vector<16x16xf32>
    %cst_246 = arith.constant dense<0.000000e+00> : vector<16xf32>
    %1107 = vector.multi_reduction <add>, %1106, %cst_246 [1] : vector<16x16xf32> to vector<16xf32>
    %1108 = vector.shape_cast %1107 : vector<16xf32> to vector<16x1xf32>
    %c18_247 = arith.constant 18 : index
    %1109 = memref.load %arg11[%c18_247] : memref<32xf32, #tpu.memory_space<smem>>
    %1110 = vector.broadcast %1109 : f32 to vector<16x1xf32>
    %1111 = arith.mulf %1108, %1110 : vector<16x1xf32>
    %c18_248 = arith.constant 18 : index
    %1112 = memref.load %arg12[%c18_248] : memref<32xf32, #tpu.memory_space<smem>>
    %1113 = vector.broadcast %1112 : f32 to vector<16x1xf32>
    %1114 = arith.addf %1111, %1113 : vector<16x1xf32>
    %cst_249 = arith.constant 0.000000e+00 : f32
    %1115 = vector.broadcast %cst_249 : f32 to vector<16x1xf32>
    %1116 = arith.maximumf %1114, %1115 : vector<16x1xf32>
    %c0_250 = arith.constant 0 : index
    %c0_251 = arith.constant 0 : index
    %c18_252 = arith.constant 18 : index
    %1117 = vector.load %arg13[%c0_250, %c0_251, %c18_252] : memref<1x16x32xf32, #tpu.memory_space<vmem>>, vector<1x16x1xf32>
    %1118 = vector.shape_cast %1117 : vector<1x16x1xf32> to vector<16x1xf32>
    %1119 = vector.shape_cast %1116 : vector<16x1xf32> to vector<1x16x1xf32>
    tpu.vector_store %arg13[%c0_250, %c0_251, %c18_252], %1119 {strides = array<i32>} : memref<1x16x32xf32, #tpu.memory_space<vmem>>, vector<1x16x1xf32>,
    %c76 = arith.constant 76 : index
    %1120 = memref.load %arg10[%c76] : memref<128xf32, #tpu.memory_space<smem>>
    %1121 = vector.broadcast %1120 : f32 to vector<16x16xf32>
    %1122 = arith.mulf %30, %1121 : vector<16x16xf32>
    %c77 = arith.constant 77 : index
    %1123 = memref.load %arg10[%c77] : memref<128xf32, #tpu.memory_space<smem>>
    %1124 = vector.broadcast %1123 : f32 to vector<16x16xf32>
    %1125 = arith.mulf %32, %1124 : vector<16x16xf32>
    %1126 = arith.addf %1122, %1125 : vector<16x16xf32>
    %c78 = arith.constant 78 : index
    %1127 = memref.load %arg10[%c78] : memref<128xf32, #tpu.memory_space<smem>>
    %1128 = vector.broadcast %1127 : f32 to vector<16x16xf32>
    %1129 = arith.mulf %34, %1128 : vector<16x16xf32>
    %1130 = arith.addf %1126, %1129 : vector<16x16xf32>
    %c79 = arith.constant 79 : index
    %1131 = memref.load %arg10[%c79] : memref<128xf32, #tpu.memory_space<smem>>
    %1132 = vector.broadcast %1131 : f32 to vector<16x16xf32>
    %1133 = arith.mulf %36, %1132 : vector<16x16xf32>
    %1134 = arith.addf %1130, %1133 : vector<16x16xf32>
    %1135 = vector.extract_strided_slice %26 {offsets = [19, 0], sizes = [1, 16], strides = [1, 1]} : vector<32x16xf32> to vector<1x16xf32>
    %1136 = vector.broadcast %1135 : vector<1x16xf32> to vector<16x16xf32>
    %1137 = arith.mulf %5, %1136 : vector<16x16xf32>
    %1138 = vector.extract_strided_slice %28 {offsets = [0, 19], sizes = [16, 1], strides = [1, 1]} : vector<16x32xf32> to vector<16x1xf32>
    %1139 = vector.broadcast %1138 : vector<16x1xf32> to vector<16x16xf32>
    %1140 = arith.mulf %11, %1139 : vector<16x16xf32>
    %1141 = arith.addf %1137, %1140 : vector<16x16xf32>
    %1142 = arith.addf %1141, %1134 : vector<16x16xf32>
    %cst_253 = arith.constant 0.000000e+00 : f32
    %1143 = vector.broadcast %cst_253 : f32 to vector<16x16xf32>
    %1144 = arith.cmpf oge, %1142, %1143 : vector<16x16xf32>
    %cst_254 = arith.constant 2.000000e-01 : f32
    %1145 = vector.broadcast %cst_254 : f32 to vector<16x16xf32>
    %1146 = arith.mulf %1145, %1142 : vector<16x16xf32>
    %1147 = arith.select %1144, %1142, %1146 : vector<16x16xi1>, vector<16x16xf32>
    %1148 = arith.mulf %1147, %5 : vector<16x16xf32>
    %1149 = arith.addf %1148, %16 : vector<16x16xf32>
    %cst_255 = arith.constant dense<0xFF800000> : vector<16xf32>
    %1150 = vector.multi_reduction <maximumf>, %1149, %cst_255 [1] : vector<16x16xf32> to vector<16xf32>
    %1151 = vector.shape_cast %1150 : vector<16xf32> to vector<16x1xf32>
    %1152 = vector.broadcast %1151 : vector<16x1xf32> to vector<16x16xf32>
    %1153 = arith.subf %1149, %1152 : vector<16x16xf32>
    %1154 = math.exp %1153 : vector<16x16xf32>
    %cst_256 = arith.constant dense<0.000000e+00> : vector<16xf32>
    %1155 = vector.multi_reduction <add>, %1154, %cst_256 [1] : vector<16x16xf32> to vector<16xf32>
    %1156 = vector.shape_cast %1155 : vector<16xf32> to vector<16x1xf32>
    %1157 = vector.broadcast %1156 : vector<16x1xf32> to vector<16x16xf32>
    %1158 = arith.divf %1154, %1157 : vector<16x16xf32>
    %1159 = arith.mulf %1158, %5 : vector<16x16xf32>
    %1160 = vector.extract_strided_slice %20 {offsets = [19, 0], sizes = [1, 16], strides = [1, 1]} : vector<32x16xf32> to vector<1x16xf32>
    %1161 = vector.broadcast %1160 : vector<1x16xf32> to vector<16x16xf32>
    %1162 = arith.mulf %1161, %5 : vector<16x16xf32>
    %1163 = arith.mulf %1162, %1159 : vector<16x16xf32>
    %cst_257 = arith.constant dense<0.000000e+00> : vector<16xf32>
    %1164 = vector.multi_reduction <add>, %1163, %cst_257 [1] : vector<16x16xf32> to vector<16xf32>
    %1165 = vector.shape_cast %1164 : vector<16xf32> to vector<16x1xf32>
    %c19_258 = arith.constant 19 : index
    %1166 = memref.load %arg11[%c19_258] : memref<32xf32, #tpu.memory_space<smem>>
    %1167 = vector.broadcast %1166 : f32 to vector<16x1xf32>
    %1168 = arith.mulf %1165, %1167 : vector<16x1xf32>
    %c19_259 = arith.constant 19 : index
    %1169 = memref.load %arg12[%c19_259] : memref<32xf32, #tpu.memory_space<smem>>
    %1170 = vector.broadcast %1169 : f32 to vector<16x1xf32>
    %1171 = arith.addf %1168, %1170 : vector<16x1xf32>
    %cst_260 = arith.constant 0.000000e+00 : f32
    %1172 = vector.broadcast %cst_260 : f32 to vector<16x1xf32>
    %1173 = arith.maximumf %1171, %1172 : vector<16x1xf32>
    %c0_261 = arith.constant 0 : index
    %c0_262 = arith.constant 0 : index
    %c19_263 = arith.constant 19 : index
    %1174 = vector.load %arg13[%c0_261, %c0_262, %c19_263] : memref<1x16x32xf32, #tpu.memory_space<vmem>>, vector<1x16x1xf32>
    %1175 = vector.shape_cast %1174 : vector<1x16x1xf32> to vector<16x1xf32>
    %1176 = vector.shape_cast %1173 : vector<16x1xf32> to vector<1x16x1xf32>
    tpu.vector_store %arg13[%c0_261, %c0_262, %c19_263], %1176 {strides = array<i32>} : memref<1x16x32xf32, #tpu.memory_space<vmem>>, vector<1x16x1xf32>,
    %c80 = arith.constant 80 : index
    %1177 = memref.load %arg10[%c80] : memref<128xf32, #tpu.memory_space<smem>>
    %1178 = vector.broadcast %1177 : f32 to vector<16x16xf32>
    %1179 = arith.mulf %30, %1178 : vector<16x16xf32>
    %c81 = arith.constant 81 : index
    %1180 = memref.load %arg10[%c81] : memref<128xf32, #tpu.memory_space<smem>>
    %1181 = vector.broadcast %1180 : f32 to vector<16x16xf32>
    %1182 = arith.mulf %32, %1181 : vector<16x16xf32>
    %1183 = arith.addf %1179, %1182 : vector<16x16xf32>
    %c82 = arith.constant 82 : index
    %1184 = memref.load %arg10[%c82] : memref<128xf32, #tpu.memory_space<smem>>
    %1185 = vector.broadcast %1184 : f32 to vector<16x16xf32>
    %1186 = arith.mulf %34, %1185 : vector<16x16xf32>
    %1187 = arith.addf %1183, %1186 : vector<16x16xf32>
    %c83 = arith.constant 83 : index
    %1188 = memref.load %arg10[%c83] : memref<128xf32, #tpu.memory_space<smem>>
    %1189 = vector.broadcast %1188 : f32 to vector<16x16xf32>
    %1190 = arith.mulf %36, %1189 : vector<16x16xf32>
    %1191 = arith.addf %1187, %1190 : vector<16x16xf32>
    %1192 = vector.extract_strided_slice %26 {offsets = [20, 0], sizes = [1, 16], strides = [1, 1]} : vector<32x16xf32> to vector<1x16xf32>
    %1193 = vector.broadcast %1192 : vector<1x16xf32> to vector<16x16xf32>
    %1194 = arith.mulf %5, %1193 : vector<16x16xf32>
    %1195 = vector.extract_strided_slice %28 {offsets = [0, 20], sizes = [16, 1], strides = [1, 1]} : vector<16x32xf32> to vector<16x1xf32>
    %1196 = vector.broadcast %1195 : vector<16x1xf32> to vector<16x16xf32>
    %1197 = arith.mulf %11, %1196 : vector<16x16xf32>
    %1198 = arith.addf %1194, %1197 : vector<16x16xf32>
    %1199 = arith.addf %1198, %1191 : vector<16x16xf32>
    %cst_264 = arith.constant 0.000000e+00 : f32
    %1200 = vector.broadcast %cst_264 : f32 to vector<16x16xf32>
    %1201 = arith.cmpf oge, %1199, %1200 : vector<16x16xf32>
    %cst_265 = arith.constant 2.000000e-01 : f32
    %1202 = vector.broadcast %cst_265 : f32 to vector<16x16xf32>
    %1203 = arith.mulf %1202, %1199 : vector<16x16xf32>
    %1204 = arith.select %1201, %1199, %1203 : vector<16x16xi1>, vector<16x16xf32>
    %1205 = arith.mulf %1204, %5 : vector<16x16xf32>
    %1206 = arith.addf %1205, %16 : vector<16x16xf32>
    %cst_266 = arith.constant dense<0xFF800000> : vector<16xf32>
    %1207 = vector.multi_reduction <maximumf>, %1206, %cst_266 [1] : vector<16x16xf32> to vector<16xf32>
    %1208 = vector.shape_cast %1207 : vector<16xf32> to vector<16x1xf32>
    %1209 = vector.broadcast %1208 : vector<16x1xf32> to vector<16x16xf32>
    %1210 = arith.subf %1206, %1209 : vector<16x16xf32>
    %1211 = math.exp %1210 : vector<16x16xf32>
    %cst_267 = arith.constant dense<0.000000e+00> : vector<16xf32>
    %1212 = vector.multi_reduction <add>, %1211, %cst_267 [1] : vector<16x16xf32> to vector<16xf32>
    %1213 = vector.shape_cast %1212 : vector<16xf32> to vector<16x1xf32>
    %1214 = vector.broadcast %1213 : vector<16x1xf32> to vector<16x16xf32>
    %1215 = arith.divf %1211, %1214 : vector<16x16xf32>
    %1216 = arith.mulf %1215, %5 : vector<16x16xf32>
    %1217 = vector.extract_strided_slice %20 {offsets = [20, 0], sizes = [1, 16], strides = [1, 1]} : vector<32x16xf32> to vector<1x16xf32>
    %1218 = vector.broadcast %1217 : vector<1x16xf32> to vector<16x16xf32>
    %1219 = arith.mulf %1218, %5 : vector<16x16xf32>
    %1220 = arith.mulf %1219, %1216 : vector<16x16xf32>
    %cst_268 = arith.constant dense<0.000000e+00> : vector<16xf32>
    %1221 = vector.multi_reduction <add>, %1220, %cst_268 [1] : vector<16x16xf32> to vector<16xf32>
    %1222 = vector.shape_cast %1221 : vector<16xf32> to vector<16x1xf32>
    %c20_269 = arith.constant 20 : index
    %1223 = memref.load %arg11[%c20_269] : memref<32xf32, #tpu.memory_space<smem>>
    %1224 = vector.broadcast %1223 : f32 to vector<16x1xf32>
    %1225 = arith.mulf %1222, %1224 : vector<16x1xf32>
    %c20_270 = arith.constant 20 : index
    %1226 = memref.load %arg12[%c20_270] : memref<32xf32, #tpu.memory_space<smem>>
    %1227 = vector.broadcast %1226 : f32 to vector<16x1xf32>
    %1228 = arith.addf %1225, %1227 : vector<16x1xf32>
    %cst_271 = arith.constant 0.000000e+00 : f32
    %1229 = vector.broadcast %cst_271 : f32 to vector<16x1xf32>
    %1230 = arith.maximumf %1228, %1229 : vector<16x1xf32>
    %c0_272 = arith.constant 0 : index
    %c0_273 = arith.constant 0 : index
    %c20_274 = arith.constant 20 : index
    %1231 = vector.load %arg13[%c0_272, %c0_273, %c20_274] : memref<1x16x32xf32, #tpu.memory_space<vmem>>, vector<1x16x1xf32>
    %1232 = vector.shape_cast %1231 : vector<1x16x1xf32> to vector<16x1xf32>
    %1233 = vector.shape_cast %1230 : vector<16x1xf32> to vector<1x16x1xf32>
    tpu.vector_store %arg13[%c0_272, %c0_273, %c20_274], %1233 {strides = array<i32>} : memref<1x16x32xf32, #tpu.memory_space<vmem>>, vector<1x16x1xf32>,
    %c84 = arith.constant 84 : index
    %1234 = memref.load %arg10[%c84] : memref<128xf32, #tpu.memory_space<smem>>
    %1235 = vector.broadcast %1234 : f32 to vector<16x16xf32>
    %1236 = arith.mulf %30, %1235 : vector<16x16xf32>
    %c85 = arith.constant 85 : index
    %1237 = memref.load %arg10[%c85] : memref<128xf32, #tpu.memory_space<smem>>
    %1238 = vector.broadcast %1237 : f32 to vector<16x16xf32>
    %1239 = arith.mulf %32, %1238 : vector<16x16xf32>
    %1240 = arith.addf %1236, %1239 : vector<16x16xf32>
    %c86 = arith.constant 86 : index
    %1241 = memref.load %arg10[%c86] : memref<128xf32, #tpu.memory_space<smem>>
    %1242 = vector.broadcast %1241 : f32 to vector<16x16xf32>
    %1243 = arith.mulf %34, %1242 : vector<16x16xf32>
    %1244 = arith.addf %1240, %1243 : vector<16x16xf32>
    %c87 = arith.constant 87 : index
    %1245 = memref.load %arg10[%c87] : memref<128xf32, #tpu.memory_space<smem>>
    %1246 = vector.broadcast %1245 : f32 to vector<16x16xf32>
    %1247 = arith.mulf %36, %1246 : vector<16x16xf32>
    %1248 = arith.addf %1244, %1247 : vector<16x16xf32>
    %1249 = vector.extract_strided_slice %26 {offsets = [21, 0], sizes = [1, 16], strides = [1, 1]} : vector<32x16xf32> to vector<1x16xf32>
    %1250 = vector.broadcast %1249 : vector<1x16xf32> to vector<16x16xf32>
    %1251 = arith.mulf %5, %1250 : vector<16x16xf32>
    %1252 = vector.extract_strided_slice %28 {offsets = [0, 21], sizes = [16, 1], strides = [1, 1]} : vector<16x32xf32> to vector<16x1xf32>
    %1253 = vector.broadcast %1252 : vector<16x1xf32> to vector<16x16xf32>
    %1254 = arith.mulf %11, %1253 : vector<16x16xf32>
    %1255 = arith.addf %1251, %1254 : vector<16x16xf32>
    %1256 = arith.addf %1255, %1248 : vector<16x16xf32>
    %cst_275 = arith.constant 0.000000e+00 : f32
    %1257 = vector.broadcast %cst_275 : f32 to vector<16x16xf32>
    %1258 = arith.cmpf oge, %1256, %1257 : vector<16x16xf32>
    %cst_276 = arith.constant 2.000000e-01 : f32
    %1259 = vector.broadcast %cst_276 : f32 to vector<16x16xf32>
    %1260 = arith.mulf %1259, %1256 : vector<16x16xf32>
    %1261 = arith.select %1258, %1256, %1260 : vector<16x16xi1>, vector<16x16xf32>
    %1262 = arith.mulf %1261, %5 : vector<16x16xf32>
    %1263 = arith.addf %1262, %16 : vector<16x16xf32>
    %cst_277 = arith.constant dense<0xFF800000> : vector<16xf32>
    %1264 = vector.multi_reduction <maximumf>, %1263, %cst_277 [1] : vector<16x16xf32> to vector<16xf32>
    %1265 = vector.shape_cast %1264 : vector<16xf32> to vector<16x1xf32>
    %1266 = vector.broadcast %1265 : vector<16x1xf32> to vector<16x16xf32>
    %1267 = arith.subf %1263, %1266 : vector<16x16xf32>
    %1268 = math.exp %1267 : vector<16x16xf32>
    %cst_278 = arith.constant dense<0.000000e+00> : vector<16xf32>
    %1269 = vector.multi_reduction <add>, %1268, %cst_278 [1] : vector<16x16xf32> to vector<16xf32>
    %1270 = vector.shape_cast %1269 : vector<16xf32> to vector<16x1xf32>
    %1271 = vector.broadcast %1270 : vector<16x1xf32> to vector<16x16xf32>
    %1272 = arith.divf %1268, %1271 : vector<16x16xf32>
    %1273 = arith.mulf %1272, %5 : vector<16x16xf32>
    %1274 = vector.extract_strided_slice %20 {offsets = [21, 0], sizes = [1, 16], strides = [1, 1]} : vector<32x16xf32> to vector<1x16xf32>
    %1275 = vector.broadcast %1274 : vector<1x16xf32> to vector<16x16xf32>
    %1276 = arith.mulf %1275, %5 : vector<16x16xf32>
    %1277 = arith.mulf %1276, %1273 : vector<16x16xf32>
    %cst_279 = arith.constant dense<0.000000e+00> : vector<16xf32>
    %1278 = vector.multi_reduction <add>, %1277, %cst_279 [1] : vector<16x16xf32> to vector<16xf32>
    %1279 = vector.shape_cast %1278 : vector<16xf32> to vector<16x1xf32>
    %c21_280 = arith.constant 21 : index
    %1280 = memref.load %arg11[%c21_280] : memref<32xf32, #tpu.memory_space<smem>>
    %1281 = vector.broadcast %1280 : f32 to vector<16x1xf32>
    %1282 = arith.mulf %1279, %1281 : vector<16x1xf32>
    %c21_281 = arith.constant 21 : index
    %1283 = memref.load %arg12[%c21_281] : memref<32xf32, #tpu.memory_space<smem>>
    %1284 = vector.broadcast %1283 : f32 to vector<16x1xf32>
    %1285 = arith.addf %1282, %1284 : vector<16x1xf32>
    %cst_282 = arith.constant 0.000000e+00 : f32
    %1286 = vector.broadcast %cst_282 : f32 to vector<16x1xf32>
    %1287 = arith.maximumf %1285, %1286 : vector<16x1xf32>
    %c0_283 = arith.constant 0 : index
    %c0_284 = arith.constant 0 : index
    %c21_285 = arith.constant 21 : index
    %1288 = vector.load %arg13[%c0_283, %c0_284, %c21_285] : memref<1x16x32xf32, #tpu.memory_space<vmem>>, vector<1x16x1xf32>
    %1289 = vector.shape_cast %1288 : vector<1x16x1xf32> to vector<16x1xf32>
    %1290 = vector.shape_cast %1287 : vector<16x1xf32> to vector<1x16x1xf32>
    tpu.vector_store %arg13[%c0_283, %c0_284, %c21_285], %1290 {strides = array<i32>} : memref<1x16x32xf32, #tpu.memory_space<vmem>>, vector<1x16x1xf32>,
    %c88 = arith.constant 88 : index
    %1291 = memref.load %arg10[%c88] : memref<128xf32, #tpu.memory_space<smem>>
    %1292 = vector.broadcast %1291 : f32 to vector<16x16xf32>
    %1293 = arith.mulf %30, %1292 : vector<16x16xf32>
    %c89 = arith.constant 89 : index
    %1294 = memref.load %arg10[%c89] : memref<128xf32, #tpu.memory_space<smem>>
    %1295 = vector.broadcast %1294 : f32 to vector<16x16xf32>
    %1296 = arith.mulf %32, %1295 : vector<16x16xf32>
    %1297 = arith.addf %1293, %1296 : vector<16x16xf32>
    %c90 = arith.constant 90 : index
    %1298 = memref.load %arg10[%c90] : memref<128xf32, #tpu.memory_space<smem>>
    %1299 = vector.broadcast %1298 : f32 to vector<16x16xf32>
    %1300 = arith.mulf %34, %1299 : vector<16x16xf32>
    %1301 = arith.addf %1297, %1300 : vector<16x16xf32>
    %c91 = arith.constant 91 : index
    %1302 = memref.load %arg10[%c91] : memref<128xf32, #tpu.memory_space<smem>>
    %1303 = vector.broadcast %1302 : f32 to vector<16x16xf32>
    %1304 = arith.mulf %36, %1303 : vector<16x16xf32>
    %1305 = arith.addf %1301, %1304 : vector<16x16xf32>
    %1306 = vector.extract_strided_slice %26 {offsets = [22, 0], sizes = [1, 16], strides = [1, 1]} : vector<32x16xf32> to vector<1x16xf32>
    %1307 = vector.broadcast %1306 : vector<1x16xf32> to vector<16x16xf32>
    %1308 = arith.mulf %5, %1307 : vector<16x16xf32>
    %1309 = vector.extract_strided_slice %28 {offsets = [0, 22], sizes = [16, 1], strides = [1, 1]} : vector<16x32xf32> to vector<16x1xf32>
    %1310 = vector.broadcast %1309 : vector<16x1xf32> to vector<16x16xf32>
    %1311 = arith.mulf %11, %1310 : vector<16x16xf32>
    %1312 = arith.addf %1308, %1311 : vector<16x16xf32>
    %1313 = arith.addf %1312, %1305 : vector<16x16xf32>
    %cst_286 = arith.constant 0.000000e+00 : f32
    %1314 = vector.broadcast %cst_286 : f32 to vector<16x16xf32>
    %1315 = arith.cmpf oge, %1313, %1314 : vector<16x16xf32>
    %cst_287 = arith.constant 2.000000e-01 : f32
    %1316 = vector.broadcast %cst_287 : f32 to vector<16x16xf32>
    %1317 = arith.mulf %1316, %1313 : vector<16x16xf32>
    %1318 = arith.select %1315, %1313, %1317 : vector<16x16xi1>, vector<16x16xf32>
    %1319 = arith.mulf %1318, %5 : vector<16x16xf32>
    %1320 = arith.addf %1319, %16 : vector<16x16xf32>
    %cst_288 = arith.constant dense<0xFF800000> : vector<16xf32>
    %1321 = vector.multi_reduction <maximumf>, %1320, %cst_288 [1] : vector<16x16xf32> to vector<16xf32>
    %1322 = vector.shape_cast %1321 : vector<16xf32> to vector<16x1xf32>
    %1323 = vector.broadcast %1322 : vector<16x1xf32> to vector<16x16xf32>
    %1324 = arith.subf %1320, %1323 : vector<16x16xf32>
    %1325 = math.exp %1324 : vector<16x16xf32>
    %cst_289 = arith.constant dense<0.000000e+00> : vector<16xf32>
    %1326 = vector.multi_reduction <add>, %1325, %cst_289 [1] : vector<16x16xf32> to vector<16xf32>
    %1327 = vector.shape_cast %1326 : vector<16xf32> to vector<16x1xf32>
    %1328 = vector.broadcast %1327 : vector<16x1xf32> to vector<16x16xf32>
    %1329 = arith.divf %1325, %1328 : vector<16x16xf32>
    %1330 = arith.mulf %1329, %5 : vector<16x16xf32>
    %1331 = vector.extract_strided_slice %20 {offsets = [22, 0], sizes = [1, 16], strides = [1, 1]} : vector<32x16xf32> to vector<1x16xf32>
    %1332 = vector.broadcast %1331 : vector<1x16xf32> to vector<16x16xf32>
    %1333 = arith.mulf %1332, %5 : vector<16x16xf32>
    %1334 = arith.mulf %1333, %1330 : vector<16x16xf32>
    %cst_290 = arith.constant dense<0.000000e+00> : vector<16xf32>
    %1335 = vector.multi_reduction <add>, %1334, %cst_290 [1] : vector<16x16xf32> to vector<16xf32>
    %1336 = vector.shape_cast %1335 : vector<16xf32> to vector<16x1xf32>
    %c22_291 = arith.constant 22 : index
    %1337 = memref.load %arg11[%c22_291] : memref<32xf32, #tpu.memory_space<smem>>
    %1338 = vector.broadcast %1337 : f32 to vector<16x1xf32>
    %1339 = arith.mulf %1336, %1338 : vector<16x1xf32>
    %c22_292 = arith.constant 22 : index
    %1340 = memref.load %arg12[%c22_292] : memref<32xf32, #tpu.memory_space<smem>>
    %1341 = vector.broadcast %1340 : f32 to vector<16x1xf32>
    %1342 = arith.addf %1339, %1341 : vector<16x1xf32>
    %cst_293 = arith.constant 0.000000e+00 : f32
    %1343 = vector.broadcast %cst_293 : f32 to vector<16x1xf32>
    %1344 = arith.maximumf %1342, %1343 : vector<16x1xf32>
    %c0_294 = arith.constant 0 : index
    %c0_295 = arith.constant 0 : index
    %c22_296 = arith.constant 22 : index
    %1345 = vector.load %arg13[%c0_294, %c0_295, %c22_296] : memref<1x16x32xf32, #tpu.memory_space<vmem>>, vector<1x16x1xf32>
    %1346 = vector.shape_cast %1345 : vector<1x16x1xf32> to vector<16x1xf32>
    %1347 = vector.shape_cast %1344 : vector<16x1xf32> to vector<1x16x1xf32>
    tpu.vector_store %arg13[%c0_294, %c0_295, %c22_296], %1347 {strides = array<i32>} : memref<1x16x32xf32, #tpu.memory_space<vmem>>, vector<1x16x1xf32>,
    %c92 = arith.constant 92 : index
    %1348 = memref.load %arg10[%c92] : memref<128xf32, #tpu.memory_space<smem>>
    %1349 = vector.broadcast %1348 : f32 to vector<16x16xf32>
    %1350 = arith.mulf %30, %1349 : vector<16x16xf32>
    %c93 = arith.constant 93 : index
    %1351 = memref.load %arg10[%c93] : memref<128xf32, #tpu.memory_space<smem>>
    %1352 = vector.broadcast %1351 : f32 to vector<16x16xf32>
    %1353 = arith.mulf %32, %1352 : vector<16x16xf32>
    %1354 = arith.addf %1350, %1353 : vector<16x16xf32>
    %c94 = arith.constant 94 : index
    %1355 = memref.load %arg10[%c94] : memref<128xf32, #tpu.memory_space<smem>>
    %1356 = vector.broadcast %1355 : f32 to vector<16x16xf32>
    %1357 = arith.mulf %34, %1356 : vector<16x16xf32>
    %1358 = arith.addf %1354, %1357 : vector<16x16xf32>
    %c95 = arith.constant 95 : index
    %1359 = memref.load %arg10[%c95] : memref<128xf32, #tpu.memory_space<smem>>
    %1360 = vector.broadcast %1359 : f32 to vector<16x16xf32>
    %1361 = arith.mulf %36, %1360 : vector<16x16xf32>
    %1362 = arith.addf %1358, %1361 : vector<16x16xf32>
    %1363 = vector.extract_strided_slice %26 {offsets = [23, 0], sizes = [1, 16], strides = [1, 1]} : vector<32x16xf32> to vector<1x16xf32>
    %1364 = vector.broadcast %1363 : vector<1x16xf32> to vector<16x16xf32>
    %1365 = arith.mulf %5, %1364 : vector<16x16xf32>
    %1366 = vector.extract_strided_slice %28 {offsets = [0, 23], sizes = [16, 1], strides = [1, 1]} : vector<16x32xf32> to vector<16x1xf32>
    %1367 = vector.broadcast %1366 : vector<16x1xf32> to vector<16x16xf32>
    %1368 = arith.mulf %11, %1367 : vector<16x16xf32>
    %1369 = arith.addf %1365, %1368 : vector<16x16xf32>
    %1370 = arith.addf %1369, %1362 : vector<16x16xf32>
    %cst_297 = arith.constant 0.000000e+00 : f32
    %1371 = vector.broadcast %cst_297 : f32 to vector<16x16xf32>
    %1372 = arith.cmpf oge, %1370, %1371 : vector<16x16xf32>
    %cst_298 = arith.constant 2.000000e-01 : f32
    %1373 = vector.broadcast %cst_298 : f32 to vector<16x16xf32>
    %1374 = arith.mulf %1373, %1370 : vector<16x16xf32>
    %1375 = arith.select %1372, %1370, %1374 : vector<16x16xi1>, vector<16x16xf32>
    %1376 = arith.mulf %1375, %5 : vector<16x16xf32>
    %1377 = arith.addf %1376, %16 : vector<16x16xf32>
    %cst_299 = arith.constant dense<0xFF800000> : vector<16xf32>
    %1378 = vector.multi_reduction <maximumf>, %1377, %cst_299 [1] : vector<16x16xf32> to vector<16xf32>
    %1379 = vector.shape_cast %1378 : vector<16xf32> to vector<16x1xf32>
    %1380 = vector.broadcast %1379 : vector<16x1xf32> to vector<16x16xf32>
    %1381 = arith.subf %1377, %1380 : vector<16x16xf32>
    %1382 = math.exp %1381 : vector<16x16xf32>
    %cst_300 = arith.constant dense<0.000000e+00> : vector<16xf32>
    %1383 = vector.multi_reduction <add>, %1382, %cst_300 [1] : vector<16x16xf32> to vector<16xf32>
    %1384 = vector.shape_cast %1383 : vector<16xf32> to vector<16x1xf32>
    %1385 = vector.broadcast %1384 : vector<16x1xf32> to vector<16x16xf32>
    %1386 = arith.divf %1382, %1385 : vector<16x16xf32>
    %1387 = arith.mulf %1386, %5 : vector<16x16xf32>
    %1388 = vector.extract_strided_slice %20 {offsets = [23, 0], sizes = [1, 16], strides = [1, 1]} : vector<32x16xf32> to vector<1x16xf32>
    %1389 = vector.broadcast %1388 : vector<1x16xf32> to vector<16x16xf32>
    %1390 = arith.mulf %1389, %5 : vector<16x16xf32>
    %1391 = arith.mulf %1390, %1387 : vector<16x16xf32>
    %cst_301 = arith.constant dense<0.000000e+00> : vector<16xf32>
    %1392 = vector.multi_reduction <add>, %1391, %cst_301 [1] : vector<16x16xf32> to vector<16xf32>
    %1393 = vector.shape_cast %1392 : vector<16xf32> to vector<16x1xf32>
    %c23_302 = arith.constant 23 : index
    %1394 = memref.load %arg11[%c23_302] : memref<32xf32, #tpu.memory_space<smem>>
    %1395 = vector.broadcast %1394 : f32 to vector<16x1xf32>
    %1396 = arith.mulf %1393, %1395 : vector<16x1xf32>
    %c23_303 = arith.constant 23 : index
    %1397 = memref.load %arg12[%c23_303] : memref<32xf32, #tpu.memory_space<smem>>
    %1398 = vector.broadcast %1397 : f32 to vector<16x1xf32>
    %1399 = arith.addf %1396, %1398 : vector<16x1xf32>
    %cst_304 = arith.constant 0.000000e+00 : f32
    %1400 = vector.broadcast %cst_304 : f32 to vector<16x1xf32>
    %1401 = arith.maximumf %1399, %1400 : vector<16x1xf32>
    %c0_305 = arith.constant 0 : index
    %c0_306 = arith.constant 0 : index
    %c23_307 = arith.constant 23 : index
    %1402 = vector.load %arg13[%c0_305, %c0_306, %c23_307] : memref<1x16x32xf32, #tpu.memory_space<vmem>>, vector<1x16x1xf32>
    %1403 = vector.shape_cast %1402 : vector<1x16x1xf32> to vector<16x1xf32>
    %1404 = vector.shape_cast %1401 : vector<16x1xf32> to vector<1x16x1xf32>
    tpu.vector_store %arg13[%c0_305, %c0_306, %c23_307], %1404 {strides = array<i32>} : memref<1x16x32xf32, #tpu.memory_space<vmem>>, vector<1x16x1xf32>,
    %c96 = arith.constant 96 : index
    %1405 = memref.load %arg10[%c96] : memref<128xf32, #tpu.memory_space<smem>>
    %1406 = vector.broadcast %1405 : f32 to vector<16x16xf32>
    %1407 = arith.mulf %30, %1406 : vector<16x16xf32>
    %c97 = arith.constant 97 : index
    %1408 = memref.load %arg10[%c97] : memref<128xf32, #tpu.memory_space<smem>>
    %1409 = vector.broadcast %1408 : f32 to vector<16x16xf32>
    %1410 = arith.mulf %32, %1409 : vector<16x16xf32>
    %1411 = arith.addf %1407, %1410 : vector<16x16xf32>
    %c98 = arith.constant 98 : index
    %1412 = memref.load %arg10[%c98] : memref<128xf32, #tpu.memory_space<smem>>
    %1413 = vector.broadcast %1412 : f32 to vector<16x16xf32>
    %1414 = arith.mulf %34, %1413 : vector<16x16xf32>
    %1415 = arith.addf %1411, %1414 : vector<16x16xf32>
    %c99 = arith.constant 99 : index
    %1416 = memref.load %arg10[%c99] : memref<128xf32, #tpu.memory_space<smem>>
    %1417 = vector.broadcast %1416 : f32 to vector<16x16xf32>
    %1418 = arith.mulf %36, %1417 : vector<16x16xf32>
    %1419 = arith.addf %1415, %1418 : vector<16x16xf32>
    %1420 = vector.extract_strided_slice %26 {offsets = [24, 0], sizes = [1, 16], strides = [1, 1]} : vector<32x16xf32> to vector<1x16xf32>
    %1421 = vector.broadcast %1420 : vector<1x16xf32> to vector<16x16xf32>
    %1422 = arith.mulf %5, %1421 : vector<16x16xf32>
    %1423 = vector.extract_strided_slice %28 {offsets = [0, 24], sizes = [16, 1], strides = [1, 1]} : vector<16x32xf32> to vector<16x1xf32>
    %1424 = vector.broadcast %1423 : vector<16x1xf32> to vector<16x16xf32>
    %1425 = arith.mulf %11, %1424 : vector<16x16xf32>
    %1426 = arith.addf %1422, %1425 : vector<16x16xf32>
    %1427 = arith.addf %1426, %1419 : vector<16x16xf32>
    %cst_308 = arith.constant 0.000000e+00 : f32
    %1428 = vector.broadcast %cst_308 : f32 to vector<16x16xf32>
    %1429 = arith.cmpf oge, %1427, %1428 : vector<16x16xf32>
    %cst_309 = arith.constant 2.000000e-01 : f32
    %1430 = vector.broadcast %cst_309 : f32 to vector<16x16xf32>
    %1431 = arith.mulf %1430, %1427 : vector<16x16xf32>
    %1432 = arith.select %1429, %1427, %1431 : vector<16x16xi1>, vector<16x16xf32>
    %1433 = arith.mulf %1432, %5 : vector<16x16xf32>
    %1434 = arith.addf %1433, %16 : vector<16x16xf32>
    %cst_310 = arith.constant dense<0xFF800000> : vector<16xf32>
    %1435 = vector.multi_reduction <maximumf>, %1434, %cst_310 [1] : vector<16x16xf32> to vector<16xf32>
    %1436 = vector.shape_cast %1435 : vector<16xf32> to vector<16x1xf32>
    %1437 = vector.broadcast %1436 : vector<16x1xf32> to vector<16x16xf32>
    %1438 = arith.subf %1434, %1437 : vector<16x16xf32>
    %1439 = math.exp %1438 : vector<16x16xf32>
    %cst_311 = arith.constant dense<0.000000e+00> : vector<16xf32>
    %1440 = vector.multi_reduction <add>, %1439, %cst_311 [1] : vector<16x16xf32> to vector<16xf32>
    %1441 = vector.shape_cast %1440 : vector<16xf32> to vector<16x1xf32>
    %1442 = vector.broadcast %1441 : vector<16x1xf32> to vector<16x16xf32>
    %1443 = arith.divf %1439, %1442 : vector<16x16xf32>
    %1444 = arith.mulf %1443, %5 : vector<16x16xf32>
    %1445 = vector.extract_strided_slice %20 {offsets = [24, 0], sizes = [1, 16], strides = [1, 1]} : vector<32x16xf32> to vector<1x16xf32>
    %1446 = vector.broadcast %1445 : vector<1x16xf32> to vector<16x16xf32>
    %1447 = arith.mulf %1446, %5 : vector<16x16xf32>
    %1448 = arith.mulf %1447, %1444 : vector<16x16xf32>
    %cst_312 = arith.constant dense<0.000000e+00> : vector<16xf32>
    %1449 = vector.multi_reduction <add>, %1448, %cst_312 [1] : vector<16x16xf32> to vector<16xf32>
    %1450 = vector.shape_cast %1449 : vector<16xf32> to vector<16x1xf32>
    %c24_313 = arith.constant 24 : index
    %1451 = memref.load %arg11[%c24_313] : memref<32xf32, #tpu.memory_space<smem>>
    %1452 = vector.broadcast %1451 : f32 to vector<16x1xf32>
    %1453 = arith.mulf %1450, %1452 : vector<16x1xf32>
    %c24_314 = arith.constant 24 : index
    %1454 = memref.load %arg12[%c24_314] : memref<32xf32, #tpu.memory_space<smem>>
    %1455 = vector.broadcast %1454 : f32 to vector<16x1xf32>
    %1456 = arith.addf %1453, %1455 : vector<16x1xf32>
    %cst_315 = arith.constant 0.000000e+00 : f32
    %1457 = vector.broadcast %cst_315 : f32 to vector<16x1xf32>
    %1458 = arith.maximumf %1456, %1457 : vector<16x1xf32>
    %c0_316 = arith.constant 0 : index
    %c0_317 = arith.constant 0 : index
    %c24_318 = arith.constant 24 : index
    %1459 = vector.load %arg13[%c0_316, %c0_317, %c24_318] : memref<1x16x32xf32, #tpu.memory_space<vmem>>, vector<1x16x1xf32>
    %1460 = vector.shape_cast %1459 : vector<1x16x1xf32> to vector<16x1xf32>
    %1461 = vector.shape_cast %1458 : vector<16x1xf32> to vector<1x16x1xf32>
    tpu.vector_store %arg13[%c0_316, %c0_317, %c24_318], %1461 {strides = array<i32>} : memref<1x16x32xf32, #tpu.memory_space<vmem>>, vector<1x16x1xf32>,
    %c100 = arith.constant 100 : index
    %1462 = memref.load %arg10[%c100] : memref<128xf32, #tpu.memory_space<smem>>
    %1463 = vector.broadcast %1462 : f32 to vector<16x16xf32>
    %1464 = arith.mulf %30, %1463 : vector<16x16xf32>
    %c101 = arith.constant 101 : index
    %1465 = memref.load %arg10[%c101] : memref<128xf32, #tpu.memory_space<smem>>
    %1466 = vector.broadcast %1465 : f32 to vector<16x16xf32>
    %1467 = arith.mulf %32, %1466 : vector<16x16xf32>
    %1468 = arith.addf %1464, %1467 : vector<16x16xf32>
    %c102 = arith.constant 102 : index
    %1469 = memref.load %arg10[%c102] : memref<128xf32, #tpu.memory_space<smem>>
    %1470 = vector.broadcast %1469 : f32 to vector<16x16xf32>
    %1471 = arith.mulf %34, %1470 : vector<16x16xf32>
    %1472 = arith.addf %1468, %1471 : vector<16x16xf32>
    %c103 = arith.constant 103 : index
    %1473 = memref.load %arg10[%c103] : memref<128xf32, #tpu.memory_space<smem>>
    %1474 = vector.broadcast %1473 : f32 to vector<16x16xf32>
    %1475 = arith.mulf %36, %1474 : vector<16x16xf32>
    %1476 = arith.addf %1472, %1475 : vector<16x16xf32>
    %1477 = vector.extract_strided_slice %26 {offsets = [25, 0], sizes = [1, 16], strides = [1, 1]} : vector<32x16xf32> to vector<1x16xf32>
    %1478 = vector.broadcast %1477 : vector<1x16xf32> to vector<16x16xf32>
    %1479 = arith.mulf %5, %1478 : vector<16x16xf32>
    %1480 = vector.extract_strided_slice %28 {offsets = [0, 25], sizes = [16, 1], strides = [1, 1]} : vector<16x32xf32> to vector<16x1xf32>
    %1481 = vector.broadcast %1480 : vector<16x1xf32> to vector<16x16xf32>
    %1482 = arith.mulf %11, %1481 : vector<16x16xf32>
    %1483 = arith.addf %1479, %1482 : vector<16x16xf32>
    %1484 = arith.addf %1483, %1476 : vector<16x16xf32>
    %cst_319 = arith.constant 0.000000e+00 : f32
    %1485 = vector.broadcast %cst_319 : f32 to vector<16x16xf32>
    %1486 = arith.cmpf oge, %1484, %1485 : vector<16x16xf32>
    %cst_320 = arith.constant 2.000000e-01 : f32
    %1487 = vector.broadcast %cst_320 : f32 to vector<16x16xf32>
    %1488 = arith.mulf %1487, %1484 : vector<16x16xf32>
    %1489 = arith.select %1486, %1484, %1488 : vector<16x16xi1>, vector<16x16xf32>
    %1490 = arith.mulf %1489, %5 : vector<16x16xf32>
    %1491 = arith.addf %1490, %16 : vector<16x16xf32>
    %cst_321 = arith.constant dense<0xFF800000> : vector<16xf32>
    %1492 = vector.multi_reduction <maximumf>, %1491, %cst_321 [1] : vector<16x16xf32> to vector<16xf32>
    %1493 = vector.shape_cast %1492 : vector<16xf32> to vector<16x1xf32>
    %1494 = vector.broadcast %1493 : vector<16x1xf32> to vector<16x16xf32>
    %1495 = arith.subf %1491, %1494 : vector<16x16xf32>
    %1496 = math.exp %1495 : vector<16x16xf32>
    %cst_322 = arith.constant dense<0.000000e+00> : vector<16xf32>
    %1497 = vector.multi_reduction <add>, %1496, %cst_322 [1] : vector<16x16xf32> to vector<16xf32>
    %1498 = vector.shape_cast %1497 : vector<16xf32> to vector<16x1xf32>
    %1499 = vector.broadcast %1498 : vector<16x1xf32> to vector<16x16xf32>
    %1500 = arith.divf %1496, %1499 : vector<16x16xf32>
    %1501 = arith.mulf %1500, %5 : vector<16x16xf32>
    %1502 = vector.extract_strided_slice %20 {offsets = [25, 0], sizes = [1, 16], strides = [1, 1]} : vector<32x16xf32> to vector<1x16xf32>
    %1503 = vector.broadcast %1502 : vector<1x16xf32> to vector<16x16xf32>
    %1504 = arith.mulf %1503, %5 : vector<16x16xf32>
    %1505 = arith.mulf %1504, %1501 : vector<16x16xf32>
    %cst_323 = arith.constant dense<0.000000e+00> : vector<16xf32>
    %1506 = vector.multi_reduction <add>, %1505, %cst_323 [1] : vector<16x16xf32> to vector<16xf32>
    %1507 = vector.shape_cast %1506 : vector<16xf32> to vector<16x1xf32>
    %c25_324 = arith.constant 25 : index
    %1508 = memref.load %arg11[%c25_324] : memref<32xf32, #tpu.memory_space<smem>>
    %1509 = vector.broadcast %1508 : f32 to vector<16x1xf32>
    %1510 = arith.mulf %1507, %1509 : vector<16x1xf32>
    %c25_325 = arith.constant 25 : index
    %1511 = memref.load %arg12[%c25_325] : memref<32xf32, #tpu.memory_space<smem>>
    %1512 = vector.broadcast %1511 : f32 to vector<16x1xf32>
    %1513 = arith.addf %1510, %1512 : vector<16x1xf32>
    %cst_326 = arith.constant 0.000000e+00 : f32
    %1514 = vector.broadcast %cst_326 : f32 to vector<16x1xf32>
    %1515 = arith.maximumf %1513, %1514 : vector<16x1xf32>
    %c0_327 = arith.constant 0 : index
    %c0_328 = arith.constant 0 : index
    %c25_329 = arith.constant 25 : index
    %1516 = vector.load %arg13[%c0_327, %c0_328, %c25_329] : memref<1x16x32xf32, #tpu.memory_space<vmem>>, vector<1x16x1xf32>
    %1517 = vector.shape_cast %1516 : vector<1x16x1xf32> to vector<16x1xf32>
    %1518 = vector.shape_cast %1515 : vector<16x1xf32> to vector<1x16x1xf32>
    tpu.vector_store %arg13[%c0_327, %c0_328, %c25_329], %1518 {strides = array<i32>} : memref<1x16x32xf32, #tpu.memory_space<vmem>>, vector<1x16x1xf32>,
    %c104 = arith.constant 104 : index
    %1519 = memref.load %arg10[%c104] : memref<128xf32, #tpu.memory_space<smem>>
    %1520 = vector.broadcast %1519 : f32 to vector<16x16xf32>
    %1521 = arith.mulf %30, %1520 : vector<16x16xf32>
    %c105 = arith.constant 105 : index
    %1522 = memref.load %arg10[%c105] : memref<128xf32, #tpu.memory_space<smem>>
    %1523 = vector.broadcast %1522 : f32 to vector<16x16xf32>
    %1524 = arith.mulf %32, %1523 : vector<16x16xf32>
    %1525 = arith.addf %1521, %1524 : vector<16x16xf32>
    %c106 = arith.constant 106 : index
    %1526 = memref.load %arg10[%c106] : memref<128xf32, #tpu.memory_space<smem>>
    %1527 = vector.broadcast %1526 : f32 to vector<16x16xf32>
    %1528 = arith.mulf %34, %1527 : vector<16x16xf32>
    %1529 = arith.addf %1525, %1528 : vector<16x16xf32>
    %c107 = arith.constant 107 : index
    %1530 = memref.load %arg10[%c107] : memref<128xf32, #tpu.memory_space<smem>>
    %1531 = vector.broadcast %1530 : f32 to vector<16x16xf32>
    %1532 = arith.mulf %36, %1531 : vector<16x16xf32>
    %1533 = arith.addf %1529, %1532 : vector<16x16xf32>
    %1534 = vector.extract_strided_slice %26 {offsets = [26, 0], sizes = [1, 16], strides = [1, 1]} : vector<32x16xf32> to vector<1x16xf32>
    %1535 = vector.broadcast %1534 : vector<1x16xf32> to vector<16x16xf32>
    %1536 = arith.mulf %5, %1535 : vector<16x16xf32>
    %1537 = vector.extract_strided_slice %28 {offsets = [0, 26], sizes = [16, 1], strides = [1, 1]} : vector<16x32xf32> to vector<16x1xf32>
    %1538 = vector.broadcast %1537 : vector<16x1xf32> to vector<16x16xf32>
    %1539 = arith.mulf %11, %1538 : vector<16x16xf32>
    %1540 = arith.addf %1536, %1539 : vector<16x16xf32>
    %1541 = arith.addf %1540, %1533 : vector<16x16xf32>
    %cst_330 = arith.constant 0.000000e+00 : f32
    %1542 = vector.broadcast %cst_330 : f32 to vector<16x16xf32>
    %1543 = arith.cmpf oge, %1541, %1542 : vector<16x16xf32>
    %cst_331 = arith.constant 2.000000e-01 : f32
    %1544 = vector.broadcast %cst_331 : f32 to vector<16x16xf32>
    %1545 = arith.mulf %1544, %1541 : vector<16x16xf32>
    %1546 = arith.select %1543, %1541, %1545 : vector<16x16xi1>, vector<16x16xf32>
    %1547 = arith.mulf %1546, %5 : vector<16x16xf32>
    %1548 = arith.addf %1547, %16 : vector<16x16xf32>
    %cst_332 = arith.constant dense<0xFF800000> : vector<16xf32>
    %1549 = vector.multi_reduction <maximumf>, %1548, %cst_332 [1] : vector<16x16xf32> to vector<16xf32>
    %1550 = vector.shape_cast %1549 : vector<16xf32> to vector<16x1xf32>
    %1551 = vector.broadcast %1550 : vector<16x1xf32> to vector<16x16xf32>
    %1552 = arith.subf %1548, %1551 : vector<16x16xf32>
    %1553 = math.exp %1552 : vector<16x16xf32>
    %cst_333 = arith.constant dense<0.000000e+00> : vector<16xf32>
    %1554 = vector.multi_reduction <add>, %1553, %cst_333 [1] : vector<16x16xf32> to vector<16xf32>
    %1555 = vector.shape_cast %1554 : vector<16xf32> to vector<16x1xf32>
    %1556 = vector.broadcast %1555 : vector<16x1xf32> to vector<16x16xf32>
    %1557 = arith.divf %1553, %1556 : vector<16x16xf32>
    %1558 = arith.mulf %1557, %5 : vector<16x16xf32>
    %1559 = vector.extract_strided_slice %20 {offsets = [26, 0], sizes = [1, 16], strides = [1, 1]} : vector<32x16xf32> to vector<1x16xf32>
    %1560 = vector.broadcast %1559 : vector<1x16xf32> to vector<16x16xf32>
    %1561 = arith.mulf %1560, %5 : vector<16x16xf32>
    %1562 = arith.mulf %1561, %1558 : vector<16x16xf32>
    %cst_334 = arith.constant dense<0.000000e+00> : vector<16xf32>
    %1563 = vector.multi_reduction <add>, %1562, %cst_334 [1] : vector<16x16xf32> to vector<16xf32>
    %1564 = vector.shape_cast %1563 : vector<16xf32> to vector<16x1xf32>
    %c26_335 = arith.constant 26 : index
    %1565 = memref.load %arg11[%c26_335] : memref<32xf32, #tpu.memory_space<smem>>
    %1566 = vector.broadcast %1565 : f32 to vector<16x1xf32>
    %1567 = arith.mulf %1564, %1566 : vector<16x1xf32>
    %c26_336 = arith.constant 26 : index
    %1568 = memref.load %arg12[%c26_336] : memref<32xf32, #tpu.memory_space<smem>>
    %1569 = vector.broadcast %1568 : f32 to vector<16x1xf32>
    %1570 = arith.addf %1567, %1569 : vector<16x1xf32>
    %cst_337 = arith.constant 0.000000e+00 : f32
    %1571 = vector.broadcast %cst_337 : f32 to vector<16x1xf32>
    %1572 = arith.maximumf %1570, %1571 : vector<16x1xf32>
    %c0_338 = arith.constant 0 : index
    %c0_339 = arith.constant 0 : index
    %c26_340 = arith.constant 26 : index
    %1573 = vector.load %arg13[%c0_338, %c0_339, %c26_340] : memref<1x16x32xf32, #tpu.memory_space<vmem>>, vector<1x16x1xf32>
    %1574 = vector.shape_cast %1573 : vector<1x16x1xf32> to vector<16x1xf32>
    %1575 = vector.shape_cast %1572 : vector<16x1xf32> to vector<1x16x1xf32>
    tpu.vector_store %arg13[%c0_338, %c0_339, %c26_340], %1575 {strides = array<i32>} : memref<1x16x32xf32, #tpu.memory_space<vmem>>, vector<1x16x1xf32>,
    %c108 = arith.constant 108 : index
    %1576 = memref.load %arg10[%c108] : memref<128xf32, #tpu.memory_space<smem>>
    %1577 = vector.broadcast %1576 : f32 to vector<16x16xf32>
    %1578 = arith.mulf %30, %1577 : vector<16x16xf32>
    %c109 = arith.constant 109 : index
    %1579 = memref.load %arg10[%c109] : memref<128xf32, #tpu.memory_space<smem>>
    %1580 = vector.broadcast %1579 : f32 to vector<16x16xf32>
    %1581 = arith.mulf %32, %1580 : vector<16x16xf32>
    %1582 = arith.addf %1578, %1581 : vector<16x16xf32>
    %c110 = arith.constant 110 : index
    %1583 = memref.load %arg10[%c110] : memref<128xf32, #tpu.memory_space<smem>>
    %1584 = vector.broadcast %1583 : f32 to vector<16x16xf32>
    %1585 = arith.mulf %34, %1584 : vector<16x16xf32>
    %1586 = arith.addf %1582, %1585 : vector<16x16xf32>
    %c111 = arith.constant 111 : index
    %1587 = memref.load %arg10[%c111] : memref<128xf32, #tpu.memory_space<smem>>
    %1588 = vector.broadcast %1587 : f32 to vector<16x16xf32>
    %1589 = arith.mulf %36, %1588 : vector<16x16xf32>
    %1590 = arith.addf %1586, %1589 : vector<16x16xf32>
    %1591 = vector.extract_strided_slice %26 {offsets = [27, 0], sizes = [1, 16], strides = [1, 1]} : vector<32x16xf32> to vector<1x16xf32>
    %1592 = vector.broadcast %1591 : vector<1x16xf32> to vector<16x16xf32>
    %1593 = arith.mulf %5, %1592 : vector<16x16xf32>
    %1594 = vector.extract_strided_slice %28 {offsets = [0, 27], sizes = [16, 1], strides = [1, 1]} : vector<16x32xf32> to vector<16x1xf32>
    %1595 = vector.broadcast %1594 : vector<16x1xf32> to vector<16x16xf32>
    %1596 = arith.mulf %11, %1595 : vector<16x16xf32>
    %1597 = arith.addf %1593, %1596 : vector<16x16xf32>
    %1598 = arith.addf %1597, %1590 : vector<16x16xf32>
    %cst_341 = arith.constant 0.000000e+00 : f32
    %1599 = vector.broadcast %cst_341 : f32 to vector<16x16xf32>
    %1600 = arith.cmpf oge, %1598, %1599 : vector<16x16xf32>
    %cst_342 = arith.constant 2.000000e-01 : f32
    %1601 = vector.broadcast %cst_342 : f32 to vector<16x16xf32>
    %1602 = arith.mulf %1601, %1598 : vector<16x16xf32>
    %1603 = arith.select %1600, %1598, %1602 : vector<16x16xi1>, vector<16x16xf32>
    %1604 = arith.mulf %1603, %5 : vector<16x16xf32>
    %1605 = arith.addf %1604, %16 : vector<16x16xf32>
    %cst_343 = arith.constant dense<0xFF800000> : vector<16xf32>
    %1606 = vector.multi_reduction <maximumf>, %1605, %cst_343 [1] : vector<16x16xf32> to vector<16xf32>
    %1607 = vector.shape_cast %1606 : vector<16xf32> to vector<16x1xf32>
    %1608 = vector.broadcast %1607 : vector<16x1xf32> to vector<16x16xf32>
    %1609 = arith.subf %1605, %1608 : vector<16x16xf32>
    %1610 = math.exp %1609 : vector<16x16xf32>
    %cst_344 = arith.constant dense<0.000000e+00> : vector<16xf32>
    %1611 = vector.multi_reduction <add>, %1610, %cst_344 [1] : vector<16x16xf32> to vector<16xf32>
    %1612 = vector.shape_cast %1611 : vector<16xf32> to vector<16x1xf32>
    %1613 = vector.broadcast %1612 : vector<16x1xf32> to vector<16x16xf32>
    %1614 = arith.divf %1610, %1613 : vector<16x16xf32>
    %1615 = arith.mulf %1614, %5 : vector<16x16xf32>
    %1616 = vector.extract_strided_slice %20 {offsets = [27, 0], sizes = [1, 16], strides = [1, 1]} : vector<32x16xf32> to vector<1x16xf32>
    %1617 = vector.broadcast %1616 : vector<1x16xf32> to vector<16x16xf32>
    %1618 = arith.mulf %1617, %5 : vector<16x16xf32>
    %1619 = arith.mulf %1618, %1615 : vector<16x16xf32>
    %cst_345 = arith.constant dense<0.000000e+00> : vector<16xf32>
    %1620 = vector.multi_reduction <add>, %1619, %cst_345 [1] : vector<16x16xf32> to vector<16xf32>
    %1621 = vector.shape_cast %1620 : vector<16xf32> to vector<16x1xf32>
    %c27_346 = arith.constant 27 : index
    %1622 = memref.load %arg11[%c27_346] : memref<32xf32, #tpu.memory_space<smem>>
    %1623 = vector.broadcast %1622 : f32 to vector<16x1xf32>
    %1624 = arith.mulf %1621, %1623 : vector<16x1xf32>
    %c27_347 = arith.constant 27 : index
    %1625 = memref.load %arg12[%c27_347] : memref<32xf32, #tpu.memory_space<smem>>
    %1626 = vector.broadcast %1625 : f32 to vector<16x1xf32>
    %1627 = arith.addf %1624, %1626 : vector<16x1xf32>
    %cst_348 = arith.constant 0.000000e+00 : f32
    %1628 = vector.broadcast %cst_348 : f32 to vector<16x1xf32>
    %1629 = arith.maximumf %1627, %1628 : vector<16x1xf32>
    %c0_349 = arith.constant 0 : index
    %c0_350 = arith.constant 0 : index
    %c27_351 = arith.constant 27 : index
    %1630 = vector.load %arg13[%c0_349, %c0_350, %c27_351] : memref<1x16x32xf32, #tpu.memory_space<vmem>>, vector<1x16x1xf32>
    %1631 = vector.shape_cast %1630 : vector<1x16x1xf32> to vector<16x1xf32>
    %1632 = vector.shape_cast %1629 : vector<16x1xf32> to vector<1x16x1xf32>
    tpu.vector_store %arg13[%c0_349, %c0_350, %c27_351], %1632 {strides = array<i32>} : memref<1x16x32xf32, #tpu.memory_space<vmem>>, vector<1x16x1xf32>,
    %c112 = arith.constant 112 : index
    %1633 = memref.load %arg10[%c112] : memref<128xf32, #tpu.memory_space<smem>>
    %1634 = vector.broadcast %1633 : f32 to vector<16x16xf32>
    %1635 = arith.mulf %30, %1634 : vector<16x16xf32>
    %c113 = arith.constant 113 : index
    %1636 = memref.load %arg10[%c113] : memref<128xf32, #tpu.memory_space<smem>>
    %1637 = vector.broadcast %1636 : f32 to vector<16x16xf32>
    %1638 = arith.mulf %32, %1637 : vector<16x16xf32>
    %1639 = arith.addf %1635, %1638 : vector<16x16xf32>
    %c114 = arith.constant 114 : index
    %1640 = memref.load %arg10[%c114] : memref<128xf32, #tpu.memory_space<smem>>
    %1641 = vector.broadcast %1640 : f32 to vector<16x16xf32>
    %1642 = arith.mulf %34, %1641 : vector<16x16xf32>
    %1643 = arith.addf %1639, %1642 : vector<16x16xf32>
    %c115 = arith.constant 115 : index
    %1644 = memref.load %arg10[%c115] : memref<128xf32, #tpu.memory_space<smem>>
    %1645 = vector.broadcast %1644 : f32 to vector<16x16xf32>
    %1646 = arith.mulf %36, %1645 : vector<16x16xf32>
    %1647 = arith.addf %1643, %1646 : vector<16x16xf32>
    %1648 = vector.extract_strided_slice %26 {offsets = [28, 0], sizes = [1, 16], strides = [1, 1]} : vector<32x16xf32> to vector<1x16xf32>
    %1649 = vector.broadcast %1648 : vector<1x16xf32> to vector<16x16xf32>
    %1650 = arith.mulf %5, %1649 : vector<16x16xf32>
    %1651 = vector.extract_strided_slice %28 {offsets = [0, 28], sizes = [16, 1], strides = [1, 1]} : vector<16x32xf32> to vector<16x1xf32>
    %1652 = vector.broadcast %1651 : vector<16x1xf32> to vector<16x16xf32>
    %1653 = arith.mulf %11, %1652 : vector<16x16xf32>
    %1654 = arith.addf %1650, %1653 : vector<16x16xf32>
    %1655 = arith.addf %1654, %1647 : vector<16x16xf32>
    %cst_352 = arith.constant 0.000000e+00 : f32
    %1656 = vector.broadcast %cst_352 : f32 to vector<16x16xf32>
    %1657 = arith.cmpf oge, %1655, %1656 : vector<16x16xf32>
    %cst_353 = arith.constant 2.000000e-01 : f32
    %1658 = vector.broadcast %cst_353 : f32 to vector<16x16xf32>
    %1659 = arith.mulf %1658, %1655 : vector<16x16xf32>
    %1660 = arith.select %1657, %1655, %1659 : vector<16x16xi1>, vector<16x16xf32>
    %1661 = arith.mulf %1660, %5 : vector<16x16xf32>
    %1662 = arith.addf %1661, %16 : vector<16x16xf32>
    %cst_354 = arith.constant dense<0xFF800000> : vector<16xf32>
    %1663 = vector.multi_reduction <maximumf>, %1662, %cst_354 [1] : vector<16x16xf32> to vector<16xf32>
    %1664 = vector.shape_cast %1663 : vector<16xf32> to vector<16x1xf32>
    %1665 = vector.broadcast %1664 : vector<16x1xf32> to vector<16x16xf32>
    %1666 = arith.subf %1662, %1665 : vector<16x16xf32>
    %1667 = math.exp %1666 : vector<16x16xf32>
    %cst_355 = arith.constant dense<0.000000e+00> : vector<16xf32>
    %1668 = vector.multi_reduction <add>, %1667, %cst_355 [1] : vector<16x16xf32> to vector<16xf32>
    %1669 = vector.shape_cast %1668 : vector<16xf32> to vector<16x1xf32>
    %1670 = vector.broadcast %1669 : vector<16x1xf32> to vector<16x16xf32>
    %1671 = arith.divf %1667, %1670 : vector<16x16xf32>
    %1672 = arith.mulf %1671, %5 : vector<16x16xf32>
    %1673 = vector.extract_strided_slice %20 {offsets = [28, 0], sizes = [1, 16], strides = [1, 1]} : vector<32x16xf32> to vector<1x16xf32>
    %1674 = vector.broadcast %1673 : vector<1x16xf32> to vector<16x16xf32>
    %1675 = arith.mulf %1674, %5 : vector<16x16xf32>
    %1676 = arith.mulf %1675, %1672 : vector<16x16xf32>
    %cst_356 = arith.constant dense<0.000000e+00> : vector<16xf32>
    %1677 = vector.multi_reduction <add>, %1676, %cst_356 [1] : vector<16x16xf32> to vector<16xf32>
    %1678 = vector.shape_cast %1677 : vector<16xf32> to vector<16x1xf32>
    %c28_357 = arith.constant 28 : index
    %1679 = memref.load %arg11[%c28_357] : memref<32xf32, #tpu.memory_space<smem>>
    %1680 = vector.broadcast %1679 : f32 to vector<16x1xf32>
    %1681 = arith.mulf %1678, %1680 : vector<16x1xf32>
    %c28_358 = arith.constant 28 : index
    %1682 = memref.load %arg12[%c28_358] : memref<32xf32, #tpu.memory_space<smem>>
    %1683 = vector.broadcast %1682 : f32 to vector<16x1xf32>
    %1684 = arith.addf %1681, %1683 : vector<16x1xf32>
    %cst_359 = arith.constant 0.000000e+00 : f32
    %1685 = vector.broadcast %cst_359 : f32 to vector<16x1xf32>
    %1686 = arith.maximumf %1684, %1685 : vector<16x1xf32>
    %c0_360 = arith.constant 0 : index
    %c0_361 = arith.constant 0 : index
    %c28_362 = arith.constant 28 : index
    %1687 = vector.load %arg13[%c0_360, %c0_361, %c28_362] : memref<1x16x32xf32, #tpu.memory_space<vmem>>, vector<1x16x1xf32>
    %1688 = vector.shape_cast %1687 : vector<1x16x1xf32> to vector<16x1xf32>
    %1689 = vector.shape_cast %1686 : vector<16x1xf32> to vector<1x16x1xf32>
    tpu.vector_store %arg13[%c0_360, %c0_361, %c28_362], %1689 {strides = array<i32>} : memref<1x16x32xf32, #tpu.memory_space<vmem>>, vector<1x16x1xf32>,
    %c116 = arith.constant 116 : index
    %1690 = memref.load %arg10[%c116] : memref<128xf32, #tpu.memory_space<smem>>
    %1691 = vector.broadcast %1690 : f32 to vector<16x16xf32>
    %1692 = arith.mulf %30, %1691 : vector<16x16xf32>
    %c117 = arith.constant 117 : index
    %1693 = memref.load %arg10[%c117] : memref<128xf32, #tpu.memory_space<smem>>
    %1694 = vector.broadcast %1693 : f32 to vector<16x16xf32>
    %1695 = arith.mulf %32, %1694 : vector<16x16xf32>
    %1696 = arith.addf %1692, %1695 : vector<16x16xf32>
    %c118 = arith.constant 118 : index
    %1697 = memref.load %arg10[%c118] : memref<128xf32, #tpu.memory_space<smem>>
    %1698 = vector.broadcast %1697 : f32 to vector<16x16xf32>
    %1699 = arith.mulf %34, %1698 : vector<16x16xf32>
    %1700 = arith.addf %1696, %1699 : vector<16x16xf32>
    %c119 = arith.constant 119 : index
    %1701 = memref.load %arg10[%c119] : memref<128xf32, #tpu.memory_space<smem>>
    %1702 = vector.broadcast %1701 : f32 to vector<16x16xf32>
    %1703 = arith.mulf %36, %1702 : vector<16x16xf32>
    %1704 = arith.addf %1700, %1703 : vector<16x16xf32>
    %1705 = vector.extract_strided_slice %26 {offsets = [29, 0], sizes = [1, 16], strides = [1, 1]} : vector<32x16xf32> to vector<1x16xf32>
    %1706 = vector.broadcast %1705 : vector<1x16xf32> to vector<16x16xf32>
    %1707 = arith.mulf %5, %1706 : vector<16x16xf32>
    %1708 = vector.extract_strided_slice %28 {offsets = [0, 29], sizes = [16, 1], strides = [1, 1]} : vector<16x32xf32> to vector<16x1xf32>
    %1709 = vector.broadcast %1708 : vector<16x1xf32> to vector<16x16xf32>
    %1710 = arith.mulf %11, %1709 : vector<16x16xf32>
    %1711 = arith.addf %1707, %1710 : vector<16x16xf32>
    %1712 = arith.addf %1711, %1704 : vector<16x16xf32>
    %cst_363 = arith.constant 0.000000e+00 : f32
    %1713 = vector.broadcast %cst_363 : f32 to vector<16x16xf32>
    %1714 = arith.cmpf oge, %1712, %1713 : vector<16x16xf32>
    %cst_364 = arith.constant 2.000000e-01 : f32
    %1715 = vector.broadcast %cst_364 : f32 to vector<16x16xf32>
    %1716 = arith.mulf %1715, %1712 : vector<16x16xf32>
    %1717 = arith.select %1714, %1712, %1716 : vector<16x16xi1>, vector<16x16xf32>
    %1718 = arith.mulf %1717, %5 : vector<16x16xf32>
    %1719 = arith.addf %1718, %16 : vector<16x16xf32>
    %cst_365 = arith.constant dense<0xFF800000> : vector<16xf32>
    %1720 = vector.multi_reduction <maximumf>, %1719, %cst_365 [1] : vector<16x16xf32> to vector<16xf32>
    %1721 = vector.shape_cast %1720 : vector<16xf32> to vector<16x1xf32>
    %1722 = vector.broadcast %1721 : vector<16x1xf32> to vector<16x16xf32>
    %1723 = arith.subf %1719, %1722 : vector<16x16xf32>
    %1724 = math.exp %1723 : vector<16x16xf32>
    %cst_366 = arith.constant dense<0.000000e+00> : vector<16xf32>
    %1725 = vector.multi_reduction <add>, %1724, %cst_366 [1] : vector<16x16xf32> to vector<16xf32>
    %1726 = vector.shape_cast %1725 : vector<16xf32> to vector<16x1xf32>
    %1727 = vector.broadcast %1726 : vector<16x1xf32> to vector<16x16xf32>
    %1728 = arith.divf %1724, %1727 : vector<16x16xf32>
    %1729 = arith.mulf %1728, %5 : vector<16x16xf32>
    %1730 = vector.extract_strided_slice %20 {offsets = [29, 0], sizes = [1, 16], strides = [1, 1]} : vector<32x16xf32> to vector<1x16xf32>
    %1731 = vector.broadcast %1730 : vector<1x16xf32> to vector<16x16xf32>
    %1732 = arith.mulf %1731, %5 : vector<16x16xf32>
    %1733 = arith.mulf %1732, %1729 : vector<16x16xf32>
    %cst_367 = arith.constant dense<0.000000e+00> : vector<16xf32>
    %1734 = vector.multi_reduction <add>, %1733, %cst_367 [1] : vector<16x16xf32> to vector<16xf32>
    %1735 = vector.shape_cast %1734 : vector<16xf32> to vector<16x1xf32>
    %c29_368 = arith.constant 29 : index
    %1736 = memref.load %arg11[%c29_368] : memref<32xf32, #tpu.memory_space<smem>>
    %1737 = vector.broadcast %1736 : f32 to vector<16x1xf32>
    %1738 = arith.mulf %1735, %1737 : vector<16x1xf32>
    %c29_369 = arith.constant 29 : index
    %1739 = memref.load %arg12[%c29_369] : memref<32xf32, #tpu.memory_space<smem>>
    %1740 = vector.broadcast %1739 : f32 to vector<16x1xf32>
    %1741 = arith.addf %1738, %1740 : vector<16x1xf32>
    %cst_370 = arith.constant 0.000000e+00 : f32
    %1742 = vector.broadcast %cst_370 : f32 to vector<16x1xf32>
    %1743 = arith.maximumf %1741, %1742 : vector<16x1xf32>
    %c0_371 = arith.constant 0 : index
    %c0_372 = arith.constant 0 : index
    %c29_373 = arith.constant 29 : index
    %1744 = vector.load %arg13[%c0_371, %c0_372, %c29_373] : memref<1x16x32xf32, #tpu.memory_space<vmem>>, vector<1x16x1xf32>
    %1745 = vector.shape_cast %1744 : vector<1x16x1xf32> to vector<16x1xf32>
    %1746 = vector.shape_cast %1743 : vector<16x1xf32> to vector<1x16x1xf32>
    tpu.vector_store %arg13[%c0_371, %c0_372, %c29_373], %1746 {strides = array<i32>} : memref<1x16x32xf32, #tpu.memory_space<vmem>>, vector<1x16x1xf32>,
    %c120 = arith.constant 120 : index
    %1747 = memref.load %arg10[%c120] : memref<128xf32, #tpu.memory_space<smem>>
    %1748 = vector.broadcast %1747 : f32 to vector<16x16xf32>
    %1749 = arith.mulf %30, %1748 : vector<16x16xf32>
    %c121 = arith.constant 121 : index
    %1750 = memref.load %arg10[%c121] : memref<128xf32, #tpu.memory_space<smem>>
    %1751 = vector.broadcast %1750 : f32 to vector<16x16xf32>
    %1752 = arith.mulf %32, %1751 : vector<16x16xf32>
    %1753 = arith.addf %1749, %1752 : vector<16x16xf32>
    %c122 = arith.constant 122 : index
    %1754 = memref.load %arg10[%c122] : memref<128xf32, #tpu.memory_space<smem>>
    %1755 = vector.broadcast %1754 : f32 to vector<16x16xf32>
    %1756 = arith.mulf %34, %1755 : vector<16x16xf32>
    %1757 = arith.addf %1753, %1756 : vector<16x16xf32>
    %c123 = arith.constant 123 : index
    %1758 = memref.load %arg10[%c123] : memref<128xf32, #tpu.memory_space<smem>>
    %1759 = vector.broadcast %1758 : f32 to vector<16x16xf32>
    %1760 = arith.mulf %36, %1759 : vector<16x16xf32>
    %1761 = arith.addf %1757, %1760 : vector<16x16xf32>
    %1762 = vector.extract_strided_slice %26 {offsets = [30, 0], sizes = [1, 16], strides = [1, 1]} : vector<32x16xf32> to vector<1x16xf32>
    %1763 = vector.broadcast %1762 : vector<1x16xf32> to vector<16x16xf32>
    %1764 = arith.mulf %5, %1763 : vector<16x16xf32>
    %1765 = vector.extract_strided_slice %28 {offsets = [0, 30], sizes = [16, 1], strides = [1, 1]} : vector<16x32xf32> to vector<16x1xf32>
    %1766 = vector.broadcast %1765 : vector<16x1xf32> to vector<16x16xf32>
    %1767 = arith.mulf %11, %1766 : vector<16x16xf32>
    %1768 = arith.addf %1764, %1767 : vector<16x16xf32>
    %1769 = arith.addf %1768, %1761 : vector<16x16xf32>
    %cst_374 = arith.constant 0.000000e+00 : f32
    %1770 = vector.broadcast %cst_374 : f32 to vector<16x16xf32>
    %1771 = arith.cmpf oge, %1769, %1770 : vector<16x16xf32>
    %cst_375 = arith.constant 2.000000e-01 : f32
    %1772 = vector.broadcast %cst_375 : f32 to vector<16x16xf32>
    %1773 = arith.mulf %1772, %1769 : vector<16x16xf32>
    %1774 = arith.select %1771, %1769, %1773 : vector<16x16xi1>, vector<16x16xf32>
    %1775 = arith.mulf %1774, %5 : vector<16x16xf32>
    %1776 = arith.addf %1775, %16 : vector<16x16xf32>
    %cst_376 = arith.constant dense<0xFF800000> : vector<16xf32>
    %1777 = vector.multi_reduction <maximumf>, %1776, %cst_376 [1] : vector<16x16xf32> to vector<16xf32>
    %1778 = vector.shape_cast %1777 : vector<16xf32> to vector<16x1xf32>
    %1779 = vector.broadcast %1778 : vector<16x1xf32> to vector<16x16xf32>
    %1780 = arith.subf %1776, %1779 : vector<16x16xf32>
    %1781 = math.exp %1780 : vector<16x16xf32>
    %cst_377 = arith.constant dense<0.000000e+00> : vector<16xf32>
    %1782 = vector.multi_reduction <add>, %1781, %cst_377 [1] : vector<16x16xf32> to vector<16xf32>
    %1783 = vector.shape_cast %1782 : vector<16xf32> to vector<16x1xf32>
    %1784 = vector.broadcast %1783 : vector<16x1xf32> to vector<16x16xf32>
    %1785 = arith.divf %1781, %1784 : vector<16x16xf32>
    %1786 = arith.mulf %1785, %5 : vector<16x16xf32>
    %1787 = vector.extract_strided_slice %20 {offsets = [30, 0], sizes = [1, 16], strides = [1, 1]} : vector<32x16xf32> to vector<1x16xf32>
    %1788 = vector.broadcast %1787 : vector<1x16xf32> to vector<16x16xf32>
    %1789 = arith.mulf %1788, %5 : vector<16x16xf32>
    %1790 = arith.mulf %1789, %1786 : vector<16x16xf32>
    %cst_378 = arith.constant dense<0.000000e+00> : vector<16xf32>
    %1791 = vector.multi_reduction <add>, %1790, %cst_378 [1] : vector<16x16xf32> to vector<16xf32>
    %1792 = vector.shape_cast %1791 : vector<16xf32> to vector<16x1xf32>
    %c30_379 = arith.constant 30 : index
    %1793 = memref.load %arg11[%c30_379] : memref<32xf32, #tpu.memory_space<smem>>
    %1794 = vector.broadcast %1793 : f32 to vector<16x1xf32>
    %1795 = arith.mulf %1792, %1794 : vector<16x1xf32>
    %c30_380 = arith.constant 30 : index
    %1796 = memref.load %arg12[%c30_380] : memref<32xf32, #tpu.memory_space<smem>>
    %1797 = vector.broadcast %1796 : f32 to vector<16x1xf32>
    %1798 = arith.addf %1795, %1797 : vector<16x1xf32>
    %cst_381 = arith.constant 0.000000e+00 : f32
    %1799 = vector.broadcast %cst_381 : f32 to vector<16x1xf32>
    %1800 = arith.maximumf %1798, %1799 : vector<16x1xf32>
    %c0_382 = arith.constant 0 : index
    %c0_383 = arith.constant 0 : index
    %c30_384 = arith.constant 30 : index
    %1801 = vector.load %arg13[%c0_382, %c0_383, %c30_384] : memref<1x16x32xf32, #tpu.memory_space<vmem>>, vector<1x16x1xf32>
    %1802 = vector.shape_cast %1801 : vector<1x16x1xf32> to vector<16x1xf32>
    %1803 = vector.shape_cast %1800 : vector<16x1xf32> to vector<1x16x1xf32>
    tpu.vector_store %arg13[%c0_382, %c0_383, %c30_384], %1803 {strides = array<i32>} : memref<1x16x32xf32, #tpu.memory_space<vmem>>, vector<1x16x1xf32>,
    %c124 = arith.constant 124 : index
    %1804 = memref.load %arg10[%c124] : memref<128xf32, #tpu.memory_space<smem>>
    %1805 = vector.broadcast %1804 : f32 to vector<16x16xf32>
    %1806 = arith.mulf %30, %1805 : vector<16x16xf32>
    %c125 = arith.constant 125 : index
    %1807 = memref.load %arg10[%c125] : memref<128xf32, #tpu.memory_space<smem>>
    %1808 = vector.broadcast %1807 : f32 to vector<16x16xf32>
    %1809 = arith.mulf %32, %1808 : vector<16x16xf32>
    %1810 = arith.addf %1806, %1809 : vector<16x16xf32>
    %c126 = arith.constant 126 : index
    %1811 = memref.load %arg10[%c126] : memref<128xf32, #tpu.memory_space<smem>>
    %1812 = vector.broadcast %1811 : f32 to vector<16x16xf32>
    %1813 = arith.mulf %34, %1812 : vector<16x16xf32>
    %1814 = arith.addf %1810, %1813 : vector<16x16xf32>
    %c127 = arith.constant 127 : index
    %1815 = memref.load %arg10[%c127] : memref<128xf32, #tpu.memory_space<smem>>
    %1816 = vector.broadcast %1815 : f32 to vector<16x16xf32>
    %1817 = arith.mulf %36, %1816 : vector<16x16xf32>
    %1818 = arith.addf %1814, %1817 : vector<16x16xf32>
    %1819 = vector.extract_strided_slice %26 {offsets = [31, 0], sizes = [1, 16], strides = [1, 1]} : vector<32x16xf32> to vector<1x16xf32>
    %1820 = vector.broadcast %1819 : vector<1x16xf32> to vector<16x16xf32>
    %1821 = arith.mulf %5, %1820 : vector<16x16xf32>
    %1822 = vector.extract_strided_slice %28 {offsets = [0, 31], sizes = [16, 1], strides = [1, 1]} : vector<16x32xf32> to vector<16x1xf32>
    %1823 = vector.broadcast %1822 : vector<16x1xf32> to vector<16x16xf32>
    %1824 = arith.mulf %11, %1823 : vector<16x16xf32>
    %1825 = arith.addf %1821, %1824 : vector<16x16xf32>
    %1826 = arith.addf %1825, %1818 : vector<16x16xf32>
    %cst_385 = arith.constant 0.000000e+00 : f32
    %1827 = vector.broadcast %cst_385 : f32 to vector<16x16xf32>
    %1828 = arith.cmpf oge, %1826, %1827 : vector<16x16xf32>
    %cst_386 = arith.constant 2.000000e-01 : f32
    %1829 = vector.broadcast %cst_386 : f32 to vector<16x16xf32>
    %1830 = arith.mulf %1829, %1826 : vector<16x16xf32>
    %1831 = arith.select %1828, %1826, %1830 : vector<16x16xi1>, vector<16x16xf32>
    %1832 = arith.mulf %1831, %5 : vector<16x16xf32>
    %1833 = arith.addf %1832, %16 : vector<16x16xf32>
    %cst_387 = arith.constant dense<0xFF800000> : vector<16xf32>
    %1834 = vector.multi_reduction <maximumf>, %1833, %cst_387 [1] : vector<16x16xf32> to vector<16xf32>
    %1835 = vector.shape_cast %1834 : vector<16xf32> to vector<16x1xf32>
    %1836 = vector.broadcast %1835 : vector<16x1xf32> to vector<16x16xf32>
    %1837 = arith.subf %1833, %1836 : vector<16x16xf32>
    %1838 = math.exp %1837 : vector<16x16xf32>
    %cst_388 = arith.constant dense<0.000000e+00> : vector<16xf32>
    %1839 = vector.multi_reduction <add>, %1838, %cst_388 [1] : vector<16x16xf32> to vector<16xf32>
    %1840 = vector.shape_cast %1839 : vector<16xf32> to vector<16x1xf32>
    %1841 = vector.broadcast %1840 : vector<16x1xf32> to vector<16x16xf32>
    %1842 = arith.divf %1838, %1841 : vector<16x16xf32>
    %1843 = arith.mulf %1842, %5 : vector<16x16xf32>
    %1844 = vector.extract_strided_slice %20 {offsets = [31, 0], sizes = [1, 16], strides = [1, 1]} : vector<32x16xf32> to vector<1x16xf32>
    %1845 = vector.broadcast %1844 : vector<1x16xf32> to vector<16x16xf32>
    %1846 = arith.mulf %1845, %5 : vector<16x16xf32>
    %1847 = arith.mulf %1846, %1843 : vector<16x16xf32>
    %cst_389 = arith.constant dense<0.000000e+00> : vector<16xf32>
    %1848 = vector.multi_reduction <add>, %1847, %cst_389 [1] : vector<16x16xf32> to vector<16xf32>
    %1849 = vector.shape_cast %1848 : vector<16xf32> to vector<16x1xf32>
    %c31_390 = arith.constant 31 : index
    %1850 = memref.load %arg11[%c31_390] : memref<32xf32, #tpu.memory_space<smem>>
    %1851 = vector.broadcast %1850 : f32 to vector<16x1xf32>
    %1852 = arith.mulf %1849, %1851 : vector<16x1xf32>
    %c31_391 = arith.constant 31 : index
    %1853 = memref.load %arg12[%c31_391] : memref<32xf32, #tpu.memory_space<smem>>
    %1854 = vector.broadcast %1853 : f32 to vector<16x1xf32>
    %1855 = arith.addf %1852, %1854 : vector<16x1xf32>
    %cst_392 = arith.constant 0.000000e+00 : f32
    %1856 = vector.broadcast %cst_392 : f32 to vector<16x1xf32>
    %1857 = arith.maximumf %1855, %1856 : vector<16x1xf32>
    %c0_393 = arith.constant 0 : index
    %c0_394 = arith.constant 0 : index
    %c31_395 = arith.constant 31 : index
    %1858 = vector.load %arg13[%c0_393, %c0_394, %c31_395] : memref<1x16x32xf32, #tpu.memory_space<vmem>>, vector<1x16x1xf32>
    %1859 = vector.shape_cast %1858 : vector<1x16x1xf32> to vector<16x1xf32>
    %1860 = vector.shape_cast %1857 : vector<16x1xf32> to vector<1x16x1xf32>
    tpu.vector_store %arg13[%c0_393, %c0_394, %c31_395], %1860 {strides = array<i32>} : memref<1x16x32xf32, #tpu.memory_space<vmem>>, vector<1x16x1xf32>,
    return
  }
  func.func @transform_0(%arg0: i32) -> (i32, i32, i32) {
    %c0_i32 = arith.constant 0 : i32
    %c0_i32_0 = arith.constant 0 : i32
    %c0_i32_1 = arith.constant 0 : i32
    return %arg0, %c0_i32, %c0_i32_0 : i32, i32, i32
  }
  func.func @transform_1(%arg0: i32) -> (i32, i32, i32) {
    %c0_i32 = arith.constant 0 : i32
    %c0_i32_0 = arith.constant 0 : i32
    %c0_i32_1 = arith.constant 0 : i32
    return %arg0, %c0_i32, %c0_i32_0 : i32, i32, i32
  }
  func.func @transform_2(%arg0: i32) -> (i32, i32, i32) {
    %c0_i32 = arith.constant 0 : i32
    %c0_i32_0 = arith.constant 0 : i32
    %c0_i32_1 = arith.constant 0 : i32
    return %arg0, %c0_i32, %c0_i32_0 : i32, i32, i32
  }
  func.func @transform_3(%arg0: i32) -> (i32, i32, i32) {
    %c0_i32 = arith.constant 0 : i32
    %c0_i32_0 = arith.constant 0 : i32
    %c0_i32_1 = arith.constant 0 : i32
    return %arg0, %c0_i32, %c0_i32_0 : i32, i32, i32
  }
  func.func @transform_4(%arg0: i32) -> (i32, i32, i32, i32) {
    %c0_i32 = arith.constant 0 : i32
    %c0_i32_0 = arith.constant 0 : i32
    %c0_i32_1 = arith.constant 0 : i32
    %c0_i32_2 = arith.constant 0 : i32
    return %arg0, %c0_i32, %c0_i32_0, %c0_i32_1 : i32, i32, i32, i32
  }
  func.func @transform_5(%arg0: i32) -> (i32, i32) {
    %c0_i32 = arith.constant 0 : i32
    %c0_i32_0 = arith.constant 0 : i32
    %c0_i32_1 = arith.constant 0 : i32
    return %c0_i32, %c0_i32_0 : i32, i32
  }
  func.func @transform_6(%arg0: i32) -> (i32, i32) {
    %c0_i32 = arith.constant 0 : i32
    %c0_i32_0 = arith.constant 0 : i32
    %c0_i32_1 = arith.constant 0 : i32
    return %c0_i32, %c0_i32_0 : i32, i32
  }
  func.func @transform_7(%arg0: i32) -> (i32, i32) {
    %c0_i32 = arith.constant 0 : i32
    %c0_i32_0 = arith.constant 0 : i32
    %c0_i32_1 = arith.constant 0 : i32
    return %c0_i32, %c0_i32_0 : i32, i32
  }
  func.func @transform_8(%arg0: i32) -> (i32, i32) {
    %c0_i32 = arith.constant 0 : i32
    %c0_i32_0 = arith.constant 0 : i32
    %c0_i32_1 = arith.constant 0 : i32
    return %c0_i32, %c0_i32_0 : i32, i32
  }
  func.func @transform_9(%arg0: i32) -> i32 {
    %c0_i32 = arith.constant 0 : i32
    %c0_i32_0 = arith.constant 0 : i32
    return %c0_i32 : i32
  }
  func.func @transform_10(%arg0: i32) -> i32 {
    %c0_i32 = arith.constant 0 : i32
    %c0_i32_0 = arith.constant 0 : i32
    return %c0_i32 : i32
  }
  func.func @transform_11(%arg0: i32) -> i32 {
    %c0_i32 = arith.constant 0 : i32
    %c0_i32_0 = arith.constant 0 : i32
    return %c0_i32 : i32
  }
  func.func @transform_12(%arg0: i32) -> (i32, i32, i32) {
    %c0_i32 = arith.constant 0 : i32
    %c0_i32_0 = arith.constant 0 : i32
    %c0_i32_1 = arith.constant 0 : i32
    return %arg0, %c0_i32, %c0_i32_0 : i32, i32, i32
  }
}

</mosaic_0001>

<bundles_post_ra>
// kernel: gconv_bn_relu_attn.1
= control target key start
LH: loop header
LB: loop body
LE: loop exit
PB: predicated region body
PF: predicated region fallthrough
CT: control target
= control target key end

     0   :  { %s9078_s0 = inlined_call_operand.vmem [shape: f32[2,16,16], index: 0, kind: input, shape index: {}]   ;;  %s9079_s1 = inlined_call_operand.vmem [shape: f32[2,16,16], index: 1, kind: input, shape index: {}]   ;;  %s9080_s2 = inlined_call_operand.vmem [shape: f32[2,8,16], index: 2, kind: input, shape index: {}]   ;;  %s9081_s3 = inlined_call_operand.vmem [shape: f32[2,16,8], index: 3, kind: input, shape index: {}]   ;;  %s9082_s4 = inlined_call_operand.vmem [shape: f32[2,4,16,16], index: 4, kind: input, shape index: {}]   ;;  %s9083_s5 = inlined_call_operand.vmem [shape: f32[32,8], index: 5, kind: input, shape index: {}]   ;;  %s9084_s6 = inlined_call_operand.vmem [shape: f32[8,32], index: 6, kind: input, shape index: {}]   ;;  %s9085_s7 = inlined_call_operand.vmem [shape: f32[32,32], index: 7, kind: input, shape index: {}]   ;;  %s9086_s8 = inlined_call_operand.vmem [shape: f32[32,32], index: 8, kind: input, shape index: {}]   ;;  %s9087_s9 = inlined_call_operand.vmem [shape: f32[128], index: 9, kind: input, shape index: {}]   ;;  %s9088_s10 = inlined_call_operand.vmem [shape: f32[32], index: 10, kind: input, shape index: {}]   ;;  %s9089_s11 = inlined_call_operand.vmem [shape: f32[32], index: 11, kind: input, shape index: {}]   ;;  %s9090_s12 = inlined_call_operand.hbm [shape: f32[2,16,32], index: 12, kind: output, shape index: {}]  }
   0x1   :  { %9194 = sst [smem:[#allocation52_spill]] %s9078_s0 }
   0x2   :  { %9195 = sst [smem:[#allocation53_spill]] %s9079_s1 }
   0x3   :  { %9196 = sst [smem:[#allocation54_spill]] %s9080_s2 }
   0x4   :  { %9197 = sst [smem:[#allocation55_spill]] %s9081_s3 }
   0x5   :  { %9198 = sst [smem:[#allocation56_spill]] %s9082_s4 }
   0x6   :  { %9199 = sst [smem:[#allocation57_spill]] %s9083_s5 }
   0x7   :  { %9200 = sst [smem:[#allocation58_spill]] %s9084_s6 }
   0x8   :  { %9201 = sst [smem:[#allocation59_spill]] %s9085_s7 }
   0x9   :  { %9202 = sst [smem:[#allocation60_spill]] %s9086_s8 }
   0xa   :  { %9203 = sst [smem:[#allocation61_spill]] %s9087_s9 }
   0xb   :  { %9204 = sst [smem:[#allocation62_spill]] %s9088_s10 }
   0xc   :  { %9205 = sst [smem:[#allocation63_spill]] %s9089_s11 }
   0xd   :  { %9206 = sst [smem:[#allocation64_spill]] %s9090_s12 }
   0xe   :  { %17 = vsyncpa [#allocation4], 0 }
   0xf   :  { %18 = vsyncpa [#allocation6], 0 }
  0x10   :  { %19 = vsyncpa [#allocation3], 0 }
  0x11   :  { %21 = vsyncpa [#allocation3 + $0x1], 0  ;;  %s5740_s21 = smov 0   ;;  %s5742_s22 = smov 0  }
  0x12   :  { %s5744_s23 = smov 0   ;;  %s5746_s24 = smov 0  }
  0x13 LB: > { %9207 = sst [smem:[#allocation12_spill]] %s5623_s21  ;;  %s5761_s25 = sadd.s32 4294967295, %s5635_s24   ;;  %s5635_s24 = sphi %s5746_s24, %s9394_s24   ;;  %s5631_s23 = sphi %s5744_s23, %s9397_s23   ;;  %s5627_s22 = sphi %s5742_s22, %s9396_s22   ;;  %s5623_s21 = sphi %s5740_s21, %s9395_s21  }
  0x14   : > { %9208 = sst [smem:[#allocation13_spill]] %s5627_s22  ;;  %s4813_s26 = sadd.s32 4294967294, %s5635_s24  }
  0x15   : > { %9209 = sst [smem:[#allocation14_spill]] %s5631_s23  ;;  %s5765_s27 = sadd.s32 1, %s5635_s24  }
  0x16   : > { %9210 = sst [smem:[#allocation15_spill]] %s5635_s24  ;;  %s311_s28 = sadd.s32 1, %s5631_s23 }
  0x17   : > { %9211 = sst [smem:[#allocation16_spill]] %s5761_s25  ;;  %s308_s29 = ssub.s32 %s5635_s24, %s5765_s27 }
  0x18   : > { %9212 = sst [smem:[#allocation17_spill]] %s5765_s27  ;;  %p321_p0 = scmp.ne.s32.totalorder %s5631_s23, %s5627_s22 }
  0x19   : > { %p309_p1 = scmp.eq.s32.totalorder %s308_s29, 0  ;;  %p322_p2 = scmp.eq.s32.totalorder %s5761_s25, 1 }
  0x1a   : > { %p327_p3 = scmp.ne.s32.totalorder %s5627_s22, %s5623_s21  ;;  %p328_p4 = scmp.eq.s32.totalorder %s4813_s26, 1 }
  0x1b   : > { %s5776_s30 = scalar_select %p309_p1, %s5631_s23, %s311_s28  }
  0x1c   : > { %p5778_p5 = por %p322_p2, %p321_p0  ;;  %p5782_p6 = por %p328_p4, %p327_p3 }
  0x1d   : > { %9213 = sst [smem:[#allocation18_spill]] %s5776_s30  ;;  %p4814_p7 = scmp.ge.s32.totalorder %s5635_s24, 1 }
  0x1e   : > { %s9214_s13 = scalar_select %p5778_p5, 1, 0 }
  0x1f   : > { %s9216_s14 = scalar_select %p5782_p6, 1, 0 }
  0x20   : > { %9215 = sst [smem:[#allocation19_spill]] %s9214_s13  ;;  %p335_p8 = scmp.lt.s32.totalorder %s5635_s24, 3 }
  0x21   : > { %9217 = sst [smem:[#allocation20_spill]] %s9216_s14  ;;  %p5086_p9 = scmp.eq.s32.totalorder %s5761_s25, 0 }
  0x22   : > { %p5789_p10 = pnand %p4814_p7, %p335_p8  ;;  %s9219_s10 = sld [smem:[#allocation62_spill]] }
  0x23   : > { %s9220_s9 = sld [smem:[#allocation61_spill]]  ;;  %s5637_s23 = smov [#allocation5]  }
  0x24   : > { %p5072_p11 = pneg %p5789_p10  ;;  %s9221_s11 = sld [smem:[#allocation63_spill]] }
  0x25   : > { %s5638_s16 = smov [#allocation2]   ;;  %s5639_s17 = smov [#allocation7]  }
  0x26   : > { %p5073_p12 = pnand %p5086_p9, %p5072_p11 }
  0x28   : > { %s369_s18 = sshll.u32 %s9219_s10, 4  ;;  %s370_s18 = int_to_ptr.vmem [resolvable:$true] %s369_s18 }
  0x29   : > { %s359_s26 = sshll.u32 %s9220_s9, 4  ;;  %431 = sbr.rel (%p5789_p10) target bundleno = 7943 (0x1f07), region = 68  ;;  %s360_s26 = int_to_ptr.vmem [resolvable:$true] %s359_s26 }
  0x2a   : > { %s379_s30 = sshll.u32 %s9221_s11, 4  ;;  %s380_s30 = int_to_ptr.vmem [resolvable:$true] %s379_s30 }
  0x2b   : > { %5078 = dma.vmem_to_smem (!%p5073_p12), %s370_s18, 16, %s5637_s23, [#allocation6]  }
  0x2c   : > { %5075 = dma.vmem_to_smem (!%p5073_p12), %s360_s26, 16, %s5638_s16, [#allocation4]  }
  0x2d   : > { %5081 = dma.vmem_to_smem (!%p5073_p12), %s380_s30, 16, %s5639_s17, [#allocation6]  }
  0x2e   : > { %5610 = dma.done.wait (%p5086_p9), [#allocation4], 16  }
  0x2f   : > { %5612 = vsyncadd (%p5086_p9), [#allocation4], 4294967280 }
  0x30   : > { %5614 = dma.done.wait (%p5086_p9), [#allocation6], 32  }
  0x31   : > { %5616 = vsyncadd (%p5086_p9), [#allocation6], 4294967264 }
  0x32   : > { %448 = sfence }
  0x33   : > { %s9222_s6 = sld [smem:[#allocation58_spill]]  ;;  %p504_p13 = scmp.lt.s32.totalorder %s5761_s25, 1  ;;  %vm553_vm0 = vcmask 64512   ;;  %vm631_vm1 = vcmask 261120   ;;  %v5640_v14 = vmov 3   ;;  %v5641_v15 = vmov 1  }
  0x34   : > { %s9223_s8 = sld [smem:[#allocation60_spill]]  ;;  %5166 = vset.pattern.permute.xlu1 %v5640_v14  ;;  %5164 = vset.pattern.permute.xlu2 %v5641_v15  ;;  %v5642_v16 = vmov 0   ;;  %v5643_v24 = vmov 5   ;;  %v5644_v25 = vmov 4   ;;  %v5645_v26 = vmov 2  }
  0x35   : > { %s5821_s30 = scalar_select %p504_p13, %s5761_s25, 1  ;;  %5163 = vset.pattern.permute.xlu0 %v5642_v16  ;;  %v5646_v27 = vmov 9   ;;  %v5647_v28 = vmov 7   ;;  %v5648_v29 = vmov 6   ;;  %v5649_v31 = vmov 8  }
  0x36   : > { %s9224_s3 = sld [smem:[#allocation55_spill]]  ;;  %v5650_v32 = vmov 10   ;;  %vm768_vm7 = vcmask 130048  }
  0x37   : > { %s5824_s15 = sshll.u32 %s5821_s30, 4  ;;  %s9225_s2 = sld [smem:[#allocation54_spill]] }
  0x38   : > { %s9226_s5 = sld [smem:[#allocation57_spill]] }
  0x39   : > { %v597_v0 = vld [vmem:[%s9222_s6] sm:$0xff]  ;;  %s4828_s6 = sshll.u32 %s5821_s30, 3  ;;  %s9229_s7 = sld [smem:[#allocation59_spill]] }
  0x3a   : > { %619 = vmatpush.msra.mxu1 %v597_v0  ;;  %v676_v1 = vld [vmem:[%s9223_s8 + $0x18] sm:$0xff]  ;;  %v675_v2 = vld [vmem:[%s9223_s8 + $0x10] sm:$0xff]  ;;  %v674_v4 = vld [vmem:[%s9223_s8 + $0x8] sm:$0xff]  ;;  %s5915_s16 = sld [smem:[#allocation2 + $0x4]] }
  0x3b   : > { %695 = vmatpush.msra.mxu3 %v676_v1  ;;  %v673_v11 = vld [vmem:[%s9223_s8] sm:$0xff]  ;;  %s5917_s23 = sld [smem:[#allocation2 + $0x5]] }
  0x3c   : > { %s522_s17 = scalar_lea.vmem %s9224_s3, %s5824_s15  ;;  %s5922_s18 = sld [smem:[#allocation2 + $0x11]] }
  0x3d   : > { %v595_v3 = vld [vmem:[%s522_s17] sm:$0xff]  ;;  %696 = vmatpush.msra.mxu3 %v675_v2  ;;  %s517_s9 = scalar_lea.vmem %s9225_s2, %s4828_s6  ;;  %v596_v7 = vld [vmem:[%s522_s17 + $0x8] sm:$0xff]  ;;  %s5919_s6 = sld [smem:[#allocation2 + $0x10]] }
  0x3e   : > { %4841 = vmatmul.msk.f32.vlgmr.msra.gmra.mxu1 %vm553_vm0, %v595_v3  ;;  %v548_v5 = vld [vmem:[%s9226_s5] sm:$0xff]  ;;  %v549_v8 = vld [vmem:[%s9226_s5 + $0x8] sm:$0xff]  ;;  %v550_v9 = vld [vmem:[%s9226_s5 + $0x10] sm:$0xff]  ;;  %s5925_s17 = sld [smem:[#allocation2 + $0x6]] }
  0x3f   : > { %697 = vmatpush.msra.mxu3 %v674_v4  ;;  %v552_v6 = vld [vmem:[%s517_s9] sm:$0xff]  ;;  %v551_v10 = vld [vmem:[%s9226_s5 + $0x18] sm:$0xff]  ;;  %v628_v22 = vld [vmem:[%s9229_s7 + $0x8] sm:$0xff]  ;;  %s5052_s9 = sshll.u32 %s5821_s30, 6  ;;  %s5927_s19 = sld [smem:[#allocation2 + $0x7]] }
  0x40   : > { %581 = vmatpush.msra.mxu0 %v552_v6  ;;  %v627_v21 = vld [vmem:[%s9229_s7] sm:$0xff]  ;;  %s9232_s4 = sld [smem:[#allocation56_spill]]  ;;  %v9138_v35 = vstv %s5915_s16  ;;  %v9123_v6 = vmov 0.0  }
  0x41   : > { %4837 = vmatmul.msk.f32.vlgmr.msra.gmra.mxu0 %vm553_vm0, %v548_v5  ;;  %698 = vmatpush.msra.mxu3 %v673_v11  ;;  %s5934_s29 = sld [smem:[#allocation2 + $0x12]]  ;;  %v9137_v36 = vstv %s5917_s23 }
  0x42   : > { %s5936_s2 = sld [smem:[#allocation2 + $0x1c]]  ;;  %v9124_v38 = vstv %s5922_s18 }
  0x43   : > { %s5938_s30 = sld [smem:[#allocation2 + $0x1d]]  ;;  %v9125_v37 = vstv %s5919_s6 }
  0x44   : > { %s5952_s20 = sld [smem:[#allocation2 + $0x1e]]  ;;  %v9134_v42 = vstv %s5925_s17 }
  0x45   : > { %s5954_s26 = sld [smem:[#allocation2 + $0xc]]  ;;  %v9132_v48 = vstv %s5927_s19 }
  0x46   : > { %4842 = vmatmul.msk.f32.gmra.mxu1 %vm553_vm0, %v596_v7  ;;  %s5932_s28 = scalar_lea.vmem %s9232_s4, %s5052_s9  ;;  %s5948_s9 = sld [smem:[#allocation2 + $0x13]] }
  0x47   : > { %9233 = sst [smem:[#allocation25_spill]] %s5932_s28  ;;  %v5941_v33 = vld [vmem:[%s5932_s28] sm:$0xff]  ;;  %v5944_v34 = vld [vmem:[%s5932_s28 + $0x10] sm:$0xff]  ;;  %v9121_v45 = vstv %s5934_s29 }
  0x48   : > { %9234 = sst [smem:[#allocation26_spill]] %s5936_s2  ;;  %v845_v39 = vmul.f32 %v9138_v35, %v5941_v33  ;;  %v849_v40 = vmul.f32 %v5944_v34, %v9137_v36  ;;  %v5973_v41 = vld [vmem:[%s5932_s28 + $0x20] sm:$0xff]  ;;  %v1214_v43 = vmul.f32 %v9125_v37, %v5941_v33  ;;  %v1218_v44 = vmul.f32 %v5944_v34, %v9124_v38  ;;  %v5989_v50 = vld [vmem:[%s5932_s28 + $0x30] sm:$0xff]  ;;  %v6229_v35 = vld [vmem:[%s5932_s28 + $0x38] sm:$0xff] }
  0x49   : > { %4838 = vmatmul.msk.f32.gmra.mxu0 %vm553_vm0, %v549_v8  ;;  %9235 = sst [smem:[#allocation27_spill]] %s5938_s30  ;;  %v855_v52 = vmul.f32 %v5973_v41, %v9134_v42  ;;  %v9115_v53 = vstv %s5936_s2  ;;  %v9114_v54 = vstv %s5938_s30  ;;  %v1224_v56 = vmul.f32 %v5973_v41, %v9121_v45 }
  0x4a   : > { %9237 = sst [smem:[#allocation29_spill]] %s5952_s20  ;;  %v851_v51 = vadd.f32 %v849_v40, %v845_v39  ;;  %v1220_v55 = vadd.f32 %v1218_v44, %v1214_v43  ;;  %v861_v60 = vmul.f32 %v5989_v50, %v9132_v48  ;;  %v1583_v61 = vmul.f32 %v9115_v53, %v5941_v33 }
  0x4b   : > { %s9238_s0 = sld [smem:[#allocation52_spill]]  ;;  %v1587_v62 = vmul.f32 %v5944_v34, %v9114_v54  ;;  %v9112_v0 = vstv %s5952_s20  ;;  %v1090_v1 = vstv %s5954_s26 }
  0x4c   : > { %9236 = sst [smem:[#allocation28_spill]] %s5948_s9  ;;  %v9118_v59 = vstv %s5948_s9  ;;  %v857_v63 = vadd.f32 %v855_v52, %v851_v51  ;;  %v1226_v4 = vadd.f32 %v1224_v56, %v1220_v55 }
  0x4d   : > { %s5966_s8 = sld [smem:[#allocation2 + $0xd]]  ;;  %v1230_v5 = vmul.f32 %v5989_v50, %v9118_v59  ;;  %v1589_v11 = vadd.f32 %v1587_v62, %v1583_v61 }
  0x4e   : > { %s9239_s1 = sld [smem:[#allocation53_spill]] }
  0x4f   : > { %s5983_s3 = sld [smem:[#allocation2 + $0x1f]] }
  0x50   : > { %s5986_s4 = sld [smem:[#allocation2 + $0xe]] }
  0x51   : > { %4839 = vmatmul.msk.f32.gmra.mxu0 %vm553_vm0, %v550_v9  ;;  %s508_s5 = scalar_lea.vmem %s9238_s0, %s5824_s15  ;;  %s5996_s10 = sld [smem:[#allocation2]] }
  0x52   : > { %v528_v46 = vld [vmem:[%s508_s5] sm:$0xff]  ;;  %v529_v47 = vld [vmem:[%s508_s5 + $0x8] sm:$0xff]  ;;  %s6001_s5 = sld [smem:[#allocation2 + $0x1]] }
  0x53   : > { %vm530_vm2 = vcmp.eq.f32.partialorder %v528_v46, 1.0  ;;  %vm531_vm3 = vcmp.eq.f32.partialorder %v529_v47, 1.0  ;;  %s6006_s11 = sld [smem:[#allocation2 + $0xf]]  ;;  %v9145_v2 = vstv %s5966_s8 }
  0x54   : > { %s513_s27 = scalar_lea.vmem %s9239_s1, %s5824_s15  ;;  %s6017_s15 = sld [smem:[#allocation2 + $0x2]]  ;;  %v6032_v7 = vsel %vm530_vm2, 1.0, %v9123_v6  ;;  %v6036_v8 = vsel %vm531_vm3, 1.0, %v9123_v6 }
  0x55   : > { %9240 = sst [smem:[#allocation30_spill]] %s5983_s3  ;;  %v536_v49 = vld [vmem:[%s513_s27] sm:$0xff]  ;;  %v537_v57 = vld [vmem:[%s513_s27 + $0x8] sm:$0xff]  ;;  %vm544_vm6 = vcmp.eq.f32.partialorder %v6032_v7, 0.0  ;;  %vm545_vm2 = vcmp.eq.f32.partialorder %v6036_v8, 0.0 }
  0x56   : > { %vm538_vm4 = vcmp.eq.f32.partialorder %v536_v49, 1.0  ;;  %s6022_s27 = sld [smem:[#allocation2 + $0x3]]  ;;  %vm539_vm5 = vcmp.eq.f32.partialorder %v537_v57, 1.0  ;;  %v6102_v55 = vsel %vm544_vm6, -9e+15, %v9123_v6 }
  0x57   : > { %s6028_s0 = sld [smem:[#allocation2 + $0x20]]  ;;  %9247 = vst [vmem:[#allocation37_spill] sm:$0xff] %v6102_v55 }
  0x58   : > { %s6040_s1 = sld [smem:[#allocation2 + $0x21]] }
  0x59   : > { %4840 = vmatmul.msk.f32.gmra.mxu0 %vm553_vm0, %v551_v10  ;;  %v9111_v10 = vstv %s5983_s3  ;;  %s6051_s14 = sld [smem:[#allocation2 + $0x22]]  ;;  %v9139_v46 = vstv %s6006_s11 }
  0x5a   : > { %s6062_s21 = sld [smem:[#allocation2 + $0x23]]  ;;  %v9127_v56 = vstv %s6017_s15 }
  0x5b   : > { %s6071_s24 = sld [smem:[#allocation2 + $0x14]] }
  0x5c   : > { %s6083_s13 = sld [smem:[#allocation2 + $0x15]] }
  0x5d   : > { %9241 = sst [smem:[#allocation31_spill]] %s6028_s0  ;;  %v9109_v62 = vstv %s6028_s0 }
  0x5e   : > { %9242 = sst [smem:[#allocation32_spill]] %s6040_s1 }
  0x5f   : > { %9243 = sst [smem:[#allocation33_spill]] %s6051_s14 }
  0x60   : > { %9246 = sst [smem:[#allocation36_spill]] %s6062_s21 }
  0x61   : > { %s6089_s12 = sld [smem:[#allocation2 + $0x8]] }
  0x62   : > { %s6099_s25 = sld [smem:[#allocation2 + $0x9]] }
  0x63   : > { %s6105_s7 = sld [smem:[#allocation2 + $0x24]] }
  0x64   : > { %s6115_s22 = sld [smem:[#allocation2 + $0x25]] }
  0x65   : > { %s6122_s3 = sld [smem:[#allocation2 + $0x16]] }
  0x66   : > { %s6133_s20 = sld [smem:[#allocation2 + $0xa]] }
  0x67   : > { %s6141_s30 = sld [smem:[#allocation2 + $0x17]]  ;;  %v967_v54 = vstv %s6089_s12 }
  0x68   : > { %s6153_s0 = sld [smem:[#allocation2 + $0x26]]  ;;  %v971_v53 = vstv %s6099_s25 }
  0x69   : > { %s6161_s2 = sld [smem:[#allocation2 + $0xb]]  ;;  %v9133_v59 = vstv %s6105_s7 }
  0x6a   : > { %s6166_s9 = sld [smem:[#allocation2 + $0x27]] }
  0x6b   : > { %s6184_s12 = sld [smem:[#allocation2 + $0x18]]  ;;  %v1346_v45 = vstv %s6122_s3 }
  0x6c   : > { %s6194_s25 = sld [smem:[#allocation2 + $0x19]]  ;;  %v977_v38 = vstv %s6133_s20 }
  0x6d   : > { %s6220_s20 = sld [smem:[#allocation2 + $0x1a]]  ;;  %v978_v42 = vmul.f32 %v5973_v41, %v977_v38 }
  0x6e   : > { %s7488_s26 = sld [smem:[#allocation7]] }
  0x6f   : > { %s9374_s3 = sld [smem:[#allocation13_spill]] }
  0xbb   : > { %v621_v12 = vpop.f32.mrf.mxu1 }
  0xbc   : > { %4847 = vmatmul.msk.f32.vlgmr.msra.gmra.mxu3 %vm631_vm1, %v621_v12  ;;  %v1593_v12 = vmul.f32 %v5973_v41, %v9112_v0 }
  0xbe   : > { %v5865_v13 = vpop.f32.mrf.mxu0  ;;  %v1595_v40 = vadd.f32 %v1593_v12, %v1589_v11  ;;  %v1107_v11 = vmul.f32 %v5989_v50, %v9139_v46 }
  0xc3   : > { %v624_v17 = vpop.f32.mrf.mxu1 }
  0xc4   : > { %4848 = vmatmul.msk.f32.gmra.mxu3 %vm631_vm1, %v624_v17  ;;  %v6059_v17 = vsel %vm539_vm5, 1.0, %v9123_v6 }
  0xc5   : > { %9245 = vst [vmem:[#allocation35_spill] sm:$0xff] %v6059_v17 }
  0xc6   : > { %v5868_v18 = vpop.f32.mrf.mxu0 }
  0xce   : > { %v5870_v19 = vpop.f32.mrf.mxu0 }
  0xcf   : > { %9227 = vst [vmem:[#allocation21_spill] sm:$0xff] %v5870_v19 }
  0xd6   : > { %v5872_v20 = vpop.f32.mrf.mxu0 }
  0xd7   : > { %9228 = vst [vmem:[#allocation22_spill] sm:$0xff] %v5872_v20  ;;  %656 = vmatpush.msrb.mxu1 %v5872_v20  ;;  %5054 = vmatpush.msra.mxu2 %v5872_v20 }
  0xd9   : > { %657 = vmatpush.msrb.mxu1 %v5870_v19  ;;  %5055 = vmatpush.msra.mxu2 %v5870_v19 }
  0xdb   : > { %658 = vmatpush.msrb.mxu1 %v5868_v18  ;;  %5056 = vmatpush.msra.mxu2 %v5868_v18 }
  0xdd   : > { %659 = vmatpush.msrb.mxu1 %v5865_v13  ;;  %5057 = vmatpush.msra.mxu2 %v5865_v13 }
  0xde   : > { %4843 = vmatmul.msk.f32.vlgmr.msrb.gmra.mxu1 %vm631_vm1, %v627_v21  ;;  %4844 = vmatmul.msk.f32.vlgmr.msra.gmra.mxu2 %vm631_vm1, %v628_v22  ;;  %v863_v21 = vadd.f32 %v861_v60, %v857_v63  ;;  %v9144_v22 = vstv %s5986_s4  ;;  %v9126_v60 = vstv %s6022_s27 }
  0xdf   : > { %v1101_v44 = vmul.f32 %v5973_v41, %v9144_v22 }
 0x13f   : > { %v5890_v23 = vpop.f32.mrf.mxu3 }
 0x140   : > { %9230 = vst [vmem:[#allocation23_spill] sm:$0xff] %v5890_v23  ;;  %1115 = vperm.xlu1 %5166, %v5890_v23   ;;  %869 = vperm.xlu2 %5164, %v5890_v23  }
 0x141   : > { %744 = vperm.xlu0 %5163, %v5890_v23  }
 0x147   : > { %v5901_v30 = vpop.f32.mrf.mxu3 }
 0x148   : > { %5168 = vset.pattern.permute.xlu1 %v5643_v24  ;;  %5167 = vset.pattern.permute.xlu2 %v5644_v25  ;;  %9231 = vst [vmem:[#allocation24_spill] sm:$0xff] %v5901_v30 }
 0x149   : > { %5165 = vset.pattern.permute.xlu0 %v5645_v26  ;;  %1361 = vperm.xlu1 %5168, %v5890_v23  }
 0x14a   : > { %1238 = vperm.xlu2 %5167, %v5890_v23   ;;  %992 = vperm.xlu0 %5165, %v5890_v23  }
 0x151   : > { %5172 = vset.pattern.permute.xlu1 %v5646_v27 }
 0x152   : > { %5170 = vset.pattern.permute.xlu2 %v5647_v28  ;;  %5169 = vset.pattern.permute.xlu0 %v5648_v29 }
 0x153   : > { %1853 = vperm.xlu1 %5172, %v5890_v23   ;;  %1607 = vperm.xlu2 %5170, %v5890_v23  }
 0x154   : > { %1484 = vperm.xlu0 %5169, %v5890_v23  }
 0x15b   : > { %5175 = vset.pattern.permute.xlu1 %v5641_v15  ;;  %5171 = vset.pattern.permute.xlu2 %v5649_v31  ;;  %v6003_v58 = vpop.f32.mrf.mxu1  ;;  %v1095_v15 = vmul.f32 %v5944_v34, %v9145_v2 }
 0x15c   : > { %5173 = vset.pattern.permute.xlu0 %v5650_v32  ;;  %1730 = vperm.xlu2 %5171, %v5890_v23   ;;  %v9131_v3 = vperm.slane %v6003_v58, 1  ;;  %v9113_v9 = vperm.slane %v6003_v58, 4  ;;  %v9128_v47 = vperm.slane %v6003_v58, 3  ;;  %v9122_v61 = vperm.slane %v6003_v58, 0 }
 0x15d   : > { %1976 = vperm.xlu0 %5173, %v5890_v23   ;;  %873 = vperm.xlu1 %5175, %v5901_v30  }
 0x15e   : > { %v6127_v12 = vmul.f32 %v6032_v7, %v9128_v47  ;;  %v1829_v47 = vmul.f32 %v9133_v59, %v5941_v33 }
 0x164   : > { %5176 = vset.pattern.permute.xlu2 %v5645_v26  ;;  %v9130_v26 = vstv %s5996_s10 }
 0x165   : > { %5174 = vset.pattern.permute.xlu0 %v5642_v16  ;;  %5177 = vset.pattern.permute.xlu1 %v5640_v14  ;;  %v1091_v14 = vmul.f32 %v1090_v1, %v5941_v33  ;;  %v6055_v16 = vsel %vm538_vm4, 1.0, %v9123_v6  ;;  %v719_v49 = vmul.f32 %v9130_v26, %v5941_v33  ;;  %v972_v6 = vmul.f32 %v5944_v34, %v971_v53 }
 0x166   : > { %996 = vperm.xlu2 %5176, %v5901_v30   ;;  %1119 = vperm.xlu1 %5177, %v5901_v30   ;;  %9244 = vst [vmem:[#allocation34_spill] sm:$0xff] %v6055_v16 }
 0x167   : > { %749 = vperm.xlu0 %5174, %v5901_v30   ;;  %v1097_v43 = vadd.f32 %v1095_v15, %v1091_v14  ;;  %v729_v15 = vmul.f32 %v5973_v41, %v9127_v56  ;;  %v6205_v56 = vld [vmem:[%s5932_s28 + $0x28] sm:$0xff] }
 0x168   : > { %v979_v36 = vmul.f32 %v6205_v56, %v977_v38  ;;  %v9149_v38 = vstv %s6184_s12 }
 0x169   : > { %v1460_v22 = vmul.f32 %v9149_v38, %v5941_v33 }
 0x16e   : > { %5179 = vset.pattern.permute.xlu2 %v5643_v24  ;;  %5180 = vset.pattern.permute.xlu1 %v5648_v29  ;;  %v866_v24 = vmul.f32 %v6032_v7, %v9131_v3  ;;  %v6076_v29 = vmul.f32 %v6032_v7, %v9113_v9  ;;  %v9143_v3 = vstv %s6153_s0 }
 0x16f   : > { %5178 = vset.pattern.permute.xlu0 %v5644_v25  ;;  %1365 = vperm.xlu2 %5179, %v5901_v30   ;;  %v6067_v25 = vadd.f32 %v1230_v5, %v1226_v4  ;;  %v1103_v5 = vadd.f32 %v1101_v44, %v1097_v43  ;;  %v9119_v43 = vstv %s6051_s14  ;;  %v9120_v44 = vstv %s6062_s21  ;;  %s6224_s21 = sld [smem:[#allocation2 + $0x1b]] }
 0x170   : > { %1488 = vperm.xlu1 %5180, %v5901_v30   ;;  %1242 = vperm.xlu0 %5178, %v5901_v30   ;;  %s6281_s14 = sld [smem:[#allocation2 + $0x2a]] }
 0x177   : > { %5183 = vset.pattern.permute.xlu2 %v5646_v27  ;;  %v9129_v27 = vstv %s6001_s5 }
 0x178   : > { %5181 = vset.pattern.permute.xlu1 %v5647_v28  ;;  %5182 = vset.pattern.permute.xlu0 %v5649_v31  ;;  %v1599_v31 = vmul.f32 %v5989_v50, %v9111_v10  ;;  %v723_v51 = vmul.f32 %v5944_v34, %v9129_v27 }
 0x179   : > { %1857 = vperm.xlu2 %5183, %v5901_v30   ;;  %1611 = vperm.xlu1 %5181, %v5901_v30  }
 0x17a   : > { %1734 = vperm.xlu0 %5182, %v5901_v30   ;;  %v6117_v4 = vadd.f32 %v1599_v31, %v1595_v40  ;;  %v725_v14 = vadd.f32 %v723_v51, %v719_v49  ;;  %v1706_v31 = vmul.f32 %v9109_v62, %v5941_v33  ;;  %v6148_v40 = vpop.f32.mrf.mxu2  ;;  %v1336_v49 = vstv %s6071_s24  ;;  %s9286_s24 = sld [smem:[#allocation31_spill]] }
 0x17b   : > { %v1340_v62 = vstv %s6083_s13  ;;  %s9287_s13 = sld [smem:[#allocation32_spill]] }
 0x17c   : > { %v731_v9 = vadd.f32 %v729_v15, %v725_v14  ;;  %v1337_v14 = vmul.f32 %v1336_v49, %v5941_v33 }
 0x181   : > { %5184 = vset.pattern.permute.xlu1 %v5650_v32  ;;  %v9108_v32 = vperm.slane %v6003_v58, 7 }
 0x182   : > { %1980 = vperm.xlu1 %5184, %v5901_v30  }
 0x183   : > { %v6110_v57 = vmul.f32 %v6032_v7, %v9108_v32 }
 0x19a   : > { %v870_v28 = vpop.permute.xlu2 %869 }
 0x19b   : > { %v876_v39 = vmul.f32 %v6055_v16, %v870_v28  ;;  %v735_v28 = vmul.f32 %v5989_v50, %v9126_v60 }
 0x19d   : > { %v878_v52 = vadd.f32 %v876_v39, %v866_v24  ;;  %v6146_v39 = vmul.f32 %v6032_v7, %v9122_v61  ;;  %v968_v61 = vmul.f32 %v967_v54, %v5941_v33  ;;  %v737_v48 = vadd.f32 %v735_v28, %v731_v9 }
 0x19f   : > { %v880_v63 = vadd.f32 %v878_v52, %v863_v21  ;;  %v9117_v21 = vstv %s6040_s1  ;;  %v6155_v52 = vadd.f32 %v1107_v11, %v1103_v5  ;;  %v6172_v5 = vld [vmem:[%s5932_s28 + $0x18] sm:$0xff]  ;;  %v1716_v11 = vmul.f32 %v5973_v41, %v9119_v43  ;;  %s6298_s1 = sld [smem:[#allocation2 + $0x2b]] }
 0x1a0   : > { %v1710_v32 = vmul.f32 %v5944_v34, %v9117_v21  ;;  %v9142_v21 = vperm.slane %v6148_v40, 0  ;;  %v9136_v43 = vstv %s6115_s22  ;;  %v973_v60 = vmul.f32 %v6172_v5, %v971_v53 }
 0x1a1   : > { %vm882_vm8 = vcmp.ge.f32.partialorder %v880_v63, 0.0  ;;  %v884_v24 = vmul.f32 0.2, %v880_v63  ;;  %v1833_v27 = vmul.f32 %v5944_v34, %v9136_v43  ;;  %v1352_v53 = vstv %s6141_s30  ;;  %s7225_s30 = sld [smem:[#allocation2 + $0x33]] }
 0x1a2   : > { %v974_v59 = vadd.f32 %v972_v6, %v968_v61  ;;  %v1353_v6 = vmul.f32 %v5989_v50, %v1352_v53  ;;  %v1839_v61 = vmul.f32 %v5973_v41, %v9143_v3  ;;  %v9155_v3 = vperm.slane %v6148_v40, 1 }
 0x1a3   : > { %v886_v51 = vsel %vm882_vm8, %v880_v63, %v884_v24  ;;  %v6169_v63 = vld [vmem:[%s5932_s28 + $0x8] sm:$0xff]  ;;  %v1722_v24 = vmul.f32 %v5989_v50, %v9120_v44  ;;  %v1712_v44 = vadd.f32 %v1710_v32, %v1706_v31  ;;  %v1357_v32 = vperm.slane %v6003_v58, 5  ;;  %s6254_s28 = sld [smem:[#allocation2 + $0x29]] }
 0x1a4   : > { %v1239_v10 = vpop.permute.xlu2 %1238  ;;  %v888_v0 = vmul.f32 %v6032_v7, %v886_v51  ;;  %v1341_v51 = vmul.f32 %v5944_v34, %v1340_v62  ;;  %v969_v37 = vmul.f32 %v967_v54, %v6169_v63  ;;  %v988_v31 = vperm.slane %v6003_v58, 2 }
 0x1a5   : > { %v1347_v54 = vmul.f32 %v5973_v41, %v1346_v45  ;;  %v1835_v9 = vadd.f32 %v1833_v27, %v1829_v47  ;;  %v980_v27 = vadd.f32 %v978_v42, %v974_v59  ;;  %v1338_v38 = vmul.f32 %v1336_v49, %v6169_v63 }
 0x1a6   : > { %v6187_v15 = vadd.f32 %v888_v0, %v6102_v55  ;;  %v1343_v26 = vadd.f32 %v1341_v51, %v1337_v14  ;;  %v1718_v14 = vadd.f32 %v1716_v11, %v1712_v44  ;;  %v983_v51 = vstv %s6161_s2  ;;  %s6245_s2 = sld [smem:[#allocation2 + $0x28]] }
 0x1a7   : > { %v975_v43 = vadd.f32 %v973_v60, %v969_v37  ;;  %v1844_v37 = vstv %s6166_s9  ;;  %v9146_v60 = vstv %s6194_s25  ;;  %v6251_v11 = vmul.f32 %v6032_v7, %v1357_v32  ;;  %s7482_s9 = sld [smem:[#allocation5]] }
 0x1a8   : > { %v892_v0 = vsel %vm768_vm7, %v6187_v15, -inf  ;;  %v1349_v28 = vadd.f32 %v1347_v54, %v1343_v26  ;;  %v984_v47 = vmul.f32 %v5989_v50, %v983_v51  ;;  %v6256_v26 = vadd.f32 %v1722_v24, %v1718_v14 }
 0x1a9   : > { %893 = vmax.xlane.f32.xlu2 %v892_v0  ;;  %v1245_v0 = vmul.f32 %v6055_v16, %v1239_v10  ;;  %v6234_v10 = vmul.f32 %v6032_v7, %v9142_v21  ;;  %v981_v54 = vadd.f32 %v979_v36, %v975_v43  ;;  %v985_v21 = vmul.f32 %v6229_v35, %v983_v51 }
 0x1aa   : > { %v1464_v42 = vmul.f32 %v5944_v34, %v9146_v60  ;;  %v6269_v2 = vadd.f32 %v1353_v6, %v1349_v28  ;;  %v989_v36 = vmul.f32 %v6032_v7, %v988_v31  ;;  %v6273_v43 = vmul.f32 %v6036_v8, %v988_v31 }
 0x1ab   : > { %v1247_v44 = vadd.f32 %v1245_v0, %v6076_v29  ;;  %v1841_v29 = vadd.f32 %v1839_v61, %v1835_v9  ;;  %v1845_v0 = vmul.f32 %v5989_v50, %v1844_v37  ;;  %v9152_v24 = vstv %s6220_s20 }
 0x1ac   : > { %v986_v61 = vadd.f32 %v984_v47, %v980_v27  ;;  %v9151_v60 = vstv %s6224_s21  ;;  %v6284_v31 = vadd.f32 %v985_v21, %v981_v54  ;;  %v9150_v28 = vperm.slane %v6003_v58, 6 }
 0x1ad   : > { %v1608_v46 = vpop.permute.xlu2 %1607  ;;  %v6277_v14 = vadd.f32 %v1247_v44, %v6067_v25  ;;  %v6289_v25 = vmul.f32 %v6032_v7, %v9155_v3  ;;  %v6293_v27 = vadd.f32 %v1845_v0, %v1841_v29  ;;  %v1466_v47 = vadd.f32 %v1464_v42, %v1460_v22 }
 0x1ae   : > { %v1348_v29 = vmul.f32 %v6205_v56, %v1346_v45  ;;  %v9153_v0 = vstv %s6245_s2  ;;  %v1614_v42 = vmul.f32 %v6055_v16, %v1608_v46  ;;  %v6322_v49 = vmul.f32 %v6032_v7, %v9150_v28 }
 0x1af   : > { %v6330_v45 = vmul.f32 %v6036_v8, %v1357_v32  ;;  %v9156_v28 = vstv %s6281_s14  ;;  %vm1251_vm12 = vcmp.ge.f32.partialorder %v6277_v14, 0.0 }
 0x1b2   : > { %v1116_v59 = vpop.permute.xlu1 %1115 }
 0x1b3   : > { %v1122_v51 = vmul.f32 %v6055_v16, %v1116_v59  ;;  %v745_v9 = vpop.permute.xlu0 %744  ;;  %v1470_v59 = vmul.f32 %v5973_v41, %v9152_v24 }
 0x1b4   : > { %v752_v6 = vmul.f32 %v6055_v16, %v745_v9  ;;  %v1476_v9 = vmul.f32 %v5989_v50, %v9151_v60  ;;  %v1616_v60 = vadd.f32 %v1614_v42, %v6110_v57  ;;  %v1962_v57 = vmul.f32 %v5973_v41, %v9156_v28 }
 0x1b5   : > { %v1124_v44 = vadd.f32 %v1122_v51, %v6127_v12  ;;  %v1342_v12 = vmul.f32 %v6172_v5, %v1340_v62  ;;  %v1354_v62 = vmul.f32 %v6229_v35, %v1352_v53  ;;  %v9249_v42 = vstv %s5986_s4  ;;  %s501_s4 = sand.u32 1, %s9374_s3  }
 0x1b6   : > { %v754_v21 = vadd.f32 %v752_v6, %v6146_v39  ;;  %v6301_v54 = vpop.permute.xlu2 %1730  ;;  %v9154_v39 = vstv %s6254_s28  ;;  %v1472_v6 = vadd.f32 %v1470_v59, %v1466_v47  ;;  %v1092_v47 = vmul.f32 %v1090_v1, %v6169_v63 }
 0x1b7   : > { %v1126_v22 = vadd.f32 %v1124_v44, %v6155_v52  ;;  %v1956_v44 = vmul.f32 %v5944_v34, %v9154_v39  ;;  %v9248_v59 = vstv %s5966_s8  ;;  %v1344_v34 = vadd.f32 %v1342_v12, %v1338_v38  ;;  %s9275_s8 = sld [smem:[#allocation27_spill]] }
 0x1b8   : > { %v756_v51 = vadd.f32 %v754_v21, %v737_v48  ;;  %v1952_v48 = vmul.f32 %v9153_v0, %v5941_v33  ;;  %v1096_v32 = vmul.f32 %v6172_v5, %v9248_v59  ;;  %v1967_v39 = vstv %s6298_s1  ;;  %s9310_s1 = sld [smem:[#allocation25_spill]] }
 0x1b9   : > { %vm1128_vm9 = vcmp.ge.f32.partialorder %v1126_v22, 0.0  ;;  %v1130_v52 = vmul.f32 0.2, %v1126_v22  ;;  %v9250_v12 = vstv %s6006_s11  ;;  %v9251_v41 = vstv %s5915_s16  ;;  %s9290_s16 = sld [smem:[#allocation33_spill]]  ;;  %s4823_s11 = sshll.u32 %s501_s4, 4 }
 0x1ba   : > { %vm758_vm10 = vcmp.ge.f32.partialorder %v756_v51, 0.0  ;;  %v760_v46 = vmul.f32 0.2, %v756_v51  ;;  %v1098_v3 = vadd.f32 %v1096_v32, %v1092_v47  ;;  %v1958_v59 = vadd.f32 %v1956_v44, %v1952_v48 }
 0x1bb   : > { %v1362_v21 = vpop.permute.xlu1 %1361  ;;  %v1132_v53 = vsel %vm1128_vm9, %v1126_v22, %v1130_v52  ;;  %v846_v44 = vmul.f32 %v9251_v41, %v6169_v63  ;;  %v9252_v47 = vstv %s5917_s23  ;;  %v1253_v41 = vmul.f32 0.2, %v6277_v14  ;;  %s9296_s23 = sld [smem:[#allocation36_spill]] }
 0x1bc   : > { %v993_v24 = vpop.permute.xlu0 %992  ;;  %v1134_v33 = vmul.f32 %v6032_v7, %v1132_v53  ;;  %v762_v0 = vsel %vm758_vm10, %v756_v51, %v760_v46  ;;  %v1102_v53 = vmul.f32 %v6205_v56, %v9249_v42  ;;  %v1368_v51 = vmul.f32 %v6055_v16, %v1362_v21 }
 0x1bd   : > { %v999_v22 = vmul.f32 %v6055_v16, %v993_v24  ;;  %v764_v52 = vmul.f32 %v6032_v7, %v762_v0  ;;  %v1108_v0 = vmul.f32 %v6229_v35, %v9250_v12  ;;  %v850_v32 = vmul.f32 %v6172_v5, %v9252_v47 }
 0x1be   : > { %v6351_v1 = vadd.f32 %v1134_v33, %v6102_v55  ;;  %v1104_v21 = vadd.f32 %v1102_v53, %v1098_v3  ;;  %v1478_v42 = vadd.f32 %v1476_v9, %v1472_v6  ;;  %v1968_v12 = vmul.f32 %v5989_v50, %v1967_v39 }
 0x1bf   : > { %v1001_v38 = vadd.f32 %v999_v22, %v989_v36  ;;  %v6361_v24 = vadd.f32 %v764_v52, %v6102_v55  ;;  %v1350_v22 = vadd.f32 %v1348_v29, %v1344_v34  ;;  %v9157_v52 = vperm.slane %v6148_v40, 2 }
 0x1c0   : > { %v6366_v46 = vpop.permute.xlu2 %996  ;;  %v1138_v48 = vsel %vm768_vm7, %v6351_v1, -inf  ;;  %v6383_v28 = vadd.f32 %v1108_v0, %v1104_v21  ;;  %v1370_v3 = vadd.f32 %v1368_v51, %v6251_v11  ;;  %v1618_v29 = vadd.f32 %v1616_v60, %v6117_v4 }
 0x1c1   : > { %v1003_v33 = vadd.f32 %v1001_v38, %v986_v61  ;;  %1139 = vmax.xlane.f32.xlu2 %v1138_v48  ;;  %v769_v36 = vsel %vm768_vm7, %v6361_v24, -inf  ;;  %v1964_v34 = vadd.f32 %v1962_v57, %v1958_v59  ;;  %v852_v9 = vadd.f32 %v850_v32, %v846_v44 }
 0x1c2   : > { %770 = vmax.xlane.f32.xlu1 %v769_v36  ;;  %v9253_v6 = vstv %s5925_s17  ;;  %v1356_v38 = vadd.f32 %v1354_v62, %v1350_v22  ;;  %v6394_v11 = vmul.f32 %v6032_v7, %v9157_v52  ;;  %v9254_v51 = vstv %s6105_s7  ;;  %s9274_s7 = sld [smem:[#allocation26_spill]] }
 0x1c3   : > { %vm1005_vm11 = vcmp.ge.f32.partialorder %v1003_v33, 0.0  ;;  %v1007_v61 = vmul.f32 0.2, %v1003_v33  ;;  %v856_v53 = vmul.f32 %v6205_v56, %v9253_v6  ;;  %v1830_v0 = vmul.f32 %v9254_v51, %v6169_v63  ;;  %s6812_s17 = sld [smem:[#allocation2 + $0x2f]] }
 0x1c4   : > { %v1737_v4 = vmul.f32 %v6055_v16, %v6301_v54  ;;  %v9255_v57 = vstv %s6115_s22  ;;  %v1255_v44 = vsel %vm1251_vm12, %v6277_v14, %v1253_v41  ;;  %v1372_v47 = vadd.f32 %v1370_v3, %v6269_v2  ;;  %s9280_s22 = sld [smem:[#allocation29_spill]] }
 0x1c5   : > { %v1854_v50 = vpop.permute.xlu1 %1853  ;;  %v1009_v48 = vsel %vm1005_vm11, %v1003_v33, %v1007_v61  ;;  %v1834_v62 = vmul.f32 %v6172_v5, %v9255_v57  ;;  %v9256_v33 = vstv %s5927_s19  ;;  %v6415_v22 = vadd.f32 %v1968_v12, %v1964_v34  ;;  %s7152_s19 = sld [smem:[#allocation2 + $0x30]] }
 0x1c6   : > { %v1485_v60 = vpop.permute.xlu0 %1484  ;;  %v1011_v59 = vmul.f32 %v6032_v7, %v1009_v48  ;;  %v1860_v32 = vmul.f32 %v6055_v16, %v1854_v50  ;;  %v862_v36 = vmul.f32 %v6229_v35, %v9256_v33  ;;  %v858_v61 = vadd.f32 %v856_v53, %v852_v9 }
 0x1c7   : > { %v1491_v21 = vmul.f32 %v6055_v16, %v1485_v60  ;;  %v9257_v6 = vperm.slane %v6003_v58, 1  ;;  %v9258_v41 = vstv %s6153_s0  ;;  %v6431_v50 = vmul.f32 %v6229_v35, %v1844_v37  ;;  %s9273_s0 = sld [smem:[#allocation28_spill]] }
 0x1c8   : > { %v6413_v54 = vadd.f32 %v1011_v59, %v6102_v55  ;;  %v6426_v3 = vmul.f32 %v6205_v56, %v9258_v41  ;;  %v1257_v12 = vmul.f32 %v6032_v7, %v1255_v44  ;;  %v1739_v34 = vadd.f32 %v1737_v4, %v6234_v10 }
 0x1c9   : > { %v6420_v48 = vmul.f32 %v6036_v8, %v9257_v6  ;;  %v1493_v2 = vadd.f32 %v1491_v21, %v6322_v49  ;;  %v1366_v14 = vpop.permute.xlu2 %1365  ;;  %v6438_v51 = vadd.f32 %v1834_v62, %v1830_v0  ;;  %v1862_v49 = vadd.f32 %v1860_v32, %v6289_v25 }
 0x1ca   : > { %v1369_v9 = vmul.f32 %v6059_v17, %v1366_v14  ;;  %v1015_v53 = vsel %vm768_vm7, %v6413_v54, -inf  ;;  %v9259_v37 = vperm.slane %v6148_v40, 1  ;;  %v1376_v57 = vmul.f32 0.2, %v1372_v47 }
 0x1cb   : > { %v1495_v60 = vadd.f32 %v1493_v2, %v1478_v42  ;;  %1016 = vmax.xlane.f32.xlu1 %v1015_v53  ;;  %v6447_v4 = vadd.f32 %v862_v36, %v858_v61  ;;  %vm1374_vm13 = vcmp.ge.f32.partialorder %v1372_v47, 0.0  ;;  %v1622_v44 = vmul.f32 0.2, %v1618_v29 }
 0x1cc   : > { %v6444_v59 = vmul.f32 %v6036_v8, %v9259_v37  ;;  %v1371_v10 = vadd.f32 %v1369_v9, %v6330_v45  ;;  %v6450_v0 = vadd.f32 %v1257_v12, %v6102_v55  ;;  %vm1620_vm15 = vcmp.ge.f32.partialorder %v1618_v29, 0.0 }
 0x1cd   : > { %vm1497_vm14 = vcmp.ge.f32.partialorder %v1495_v60, 0.0  ;;  %v1499_v25 = vmul.f32 0.2, %v1495_v60  ;;  %v1741_v42 = vadd.f32 %v1739_v34, %v6256_v26  ;;  %v9260_v32 = vstv %s5996_s10  ;;  %s7507_s10 = sld [smem:[#allocation5 + $0x1]] }
 0x1ce   : > { %v1373_v62 = vadd.f32 %v1371_v10, %v1356_v38  ;;  %v720_v21 = vmul.f32 %v9260_v32, %v6169_v63  ;;  %v9261_v33 = vstv %s6001_s5  ;;  %v1864_v36 = vadd.f32 %v1862_v49, %v6293_v27  ;;  %s7516_s5 = sld [smem:[#allocation7 + $0x1]] }
 0x1cf   : > { %v724_v45 = vmul.f32 %v6172_v5, %v9261_v33  ;;  %v1977_v61 = vpop.permute.xlu0 %1976  ;;  %v874_v6 = vpop.permute.xlu1 %873  ;;  %v1501_v2 = vsel %vm1497_vm14, %v1495_v60, %v1499_v25  ;;  %v9262_v14 = vperm.slane %v6003_v58, 3  ;;  %v1378_v12 = vsel %vm1374_vm13, %v1372_v47, %v1376_v57 }
 0x1d0   : > { %v6465_v26 = vmul.f32 %v6059_v17, %v6366_v46  ;;  %v1503_v38 = vmul.f32 %v6032_v7, %v1501_v2  ;;  %vm1375_vm0 = vcmp.ge.f32.partialorder %v1373_v62, 0.0  ;;  %v1624_v34 = vsel %vm1620_vm15, %v1618_v29, %v1622_v44 }
 0x1d1   : > { %v1113_v41 = vmul.f32 %v6036_v8, %v9262_v14  ;;  %v1983_v27 = vmul.f32 %v6055_v16, %v1977_v61  ;;  %v1261_v9 = vsel %vm768_vm7, %v6450_v0, -inf  ;;  %v9263_v53 = vstv %s6017_s15  ;;  %s7523_s15 = sld [smem:[#allocation5 + $0x2]] }
 0x1d2   : > { %v730_v49 = vmul.f32 %v6205_v56, %v9263_v53  ;;  %v1377_v60 = vmul.f32 0.2, %v1373_v62  ;;  %v6475_v47 = vadd.f32 %v1503_v38, %v6102_v55  ;;  %v726_v46 = vadd.f32 %v724_v45, %v720_v21 }
 0x1d3   : > { %v1380_v37 = vmul.f32 %v6032_v7, %v1378_v12  ;;  %1262 = vmax.xlane.f32.xlu1 %v1261_v9  ;;  %v9264_v29 = vstv %s6022_s27  ;;  %v1626_v44 = vmul.f32 %v6032_v7, %v1624_v34  ;;  %v1868_v25 = vmul.f32 0.2, %v1864_v36  ;;  %s7528_s27 = sld [smem:[#allocation7 + $0x2]] }
 0x1d4   : > { %v736_v57 = vmul.f32 %v6229_v35, %v9264_v29  ;;  %v1379_v10 = vsel %vm1375_vm0, %v1373_v62, %v1377_v60  ;;  %v1507_v32 = vsel %vm768_vm7, %v6475_v47, -inf  ;;  %v9265_v33 = vstv %s5919_s6  ;;  %s4919_s6 = sld [smem:[#allocation2 + $0x2d]] }
 0x1d5   : > { %v1215_v21 = vmul.f32 %v9265_v33, %v6169_v63  ;;  %v9266_v45 = vstv %s5922_s18  ;;  %vm1866_vm3 = vcmp.ge.f32.partialorder %v1864_v36, 0.0  ;;  %v1985_v2 = vadd.f32 %v1983_v27, %v6394_v11  ;;  %1508 = vmax.xlane.f32.xlu2 %v1507_v32  ;;  %s4920_s18 = sld [smem:[#allocation2 + $0x2e]] }
 0x1d6   : > { %v1219_v61 = vmul.f32 %v6172_v5, %v9266_v45  ;;  %v9267_v14 = vmov 0.0   ;;  %v1381_v12 = vmul.f32 %v6036_v8, %v1379_v10  ;;  %v1745_v38 = vmul.f32 0.2, %v1741_v42 }
 0x1d7   : > { %v6493_v62 = vsel %vm545_vm2, -9e+15, %v9267_v14  ;;  %v732_v34 = vadd.f32 %v730_v49, %v726_v46  ;;  %v6497_v9 = vadd.f32 %v1380_v37, %v6102_v55  ;;  %v9269_v53 = vstv %s6184_s12  ;;  %s7535_s12 = scalar_lea.vmem [#allocation8], %s4823_s11  ;;  %s7833_s11 = sld [smem:[#allocation2 + $0x38]] }
 0x1d8   : > { %9268 = vst [vmem:[#allocation38_spill] sm:$0xff] %v6493_v62  ;;  %v1461_v60 = vmul.f32 %v9269_v53, %v6169_v63  ;;  %vm1743_vm4 = vcmp.ge.f32.partialorder %v1741_v42, 0.0  ;;  %v877_v29 = vmul.f32 %v6059_v17, %v874_v6  ;;  %v6504_v11 = vadd.f32 %v1381_v12, %v6493_v62  ;;  %v1120_v45 = vpop.permute.xlu1 %1119 }
 0x1d9   : > { %v9270_v27 = vstv %s6194_s25  ;;  %v1870_v33 = vsel %vm1866_vm3, %v1864_v36, %v1868_v25  ;;  %v9271_v10 = vperm.slane %v6003_v58, 0  ;;  %v6513_v46 = vadd.f32 %v1626_v44, %v6102_v55  ;;  %s7567_s25 = sld [smem:[#allocation5 + $0x4]] }
 0x1da   : > { %v1465_v32 = vmul.f32 %v6172_v5, %v9270_v27  ;;  %v1221_v37 = vadd.f32 %v1219_v61, %v1215_v21  ;;  %v9272_v14 = vstv %s5934_s29  ;;  %v1987_v12 = vadd.f32 %v1985_v2, %v6415_v22  ;;  %v750_v27 = vpop.permute.xlu0 %749  ;;  %s7177_s29 = sld [smem:[#allocation2 + $0x32]] }
 0x1db   : > { %v741_v49 = vmul.f32 %v6036_v8, %v9271_v10  ;;  %v1225_v6 = vmul.f32 %v6205_v56, %v9272_v14  ;;  %v1123_v53 = vmul.f32 %v6059_v17, %v1120_v45  ;;  %v1387_v36 = vsel %vm768_vm7, %v6504_v11, -inf }
 0x1dc   : > { %v1747_v25 = vsel %vm1743_vm4, %v1741_v42, %v1745_v38  ;;  %v738_v52 = vadd.f32 %v736_v57, %v732_v34  ;;  %v753_v10 = vmul.f32 %v6059_v17, %v750_v27  ;;  %1388 = vmax.xlane.f32.xlu0 %v1387_v36  ;;  %v1384_v44 = vsel %vm768_vm7, %v6497_v9, -inf }
 0x1dd   : > { %v1872_v21 = vmul.f32 %v6032_v7, %v1870_v33  ;;  %v879_v22 = vadd.f32 %v877_v29, %v6420_v48  ;;  %v1125_v61 = vadd.f32 %v1123_v53, %v1113_v41  ;;  %1385 = vmax.xlane.f32.xlu1 %v1384_v44  ;;  %v1467_v2 = vadd.f32 %v1465_v32, %v1461_v60 }
 0x1de   : > { %v9276_v45 = vstv %s6220_s20  ;;  %v755_v42 = vadd.f32 %v753_v10, %v741_v49  ;;  %v1630_v57 = vsel %vm768_vm7, %v6513_v46, -inf  ;;  %v9277_v38 = vstv %s9273_s0  ;;  %s7571_s20 = sld [smem:[#allocation5 + $0x5]] }
 0x1df   : > { %v1471_v14 = vmul.f32 %v6205_v56, %v9276_v45  ;;  %v1231_v34 = vmul.f32 %v6229_v35, %v9277_v38  ;;  %v1749_v27 = vmul.f32 %v6032_v7, %v1747_v25  ;;  %v6537_v33 = vadd.f32 %v1125_v61, %v6383_v28  ;;  %1631 = vmax.xlane.f32.xlu2 %v1630_v57  ;;  %v1858_v45 = vpop.permute.xlu2 %1857  ;;  %s7575_s0 = sld [smem:[#allocation5 + $0x3]] }
 0x1e0   : > { %v1227_v48 = vadd.f32 %v1225_v6, %v1221_v37  ;;  %v9278_v41 = vstv %s9274_s7  ;;  %v1991_v29 = vmul.f32 0.2, %v1987_v12  ;;  %v757_v32 = vadd.f32 %v755_v42, %v738_v52  ;;  %s7577_s7 = sld [smem:[#allocation7 + $0x5]] }
 0x1e1   : > { %v1584_v60 = vmul.f32 %v9278_v41, %v6169_v63  ;;  %v6543_v49 = vadd.f32 %v1872_v21, %v6102_v55  ;;  %v9279_v53 = vstv %s9275_s8  ;;  %vm1989_vm5 = vcmp.ge.f32.partialorder %v1987_v12, 0.0  ;;  %s7581_s8 = sld [smem:[#allocation7 + $0x3]] }
 0x1e2   : > { %v1588_v36 = vmul.f32 %v6172_v5, %v9279_v53  ;;  %v1002_v25 = vadd.f32 %v6465_v26, %v6273_v43  ;;  %v881_v28 = vadd.f32 %v879_v22, %v6447_v4  ;;  %v1842_v37 = vadd.f32 %v6426_v3, %v6438_v51  ;;  %v1489_v51 = vpop.permute.xlu1 %1488  ;;  %v1243_v42 = vpop.permute.xlu0 %1242 }
 0x1e3   : > { %v9281_v6 = vstv %s6224_s21  ;;  %v9282_v52 = vperm.slane %v6003_v58, 6  ;;  %v6560_v21 = vadd.f32 %v1749_v27, %v6102_v55  ;;  %vm759_vm6 = vcmp.ge.f32.partialorder %v757_v32, 0.0  ;;  %s9285_s21 = sld [smem:[#allocation30_spill]] }
 0x1e4   : > { %v1477_v10 = vmul.f32 %v6229_v35, %v9281_v6  ;;  %v761_v61 = vmul.f32 0.2, %v757_v32  ;;  %v1473_v43 = vadd.f32 %v1471_v14, %v1467_v2  ;;  %v1233_v26 = vadd.f32 %v1231_v34, %v1227_v48 }
 0x1e5   : > { %v1482_v44 = vmul.f32 %v6036_v8, %v9282_v52  ;;  %v9283_v4 = vperm.slane %v6003_v58, 4  ;;  %v1993_v3 = vsel %vm1989_vm5, %v1987_v12, %v1991_v29  ;;  %v1876_v57 = vsel %vm768_vm7, %v6543_v49, -inf }
 0x1e6   : > { %v1590_v38 = vadd.f32 %v1588_v36, %v1584_v60  ;;  %v9284_v41 = vstv %s9280_s22  ;;  %v763_v53 = vsel %vm759_vm6, %v757_v32, %v761_v61  ;;  %v1492_v2 = vmul.f32 %v6059_v17, %v1489_v51  ;;  %1877 = vmax.xlane.f32.xlu1 %v1876_v57  ;;  %s7585_s22 = sld [smem:[#allocation5 + $0x7]] }
 0x1e7   : > { %v1236_v22 = vmul.f32 %v6036_v8, %v9283_v4  ;;  %v1594_v27 = vmul.f32 %v6205_v56, %v9284_v41  ;;  %v1246_v14 = vmul.f32 %v6059_v17, %v1243_v42  ;;  %v765_v34 = vmul.f32 %v6036_v8, %v763_v53 }
 0x1e8   : > { %v885_v12 = vmul.f32 0.2, %v881_v28  ;;  %v1861_v48 = vmul.f32 %v6059_v17, %v1858_v45  ;;  %v1753_v60 = vsel %vm768_vm7, %v6560_v21, -inf  ;;  %v1995_v29 = vmul.f32 %v6032_v7, %v1993_v3 }
 0x1e9   : > { %vm883_vm8 = vcmp.ge.f32.partialorder %v881_v28, 0.0  ;;  %v1479_v32 = vadd.f32 %v1477_v10, %v1473_v43  ;;  %v1494_v36 = vadd.f32 %v1492_v2, %v1482_v44  ;;  %v1248_v6 = vadd.f32 %v1246_v14, %v1236_v22  ;;  %1754 = vmax.xlane.f32.xlu2 %v1753_v60 }
 0x1ea   : > { %v1004_v52 = vadd.f32 %v1002_v25, %v6284_v31  ;;  %v9288_v61 = vstv %s9285_s21  ;;  %v9289_v51 = vstv %s9286_s24  ;;  %v6585_v42 = vadd.f32 %v765_v34, %v6493_v62  ;;  %s7590_s21 = sld [smem:[#allocation5 + $0x8]] }
 0x1eb   : > { %v1600_v4 = vmul.f32 %v6229_v35, %v9288_v61  ;;  %v1707_v45 = vmul.f32 %v9289_v51, %v6169_v63  ;;  %v1250_v3 = vadd.f32 %v1248_v6, %v1233_v26  ;;  %v1596_v57 = vadd.f32 %v1594_v27, %v1590_v38  ;;  %s7594_s24 = sld [smem:[#allocation5 + $0x9]] }
 0x1ec   : > { %v9291_v41 = vstv %s9287_s13  ;;  %v887_v44 = vsel %vm883_vm8, %v881_v28, %v885_v12  ;;  %v1848_v43 = vadd.f32 %v6431_v50, %v1842_v37  ;;  %v1863_v31 = vadd.f32 %v1861_v48, %v6444_v59  ;;  %v1612_v12 = vpop.permute.xlu1 %1611  ;;  %s7598_s13 = sld [smem:[#allocation5 + $0x6]] }
 0x1ed   : > { %v1711_v10 = vmul.f32 %v6172_v5, %v9291_v41  ;;  %v6593_v25 = vadd.f32 %v1995_v29, %v6102_v55  ;;  %v9292_v22 = vstv %s6245_s2  ;;  %v1496_v2 = vadd.f32 %v1494_v36, %v1479_v32  ;;  %v1735_v29 = vpop.permute.xlu0 %1734  ;;  %s7573_s2 = sld [smem:[#allocation7 + $0x4]] }
 0x1ee   : > { %v1953_v53 = vmul.f32 %v9292_v22, %v6169_v63  ;;  %v9293_v14 = vstv %s6254_s28  ;;  %vm1252_vm9 = vcmp.ge.f32.partialorder %v1250_v3, 0.0  ;;  %v1254_v26 = vmul.f32 0.2, %v1250_v3  ;;  %s7154_s28 = sld [smem:[#allocation2 + $0x31]] }
 0x1ef   : > { %v1957_v34 = vmul.f32 %v6172_v5, %v9293_v14  ;;  %v9294_v38 = vperm.slane %v6003_v58, 7  ;;  %v9295_v27 = vstv %s9290_s16  ;;  %v772_v59 = vsel %vm768_vm7, %v6585_v42, -inf  ;;  %s7602_s16 = sld [smem:[#allocation7 + $0x7]] }
 0x1f0   : > { %v1717_v50 = vmul.f32 %v6205_v56, %v9295_v27  ;;  %v889_v37 = vmul.f32 %v6036_v8, %v887_v44  ;;  %v1602_v63 = vadd.f32 %v1600_v4, %v1596_v57  ;;  %v1713_v48 = vadd.f32 %v1711_v10, %v1707_v45  ;;  %773 = vmax.xlane.f32.xlu1 %v772_v59 }
 0x1f1   : > { %v1605_v28 = vmul.f32 %v6036_v8, %v9294_v38  ;;  %v1256_v5 = vsel %vm1252_vm9, %v1250_v3, %v1254_v26  ;;  %v1008_v60 = vmul.f32 0.2, %v1004_v52  ;;  %v1615_v58 = vmul.f32 %v6059_v17, %v1612_v12 }
 0x1f2   : > { %v1999_v32 = vsel %vm768_vm7, %v6593_v25, -inf  ;;  %v1258_v36 = vmul.f32 %v6036_v8, %v1256_v5  ;;  %vm1006_vm10 = vcmp.ge.f32.partialorder %v1004_v52, 0.0  ;;  %v1865_v6 = vadd.f32 %v1863_v31, %v1848_v43 }
 0x1f3   : > { %2000 = vmax.xlane.f32.xlu2 %v1999_v32  ;;  %v1959_v61 = vadd.f32 %v1957_v34, %v1953_v53  ;;  %v9297_v4 = vstv %s6281_s14  ;;  %v1500_v45 = vmul.f32 0.2, %v1496_v2  ;;  %v1617_v3 = vadd.f32 %v1615_v58, %v1605_v28  ;;  %s4918_s14 = sld [smem:[#allocation2 + $0x2c]] }
 0x1f4   : > { %v1963_v51 = vmul.f32 %v6205_v56, %v9297_v4  ;;  %v6618_v57 = vadd.f32 %v889_v37, %v6493_v62  ;;  %vm1498_vm11 = vcmp.ge.f32.partialorder %v1496_v2, 0.0  ;;  %v1719_v41 = vadd.f32 %v1717_v50, %v1713_v48  ;;  %v1981_v12 = vpop.permute.xlu1 %1980 }
 0x1f5   : > { %v9298_v10 = vstv %s9296_s23  ;;  %v1738_v22 = vmul.f32 %v6059_v17, %v1735_v29  ;;  %v1010_v14 = vsel %vm1006_vm10, %v1004_v52, %v1008_v60  ;;  %v1619_v43 = vadd.f32 %v1617_v3, %v1602_v63  ;;  %s7608_s23 = sld [smem:[#allocation7 + $0x6]] }
 0x1f6   : > { %v1723_v44 = vmul.f32 %v6229_v35, %v9298_v10  ;;  %v9299_v31 = vperm.slane %v6148_v40, 0  ;;  %v6628_v56 = vadd.f32 %v1258_v36, %v6493_v62  ;;  %v1965_v34 = vadd.f32 %v1963_v51, %v1959_v61 }
 0x1f7   : > { %v1969_v26 = vmul.f32 %v6229_v35, %v1967_v39  ;;  %v1502_v38 = vsel %vm1498_vm11, %v1496_v2, %v1500_v45  ;;  %v1869_v28 = vmul.f32 0.2, %v1865_v6  ;;  %v895_v27 = vsel %vm768_vm7, %v6618_v57, -inf }
 0x1f8   : > { %v1728_v53 = vmul.f32 %v6036_v8, %v9299_v31  ;;  %vm1621_vm12 = vcmp.ge.f32.partialorder %v1619_v43, 0.0  ;;  %v1623_v50 = vmul.f32 0.2, %v1619_v43  ;;  %v1012_v52 = vmul.f32 %v6036_v8, %v1010_v14  ;;  %896 = vmax.xlane.f32.xlu1 %v895_v27 }
 0x1f9   : > { %v1725_v59 = vadd.f32 %v1723_v44, %v1719_v41  ;;  %vm1867_vm13 = vcmp.ge.f32.partialorder %v1865_v6, 0.0  ;;  %v1131_v63 = vmul.f32 0.2, %v6537_v33  ;;  %v1264_v48 = vsel %vm768_vm7, %v6628_v56, -inf }
 0x1fa   : > { %v1740_v37 = vadd.f32 %v1738_v22, %v1728_v53  ;;  %v1625_v35 = vsel %vm1621_vm12, %v1619_v43, %v1623_v50  ;;  %v1504_v39 = vmul.f32 %v6036_v8, %v1502_v38  ;;  %vm1129_vm14 = vcmp.ge.f32.partialorder %v6537_v33, 0.0 }
 0x1fb   : > { %v1971_v2 = vadd.f32 %v1969_v26, %v1965_v34  ;;  %v9300_v5 = vperm.slane %v6148_v40, 2  ;;  %v1984_v58 = vmul.f32 %v6059_v17, %v1981_v12  ;;  %1265 = vmax.xlane.f32.xlu2 %v1264_v48  ;;  %v1627_v29 = vmul.f32 %v6036_v8, %v1625_v35 }
 0x1fc   : > { %v6647_v32 = vadd.f32 %v1012_v52, %v6493_v62  ;;  %v1871_v36 = vsel %vm1867_vm13, %v1865_v6, %v1869_v28  ;;  %v1742_v61 = vadd.f32 %v1740_v37, %v1725_v59  ;;  %v1133_v45 = vsel %vm1129_vm14, %v6537_v33, %v1131_v63 }
 0x1fd   : > { %v1974_v60 = vmul.f32 %v6036_v8, %v9300_v5  ;;  %v6650_v51 = vadd.f32 %v1627_v29, %v6493_v62  ;;  %v6654_v3 = vadd.f32 %v1504_v39, %v6493_v62  ;;  %v1873_v44 = vmul.f32 %v6036_v8, %v1871_v36 }
 0x1fe   : > { %v1018_v6 = vsel %vm768_vm7, %v6647_v32, -inf  ;;  %v1135_v22 = vmul.f32 %v6036_v8, %v1133_v45  ;;  %v1746_v43 = vmul.f32 0.2, %v1742_v61  ;;  %vm1744_vm0 = vcmp.ge.f32.partialorder %v1742_v61, 0.0 }
 0x1ff   : > { %v1986_v4 = vadd.f32 %v1984_v58, %v1974_v60  ;;  %v1633_v10 = vsel %vm768_vm7, %v6650_v51, -inf  ;;  %v1510_v33 = vsel %vm768_vm7, %v6654_v3, -inf  ;;  %v6665_v31 = vadd.f32 %v1873_v44, %v6493_v62 }
 0x200   : > { %1634 = vmax.xlane.f32.xlu0 %v1633_v10  ;;  %1019 = vmax.xlane.f32.xlu1 %v1018_v6  ;;  %v6668_v34 = vadd.f32 %v1135_v22, %v6493_v62  ;;  %v1748_v38 = vsel %vm1744_vm0, %v1742_v61, %v1746_v43 }
 0x201   : > { %v1988_v41 = vadd.f32 %v1986_v4, %v1971_v2  ;;  %v1879_v27 = vsel %vm768_vm7, %v6665_v31, -inf  ;;  %v1750_v52 = vmul.f32 %v6036_v8, %v1748_v38 }
 0x202   : > { %v1141_v50 = vsel %vm768_vm7, %v6668_v34, -inf }
 0x203   : > { %vm1990_vm15 = vcmp.ge.f32.partialorder %v1988_v41, 0.0  ;;  %v1992_v14 = vmul.f32 0.2, %v1988_v41  ;;  %1511 = vmax.xlane.f32.xlu2 %v1510_v33  ;;  %v6682_v37 = vadd.f32 %v1750_v52, %v6493_v62 }
 0x205   : > { %v1994_v53 = vsel %vm1990_vm15, %v1988_v41, %v1992_v14  ;;  %v1756_v63 = vsel %vm768_vm7, %v6682_v37, -inf }
 0x206   : > { %v1996_v26 = vmul.f32 %v6036_v8, %v1994_v53 }
 0x208   : > { %v6672_v28 = vadd.f32 %v1996_v26, %v6493_v62  ;;  %1880 = vmax.xlane.f32.xlu0 %v1879_v27  ;;  %1142 = vmax.xlane.f32.xlu1 %v1141_v50 }
 0x20a   : > { %v2002_v59 = vsel %vm768_vm7, %v6672_v28, -inf }
 0x20b   : > { %2003 = vmax.xlane.f32.xlu2 %v2002_v59 }
 0x210   : > { %1757 = vmax.xlane.f32.xlu1 %v1756_v63 }
 0x21c   : > { %v894_v12 = vpop.xlane.xlu2 %893 }
 0x21d   : > { %v898_v48 = vsub.f32 %v6187_v15, %v894_v12 }
 0x21f   : > { %v900_v35 = vmul.f32 1.442695, %v898_v48 }
 0x221   : > { %5224 = vpow2.f32 %v900_v35 }
 0x227   : > { %v6687_v39 = vpop.eup %5224 }
 0x228   : > { %v904_v2 = vsel %vm768_vm7, %v6687_v39, 0.0 }
 0x229   : > { %905 = vadd.xlane.f32.xlu0 %v904_v2 }
 0x234   : > { %v1140_v5 = vpop.xlane.xlu2 %1139 }
 0x235   : > { %v771_v60 = vpop.xlane.xlu1 %770  ;;  %v1144_v29 = vsub.f32 %v6351_v1, %v1140_v5 }
 0x236   : > { %v775_v58 = vsub.f32 %v6361_v24, %v771_v60 }
 0x237   : > { %v1146_v61 = vmul.f32 1.442695, %v1144_v29 }
 0x238   : > { %v777_v36 = vmul.f32 1.442695, %v775_v58 }
 0x23a   : > { %5226 = vpow2.f32 %v777_v36 }
 0x23b   : > { %5228 = vpow2.f32 %v1146_v61 }
 0x23e   : > { %v1017_v4 = vpop.xlane.xlu1 %1016 }
 0x23f   : > { %v1021_v15 = vsub.f32 %v6413_v54, %v1017_v4 }
 0x240   : > { %v6694_v45 = vpop.eup %5226 }
 0x241   : > { %v1023_v41 = vmul.f32 1.442695, %v1021_v15  ;;  %v781_v10 = vsel %vm768_vm7, %v6694_v45, 0.0  ;;  %v6698_v44 = vpop.eup %5228 }
 0x242   : > { %782 = vadd.xlane.f32.xlu2 %v781_v10  ;;  %v1150_v43 = vsel %vm768_vm7, %v6698_v44, 0.0 }
 0x243   : > { %5230 = vpow2.f32 %v1023_v41 }
 0x246   : > { %v1263_v24 = vpop.xlane.xlu1 %1262 }
 0x247   : > { %v1267_v1 = vsub.f32 %v6450_v0, %v1263_v24 }
 0x248   : > { %v1509_v6 = vpop.xlane.xlu2 %1508 }
 0x249   : > { %v6701_v22 = vpop.eup %5230  ;;  %v1269_v14 = vmul.f32 1.442695, %v1267_v1  ;;  %v1513_v54 = vsub.f32 %v6475_v47, %v1509_v6 }
 0x24a   : > { %1151 = vadd.xlane.f32.xlu2 %v1150_v43  ;;  %v1027_v33 = vsel %vm768_vm7, %v6701_v22, 0.0 }
 0x24b   : > { %5232 = vpow2.f32 %v1269_v14  ;;  %1028 = vadd.xlane.f32.xlu1 %v1027_v33  ;;  %v1515_v53 = vmul.f32 1.442695, %v1513_v54 }
 0x24d   : > { %5234 = vpow2.f32 %v1515_v53 }
 0x24f   : > { %v1389_v6 = vpop.xlane.xlu0 %1388 }
 0x250   : > { %v1386_v26 = vpop.xlane.xlu1 %1385 }
 0x251   : > { %v1390_v38 = vsub.f32 %v6497_v9, %v1386_v26  ;;  %v6709_v27 = vpop.eup %5232 }
 0x252   : > { %v1632_v0 = vpop.xlane.xlu2 %1631  ;;  %v1273_v52 = vsel %vm768_vm7, %v6709_v27, 0.0 }
 0x253   : > { %v1392_v50 = vmul.f32 1.442695, %v1390_v38  ;;  %v1636_v47 = vsub.f32 %v6513_v46, %v1632_v0  ;;  %1274 = vadd.xlane.f32.xlu1 %v1273_v52  ;;  %v6714_v12 = vpop.eup %5234 }
 0x254   : > { %9301 = vst [vmem:[#allocation39_spill] sm:$0xff] %v6714_v12  ;;  %v1519_v46 = vsel %vm768_vm7, %v6714_v12, 0.0 }
 0x255   : > { %5236 = vpow2.f32 %v1392_v50  ;;  %v1638_v59 = vmul.f32 1.442695, %v1636_v47 }
 0x257   : > { %5238 = vpow2.f32 %v1638_v59 }
 0x259   : > { %v1878_v63 = vpop.xlane.xlu1 %1877 }
 0x25a   : > { %v1882_v48 = vsub.f32 %v6543_v49, %v1878_v63 }
 0x25b   : > { %v6717_v35 = vpop.eup %5236  ;;  %1520 = vadd.xlane.f32.xlu1 %v1519_v46  ;;  %v5652_v46 = vmov 11  }
 0x25c   : > { %v1755_v9 = vpop.xlane.xlu2 %1754  ;;  %v1884_v2 = vmul.f32 1.442695, %v1882_v48  ;;  %v1396_v60 = vsel %vm768_vm7, %v6717_v35, 0.0  ;;  %5185 = vset.pattern.permute.xlu2 %v5652_v46 }
 0x25d   : > { %v1759_v5 = vsub.f32 %v6560_v21, %v1755_v9  ;;  %v6724_v58 = vpop.eup %5238  ;;  %1397 = vadd.xlane.f32.xlu2 %v1396_v60 }
 0x25e   : > { %5240 = vpow2.f32 %v1884_v2  ;;  %v1642_v49 = vsel %vm768_vm7, %v6724_v58, 0.0 }
 0x25f   : > { %v1761_v29 = vmul.f32 1.442695, %v1759_v5  ;;  %1643 = vadd.xlane.f32.xlu0 %v1642_v49 }
 0x261   : > { %5242 = vpow2.f32 %v1761_v29 }
 0x263   : > { %v774_v36 = vpop.xlane.xlu1 %773 }
 0x264   : > { %v6728_v21 = vpop.eup %5240  ;;  %v776_v15 = vsub.f32 %v6585_v42, %v774_v36 }
 0x265   : > { %v1888_v41 = vsel %vm768_vm7, %v6728_v21, 0.0 }
 0x266   : > { %v2001_v61 = vpop.xlane.xlu2 %2000  ;;  %1889 = vadd.xlane.f32.xlu2 %v1888_v41  ;;  %v779_v14 = vmul.f32 1.442695, %v776_v15 }
 0x267   : > { %v2005_v4 = vsub.f32 %v6593_v25, %v2001_v61  ;;  %v6734_v10 = vpop.eup %5242  ;;  %v1391_v61 = vsub.f32 %v6504_v11, %v1389_v6 }
 0x268   : > { %v1765_v1 = vsel %vm768_vm7, %v6734_v10, 0.0 }
 0x269   : > { %v2007_v24 = vmul.f32 1.442695, %v2005_v4  ;;  %1766 = vadd.xlane.f32.xlu1 %v1765_v1 }
 0x26b   : > { %5244 = vpow2.f32 %v2007_v24  ;;  %v897_v54 = vpop.xlane.xlu1 %896  ;;  %v1394_v24 = vmul.f32 1.442695, %v1391_v61  ;;  %v6815_v61 = vld [vmem:[%s9310_s1] sm:$0xff] }
 0x26c   : > { %v899_v43 = vsub.f32 %v6618_v57, %v897_v54  ;;  %5246 = vpow2.f32 %v779_v14 }
 0x26e   : > { %v1266_v25 = vpop.xlane.xlu2 %1265  ;;  %v902_v33 = vmul.f32 1.442695, %v899_v43 }
 0x26f   : > { %v1268_v42 = vsub.f32 %v6628_v56, %v1266_v25 }
 0x270   : > { %5248 = vpow2.f32 %v902_v33 }
 0x271   : > { %v6740_v53 = vpop.eup %5244  ;;  %v1271_v26 = vmul.f32 1.442695, %v1268_v42 }
 0x272   : > { %9302 = vst [vmem:[#allocation40_spill] sm:$0xff] %v6740_v53  ;;  %v2011_v38 = vsel %vm768_vm7, %v6740_v53, 0.0  ;;  %v6746_v52 = vpop.eup %5246 }
 0x273   : > { %5250 = vpow2.f32 %v1271_v26  ;;  %v1635_v0 = vpop.xlane.xlu0 %1634  ;;  %2012 = vadd.xlane.f32.xlu2 %v2011_v38  ;;  %v1020_v47 = vpop.xlane.xlu1 %1019 }
 0x274   : > { %v1637_v50 = vsub.f32 %v6650_v51, %v1635_v0  ;;  %v1022_v57 = vsub.f32 %v6647_v32, %v1020_v47  ;;  %v784_v51 = vsel %vm768_vm7, %v6746_v52, 0.0 }
 0x276   : > { %v1640_v59 = vmul.f32 1.442695, %v1637_v50  ;;  %v1512_v56 = vpop.xlane.xlu2 %1511  ;;  %v6748_v63 = vpop.eup %5248  ;;  %v1025_v48 = vmul.f32 1.442695, %v1022_v57 }
 0x277   : > { %9303 = vst [vmem:[#allocation41_spill] sm:$0xff] %v6748_v63  ;;  %v1514_v9 = vsub.f32 %v6654_v3, %v1512_v56  ;;  %v907_v2 = vsel %vm768_vm7, %v6748_v63, 0.0  ;;  %v6849_v63 = vld [vmem:[%s9310_s1 + $0x38] sm:$0xff] }
 0x278   : > { %5252 = vpow2.f32 %v1640_v59  ;;  %908 = vadd.xlane.f32.xlu0 %v907_v2  ;;  %9312 = vst [vmem:[#allocation49_spill] sm:$0xff] %v6849_v63 }
 0x279   : > { %v6753_v5 = vpop.eup %5250  ;;  %5254 = vpow2.f32 %v1025_v48  ;;  %v1517_v60 = vmul.f32 1.442695, %v1514_v9 }
 0x27a   : > { %v1276_v32 = vsel %vm768_vm7, %v6753_v5, 0.0 }
 0x27b   : > { %1277 = vadd.xlane.f32.xlu1 %v1276_v32  ;;  %785 = vadd.xlane.f32.xlu2 %v784_v51  ;;  %v1143_v29 = vpop.xlane.xlu1 %1142  ;;  %5256 = vpow2.f32 %v1517_v60  ;;  %v1881_v1 = vpop.xlane.xlu0 %1880 }
 0x27c   : > { %v1145_v3 = vsub.f32 %v6668_v34, %v1143_v29  ;;  %v1883_v11 = vsub.f32 %v6665_v31, %v1881_v1  ;;  %v2074_v29 = vstv %s4918_s14  ;;  %s7612_s14 = sld [smem:[#allocation7 + $0x9]] }
 0x27e   : > { %v6760_v49 = vpop.eup %5252  ;;  %v1148_v4 = vmul.f32 1.442695, %v1145_v3  ;;  %v2004_v34 = vpop.xlane.xlu2 %2003  ;;  %v1886_v26 = vmul.f32 1.442695, %v1883_v11  ;;  %v2078_v3 = vstv %s4919_s6  ;;  %v2090_v11 = vstv %s6812_s17  ;;  %s7616_s6 = sld [smem:[#allocation7 + $0x8]] }
 0x27f   : > { %9304 = vst [vmem:[#allocation42_spill] sm:$0xff] %v6760_v49  ;;  %v6762_v36 = vpop.eup %5254  ;;  %v1645_v41 = vsel %vm768_vm7, %v6760_v49, 0.0  ;;  %v2006_v25 = vsub.f32 %v6672_v28, %v2004_v34  ;;  %s7645_s17 = sld [smem:[#allocation7 + $0xa]] }
 0x280   : > { %v1030_v15 = vsel %vm768_vm7, %v6762_v36, 0.0  ;;  %5258 = vpow2.f32 %v1148_v4  ;;  %v2075_v4 = vmul.f32 %v6815_v61, %v2074_v29 }
 0x281   : > { %v6770_v43 = vpop.eup %5256  ;;  %5260 = vpow2.f32 %v1394_v24  ;;  %v2084_v24 = vstv %s4920_s18  ;;  %s7633_s18 = sld [smem:[#allocation5 + $0xa]] }
 0x282   : > { %9305 = vst [vmem:[#allocation43_spill] sm:$0xff] %v6770_v43  ;;  %v1522_v38 = vsel %vm768_vm7, %v6770_v43, 0.0 }
 0x283   : > { %1646 = vadd.xlane.f32.xlu1 %v1645_v41  ;;  %1031 = vadd.xlane.f32.xlu2 %v1030_v15  ;;  %v1758_v14 = vpop.xlane.xlu1 %1757  ;;  %v6819_v15 = vld [vmem:[%s9310_s1 + $0x10] sm:$0xff] }
 0x284   : > { %v1760_v54 = vsub.f32 %v6682_v37, %v1758_v14  ;;  %v2009_v37 = vmul.f32 1.442695, %v2006_v25  ;;  %v2079_v41 = vmul.f32 %v6819_v15, %v2078_v3  ;;  %v6825_v14 = vld [vmem:[%s9310_s1 + $0x20] sm:$0xff]  ;;  %v2095_v25 = vperm.slane %v6148_v40, 3 }
 0x286   : > { %v6773_v6 = vpop.eup %5258  ;;  %v1763_v33 = vmul.f32 1.442695, %v1760_v54  ;;  %v2081_v34 = vadd.f32 %v2079_v41, %v2075_v4  ;;  %v2085_v54 = vmul.f32 %v6825_v14, %v2084_v24 }
 0x287   : > { %9306 = vst [vmem:[#allocation44_spill] sm:$0xff] %v6773_v6  ;;  %v1153_v42 = vsel %vm768_vm7, %v6773_v6, 0.0  ;;  %v6780_v0 = vpop.eup %5260 }
 0x288   : > { %5262 = vpow2.f32 %v1763_v33  ;;  %1154 = vadd.xlane.f32.xlu0 %v1153_v42  ;;  %9307 = vst [vmem:[#allocation45_spill] sm:$0xff] %v6780_v0  ;;  %v1399_v28 = vsel %vm768_vm7, %v6780_v0, 0.0  ;;  %v2087_v33 = vadd.f32 %v2085_v54, %v2081_v34  ;;  %v6831_v42 = vld [vmem:[%s9310_s1 + $0x30] sm:$0xff]  ;;  %v6845_v54 = vld [vmem:[%s9310_s1 + $0x28] sm:$0xff] }
 0x289   : > { %5264 = vpow2.f32 %v1886_v26  ;;  %v2091_v26 = vmul.f32 %v6831_v42, %v2090_v11  ;;  %9311 = vst [vmem:[#allocation48_spill] sm:$0xff] %v6845_v54  ;;  %v2086_v20 = vmul.f32 %v6845_v54, %v2084_v24 }
 0x28a   : > { %5266 = vpow2.f32 %v2009_v37 }
 0x28b   : > { %1523 = vadd.xlane.f32.xlu2 %v1522_v38  ;;  %v6835_v38 = vld [vmem:[%s9310_s1 + $0x8] sm:$0xff]  ;;  %v2093_v4 = vadd.f32 %v2091_v26, %v2087_v33 }
 0x28c   : > { %v2076_v37 = vmul.f32 %v6835_v38, %v2074_v29  ;;  %v2092_v29 = vmul.f32 %v6849_v63, %v2090_v11 }
 0x28e   : > { %v6782_v31 = vpop.eup %5262 }
 0x28f   : > { %v1768_v50 = vsel %vm768_vm7, %v6782_v31, 0.0  ;;  %v6788_v47 = vpop.eup %5264 }
 0x290   : > { %1400 = vadd.xlane.f32.xlu0 %v1399_v28  ;;  %1769 = vadd.xlane.f32.xlu1 %v1768_v50  ;;  %9308 = vst [vmem:[#allocation46_spill] sm:$0xff] %v6788_v47  ;;  %v6790_v57 = vpop.eup %5266  ;;  %v1891_v59 = vsel %vm768_vm7, %v6788_v47, 0.0  ;;  %v6839_v28 = vld [vmem:[%s9310_s1 + $0x18] sm:$0xff] }
 0x291   : > { %9309 = vst [vmem:[#allocation47_spill] sm:$0xff] %v6790_v57  ;;  %v2014_v56 = vsel %vm768_vm7, %v6790_v57, 0.0  ;;  %v2080_v50 = vmul.f32 %v6839_v28, %v2078_v3  ;;  %v2097_v3 = vmul.f32 %v6036_v8, %v2095_v25 }
 0x293   : > { %v2082_v34 = vadd.f32 %v2080_v50, %v2076_v37 }
 0x295   : > { %v2088_v47 = vadd.f32 %v2086_v20, %v2082_v34 }
 0x297   : > { %v2094_v53 = vadd.f32 %v2092_v29, %v2088_v47 }
 0x298   : > { %1892 = vadd.xlane.f32.xlu0 %v1891_v59  ;;  %2015 = vadd.xlane.f32.xlu1 %v2014_v56  ;;  %v2096_v59 = vmul.f32 %v6032_v7, %v2095_v25 }
 0x29c   : > { %v906_v43 = vpop.xlane.xlu0 %905 }
 0x29d   : > { %vm915_vm9 = vweird.f32 %v906_v43 }
 0x2a3   : > { %2099 = vperm.xlu2 %5185, %v5890_v23  }
 0x2ab   : > { %2103 = vperm.xlu2 %5185, %v5901_v30  }
 0x2b5   : > { %v6798_v48 = vpop.xlane.xlu2 %782 }
 0x2b6   : > { %vm792_vm5 = vweird.f32 %v6798_v48 }
 0x2bd   : > { %v6800_v9 = vpop.xlane.xlu2 %1151 }
 0x2d0   : > { %v6802_v2 = vpop.xlane.xlu2 %1397 }
 0x2d9   : > { %v6804_v32 = vpop.xlane.xlu2 %1889 }
 0x2e6   : > { %v6806_v51 = vpop.xlane.xlu2 %2012 }
 0x2ee   : > { %v6808_v46 = vpop.xlane.xlu2 %785 }
 0x2f6   : > { %v6810_v60 = vpop.xlane.xlu2 %1031 }
 0x2fe   : > { %v6822_v1 = vpop.xlane.xlu2 %1523 }
 0x306   : > { %v2100_v56 = vpop.permute.xlu2 %2099 }
 0x307   : > { %v2106_v41 = vmul.f32 %v6055_v16, %v2100_v56  ;;  %v1411_v16 = vand.u32 2147483647, %v6802_v2 }
 0x309   : > { %v2108_v19 = vadd.f32 %v2106_v41, %v2096_v59 }
 0x30b   : > { %v2110_v57 = vadd.f32 %v2108_v19, %v2093_v4  ;;  %v6860_v4 = vpop.xlane.xlu1 %1028 }
 0x30c   : > { %vm1038_vm14 = vweird.f32 %v6860_v4 }
 0x30d   : > { %vm2112_vm2 = vcmp.ge.f32.partialorder %v2110_v57, 0.0  ;;  %v2114_v26 = vmul.f32 0.2, %v2110_v57 }
 0x30e   : > { %v2104_v49 = vpop.permute.xlu2 %2103 }
 0x30f   : > { %v2107_v33 = vmul.f32 %v6059_v17, %v2104_v49  ;;  %v2116_v50 = vsel %vm2112_vm2, %v2110_v57, %v2114_v26 }
 0x310   : > { %v2118_v56 = vmul.f32 %v6032_v7, %v2116_v50 }
 0x311   : > { %v2109_v37 = vadd.f32 %v2107_v33, %v2097_v3  ;;  %v5653_v33 = vmov 12  }
 0x312   : > { %v2120_v19 = vadd.f32 %v2118_v56, %v6102_v55  ;;  %5186 = vset.pattern.permute.xlu0 %v5653_v33  ;;  %5187 = vset.pattern.permute.xlu1 %v5653_v33 }
 0x313   : > { %v2111_v24 = vadd.f32 %v2109_v37, %v2094_v53  ;;  %v6862_v57 = vpop.xlane.xlu1 %1274 }
 0x314   : > { %v2122_v59 = vsel %vm768_vm7, %v2120_v19, -inf }
 0x315   : > { %vm2113_vm3 = vcmp.ge.f32.partialorder %v2111_v24, 0.0  ;;  %v2115_v20 = vmul.f32 0.2, %v2111_v24  ;;  %2123 = vmax.xlane.f32.xlu1 %v2122_v59 }
 0x317   : > { %v2117_v11 = vsel %vm2113_vm3, %v2111_v24, %v2115_v20  ;;  %vm1284_vm3 = vweird.f32 %v6862_v57 }
 0x318   : > { %v2119_v25 = vmul.f32 %v6036_v8, %v2117_v11 }
 0x31a   : > { %v2121_v47 = vadd.f32 %v2119_v25, %v6493_v62 }
 0x31b   : > { %v6864_v53 = vpop.xlane.xlu1 %1520 }
 0x31c   : > { %v2125_v49 = vsel %vm768_vm7, %v2121_v47, -inf }
 0x31d   : > { %2126 = vmax.xlane.f32.xlu2 %v2125_v49 }
 0x323   : > { %v6866_v41 = vpop.xlane.xlu1 %1766 }
 0x32b   : > { %v6868_v34 = vpop.xlane.xlu1 %1277 }
 0x333   : > { %v6870_v29 = vpop.xlane.xlu1 %1646 }
 0x33b   : > { %v6872_v3 = vpop.xlane.xlu1 %1769 }
 0x343   : > { %v6874_v26 = vpop.xlane.xlu1 %2015 }
 0x344   : > { %9313 = vst [vmem:[#allocation50_spill] sm:$0xff] %v6874_v26 }
 0x388   : > { %v2124_v37 = vpop.xlane.xlu1 %2123 }
 0x389   : > { %v2128_v50 = vsub.f32 %v2120_v19, %v2124_v37 }
 0x38b   : > { %v2130_v56 = vmul.f32 1.442695, %v2128_v50 }
 0x38d   : > { %5268 = vpow2.f32 %v2130_v56 }
 0x390   : > { %v2127_v24 = vpop.xlane.xlu2 %2126 }
 0x391   : > { %v2129_v20 = vsub.f32 %v2121_v47, %v2127_v24 }
 0x393   : > { %v2132_v59 = vmul.f32 1.442695, %v2129_v20  ;;  %v6876_v11 = vpop.eup %5268 }
 0x394   : > { %v2134_v25 = vsel %vm768_vm7, %v6876_v11, 0.0 }
 0x395   : > { %5270 = vpow2.f32 %v2132_v59  ;;  %2135 = vadd.xlane.f32.xlu0 %v2134_v25 }
 0x396   : > { %5272 = vrcp.f32 %v6798_v48 }
 0x397   : > { %5274 = vrcp.f32 %v906_v43 }
 0x398   : > { %5276 = vrcp.f32 %v6860_v4 }
 0x399   : > { %5278 = vrcp.f32 %v6862_v57 }
 0x39a   : > { %5280 = vrcp.f32 %v6808_v46 }
 0x39b   : > { %v6880_v49 = vpop.eup %5270  ;;  %5282 = vrcp.f32 %v6802_v2 }
 0x39c   : > { %9314 = vst [vmem:[#allocation51_spill] sm:$0xff] %v6880_v49  ;;  %v2137_v33 = vsel %vm768_vm7, %v6880_v49, 0.0  ;;  %v5273_v19 = vpop.eup %5272  ;;  %5284 = vrcp.f32 %v6868_v34  ;;  %v6915_v49 = vpop.xlane.xlu0 %1643 }
 0x39d   : > { %2138 = vadd.xlane.f32.xlu1 %v2137_v33  ;;  %v5275_v47 = vpop.eup %5274  ;;  %v788_v37 = vmul.f32 %v5273_v19, %v6798_v48  ;;  %vm793_vm4 = vweird.f32 %v5273_v19  ;;  %5286 = vrcp.f32 %v6915_v49 }
 0x39e   : > { %v911_v50 = vmul.f32 %v5275_v47, %v906_v43  ;;  %v6890_v20 = vpop.eup %5276  ;;  %vm6901_vm6 = vmor %vm792_vm5, %vm793_vm4  ;;  %vm916_vm8 = vweird.f32 %v5275_v47  ;;  %5288 = vrcp.f32 %v6872_v3 }
 0x39f   : > { %v789_v56 = vsub.f32 1.0, %v788_v37  ;;  %v1034_v33 = vmul.f32 %v6890_v20, %v6860_v4  ;;  %v6895_v62 = vpop.eup %5278  ;;  %v798_v37 = vand.u32 2147483648, %v6798_v48  ;;  %vm917_vm11 = vmor %vm915_vm9, %vm916_vm8  ;;  %vm1039_vm13 = vweird.f32 %v6890_v20 }
 0x3a0   : > { %v912_v24 = vsub.f32 1.0, %v911_v50  ;;  %v796_v50 = vand.u32 2147483647, %v6798_v48  ;;  %v6905_v0 = vpop.eup %5280  ;;  %v1280_v26 = vmul.f32 %v6895_v62, %v6862_v57  ;;  %vm6937_vm15 = vmor %vm1038_vm14, %vm1039_vm13  ;;  %vm1285_vm0 = vweird.f32 %v6895_v62 }
 0x3a1   : > { %v790_v59 = vmul.f32 %v5273_v19, %v789_v56  ;;  %v799_v48 = vor.u32 1.1754944e-38, %v798_v37  ;;  %v6917_v56 = vpop.eup %5282  ;;  %5290 = vrcp.f32 %v6866_v41  ;;  %vm6964_vm4 = vmor %vm1284_vm3, %vm1285_vm0  ;;  %vm808_vm5 = vweird.f32 %v6905_v0 }
 0x3a2   : > { %v913_v25 = vmul.f32 %v5275_v47, %v912_v24  ;;  %vm797_vm10 = vcmp.eq.f32.partialorder %v796_v50, 8.507059e+37  ;;  %v1281_v63 = vsub.f32 1.0, %v1280_v26  ;;  %v1044_v26 = vand.u32 2147483648, %v6860_v4 }
 0x3a3   : > { %v1403_v50 = vmul.f32 %v6917_v56, %v6802_v2  ;;  %5292 = vrcp.f32 %v6804_v32  ;;  %vm1412_vm0 = vcmp.eq.f32.partialorder %v1411_v16, 8.507059e+37  ;;  %v1657_v16 = vand.u32 2147483647, %v6915_v49 }
 0x3a4   : > { %v914_v24 = vadd.f32 %v5275_v47, %v913_v25  ;;  %v803_v25 = vmul.f32 %v6905_v0, %v6808_v46  ;;  %5294 = vrcp.f32 %v6800_v9 }
 0x3a5   : > { %5296 = vrcp.f32 %v6864_v53 }
 0x3a6   : > { %v918_v6 = vsel %vm917_vm11, %v5275_v47, %v914_v24  ;;  %v1282_v47 = vmul.f32 %v6895_v62, %v1281_v63  ;;  %vm1407_vm11 = vweird.f32 %v6802_v2  ;;  %5298 = vrcp.f32 %v6810_v60 }
 0x3a9   : > { %2222 = vperm.xlu0 %5186, %v5890_v23   ;;  %v791_v23 = vadd.f32 %v5273_v19, %v790_v59  ;;  %v921_v59 = vand.u32 2147483648, %v906_v43 }
 0x3ab   : > { %v795_v12 = vsel %vm6901_vm6, %v5273_v19, %v791_v23  ;;  %v922_v54 = vor.u32 1.1754944e-38, %v921_v59  ;;  %vm807_vm6 = vweird.f32 %v6808_v46 }
 0x3ac   : > { %v800_v17 = vsel %vm797_vm10, %v799_v48, %v795_v12  ;;  %v6924_v12 = vpop.eup %5284  ;;  %vm6987_vm9 = vmor %vm807_vm6, %vm808_vm5  ;;  %vm1408_vm10 = vweird.f32 %v6917_v56 }
 0x3ad   : > { %v801_v23 = vmul.f32 %v6694_v45, %v800_v17  ;;  %v9186_v17 = vperm.slane %v5865_v13, 1  ;;  %v6954_v59 = vpop.eup %5286  ;;  %vm7006_vm13 = vmor %vm1407_vm11, %vm1408_vm10  ;;  %vm1300_vm14 = vweird.f32 %v6924_v12  ;;  %vm1658_vm10 = vcmp.eq.f32.partialorder %v1657_v16, 8.507059e+37 }
 0x3ae   : > { %v6970_v24 = vpop.eup %5288  ;;  %vm1654_vm3 = vweird.f32 %v6954_v59 }
 0x3b6   : > { %2226 = vperm.xlu1 %5187, %v5901_v30   ;;  %v1035_v30 = vsub.f32 1.0, %v1034_v33  ;;  %v919_v33 = vand.u32 2147483647, %v906_v43  ;;  %v9185_v43 = vperm.slane %v5865_v13, 0 }
 0x3b8   : > { %v1036_v55 = vmul.f32 %v6890_v20, %v1035_v30  ;;  %vm920_vm12 = vcmp.eq.f32.partialorder %v919_v33, 8.507059e+37  ;;  %v804_v30 = vsub.f32 1.0, %v803_v25  ;;  %v1404_v25 = vsub.f32 1.0, %v1403_v50 }
 0x3b9   : > { %v923_v19 = vsel %vm920_vm12, %v922_v54, %v918_v6  ;;  %v1042_v6 = vand.u32 2147483647, %v6860_v4  ;;  %v817_v54 = vmul.f32 %v6032_v7, %v801_v23  ;;  %v820_v4 = vmul.f32 %v6032_v7, %v9185_v43 }
 0x3ba   : > { %v1037_v37 = vadd.f32 %v6890_v20, %v1036_v55  ;;  %v924_v45 = vmul.f32 %v6687_v39, %v923_v19  ;;  %v1065_v55 = vperm.slane %v5865_v13, 2  ;;  %v805_v48 = vmul.f32 %v6905_v0, %v804_v30 }
 0x3bb   : > { %v1295_v39 = vmul.f32 %v6924_v12, %v6868_v34  ;;  %v1045_v23 = vor.u32 1.1754944e-38, %v1044_v26  ;;  %v1283_v19 = vadd.f32 %v6895_v62, %v1282_v47  ;;  %v1290_v30 = vand.u32 2147483648, %v6862_v57 }
 0x3bc   : > { %v1041_v33 = vsel %vm6937_vm15, %v6890_v20, %v1037_v37  ;;  %v940_v63 = vmul.f32 %v6032_v7, %v924_v45  ;;  %v943_v43 = vmul.f32 %v6032_v7, %v9186_v17  ;;  %vm1043_vm2 = vcmp.eq.f32.partialorder %v1042_v6, 8.507059e+37 }
 0x3bd   : > { %v822_v20 = vmul.f32 %v820_v4, %v817_v54  ;;  %v1046_v37 = vsel %vm1043_vm2, %v1045_v23, %v1041_v33  ;;  %v1288_v26 = vand.u32 2147483647, %v6862_v57  ;;  %v1296_v47 = vsub.f32 1.0, %v1295_v39 }
 0x3be   : > { %v806_v45 = vadd.f32 %v6905_v0, %v805_v48  ;;  %v1405_v6 = vmul.f32 %v6917_v56, %v1404_v25  ;;  %v1649_v54 = vmul.f32 %v6954_v59, %v6915_v49  ;;  %v813_v57 = vand.u32 2147483648, %v6808_v46 }
 0x3bf   : > { %v1287_v39 = vsel %vm6964_vm4, %v6895_v62, %v1283_v19  ;;  %v1047_v4 = vmul.f32 %v6701_v22, %v1046_v37  ;;  %v1291_v48 = vor.u32 1.1754944e-38, %v1290_v30  ;;  %v811_v33 = vand.u32 2147483647, %v6808_v46 }
 0x3c0   : > { %v1413_v23 = vand.u32 2147483648, %v6802_v2  ;;  %v824_v25 = vsel %vm768_vm7, %v822_v20, 0.0  ;;  %v1066_v17 = vmul.f32 %v6032_v7, %v1065_v55  ;;  %vm1289_vm8 = vcmp.eq.f32.partialorder %v1288_v26, 8.507059e+37  ;;  %v6999_v26 = vpop.eup %5290 }
 0x3c1   : > { %v1297_v62 = vmul.f32 %v6924_v12, %v1296_v47  ;;  %v1787_v22 = vmul.f32 %v6970_v24, %v6872_v3  ;;  %v1292_v46 = vsel %vm1289_vm8, %v1291_v48, %v1287_v39  ;;  %v810_v19 = vsel %vm6987_vm9, %v6905_v0, %v806_v45 }
 0x3c2   : > { %v1650_v30 = vsub.f32 1.0, %v1649_v54  ;;  %v814_v20 = vor.u32 1.1754944e-38, %v813_v57  ;;  %v1406_v37 = vadd.f32 %v6917_v56, %v1405_v6  ;;  %v945_v47 = vmul.f32 %v943_v43, %v940_v63 }
 0x3c3   : > { %v1063_v50 = vmul.f32 %v6032_v7, %v1047_v4  ;;  %vm812_vm12 = vcmp.eq.f32.partialorder %v811_v33, 8.507059e+37  ;;  %v1293_v39 = vmul.f32 %v6709_v27, %v1292_v46  ;;  %v1414_v0 = vor.u32 1.1754944e-38, %v1413_v23  ;;  %v7078_v46 = vpop.xlane.xlu0 %908 }
 0x3c4   : > { %v815_v48 = vsel %vm812_vm12, %v814_v20, %v810_v19  ;;  %v1788_v45 = vsub.f32 1.0, %v1787_v22  ;;  %v1298_v54 = vadd.f32 %v6924_v12, %v1297_v62  ;;  %v1651_v43 = vmul.f32 %v6954_v59, %v1650_v30 }
 0x3c5   : > { %v1772_v27 = vmul.f32 %v6999_v26, %v6866_v41  ;;  %v1305_v63 = vand.u32 2147483648, %v6868_v34  ;;  %v1410_v2 = vsel %vm7006_vm13, %v6917_v56, %v1406_v37  ;;  %vm1299_vm15 = vweird.f32 %v6868_v34  ;;  %v7038_v37 = vpop.eup %5292 }
 0x3c6   : > { %v1068_v57 = vmul.f32 %v1066_v17, %v1063_v50  ;;  %v816_v4 = vmul.f32 %v6746_v52, %v815_v48  ;;  %v1303_v33 = vand.u32 2147483647, %v6868_v34  ;;  %v947_v23 = vsel %vm768_vm7, %v945_v47, 0.0  ;;  %vm7027_vm2 = vmor %vm1299_vm15, %vm1300_vm14 }
 0x3c7   : > { %v9325_v62 = vperm.slane %v5865_v13, 4  ;;  %v1659_v56 = vand.u32 2147483648, %v6915_v49  ;;  %v1789_v17 = vmul.f32 %v6970_v24, %v1788_v45  ;;  %v1415_v52 = vsel %vm1412_vm0, %v1414_v0, %v1410_v2 }
 0x3c8   : > { %v1302_v34 = vsel %vm7027_vm2, %v6924_v12, %v1298_v54  ;;  %v1773_v19 = vsub.f32 1.0, %v1772_v27  ;;  %v1306_v30 = vor.u32 1.1754944e-38, %v1305_v63  ;;  %v1652_v20 = vadd.f32 %v6954_v59, %v1651_v43 }
 0x3c9   : > { %v1312_v22 = vmul.f32 %v6032_v7, %v9325_v62  ;;  %vm1653_vm4 = vweird.f32 %v6915_v49  ;;  %v1070_v47 = vsel %vm768_vm7, %v1068_v57, 0.0  ;;  %v818_v50 = vmul.f32 %v6036_v8, %v816_v4 }
 0x3ca   : > { %vm1304_vm5 = vcmp.eq.f32.partialorder %v1303_v33, 8.507059e+37  ;;  %v1416_v48 = vmul.f32 %v6717_v35, %v1415_v52  ;;  %v9328_v0 = vperm.slane %v5865_v13, 0  ;;  %vm7048_vm6 = vmor %vm1653_vm4, %vm1654_vm3  ;;  %v1660_v54 = vor.u32 1.1754944e-38, %v1659_v56 }
 0x3cb   : > { %v1307_v12 = vsel %vm1304_vm5, %v1306_v30, %v1302_v34  ;;  %v1790_v43 = vadd.f32 %v6970_v24, %v1789_v17  ;;  %vm1792_vm8 = vweird.f32 %v6970_v24  ;;  %v1895_v27 = vmul.f32 %v7038_v37, %v6804_v32 }
 0x3cc   : > { %v821_v45 = vmul.f32 %v6036_v8, %v9328_v0  ;;  %v1774_v35 = vmul.f32 %v6999_v26, %v1773_v19  ;;  %v1797_v49 = vand.u32 2147483648, %v6872_v3  ;;  %v1656_v63 = vsel %vm7048_vm6, %v6954_v59, %v1652_v20  ;;  %v7095_v0 = vpop.eup %5294 }
 0x3cd   : > { %vm1791_vm9 = vweird.f32 %v6872_v3  ;;  %v1308_v57 = vmul.f32 %v6753_v5, %v1307_v12  ;;  %v1795_v4 = vand.u32 2147483647, %v6872_v3  ;;  %vm1776_vm12 = vweird.f32 %v6866_v41 }
 0x3ce   : > { %v823_v2 = vmul.f32 %v821_v45, %v818_v50  ;;  %vm7069_vm11 = vmor %vm1791_vm9, %vm1792_vm8  ;;  %v1661_v5 = vsel %vm1658_vm10, %v1660_v54, %v1656_v63  ;;  %v1896_v59 = vsub.f32 1.0, %v1895_v27  ;;  %v1798_v56 = vor.u32 1.1754944e-38, %v1797_v49 }
 0x3cf   : > { %v1794_v3 = vsel %vm7069_vm11, %v6970_v24, %v1790_v43  ;;  %v1775_v17 = vadd.f32 %v6999_v26, %v1774_v35  ;;  %vm1777_vm13 = vweird.f32 %v6999_v26  ;;  %v1782_v52 = vand.u32 2147483648, %v6866_v41  ;;  %v7101_v35 = vpop.xlane.xlu0 %1154 }
 0x3d0   : > { %v827_v34 = vsel %vm768_vm7, %v823_v2, 0.0  ;;  %v1310_v19 = vmul.f32 %v6036_v8, %v1308_v57  ;;  %vm1796_vm14 = vcmp.eq.f32.partialorder %v1795_v4, 8.507059e+37  ;;  %v1662_v20 = vmul.f32 %v6724_v58, %v1661_v5  ;;  %vm1778_vm15 = vmor %vm1776_vm12, %vm1777_vm13 }
 0x3d1   : > { %v1799_v24 = vsel %vm1796_vm14, %v1798_v56, %v1794_v3  ;;  %v9334_v50 = vperm.slane %v5865_v13, 4  ;;  %v9190_v12 = vperm.slane %v5865_v13, 7  ;;  %v1779_v16 = vsel %vm1778_vm15, %v6999_v26, %v1775_v17 }
 0x3d2   : > { %v1800_v58 = vmul.f32 %v6782_v31, %v1799_v24  ;;  %v1783_v6 = vor.u32 1.1754944e-38, %v1782_v52  ;;  %v1678_v43 = vmul.f32 %v6032_v7, %v1662_v20  ;;  %vm1900_vm2 = vweird.f32 %v7038_v37 }
 0x3d3   : > { %825 = vadd.xlane.f32.xlu0 %v824_v25  ;;  %v1309_v25 = vmul.f32 %v6032_v7, %v1293_v39  ;;  %v1681_v26 = vmul.f32 %v6032_v7, %v9190_v12  ;;  %v1905_v31 = vand.u32 2147483648, %v6804_v32  ;;  %vm1899_vm3 = vweird.f32 %v6804_v32 }
 0x3d4   : > { %v1802_v2 = vmul.f32 %v6036_v8, %v1800_v58  ;;  %vm1901_vm4 = vmor %vm1899_vm3, %vm1900_vm2  ;;  %v9189_v20 = vperm.slane %v5868_v18, 1  ;;  %vm1162_vm6 = vweird.f32 %v7095_v0  ;;  %vm1161_vm8 = vweird.f32 %v6800_v9 }
 0x3d5   : > { %v1314_v39 = vmul.f32 %v1312_v22, %v1309_v25  ;;  %v9331_v25 = vperm.slane %v5865_v13, 5  ;;  %v1683_v57 = vmul.f32 %v1681_v26, %v1678_v43  ;;  %v1906_v5 = vor.u32 1.1754944e-38, %v1905_v31  ;;  %vm1163_vm9 = vmor %vm1161_vm8, %vm1162_vm6 }
 0x3d6   : > { %5300 = vrcp.f32 %v7101_v35  ;;  %vm1530_vm12 = vweird.f32 %v6864_v53  ;;  %vm1053_vm15 = vweird.f32 %v6810_v60  ;;  %vm1176_vm3 = vweird.f32 %v7101_v35 }
 0x3d7   : > { %v1316_v33 = vsel %vm768_vm7, %v1314_v39, 0.0  ;;  %v1435_v62 = vmul.f32 %v6032_v7, %v9331_v25  ;;  %v1313_v39 = vmul.f32 %v6036_v8, %v9334_v50  ;;  %v1685_v3 = vsel %vm768_vm7, %v1683_v57, 0.0  ;;  %v7123_v52 = vpop.xlane.xlu0 %1400 }
 0x3d8   : > { %5302 = vrcp.f32 %v6806_v51  ;;  %v9191_v57 = vperm.slane %v5865_v13, 6 }
 0x3d9   : > { %v1315_v45 = vmul.f32 %v1313_v39, %v1310_v19  ;;  %5304 = vrcp.f32 %v6822_v1 }
 0x3db   : > { %948 = vadd.xlane.f32.xlu0 %v947_v23  ;;  %v1432_v23 = vmul.f32 %v6032_v7, %v1416_v48  ;;  %v1897_v48 = vmul.f32 %v7038_v37, %v1896_v59  ;;  %v1319_v63 = vsel %vm768_vm7, %v1315_v45, 0.0 }
 0x3dd   : > { %v1437_v30 = vmul.f32 %v1435_v62, %v1432_v23  ;;  %v1898_v49 = vadd.f32 %v7038_v37, %v1897_v48  ;;  %v1157_v23 = vmul.f32 %v7095_v0, %v6800_v9  ;;  %v1927_v48 = vmul.f32 %v6032_v7, %v9189_v20 }
 0x3de   : > { %v1180_v20 = vand.u32 2147483647, %v7101_v35 }
 0x3df   : > { %v1439_v54 = vsel %vm768_vm7, %v1437_v30, 0.0  ;;  %v1902_v62 = vsel %vm1901_vm4, %v7038_v37, %v1898_v49  ;;  %v7127_v30 = vpop.eup %5296 }
 0x3e0   : > { %1071 = vadd.xlane.f32.xlu1 %v1070_v47  ;;  %v1780_v47 = vand.u32 2147483647, %v6866_v41  ;;  %v1803_v41 = vperm.slane %v5868_v18, 0  ;;  %v1526_v50 = vmul.f32 %v7127_v30, %v6864_v53  ;;  %vm1531_vm11 = vweird.f32 %v7127_v30 }
 0x3e1   : > { %vm7201_vm13 = vmor %vm1530_vm12, %vm1531_vm11 }
 0x3e2   : > { %vm1781_vm0 = vcmp.eq.f32.partialorder %v1780_v47, 8.507059e+37  ;;  %v1805_v25 = vmul.f32 %v6036_v8, %v1803_v41  ;;  %v1804_v56 = vmul.f32 %v6032_v7, %v1803_v41  ;;  %v1527_v58 = vsub.f32 1.0, %v1526_v50  ;;  %v7146_v41 = vpop.eup %5298 }
 0x3e3   : > { %1317 = vadd.xlane.f32.xlu0 %v1316_v33  ;;  %v1784_v27 = vsel %vm1781_vm0, %v1783_v6, %v1779_v16  ;;  %v1903_v33 = vand.u32 2147483647, %v6804_v32  ;;  %v1165_v16 = vand.u32 2147483647, %v6800_v9  ;;  %vm1054_vm0 = vweird.f32 %v7146_v41 }
 0x3e4   : > { %v1785_v4 = vmul.f32 %v6734_v10, %v1784_v27  ;;  %v1807_v22 = vmul.f32 %v1805_v25, %v1802_v2  ;;  %v1158_v10 = vsub.f32 1.0, %v1157_v23  ;;  %v1528_v49 = vmul.f32 %v7127_v30, %v1527_v58  ;;  %v7171_v25 = vpop.eup %5300 }
 0x3e5   : > { %vm1904_vm5 = vcmp.eq.f32.partialorder %v1903_v33, 8.507059e+37  ;;  %vm1166_vm10 = vcmp.eq.f32.partialorder %v1165_v16, 8.507059e+37  ;;  %v7164_v2 = vmul.f32 %v6036_v8, %v1065_v55  ;;  %v2218_v33 = vperm.slane %v6148_v40, 4 }
 0x3e6   : > { %v1801_v59 = vmul.f32 %v6032_v7, %v1785_v4  ;;  %v1907_v32 = vsel %vm1904_vm5, %v1906_v5, %v1902_v62  ;;  %v1811_v17 = vsel %vm768_vm7, %v1807_v22, 0.0  ;;  %v1159_v19 = vmul.f32 %v7095_v0, %v1158_v10  ;;  %v7183_v22 = vpop.eup %5302  ;;  %vm7282_vm5 = vmor %vm1053_vm15, %vm1054_vm0 }
 0x3e7   : > { %v1536_v4 = vand.u32 2147483648, %v6864_v53  ;;  %v1529_v23 = vadd.f32 %v7127_v30, %v1528_v49  ;;  %v7220_v50 = vmul.f32 %v7183_v22, %v6806_v51  ;;  %v7229_v16 = vmul.f32 %v6036_v8, %v2218_v33 }
 0x3e8   : > { %828 = vadd.xlane.f32.xlu1 %v827_v34  ;;  %v1806_v37 = vmul.f32 %v1804_v56, %v1801_v59  ;;  %v1908_v34 = vmul.f32 %v6728_v21, %v1907_v32  ;;  %v1160_v39 = vadd.f32 %v7095_v0, %v1159_v19  ;;  %v1167_v21 = vand.u32 2147483648, %v6800_v9 }
 0x3e9   : > { %v1188_v9 = vperm.slane %v5865_v13, 3  ;;  %v1534_v59 = vand.u32 2147483647, %v6864_v53  ;;  %v9335_v56 = vperm.slane %v5865_v13, 5  ;;  %v7208_v53 = vmul.f32 %v6032_v7, %v9191_v57 }
 0x3ea   : > { %v1808_v24 = vsel %vm768_vm7, %v1806_v37, 0.0  ;;  %v1924_v47 = vmul.f32 %v6032_v7, %v1908_v34  ;;  %v1164_v6 = vsel %vm1163_vm9, %v7095_v0, %v1160_v39  ;;  %v1168_v43 = vor.u32 1.1754944e-38, %v1167_v21 }
 0x3eb   : > { %1440 = vadd.xlane.f32.xlu0 %v1439_v54  ;;  %v7144_v54 = vpop.xlane.xlu0 %1892  ;;  %v1049_v0 = vmul.f32 %v7146_v41, %v6810_v60  ;;  %v7180_v55 = vmul.f32 %v6036_v8, %v1188_v9  ;;  %v1189_v62 = vmul.f32 %v6032_v7, %v1188_v9  ;;  %v1172_v34 = vmul.f32 %v7171_v25, %v7101_v35 }
 0x3ec   : > { %v1929_v45 = vmul.f32 %v1927_v48, %v1924_v47  ;;  %v1169_v26 = vsel %vm1166_vm10, %v1168_v43, %v1164_v6  ;;  %v7213_v19 = vmul.f32 %v6032_v7, %v2218_v33  ;;  %v1537_v47 = vor.u32 1.1754944e-38, %v1536_v4 }
 0x3ed   : > { %v1170_v31 = vmul.f32 %v6698_v44, %v1169_v26  ;;  %v1050_v5 = vsub.f32 1.0, %v1049_v0  ;;  %v2197_v39 = vstv %s7152_s19  ;;  %v2201_v21 = vstv %s7154_s28  ;;  %s7674_s19 = sld [smem:[#allocation5 + $0xb]] }
 0x3ee   : > { %v1931_v27 = vsel %vm768_vm7, %v1929_v45, 0.0  ;;  %vm1535_vm14 = vcmp.eq.f32.partialorder %v1534_v59, 8.507059e+37  ;;  %v1057_v43 = vand.u32 2147483647, %v6810_v60  ;;  %v1173_v49 = vsub.f32 1.0, %v1172_v34  ;;  %s7690_s28 = sld [smem:[#allocation7 + $0xb]] }
 0x3ef   : > { %v1051_v48 = vmul.f32 %v7146_v41, %v1050_v5  ;;  %v2198_v9 = vmul.f32 %v6815_v61, %v2197_v39  ;;  %v2202_v0 = vmul.f32 %v6819_v15, %v2201_v21  ;;  %v9192_v4 = vstv %s7177_s29 }
 0x3f0   : > { %1320 = vadd.xlane.f32.xlu1 %v1319_v63  ;;  %v2172_v63 = vperm.slane %v5868_v18, 3  ;;  %v1059_v33 = vand.u32 2147483648, %v6810_v60  ;;  %v1182_v15 = vand.u32 2147483648, %v7101_v35  ;;  %vm7264_vm2 = vcmp.eq.f32.partialorder %v1057_v43, 8.507059e+37 }
 0x3f1   : > { %v1174_v59 = vmul.f32 %v7171_v25, %v1173_v49  ;;  %v2204_v37 = vadd.f32 %v2202_v0, %v2198_v9  ;;  %v2208_v34 = vmul.f32 %v6825_v14, %v9192_v4  ;;  %vm1177_vm6 = vweird.f32 %v7171_v25 }
 0x3f2   : > { %v7189_v10 = vmul.f32 %v6032_v7, %v2172_v63  ;;  %v7192_v32 = vmul.f32 %v6036_v8, %v2172_v63  ;;  %vm1181_vm15 = vcmp.eq.f32.partialorder %v1180_v20, 8.507059e+37 }
 0x3f3   : > { %1686 = vadd.xlane.f32.xlu0 %v1685_v3  ;;  %v1186_v3 = vmul.f32 %v6032_v7, %v1170_v31  ;;  %v2210_v57 = vadd.f32 %v2208_v34, %v2204_v37  ;;  %v1175_v37 = vadd.f32 %v7171_v25, %v1174_v59  ;;  %v9342_v59 = vld [vmem:[#allocation34_spill] sm:$0xff] }
 0x3f5   : > { %v7231_v45 = vmul.f32 %v1189_v62, %v1186_v3  ;;  %v2203_v3 = vmul.f32 %v6839_v28, %v2201_v21 }
 0x3f8   : > { %1812 = vadd.xlane.f32.xlu1 %v1811_v17  ;;  %v7197_v17 = vmul.f32 %v6036_v8, %v9335_v56 }
 0x3fb   : > { %1809 = vadd.xlane.f32.xlu0 %v1808_v24  ;;  %v1533_v24 = vsel %vm7201_vm13, %v7127_v30, %v1529_v23  ;;  %v7233_v30 = vpop.eup %5304  ;;  %v1052_v23 = vadd.f32 %v7146_v41, %v1051_v48  ;;  %v9193_v48 = vstv %s7225_s30  ;;  %vm7321_vm13 = vmor %vm1176_vm3, %vm1177_vm6 }
 0x3fc   : > { %v7262_v62 = vmul.f32 %v7233_v30, %v6822_v1  ;;  %v2214_v58 = vmul.f32 %v6831_v42, %v9193_v48  ;;  %v1179_v28 = vsel %vm7321_vm13, %v7171_v25, %v1175_v37  ;;  %v9349_v37 = vld [vmem:[#allocation49_spill] sm:$0xff] }
 0x3fd   : > { %v1056_v0 = vsel %vm7282_vm5, %v7146_v41, %v1052_v23  ;;  %v1183_v41 = vor.u32 1.1754944e-38, %v1182_v15  ;;  %vm2022_vm5 = vweird.f32 %v6806_v51 }
 0x3fe   : > { %v2216_v15 = vadd.f32 %v2214_v58, %v2210_v57 }
 0x3ff   : > { %v1184_v20 = vsel %vm1181_vm15, %v1183_v41, %v1179_v28  ;;  %v9350_v41 = vld [vmem:[#allocation44_spill] sm:$0xff] }
 0x403   : > { %1932 = vadd.xlane.f32.xlu0 %v1931_v27  ;;  %v7240_v27 = vsel %vm1535_vm14, %v1537_v47, %v1533_v24 }
 0x408   : > { %v7175_v44 = vpop.xlane.xlu0 %2135 }
 0x409   : > { %5306 = vrcp.f32 %v7175_v44  ;;  %v2151_v56 = vand.u32 2147483648, %v7175_v44  ;;  %v2149_v43 = vand.u32 2147483647, %v7175_v44  ;;  %vm2145_vm8 = vweird.f32 %v7175_v44 }
 0x40a   : > { %5308 = vrcp.f32 %v7123_v52 }
 0x40b   : > { %5310 = vrcp.f32 %v7078_v46  ;;  %v2152_v49 = vor.u32 1.1754944e-38, %v2151_v56  ;;  %vm2150_vm10 = vcmp.eq.f32.partialorder %v2149_v43, 8.507059e+37 }
 0x40f   : > { %v5307_v26 = vpop.eup %5306 }
 0x410   : > { %v7237_v6 = vpop.xlane.xlu1 %2138  ;;  %v2141_v63 = vmul.f32 %v5307_v26, %v7175_v44  ;;  %v7257_v61 = vpop.eup %5308  ;;  %vm2146_vm4 = vweird.f32 %v5307_v26 }
 0x411   : > { %5312 = vrcp.f32 %v7237_v6  ;;  %v7274_v24 = vpop.eup %5310  ;;  %v1418_v14 = vmul.f32 %v7257_v61, %v7123_v52  ;;  %vm2147_vm9 = vmor %vm2145_vm8, %vm2146_vm4  ;;  %v2166_v31 = vand.u32 2147483648, %v7237_v6  ;;  %v2164_v56 = vand.u32 2147483647, %v7237_v6 }
 0x412   : > { %5314 = vrcp.f32 %v6870_v29  ;;  %v2142_v5 = vsub.f32 1.0, %v2141_v63  ;;  %v1060_v63 = vor.u32 1.1754944e-38, %v1059_v33  ;;  %vm2160_vm12 = vweird.f32 %v7237_v6 }
 0x413   : > { %vm2165_vm0 = vcmp.eq.f32.partialorder %v2164_v56, 8.507059e+37  ;;  %vm1423_vm3 = vweird.f32 %v7257_v61  ;;  %5316 = vrcp.f32 %v7144_v54 }
 0x414   : > { %v2143_v47 = vmul.f32 %v5307_v26, %v2142_v5  ;;  %v1061_v44 = vsel %vm7264_vm2, %v1060_v63, %v1056_v0  ;;  %vm1422_vm2 = vweird.f32 %v7123_v52 }
 0x415   : > { %v1062_v43 = vmul.f32 %v6762_v36, %v1061_v44  ;;  %v2167_v36 = vor.u32 1.1754944e-38, %v2166_v31  ;;  %vm7364_vm6 = vmor %vm1422_vm2, %vm1423_vm3 }
 0x416   : > { %v2144_v60 = vadd.f32 %v5307_v26, %v2143_v47  ;;  %v1419_v47 = vsub.f32 1.0, %v1418_v14 }
 0x417   : > { %v5313_v9 = vpop.eup %5312  ;;  %v1064_v63 = vmul.f32 %v6036_v8, %v1062_v43 }
 0x418   : > { %v2156_v5 = vmul.f32 %v5313_v9, %v7237_v6  ;;  %v7295_v12 = vpop.eup %5314  ;;  %v2148_v23 = vsel %vm2147_vm9, %v5307_v26, %v2144_v60  ;;  %vm2161_vm11 = vweird.f32 %v5313_v9  ;;  %v2199_v26 = vmul.f32 %v6835_v38, %v2197_v39 }
 0x419   : > { %v2153_v4 = vsel %vm2150_vm10, %v2152_v49, %v2148_v23  ;;  %v1420_v38 = vmul.f32 %v7257_v61, %v1419_v47  ;;  %vm2162_vm14 = vmor %vm2160_vm12, %vm2161_vm11  ;;  %v9345_v6 = vstv %s7177_s29  ;;  %v9347_v49 = vld [vmem:[#allocation51_spill] sm:$0xff]  ;;  %v9348_v47 = vstv %s7225_s30  ;;  %s7739_s29 = sld [smem:[#allocation2 + $0x34]] }
 0x41a   : > { %v2157_v33 = vsub.f32 1.0, %v2156_v5  ;;  %v2154_v42 = vmul.f32 %v6876_v11, %v2153_v4  ;;  %v2205_v35 = vadd.f32 %v2203_v3, %v2199_v26  ;;  %v1069_v56 = vmul.f32 %v7164_v2, %v1064_v63  ;;  %s7741_s30 = sld [smem:[#allocation2 + $0x35]] }
 0x41b   : > { %v2223_v48 = vpop.permute.xlu0 %2222  ;;  %v1421_v23 = vadd.f32 %v7257_v61, %v1420_v38  ;;  %v9351_v3 = vsub.f32 1.0, %v7220_v50  ;;  %vm1546_vm9 = vweird.f32 %v7233_v30  ;;  %vm2023_vm10 = vweird.f32 %v7183_v22 }
 0x41c   : > { %v2158_v34 = vmul.f32 %v5313_v9, %v2157_v33  ;;  %v2229_v14 = vmul.f32 %v9342_v59, %v2223_v48  ;;  %v2170_v11 = vmul.f32 %v6032_v7, %v2154_v42  ;;  %v9346_v48 = vld [vmem:[#allocation48_spill] sm:$0xff]  ;;  %v1185_v42 = vmul.f32 %v9350_v41, %v1184_v20  ;;  %vm7416_vm15 = vmor %vm2022_vm5, %vm2023_vm10 }
 0x41d   : > { %v2209_v0 = vmul.f32 %v9346_v48, %v9345_v6  ;;  %v2020_v43 = vmul.f32 %v7183_v22, %v9351_v3  ;;  %v1425_v38 = vsel %vm7364_vm6, %v7257_v61, %v1421_v23  ;;  %v1073_v6 = vsel %vm768_vm7, %v1069_v56, 0.0 }
 0x41e   : > { %v2159_v4 = vadd.f32 %v5313_v9, %v2158_v34  ;;  %v2231_v39 = vadd.f32 %v2229_v14, %v7213_v19  ;;  %v2175_v21 = vmul.f32 %v7189_v10, %v2170_v11  ;;  %v1542_v19 = vsub.f32 1.0, %v7262_v62 }
 0x41f   : > { %v1428_v10 = vand.u32 2147483648, %v7123_v52  ;;  %v2211_v44 = vadd.f32 %v2209_v0, %v2205_v35  ;;  %v2215_v34 = vmul.f32 %v9349_v37, %v9348_v47  ;;  %v1426_v62 = vand.u32 2147483647, %v7123_v52  ;;  %v9356_v0 = vld [vmem:[#allocation39_spill] sm:$0xff] }
 0x420   : > { %v2163_v58 = vsel %vm2162_vm14, %v5313_v9, %v2159_v4  ;;  %v2233_v31 = vadd.f32 %v2231_v39, %v2216_v15  ;;  %v2177_v60 = vsel %vm768_vm7, %v2175_v21, 0.0  ;;  %v926_v14 = vmul.f32 %v7274_v24, %v7078_v46  ;;  %v9354_v39 = vld [vmem:[#allocation35_spill] sm:$0xff] }
 0x421   : > { %v2168_v5 = vsel %vm2165_vm0, %v2167_v36, %v2163_v58  ;;  %2178 = vadd.xlane.f32.xlu0 %v2177_v60  ;;  %v1664_v11 = vmul.f32 %v7295_v12, %v6870_v29  ;;  %v1429_v36 = vor.u32 1.1754944e-38, %v1428_v10  ;;  %v2217_v28 = vadd.f32 %v2215_v34, %v2211_v44  ;;  %v9355_v58 = vld [vmem:[#allocation37_spill] sm:$0xff]  ;;  %v9357_v10 = vld [vmem:[#allocation50_spill] sm:$0xff] }
 0x422   : > { %v2169_v25 = vmul.f32 %v9347_v49, %v2168_v5  ;;  %vm2235_vm4 = vcmp.ge.f32.partialorder %v2233_v31, 0.0  ;;  %v2237_v33 = vmul.f32 0.2, %v2233_v31  ;;  %v1187_v35 = vmul.f32 %v6036_v8, %v1185_v42  ;;  %v7386_v49 = vpop.eup %5316 }
 0x423   : > { %v1193_v48 = vsel %vm768_vm7, %v7231_v45, 0.0  ;;  %vm1427_vm8 = vcmp.eq.f32.partialorder %v1426_v62, 8.507059e+37  ;;  %v1539_v63 = vmul.f32 %v9356_v0, %v7240_v27  ;;  %v927_v61 = vsub.f32 1.0, %v926_v14 }
 0x424   : > { %v2171_v9 = vmul.f32 %v6036_v8, %v2169_v25  ;;  %v2239_v26 = vsel %vm2235_vm4, %v2233_v31, %v2237_v33  ;;  %v1430_v60 = vsel %vm1427_vm8, %v1429_v36, %v1425_v38  ;;  %v1665_v25 = vsub.f32 1.0, %v1664_v11 }
 0x425   : > { %v2241_v4 = vmul.f32 %v6032_v7, %v2239_v26  ;;  %v1551_v20 = vand.u32 2147483648, %v6822_v1  ;;  %v1192_v27 = vmul.f32 %v7180_v55, %v1187_v35  ;;  %vm1545_vm11 = vweird.f32 %v6822_v1 }
 0x426   : > { %v2176_v15 = vmul.f32 %v7192_v32, %v2171_v9  ;;  %v1543_v32 = vmul.f32 %v7233_v30, %v1542_v19  ;;  %5318 = vrcp.f32 %v9357_v10  ;;  %v9358_v9 = vld [vmem:[#allocation45_spill] sm:$0xff]  ;;  %v1549_v23 = vand.u32 2147483647, %v6822_v1  ;;  %vm7401_vm14 = vmor %vm1545_vm11, %vm1546_vm9 }
 0x427   : > { %v7375_v52 = vadd.f32 %v2241_v4, %v9355_v58  ;;  %v1431_v33 = vmul.f32 %v9358_v9, %v1430_v60  ;;  %vm930_vm12 = vweird.f32 %v7078_v46  ;;  %v1910_v44 = vmul.f32 %v7386_v49, %v7144_v54 }
 0x428   : > { %v2227_v50 = vpop.permute.xlu1 %2226  ;;  %v2180_v57 = vsel %vm768_vm7, %v2176_v15, 0.0  ;;  %v1544_v45 = vadd.f32 %v7233_v30, %v1543_v32  ;;  %v2026_v37 = vand.u32 2147483647, %v6806_v51  ;;  %v928_v34 = vmul.f32 %v7274_v24, %v927_v61  ;;  %v9366_v61 = vld [vmem:[#allocation40_spill] sm:$0xff] }
 0x429   : > { %v2230_v21 = vmul.f32 %v9354_v39, %v2227_v50  ;;  %2181 = vadd.xlane.f32.xlu1 %v2180_v57  ;;  %1074 = vadd.xlane.f32.xlu0 %v1073_v6  ;;  %v2245_v31 = vsel %vm768_vm7, %v7375_v52, -inf  ;;  %v936_v41 = vand.u32 2147483648, %v7078_v46  ;;  %v1666_v42 = vmul.f32 %v7295_v12, %v1665_v25  ;;  %v9364_v57 = vld [vmem:[#allocation38_spill] sm:$0xff]  ;;  %v9365_v6 = vld [vmem:[#allocation43_spill] sm:$0xff] }
 0x42a   : > { %2246 = vmax.xlane.f32.xlu2 %v2245_v31  ;;  %v1548_v1 = vsel %vm7401_vm14, %v7233_v30, %v1544_v45  ;;  %v1196_v56 = vsel %vm768_vm7, %v1192_v27, 0.0  ;;  %v1552_v26 = vor.u32 1.1754944e-38, %v1551_v20  ;;  %v1433_v30 = vmul.f32 %v6036_v8, %v1431_v33 }
 0x42b   : > { %v2232_v5 = vadd.f32 %v2230_v21, %v7229_v16  ;;  %v2021_v16 = vadd.f32 %v7183_v22, %v2020_v43  ;;  %vm1550_vm0 = vcmp.eq.f32.partialorder %v1549_v23, 8.507059e+37  ;;  %v9363_v14 = vand.u32 2147483648, %v6806_v51 }
 0x42c   : > { %v1911_v4 = vsub.f32 1.0, %v1910_v44  ;;  %v1555_v2 = vmul.f32 %v6032_v7, %v1539_v63  ;;  %v1553_v32 = vsel %vm1550_vm0, %v1552_v26, %v1548_v1  ;;  %vm2027_vm2 = vcmp.eq.f32.partialorder %v2026_v37, 8.507059e+37  ;;  %v7429_v50 = vpop.eup %5318  ;;  %v9372_v1 = vld [vmem:[#allocation42_spill] sm:$0xff]  ;;  %v9373_v26 = vld [vmem:[#allocation41_spill] sm:$0xff] }
 0x42d   : > { %v2234_v19 = vadd.f32 %v2232_v5, %v2217_v28  ;;  %v2025_v3 = vsel %vm7416_vm15, %v7183_v22, %v2021_v16  ;;  %v2029_v11 = vor.u32 1.1754944e-38, %v9363_v14  ;;  %v1667_v36 = vadd.f32 %v7295_v12, %v1666_v42 }
 0x42e   : > { %vm1669_vm3 = vweird.f32 %v7295_v12  ;;  %vm1668_vm4 = vweird.f32 %v6870_v29  ;;  %v1674_v51 = vand.u32 2147483648, %v6870_v29  ;;  %v929_v28 = vadd.f32 %v7274_v24, %v928_v34 }
 0x42f   : > { %vm2236_vm13 = vcmp.ge.f32.partialorder %v2234_v19, 0.0  ;;  %v2238_v47 = vmul.f32 0.2, %v2234_v19  ;;  %v2030_v22 = vsel %vm2027_vm2, %v2029_v11, %v2025_v3  ;;  %vm931_vm5 = vweird.f32 %v7274_v24  ;;  %vm7447_vm6 = vmor %vm1668_vm4, %vm1669_vm3 }
 0x430   : > { %v1438_v35 = vmul.f32 %v7197_v17, %v1433_v30  ;;  %v1672_v0 = vand.u32 2147483647, %v6870_v29  ;;  %v1560_v63 = vmul.f32 %v7208_v53, %v1555_v2  ;;  %v2031_v5 = vmul.f32 %v9366_v61, %v2030_v22  ;;  %vm7460_vm8 = vmor %vm930_vm12, %vm931_vm5 }
 0x431   : > { %v2240_v15 = vsel %vm2236_vm13, %v2234_v19, %v2238_v47  ;;  %1197 = vadd.xlane.f32.xlu0 %v1196_v56  ;;  %v934_v60 = vand.u32 2147483647, %v7078_v46  ;;  %v1912_v25 = vmul.f32 %v7386_v49, %v1911_v4  ;;  %v2033_v17 = vmul.f32 %v7429_v50, %v9357_v10 }
 0x432   : > { %v2242_v43 = vmul.f32 %v6036_v8, %v2240_v15  ;;  %1194 = vadd.xlane.f32.xlu2 %v1193_v48  ;;  %v1554_v48 = vmul.f32 %v9365_v6, %v1553_v32  ;;  %v1671_v29 = vsel %vm7447_vm6, %v7295_v12, %v1667_v36  ;;  %v5654_v20 = vmov 13  }
 0x433   : > { %5189 = vset.pattern.permute.xlu1 %v5654_v20  ;;  %5188 = vset.pattern.permute.xlu2 %v5654_v20  ;;  %v9371_v45 = vperm.slane %v5865_v13, 6  ;;  %v2049_v27 = vperm.slane %v5868_v18, 2  ;;  %v1675_v16 = vor.u32 1.1754944e-38, %v1674_v51  ;;  %v933_v12 = vsel %vm7460_vm8, %v7274_v24, %v929_v28 }
 0x434   : > { %v7432_v38 = vadd.f32 %v2242_v43, %v9364_v57  ;;  %v1442_v46 = vsel %vm768_vm7, %v1438_v35, 0.0  ;;  %v1556_v9 = vmul.f32 %v6036_v8, %v1554_v48  ;;  %vm1673_vm9 = vcmp.eq.f32.partialorder %v1672_v0, 8.507059e+37  ;;  %v9377_v48 = vld [vmem:[#allocation46_spill] sm:$0xff] }
 0x435   : > { %v1559_v19 = vmul.f32 %v6036_v8, %v9371_v45  ;;  %v937_v33 = vor.u32 1.1754944e-38, %v936_v41  ;;  %v1562_v23 = vsel %vm768_vm7, %v1560_v63, 0.0  ;;  %v2047_v44 = vmul.f32 %v6032_v7, %v2031_v5 }
 0x436   : > { %v2248_v21 = vsel %vm768_vm7, %v7432_v38, -inf  ;;  %v1676_v47 = vsel %vm1673_vm9, %v1675_v16, %v1671_v29  ;;  %vm935_vm10 = vcmp.eq.f32.partialorder %v934_v60, 8.507059e+37  ;;  %v2034_v55 = vsub.f32 1.0, %v2033_v17 }
 0x437   : > { %2249 = vmax.xlane.f32.xlu1 %v2248_v21  ;;  %v938_v37 = vsel %vm935_vm10, %v937_v33, %v933_v12  ;;  %v1913_v34 = vadd.f32 %v7386_v49, %v1912_v25  ;;  %vm1915_vm11 = vweird.f32 %v7386_v49  ;;  %v1920_v24 = vand.u32 2147483648, %v7144_v54 }
 0x438   : > { %v2050_v41 = vmul.f32 %v6032_v7, %v2049_v27  ;;  %vm1914_vm12 = vweird.f32 %v7144_v54  ;;  %v1561_v42 = vmul.f32 %v1559_v19, %v1556_v9  ;;  %v1677_v62 = vmul.f32 %v9372_v1, %v1676_v47  ;;  %v9381_v9 = vld [vmem:[#allocation47_spill] sm:$0xff]  ;;  %v9382_v47 = vld [vmem:[#allocation24_spill] sm:$0xff] }
 0x439   : > { %1443 = vadd.xlane.f32.xlu0 %v1442_v46  ;;  %v1918_v56 = vand.u32 2147483647, %v7144_v54  ;;  %v939_v3 = vmul.f32 %v9373_v26, %v938_v37  ;;  %vm1916_vm13 = vmor %vm1914_vm12, %vm1915_vm11  ;;  %v2035_v43 = vmul.f32 %v7429_v50, %v2034_v55  ;;  %v1921_v14 = vor.u32 1.1754944e-38, %v1920_v24 }
 0x43a   : > { %1563 = vadd.xlane.f32.xlu2 %v1562_v23  ;;  %v2052_v15 = vmul.f32 %v2050_v41, %v2047_v44  ;;  %v1917_v30 = vsel %vm1916_vm13, %v7386_v49, %v1913_v34  ;;  %v1565_v11 = vsel %vm768_vm7, %v1561_v42, 0.0  ;;  %v1679_v4 = vmul.f32 %v6036_v8, %v1677_v62 }
 0x43b   : > { %vm1919_vm14 = vcmp.eq.f32.partialorder %v1918_v56, 8.507059e+37  ;;  %v941_v2 = vmul.f32 %v6036_v8, %v939_v3  ;;  %v9375_v22 = vperm.slane %v5865_v13, 7  ;;  %v2036_v36 = vadd.f32 %v7429_v50, %v2035_v43 }
 0x43c   : > { %v2054_v54 = vsel %vm768_vm7, %v2052_v15, 0.0  ;;  %v1922_v32 = vsel %vm1919_vm14, %v1921_v14, %v1917_v30  ;;  %vm2038_vm15 = vweird.f32 %v7429_v50  ;;  %vm2037_vm0 = vweird.f32 %v9357_v10 }
 0x43d   : > { %v1682_v49 = vmul.f32 %v6036_v8, %v9375_v22  ;;  %v2043_v51 = vand.u32 2147483648, %v9357_v10  ;;  %v9376_v28 = vperm.slane %v5865_v13, 1  ;;  %v831_v35 = vstv %s7482_s9  ;;  %vm7511_vm2 = vmor %vm2037_vm0, %vm2038_vm15  ;;  %s7743_s9 = sld [smem:[#allocation2 + $0x36]] }
 0x43e   : > { %v1923_v0 = vmul.f32 %v9377_v48, %v1922_v32  ;;  %v2041_v63 = vand.u32 2147483647, %v9357_v10  ;;  %v835_v31 = vstv %s7488_s26  ;;  %v2040_v13 = vsel %vm7511_vm2, %v7429_v50, %v2036_v36  ;;  %s7747_s26 = sld [smem:[#allocation2 + $0x37]] }
 0x43f   : > { %v944_v21 = vmul.f32 %v6036_v8, %v9376_v28  ;;  %v1684_v6 = vmul.f32 %v1682_v49, %v1679_v4  ;;  %v2044_v10 = vor.u32 1.1754944e-38, %v2043_v51  ;;  %vm840_vm4 = vcmask 7168  }
 0x440   : > { %v1925_v29 = vmul.f32 %v6036_v8, %v1923_v0  ;;  %vm2042_vm3 = vcmp.eq.f32.partialorder %v2041_v63, 8.507059e+37  ;;  %v9380_v45 = vperm.slane %v5868_v18, 1  ;;  %v954_v12 = vstv %s7507_s10  ;;  %s4928_s10 = sld [smem:[#allocation5 + $0xc]] }
 0x441   : > { %1566 = vadd.xlane.f32.xlu0 %v1565_v11  ;;  %v946_v61 = vmul.f32 %v944_v21, %v941_v2  ;;  %v1688_v17 = vsel %vm768_vm7, %v1684_v6, 0.0  ;;  %v2045_v50 = vsel %vm2042_vm3, %v2044_v10, %v2040_v13  ;;  %v958_v23 = vstv %s7516_s5  ;;  %s4929_s5 = sld [smem:[#allocation7 + $0xc]] }
 0x442   : > { %2055 = vadd.xlane.f32.xlu2 %v2054_v54  ;;  %v1928_v19 = vmul.f32 %v6036_v8, %v9380_v45  ;;  %v2046_v33 = vmul.f32 %v9381_v9, %v2045_v50  ;;  %v1077_v37 = vstv %s7523_s15  ;;  %v1081_v42 = vstv %s7528_s27  ;;  %s7835_s15 = sld [smem:[#allocation2 + $0x39]] }
 0x443   : > { %v950_v20 = vsel %vm768_vm7, %v946_v61, 0.0  ;;  %vm963_vm5 = vcmask 15368   ;;  %v2051_v56 = vmul.f32 %v6036_v8, %v2049_v27  ;;  %vm1086_vm6 = vcmask 23568   ;;  %s7837_s27 = sld [smem:[#allocation2 + $0x3a]] }
 0x444   : > { %v1930_v46 = vmul.f32 %v1928_v19, %v1925_v29  ;;  %v2048_v24 = vmul.f32 %v6036_v8, %v2046_v33  ;;  %v1323_v48 = vstv %s7567_s25  ;;  %v1446_v61 = vstv %s7571_s20  ;;  %s7841_s25 = sld [smem:[#allocation2 + $0x3b]] }
 0x445   : > { %v1204_v10 = vstv %s7581_s8  ;;  %v1692_v45 = vstv %s7585_s22  ;;  %vm1209_vm8 = vcmask 31768   ;;  %vm1332_vm9 = vcmask 39968   ;;  %s4934_s20 = sld [smem:[#allocation5 + $0xd]] }
 0x446   : > { %v826_v60 = vpop.xlane.xlu0 %825  ;;  %v1934_v34 = vsel %vm768_vm7, %v1930_v46, 0.0  ;;  %v2053_v3 = vmul.f32 %v2051_v56, %v2048_v24  ;;  %v1815_v46 = vstv %s7590_s21  ;;  %vm1455_vm10 = vcmask 48168   ;;  %s7910_s8 = sld [smem:[#allocation2 + $0x3e]] }
 0x447   : > { %v832_v25 = vmul.f32 %v831_v35, %v826_v60  ;;  %vm1578_vm11 = vcmask 56368   ;;  %vm1701_vm12 = vcmask 64568   ;;  %vm1824_vm13 = vcmask 72768   ;;  %s7914_s22 = sld [smem:[#allocation2 + $0x3f]] }
 0x448   : > { %v2057_v30 = vsel %vm768_vm7, %v2053_v3, 0.0  ;;  %v1573_v3 = vstv %s7608_s23  ;;  %vm1947_vm14 = vcmask 80968   ;;  %vm2070_vm15 = vcmask 89168   ;;  %s4940_s21 = sld [smem:[#allocation5 + $0xe]] }
 0x449   : > { %v836_v53 = vadd.f32 %v835_v31, %v832_v25  ;;  %1689 = vadd.xlane.f32.xlu0 %v1688_v17  ;;  %v1450_v25 = vstv %s7577_s7  ;;  %vm2193_vm0 = vcmask 97368   ;;  %s7908_s7 = sld [smem:[#allocation2 + $0x3d]] }
 0x44a   : > { %951 = vadd.xlane.f32.xlu2 %v950_v20  ;;  %s9384_s23 = sld [smem:[#allocation59_spill]] }
 0x44b   : > { %v838_v16 = vmax.f32 %v836_v53, 0.0 }
 0x44d   : > { %841 = vst.msk [vmem:[%s7535_s12] sm:$0xff] %vm840_vm4, %v838_v16 }
 0x44e   : > { %v949_v44 = vpop.xlane.xlu0 %948 }
 0x44f   : > { %v955_v55 = vmul.f32 %v954_v12, %v949_v44 }
 0x450   : > { %2349 = vperm.xlu1 %5189, %v9382_v47  }
 0x451   : > { %v959_v41 = vadd.f32 %v958_v23, %v955_v55  ;;  %1935 = vadd.xlane.f32.xlu0 %v1934_v34  ;;  %v1938_v55 = vstv %s7594_s24  ;;  %s4941_s24 = sld [smem:[#allocation7 + $0xe]] }
 0x453   : > { %v1072_v1 = vpop.xlane.xlu1 %1071  ;;  %v961_v15 = vmax.f32 %v959_v41, 0.0 }
 0x454   : > { %v1078_v62 = vmul.f32 %v1077_v37, %v1072_v1  ;;  %v1569_v1 = vstv %s7598_s13  ;;  %s4970_s13 = sld [smem:[#allocation5 + $0x13]] }
 0x455   : > { %964 = vst.msk [vmem:[%s7535_s12] sm:$0xff] %vm963_vm5, %v961_v15 }
 0x456   : > { %v1082_v26 = vadd.f32 %v1081_v42, %v1078_v62  ;;  %v1318_v27 = vpop.xlane.xlu0 %1317  ;;  %v1696_v62 = vstv %s7602_s16  ;;  %s4971_s16 = sld [smem:[#allocation7 + $0x13]] }
 0x457   : > { %v1324_v5 = vmul.f32 %v1323_v48, %v1318_v27 }
 0x458   : > { %v1084_v43 = vmax.f32 %v1082_v26, 0.0 }
 0x459   : > { %2058 = vadd.xlane.f32.xlu0 %v2057_v30  ;;  %v1942_v30 = vstv %s7612_s14  ;;  %s4946_s14 = sld [smem:[#allocation5 + $0xf]] }
 0x45a   : > { %1087 = vst.msk [vmem:[%s7535_s12] sm:$0xff] %vm1086_vm6, %v1084_v43 }
 0x45b   : > { %v829_v14 = vpop.xlane.xlu1 %828 }
 0x45c   : > { %v833_v11 = vmul.f32 %v831_v35, %v829_v14 }
 0x45e   : > { %v837_v4 = vadd.f32 %v835_v31, %v833_v11  ;;  %v1441_v2 = vpop.xlane.xlu0 %1440  ;;  %v1200_v31 = vstv %s7575_s0  ;;  %s7906_s0 = sld [smem:[#allocation2 + $0x3c]] }
 0x45f   : > { %v1447_v60 = vmul.f32 %v1446_v61, %v1441_v2 }
 0x460   : > { %v839_v54 = vmax.f32 %v837_v4, 0.0  ;;  %v1819_v4 = vstv %s7616_s6  ;;  %s4947_s6 = sld [smem:[#allocation7 + $0xf]] }
 0x461   : > { %v1451_v50 = vadd.f32 %v1450_v25, %v1447_v60 }
 0x462   : > { %842 = vst.msk [vmem:[%s7535_s12 + $0x8] sm:$0xff] %vm840_vm4, %v839_v54 }
 0x463   : > { %v7563_v36 = vpop.xlane.xlu1 %1320 }
 0x466   : > { %v1687_v32 = vpop.xlane.xlu0 %1686 }
 0x467   : > { %v1693_v24 = vmul.f32 %v1692_v45, %v1687_v32 }
 0x469   : > { %v1697_v11 = vadd.f32 %v1696_v62, %v1693_v24 }
 0x46b   : > { %v7569_v28 = vpop.xlane.xlu1 %1812 }
 0x46e   : > { %v1810_v22 = vpop.xlane.xlu0 %1809 }
 0x46f   : > { %v1816_v56 = vmul.f32 %v1815_v46, %v1810_v22 }
 0x471   : > { %v1820_v54 = vadd.f32 %v1819_v4, %v1816_v56 }
 0x476   : > { %v1933_v49 = vpop.xlane.xlu0 %1932 }
 0x477   : > { %v1939_v26 = vmul.f32 %v1938_v55, %v1933_v49  ;;  %v1699_v49 = vmax.f32 %v1697_v11, 0.0 }
 0x479   : > { %v1943_v2 = vadd.f32 %v1942_v30, %v1939_v26 }
 0x47b   : > { %v1945_v60 = vmax.f32 %v1943_v2, 0.0 }
 0x494   : > { %v7565_v51 = vpop.xlane.xlu0 %2178 }
 0x49c   : > { %v7579_v21 = vpop.xlane.xlu0 %1074  ;;  %v7587_v0 = vpop.xlane.xlu1 %2181 }
 0x49d   : > { %v2247_v35 = vpop.xlane.xlu2 %2246 }
 0x49e   : > { %v2251_v6 = vsub.f32 %v7375_v52, %v2247_v35  ;;  %v1327_v52 = vstv %s7573_s2  ;;  %v2061_v35 = vstv %s7633_s18  ;;  %s4935_s2 = sld [smem:[#allocation7 + $0xd]] }
 0x49f   : > { %v1328_v29 = vadd.f32 %v1327_v52, %v1324_v5  ;;  %s4948_s18 = sld [smem:[#allocation2 + $0x40]] }
 0x4a0   : > { %v2253_v63 = vmul.f32 1.442695, %v2251_v6  ;;  %v1822_v6 = vmax.f32 %v1820_v54, 0.0 }
 0x4a1   : > { %v1330_v44 = vmax.f32 %v1328_v29, 0.0 }
 0x4a2   : > { %5320 = vpow2.f32 %v2253_v63 }
 0x4a4   : > { %v7604_v13 = vpop.xlane.xlu0 %1197 }
 0x4a5   : > { %v1195_v17 = vpop.xlane.xlu2 %1194 }
 0x4a6   : > { %v1201_v53 = vmul.f32 %v1200_v31, %v1195_v17  ;;  %v2065_v17 = vstv %s7645_s17  ;;  %s4949_s17 = sld [smem:[#allocation2 + $0x41]] }
 0x4a8   : > { %v7618_v20 = vpop.eup %5320  ;;  %v1205_v19 = vadd.f32 %v1204_v10, %v1201_v53 }
 0x4a9   : > { %v2257_v9 = vsel %vm768_vm7, %v7618_v20, 0.0 }
 0x4aa   : > { %v2250_v16 = vpop.xlane.xlu1 %2249  ;;  %v1207_v34 = vmax.f32 %v1205_v19, 0.0  ;;  %2258 = vadd.xlane.f32.xlu2 %v2257_v9  ;;  %v1202_v9 = vmul.f32 %v1200_v31, %v7604_v13 }
 0x4ab   : > { %v2252_v33 = vsub.f32 %v7432_v38, %v2250_v16  ;;  %v1453_v38 = vmax.f32 %v1451_v50, 0.0  ;;  %v1079_v16 = vmul.f32 %v1077_v37, %v7579_v21 }
 0x4ac   : > { %1210 = vst.msk [vmem:[%s7535_s12] sm:$0xff] %vm1209_vm8, %v1207_v34  ;;  %v1444_v15 = vpop.xlane.xlu0 %1443  ;;  %v1206_v31 = vadd.f32 %v1204_v10, %v1202_v9  ;;  %v2184_v10 = vstv %s7674_s19  ;;  %s4950_s19 = sld [smem:[#allocation2 + $0x42]] }
 0x4ad   : > { %v2255_v41 = vmul.f32 1.442695, %v2252_v33  ;;  %1333 = vst.msk [vmem:[%s7535_s12] sm:$0xff] %vm1332_vm9, %v1330_v44  ;;  %v1564_v43 = vpop.xlane.xlu2 %1563  ;;  %v1325_v44 = vmul.f32 %v1323_v48, %v7563_v36  ;;  %v1448_v24 = vmul.f32 %v1446_v61, %v1444_v15  ;;  %v1083_v21 = vadd.f32 %v1081_v42, %v1079_v16 }
 0x4ae   : > { %1456 = vst.msk [vmem:[%s7535_s12] sm:$0xff] %vm1455_vm10, %v1453_v38  ;;  %v1570_v14 = vmul.f32 %v1569_v1, %v1564_v43  ;;  %v1208_v56 = vmax.f32 %v1206_v31, 0.0  ;;  %v2186_v11 = vmul.f32 %v2184_v10, %v7587_v0  ;;  %v2320_v0 = vstv %s7739_s29  ;;  %s8016_s29 = sld [smem:[#allocation2 + $0x44]] }
 0x4af   : > { %5322 = vpow2.f32 %v2255_v41  ;;  %v1329_v48 = vadd.f32 %v1327_v52, %v1325_v44  ;;  %v1452_v61 = vadd.f32 %v1450_v25, %v1448_v24  ;;  %v2336_v16 = vstv %s7747_s26  ;;  %s8024_s26 = sld [smem:[#allocation2 + $0x47]] }
 0x4b0   : > { %v1574_v27 = vadd.f32 %v1573_v3, %v1570_v14 }
 0x4b1   : > { %v1331_v52 = vmax.f32 %v1329_v48, 0.0  ;;  %v1454_v25 = vmax.f32 %v1452_v61, 0.0 }
 0x4b2   : > { %v1576_v32 = vmax.f32 %v1574_v27, 0.0 }
 0x4b4   : > { %1579 = vst.msk [vmem:[%s7535_s12] sm:$0xff] %vm1578_vm11, %v1576_v32  ;;  %v1567_v63 = vpop.xlane.xlu0 %1566 }
 0x4b5   : > { %v7655_v22 = vpop.eup %5322  ;;  %1702 = vst.msk [vmem:[%s7535_s12] sm:$0xff] %vm1701_vm12, %v1699_v49  ;;  %v2056_v29 = vpop.xlane.xlu2 %2055  ;;  %v1571_v41 = vmul.f32 %v1569_v1, %v1567_v63  ;;  %v1085_v1 = vmax.f32 %v1083_v21, 0.0 }
 0x4b6   : > { %v2260_v5 = vsel %vm768_vm7, %v7655_v22, 0.0  ;;  %1825 = vst.msk [vmem:[%s7535_s12] sm:$0xff] %vm1824_vm13, %v1822_v6  ;;  %v2062_v53 = vmul.f32 %v2061_v35, %v2056_v29  ;;  %v7750_v6 = vld [vmem:[%s9310_s1 + $0x8] sm:$0xff] }
 0x4b7   : > { %2261 = vadd.xlane.f32.xlu2 %v2260_v5  ;;  %1948 = vst.msk [vmem:[%s7535_s12] sm:$0xff] %vm1947_vm14, %v1945_v60  ;;  %v1575_v38 = vadd.f32 %v1573_v3, %v1571_v41  ;;  %v2188_v3 = vstv %s7690_s28  ;;  %v2322_v63 = vmul.f32 %v7750_v6, %v2320_v0  ;;  %v7756_v5 = vld [vmem:[%s9310_s1 + $0x18] sm:$0xff]  ;;  %s4951_s28 = sld [smem:[#allocation2 + $0x43]] }
 0x4b8   : > { %v2066_v50 = vadd.f32 %v2065_v17, %v2062_v53  ;;  %v2190_v54 = vadd.f32 %v2188_v3, %v2186_v11 }
 0x4ba   : > { %v2068_v19 = vmax.f32 %v2066_v50, 0.0  ;;  %v2192_v49 = vmax.f32 %v2190_v54, 0.0  ;;  %v7763_v50 = vld [vmem:[%s9310_s1 + $0x28] sm:$0xff] }
 0x4bc   : > { %2071 = vst.msk [vmem:[%s7535_s12] sm:$0xff] %vm2070_vm15, %v2068_v19  ;;  %v1690_v33 = vpop.xlane.xlu0 %1689 }
 0x4bd   : > { %v952_v34 = vpop.xlane.xlu2 %951  ;;  %v1694_v13 = vmul.f32 %v1692_v45, %v1690_v33  ;;  %v2341_v33 = vperm.slane %v6148_v40, 5 }
 0x4be   : > { %v956_v37 = vmul.f32 %v954_v12, %v952_v34  ;;  %v1817_v12 = vmul.f32 %v1815_v46, %v7569_v28  ;;  %v2185_v46 = vmul.f32 %v2184_v10, %v7565_v51  ;;  %v7771_v34 = vld [vmem:[%s9310_s1 + $0x38] sm:$0xff] }
 0x4bf   : > { %v1698_v45 = vadd.f32 %v1696_v62, %v1694_v13  ;;  %v1577_v62 = vmax.f32 %v1575_v38, 0.0  ;;  %v2338_v24 = vmul.f32 %v7771_v34, %v2336_v16  ;;  %v2343_v41 = vmul.f32 %v6036_v8, %v2341_v33 }
 0x4c0   : > { %v960_v36 = vadd.f32 %v958_v23, %v956_v37  ;;  %v1821_v15 = vadd.f32 %v1819_v4, %v1817_v12  ;;  %v2189_v51 = vadd.f32 %v2188_v3, %v2185_v46 }
 0x4c1   : > { %v1700_v43 = vmax.f32 %v1698_v45, 0.0 }
 0x4c2   : > { %v962_v42 = vmax.f32 %v960_v36, 0.0  ;;  %v1823_v14 = vmax.f32 %v1821_v15, 0.0  ;;  %v2191_v27 = vmax.f32 %v2189_v51, 0.0  ;;  %v2350_v9 = vpop.permute.xlu1 %2349 }
 0x4c3   : > { %v2353_v37 = vmul.f32 %v9354_v39, %v2350_v9  ;;  %v9383_v9 = vld [vmem:[#allocation23_spill] sm:$0xff] }
 0x4c4   : > { %965 = vst.msk [vmem:[%s7535_s12 + $0x8] sm:$0xff] %vm963_vm5, %v962_v42  ;;  %v1936_v23 = vpop.xlane.xlu0 %1935 }
 0x4c5   : > { %1088 = vst.msk [vmem:[%s7535_s12 + $0x8] sm:$0xff] %vm1086_vm6, %v1085_v1  ;;  %v1940_v28 = vmul.f32 %v1938_v55, %v1936_v23  ;;  %v2355_v36 = vadd.f32 %v2353_v37, %v2343_v41  ;;  %v2295_v23 = vperm.slane %v5868_v18, 4  ;;  %v5655_v41 = vmov 14  }
 0x4c6   : > { %1211 = vst.msk [vmem:[%s7535_s12 + $0x8] sm:$0xff] %vm1209_vm8, %v1208_v56  ;;  %5190 = vset.pattern.permute.xlu0 %v5655_v41 }
 0x4c7   : > { %1334 = vst.msk [vmem:[%s7535_s12 + $0x8] sm:$0xff] %vm1332_vm9, %v1331_v52  ;;  %v1944_v26 = vadd.f32 %v1942_v30, %v1940_v28 }
 0x4c8   : > { %1457 = vst.msk [vmem:[%s7535_s12 + $0x8] sm:$0xff] %vm1455_vm10, %v1454_v25 }
 0x4c9   : > { %1580 = vst.msk [vmem:[%s7535_s12 + $0x8] sm:$0xff] %vm1578_vm11, %v1577_v62  ;;  %v1946_v55 = vmax.f32 %v1944_v26, 0.0  ;;  %v2296_v26 = vmul.f32 %v6032_v7, %v2295_v23 }
 0x4ca   : > { %1703 = vst.msk [vmem:[%s7535_s12 + $0x8] sm:$0xff] %vm1701_vm12, %v1700_v43  ;;  %vm2316_vm12 = vcmask 105568  }
 0x4cb   : > { %1826 = vst.msk [vmem:[%s7535_s12 + $0x8] sm:$0xff] %vm1824_vm13, %v1823_v14 }
 0x4cc   : > { %1949 = vst.msk [vmem:[%s7535_s12 + $0x8] sm:$0xff] %vm1947_vm14, %v1946_v55  ;;  %v2059_v30 = vpop.xlane.xlu0 %2058 }
 0x4cd   : > { %v2063_v4 = vmul.f32 %v2061_v35, %v2059_v30  ;;  %2194 = vst.msk [vmem:[%s7535_s12] sm:$0xff] %vm2193_vm0, %v2191_v27  ;;  %v2324_v35 = vstv %s7741_s30  ;;  %s8018_s30 = sld [smem:[#allocation2 + $0x45]] }
 0x4ce   : > { %v2326_v60 = vmul.f32 %v7756_v5, %v2324_v35 }
 0x4cf   : > { %v2067_v2 = vadd.f32 %v2065_v17, %v2063_v4  ;;  %v2330_v17 = vstv %s7743_s9  ;;  %s8020_s9 = sld [smem:[#allocation2 + $0x46]] }
 0x4d0   : > { %v2328_v53 = vadd.f32 %v2326_v60, %v2322_v63  ;;  %v2332_v19 = vmul.f32 %v7763_v50, %v2330_v17  ;;  %v2297_v60 = vmul.f32 %v6036_v8, %v2295_v23 }
 0x4d1   : > { %v2069_v32 = vmax.f32 %v2067_v2, 0.0 }
 0x4d2   : > { %v2334_v44 = vadd.f32 %v2332_v19, %v2328_v53 }
 0x4d3   : > { %2072 = vst.msk [vmem:[%s7535_s12 + $0x8] sm:$0xff] %vm2070_vm15, %v2069_v32 }
 0x4d4   : > { %2195 = vst.msk [vmem:[%s7535_s12 + $0x8] sm:$0xff] %vm2193_vm0, %v2192_v49  ;;  %v2340_v13 = vadd.f32 %v2338_v24, %v2334_v44  ;;  %v2311_v44 = vstv %s4929_s5  ;;  %s4953_s5 = sld [smem:[#allocation7 + $0x10]] }
 0x4d6   : > { %v2357_v38 = vadd.f32 %v2355_v36, %v2340_v13  ;;  %v7796_v36 = vld [vmem:[%s9310_s1] sm:$0xff] }
 0x4d8   : > { %v2361_v15 = vmul.f32 0.2, %v2357_v38  ;;  %vm2359_vm6 = vcmp.ge.f32.partialorder %v2357_v38, 0.0 }
 0x4da   : > { %v2363_v43 = vsel %vm2359_vm6, %v2357_v38, %v2361_v15 }
 0x4db   : > { %v2365_v4 = vmul.f32 %v6036_v8, %v2363_v43 }
 0x4dd   : > { %v2367_v2 = vadd.f32 %v2365_v4, %v9364_v57  ;;  %v2443_v4 = vstv %s7833_s11  ;;  %s8090_s11 = sld [smem:[#allocation2 + $0x48]] }
 0x51d   : > { %v2259_v29 = vpop.xlane.xlu2 %2258 }
 0x51e   : > { %5324 = vrcp.f32 %v2259_v29  ;;  %v2274_v12 = vand.u32 2147483648, %v2259_v29  ;;  %v2272_v1 = vand.u32 2147483647, %v2259_v29  ;;  %vm2268_vm3 = vweird.f32 %v2259_v29 }
 0x520   : > { %v2275_v56 = vor.u32 1.1754944e-38, %v2274_v12  ;;  %vm2273_vm5 = vcmp.eq.f32.partialorder %v2272_v1, 8.507059e+37  ;;  %v7802_v12 = vld [vmem:[%s9310_s1 + $0x10] sm:$0xff] }
 0x524   : > { %v5325_v21 = vpop.eup %5324 }
 0x525   : > { %v2264_v31 = vmul.f32 %v5325_v21, %v2259_v29  ;;  %vm2269_vm2 = vweird.f32 %v5325_v21  ;;  %v2371_v29 = vsel %vm768_vm7, %v2367_v2, -inf }
 0x526   : > { %vm2270_vm4 = vmor %vm2268_vm3, %vm2269_vm2 }
 0x527   : > { %v2265_v48 = vsub.f32 1.0, %v2264_v31 }
 0x529   : > { %v2266_v42 = vmul.f32 %v5325_v21, %v2265_v48  ;;  %v2321_v48 = vmul.f32 %v7796_v36, %v2320_v0 }
 0x52a   : > { %v2262_v61 = vpop.xlane.xlu2 %2261 }
 0x52b   : > { %5326 = vrcp.f32 %v2262_v61  ;;  %v2267_v10 = vadd.f32 %v5325_v21, %v2266_v42  ;;  %v2289_v14 = vand.u32 2147483648, %v2262_v61  ;;  %v2287_v51 = vand.u32 2147483647, %v2262_v61 }
 0x52c   : > { %vm2283_vm9 = vweird.f32 %v2262_v61 }
 0x52d   : > { %v2271_v45 = vsel %vm2270_vm4, %v5325_v21, %v2267_v10  ;;  %v2290_v54 = vor.u32 1.1754944e-38, %v2289_v14  ;;  %vm2288_vm11 = vcmp.eq.f32.partialorder %v2287_v51, 8.507059e+37 }
 0x52e   : > { %v2276_v52 = vsel %vm2273_vm5, %v2275_v56, %v2271_v45  ;;  %v7808_v45 = vld [vmem:[%s9310_s1 + $0x20] sm:$0xff] }
 0x52f   : > { %v2277_v25 = vmul.f32 %v7618_v20, %v2276_v52  ;;  %v2331_v23 = vmul.f32 %v7808_v45, %v2330_v17 }
 0x531   : > { %v5327_v28 = vpop.eup %5326  ;;  %v2293_v62 = vmul.f32 %v6032_v7, %v2277_v25 }
 0x532   : > { %v2279_v46 = vmul.f32 %v5327_v28, %v2262_v61  ;;  %vm2284_vm8 = vweird.f32 %v5327_v28  ;;  %v2325_v61 = vmul.f32 %v7802_v12, %v2324_v35 }
 0x533   : > { %v2298_v55 = vmul.f32 %v2296_v26, %v2293_v62  ;;  %vm2285_vm10 = vmor %vm2283_vm9, %vm2284_vm8  ;;  %v2342_v26 = vmul.f32 %v6032_v7, %v2341_v33  ;;  %v5656_v33 = vmov 15   ;;  %vm2439_vm9 = vcmask 113768  }
 0x534   : > { %v2280_v3 = vsub.f32 1.0, %v2279_v46  ;;  %v2327_v56 = vadd.f32 %v2325_v61, %v2321_v48  ;;  %5192 = vset.pattern.permute.xlu1 %v5656_v33 }
 0x535   : > { %v2300_v30 = vsel %vm768_vm7, %v2298_v55, 0.0 }
 0x536   : > { %v2281_v11 = vmul.f32 %v5327_v28, %v2280_v3  ;;  %2301 = vadd.xlane.f32.xlu0 %v2300_v30  ;;  %v2333_v0 = vadd.f32 %v2331_v23, %v2327_v56 }
 0x538   : > { %v2282_v20 = vadd.f32 %v5327_v28, %v2281_v11 }
 0x53a   : > { %v2286_v27 = vsel %vm2285_vm10, %v5327_v28, %v2282_v20  ;;  %v7814_v28 = vld [vmem:[%s9310_s1 + $0x30] sm:$0xff]  ;;  %v2447_v20 = vstv %s7835_s15  ;;  %s8092_s15 = sld [smem:[#allocation2 + $0x49]] }
 0x53b   : > { %v2291_v32 = vsel %vm2288_vm11, %v2290_v54, %v2286_v27  ;;  %v2337_v25 = vmul.f32 %v7814_v28, %v2336_v16  ;;  %v2445_v54 = vmul.f32 %v7750_v6, %v2443_v4  ;;  %v2449_v27 = vmul.f32 %v7756_v5, %v2447_v20 }
 0x53c   : > { %v2292_v49 = vmul.f32 %v7655_v22, %v2291_v32  ;;  %v2307_v22 = vstv %s4928_s10  ;;  %s4952_s10 = sld [smem:[#allocation5 + $0x10]] }
 0x53d   : > { %v2339_v62 = vadd.f32 %v2337_v25, %v2333_v0 }
 0x53e   : > { %v2294_v63 = vmul.f32 %v6036_v8, %v2292_v49  ;;  %2372 = vmax.xlane.f32.xlu0 %v2371_v29  ;;  %v2459_v29 = vstv %s7841_s25  ;;  %s8098_s25 = sld [smem:[#allocation2 + $0x4b]] }
 0x540   : > { %v2299_v53 = vmul.f32 %v2297_v60, %v2294_v63  ;;  %v2451_v63 = vadd.f32 %v2449_v27, %v2445_v54 }
 0x542   : > { %v2303_v19 = vsel %vm768_vm7, %v2299_v53, 0.0 }
 0x543   : > { %2304 = vadd.xlane.f32.xlu2 %v2303_v19 }
 0x55b   : > { %2345 = vperm.xlu2 %5188, %v9383_v9  }
 0x563   : > { %5191 = vset.pattern.permute.xlu2 %v5655_v41 }
 0x5a9   : > { %v2302_v24 = vpop.xlane.xlu0 %2301 }
 0x5aa   : > { %v2308_v37 = vmul.f32 %v2307_v22, %v2302_v24 }
 0x5ac   : > { %v2312_v21 = vadd.f32 %v2311_v44, %v2308_v37 }
 0x5ae   : > { %v2314_v31 = vmax.f32 %v2312_v21, 0.0 }
 0x5b0   : > { %2317 = vst.msk [vmem:[%s7535_s12] sm:$0xff] %vm2316_vm12, %v2314_v31 }
 0x5b1   : > { %v2373_v13 = vpop.xlane.xlu0 %2372 }
 0x5b2   : > { %v2375_v42 = vsub.f32 %v2367_v2, %v2373_v13  ;;  %v2453_v2 = vstv %s7837_s27  ;;  %s8094_s27 = sld [smem:[#allocation2 + $0x4a]] }
 0x5b3   : > { %v2455_v60 = vmul.f32 %v7763_v50, %v2453_v2 }
 0x5b4   : > { %v2378_v1 = vmul.f32 1.442695, %v2375_v42 }
 0x5b5   : > { %v2457_v19 = vadd.f32 %v2455_v60, %v2451_v63 }
 0x5b6   : > { %v2305_v38 = vpop.xlane.xlu2 %2304  ;;  %5328 = vpow2.f32 %v2378_v1 }
 0x5b7   : > { %v2309_v10 = vmul.f32 %v2307_v22, %v2305_v38  ;;  %v2461_v22 = vmul.f32 %v7771_v34, %v2459_v29 }
 0x5b9   : > { %v2313_v52 = vadd.f32 %v2311_v44, %v2309_v10  ;;  %v2464_v44 = vperm.slane %v6148_v40, 6  ;;  %v2463_v37 = vadd.f32 %v2461_v22, %v2457_v19 }
 0x5bb   : > { %v2315_v15 = vmax.f32 %v2313_v52, 0.0  ;;  %v2466_v21 = vmul.f32 %v6036_v8, %v2464_v44 }
 0x5bc   : > { %v7821_v35 = vpop.eup %5328 }
 0x5bd   : > { %2318 = vst.msk [vmem:[%s7535_s12 + $0x8] sm:$0xff] %vm2316_vm12, %v2315_v15  ;;  %v2383_v3 = vsel %vm768_vm7, %v7821_v35, 0.0 }
 0x5be   : > { %v2346_v46 = vpop.permute.xlu2 %2345  ;;  %2384 = vadd.xlane.f32.xlu1 %v2383_v3 }
 0x5bf   : > { %v2352_v17 = vmul.f32 %v9342_v59, %v2346_v46 }
 0x5c1   : > { %v2354_v43 = vadd.f32 %v2352_v17, %v2342_v26 }
 0x5c3   : > { %v2356_v14 = vadd.f32 %v2354_v43, %v2339_v62 }
 0x5c5   : > { %v2360_v55 = vmul.f32 0.2, %v2356_v14  ;;  %vm2358_vm13 = vcmp.ge.f32.partialorder %v2356_v14, 0.0 }
 0x5c7   : > { %v2362_v16 = vsel %vm2358_vm13, %v2356_v14, %v2360_v55 }
 0x5c8   : > { %v2364_v11 = vmul.f32 %v6032_v7, %v2362_v16 }
 0x5ca   : > { %v2366_v51 = vadd.f32 %v2364_v11, %v9355_v58 }
 0x5cc   : > { %v2368_v30 = vsel %vm768_vm7, %v2366_v51, -inf }
 0x5cd   : > { %2369 = vmax.xlane.f32.xlu2 %v2368_v30 }
 0x5e5   : > { %2472 = vperm.xlu2 %5191, %v9382_v47  }
 0x5ed   : > { %5193 = vset.pattern.permute.xlu2 %v5656_v33 }
 0x631   : > { %v2385_v23 = vpop.xlane.xlu1 %2384 }
 0x632   : > { %vm2406_vm0 = vweird.f32 %v2385_v23  ;;  %v2412_v43 = vand.u32 2147483648, %v2385_v23  ;;  %v2410_v11 = vand.u32 2147483647, %v2385_v23 }
 0x634   : > { %v2413_v54 = vor.u32 1.1754944e-38, %v2412_v43  ;;  %vm2411_vm8 = vcmp.eq.f32.partialorder %v2410_v11, 8.507059e+37 }
 0x640   : > { %v2370_v32 = vpop.xlane.xlu2 %2369 }
 0x641   : > { %v2374_v49 = vsub.f32 %v2366_v51, %v2370_v32  ;;  %v2418_v32 = vperm.slane %v5868_v18, 5 }
 0x643   : > { %v2376_v53 = vmul.f32 1.442695, %v2374_v49  ;;  %v2419_v19 = vmul.f32 %v6032_v7, %v2418_v32 }
 0x645   : > { %5330 = vpow2.f32 %v2376_v53 }
 0x646   : > { %5332 = vrcp.f32 %v2385_v23 }
 0x648   : > { %v2473_v24 = vpop.permute.xlu2 %2472 }
 0x649   : > { %v2476_v41 = vmul.f32 %v9354_v39, %v2473_v24 }
 0x64b   : > { %v5331_v31 = vpop.eup %5330  ;;  %v2478_v13 = vadd.f32 %v2476_v41, %v2466_v21  ;;  %v2420_v41 = vmul.f32 %v6036_v8, %v2418_v32 }
 0x64c   : > { %v2380_v48 = vsel %vm768_vm7, %v5331_v31, 0.0  ;;  %v5333_v52 = vpop.eup %5332 }
 0x64d   : > { %v2480_v61 = vadd.f32 %v2478_v13, %v2463_v37  ;;  %2381 = vadd.xlane.f32.xlu0 %v2380_v48  ;;  %v2402_v15 = vmul.f32 %v5333_v52, %v2385_v23  ;;  %vm2407_vm15 = vweird.f32 %v5333_v52 }
 0x64e   : > { %vm2408_vm3 = vmor %vm2406_vm0, %vm2407_vm15 }
 0x64f   : > { %v2484_v42 = vmul.f32 0.2, %v2480_v61  ;;  %vm2482_vm14 = vcmp.ge.f32.partialorder %v2480_v61, 0.0  ;;  %v2403_v25 = vsub.f32 1.0, %v2402_v15 }
 0x651   : > { %v2486_v1 = vsel %vm2482_vm14, %v2480_v61, %v2484_v42  ;;  %v2404_v46 = vmul.f32 %v5333_v52, %v2403_v25  ;;  %v2434_v61 = vstv %s4935_s2  ;;  %v2448_v25 = vmul.f32 %v7802_v12, %v2447_v20  ;;  %s4959_s2 = sld [smem:[#allocation7 + $0x11]] }
 0x652   : > { %v2488_v38 = vmul.f32 %v6036_v8, %v2486_v1 }
 0x653   : > { %v2405_v3 = vadd.f32 %v5333_v52, %v2404_v46 }
 0x654   : > { %v7865_v10 = vadd.f32 %v2488_v38, %v9364_v57 }
 0x655   : > { %v2409_v30 = vsel %vm2408_vm3, %v5333_v52, %v2405_v3 }
 0x656   : > { %v2494_v56 = vsel %vm768_vm7, %v7865_v10, -inf  ;;  %v2414_v63 = vsel %vm2411_vm8, %v2413_v54, %v2409_v30 }
 0x657   : > { %2495 = vmax.xlane.f32.xlu2 %v2494_v56  ;;  %v2415_v22 = vmul.f32 %v7821_v35, %v2414_v63  ;;  %v2430_v35 = vstv %s4934_s20  ;;  %s4958_s20 = sld [smem:[#allocation5 + $0x11]] }
 0x659   : > { %v2417_v21 = vmul.f32 %v6036_v8, %v2415_v22 }
 0x65b   : > { %v2422_v13 = vmul.f32 %v2420_v41, %v2417_v21 }
 0x65d   : > { %v2426_v48 = vsel %vm768_vm7, %v2422_v13, 0.0 }
 0x66f   : > { %2595 = vperm.xlu2 %5193, %v9382_v47  }
 0x6c0   : > { %v2382_v0 = vpop.xlane.xlu0 %2381 }
 0x6c1   : > { %5334 = vrcp.f32 %v2382_v0  ;;  %v2397_v14 = vand.u32 2147483648, %v2382_v0  ;;  %v2395_v16 = vand.u32 2147483647, %v2382_v0  ;;  %vm2391_vm4 = vweird.f32 %v2382_v0 }
 0x6c3   : > { %v2398_v33 = vor.u32 1.1754944e-38, %v2397_v14  ;;  %vm2396_vm6 = vcmp.eq.f32.partialorder %v2395_v16, 8.507059e+37  ;;  %v2465_v14 = vmul.f32 %v6032_v7, %v2464_v44 }
 0x6c7   : > { %v5335_v62 = vpop.eup %5334 }
 0x6c8   : > { %v2387_v26 = vmul.f32 %v5335_v62, %v2382_v0  ;;  %vm2392_vm2 = vweird.f32 %v5335_v62  ;;  %v2444_v0 = vmul.f32 %v7796_v36, %v2443_v4 }
 0x6c9   : > { %vm2393_vm5 = vmor %vm2391_vm4, %vm2392_vm2 }
 0x6ca   : > { %v2388_v17 = vsub.f32 1.0, %v2387_v26  ;;  %v2450_v46 = vadd.f32 %v2448_v25, %v2444_v0 }
 0x6cc   : > { %v2389_v55 = vmul.f32 %v5335_v62, %v2388_v17  ;;  %v2460_v17 = vmul.f32 %v7814_v28, %v2459_v29  ;;  %v2496_v29 = vpop.xlane.xlu2 %2495 }
 0x6ce   : > { %v2390_v51 = vadd.f32 %v5335_v62, %v2389_v55 }
 0x6d0   : > { %v2394_v27 = vsel %vm2393_vm5, %v5335_v62, %v2390_v51  ;;  %v2454_v62 = vmul.f32 %v7808_v45, %v2453_v2  ;;  %vm2562_vm5 = vcmask 121968  }
 0x6d1   : > { %v2399_v49 = vsel %vm2396_vm6, %v2398_v33, %v2394_v27  ;;  %v2498_v27 = vsub.f32 %v7865_v10, %v2496_v29  ;;  %v2566_v10 = vstv %s7906_s0  ;;  %s8180_s0 = sld [smem:[#allocation2 + $0x4c]] }
 0x6d2   : > { %v2400_v60 = vmul.f32 %v5331_v31, %v2399_v49  ;;  %v2456_v26 = vadd.f32 %v2454_v62, %v2450_v46  ;;  %v2568_v22 = vmul.f32 %v7750_v6, %v2566_v10 }
 0x6d3   : > { %v2501_v32 = vmul.f32 1.442695, %v2498_v27 }
 0x6d4   : > { %v2416_v53 = vmul.f32 %v6032_v7, %v2400_v60  ;;  %v2462_v43 = vadd.f32 %v2460_v17, %v2456_v26 }
 0x6d6   : > { %v2421_v24 = vmul.f32 %v2419_v19, %v2416_v53  ;;  %v2570_v19 = vstv %s7908_s7  ;;  %s8182_s7 = sld [smem:[#allocation2 + $0x4d]] }
 0x6d8   : > { %v2423_v37 = vsel %vm768_vm7, %v2421_v24, 0.0  ;;  %v2572_v24 = vmul.f32 %v7756_v5, %v2570_v19 }
 0x6d9   : > { %2424 = vadd.xlane.f32.xlu0 %v2423_v37  ;;  %v2576_v37 = vstv %s7910_s8  ;;  %s8184_s8 = sld [smem:[#allocation2 + $0x4e]] }
 0x6da   : > { %v2574_v41 = vadd.f32 %v2572_v24, %v2568_v22  ;;  %v2578_v13 = vmul.f32 %v7763_v50, %v2576_v37 }
 0x6e1   : > { %2427 = vadd.xlane.f32.xlu0 %v2426_v48  ;;  %v2582_v48 = vstv %s7914_s22  ;;  %s8189_s22 = sld [smem:[#allocation2 + $0x4f]] }
 0x6f5   : > { %2468 = vperm.xlu0 %5190, %v9383_v9  }
 0x74c   : > { %v2425_v31 = vpop.xlane.xlu0 %2424 }
 0x74d   : > { %v2431_v42 = vmul.f32 %v2430_v35, %v2425_v31  ;;  %v2587_v31 = vperm.slane %v6148_v40, 7 }
 0x74f   : > { %v2435_v1 = vadd.f32 %v2434_v61, %v2431_v42  ;;  %v2584_v42 = vmul.f32 %v7771_v34, %v2582_v48 }
 0x751   : > { %v2437_v38 = vmax.f32 %v2435_v1, 0.0 }
 0x753   : > { %2440 = vst.msk [vmem:[%s7535_s12] sm:$0xff] %vm2439_vm9, %v2437_v38 }
 0x754   : > { %v2428_v56 = vpop.xlane.xlu0 %2427 }
 0x755   : > { %v2432_v23 = vmul.f32 %v2430_v35, %v2428_v56  ;;  %v2596_v35 = vpop.permute.xlu2 %2595  ;;  %v2589_v56 = vmul.f32 %v6036_v8, %v2587_v31 }
 0x756   : > { %v2599_v1 = vmul.f32 %v9354_v39, %v2596_v35 }
 0x757   : > { %v2436_v52 = vadd.f32 %v2434_v61, %v2432_v23  ;;  %v2580_v61 = vadd.f32 %v2578_v13, %v2574_v41 }
 0x758   : > { %v2601_v0 = vadd.f32 %v2599_v1, %v2589_v56  ;;  %v2553_v56 = vstv %s4940_s21  ;;  %s4964_s21 = sld [smem:[#allocation5 + $0x12]] }
 0x759   : > { %v2438_v15 = vmax.f32 %v2436_v52, 0.0 }
 0x75b   : > { %2441 = vst.msk [vmem:[%s7535_s12 + $0x8] sm:$0xff] %vm2439_vm9, %v2438_v15  ;;  %v2586_v15 = vadd.f32 %v2584_v42, %v2580_v61 }
 0x75d   : > { %v2603_v17 = vadd.f32 %v2601_v0, %v2586_v15 }
 0x75f   : > { %vm2605_vm15 = vcmp.ge.f32.partialorder %v2603_v17, 0.0 }
 0x767   : > { %v2469_v3 = vpop.permute.xlu0 %2468 }
 0x768   : > { %v2475_v55 = vmul.f32 %v9342_v59, %v2469_v3 }
 0x76a   : > { %v2477_v4 = vadd.f32 %v2475_v55, %v2465_v14  ;;  %v2541_v55 = vperm.slane %v5868_v18, 6 }
 0x76c   : > { %v2479_v16 = vadd.f32 %v2477_v4, %v2462_v43  ;;  %v2542_v29 = vmul.f32 %v6032_v7, %v2541_v55  ;;  %v2543_v61 = vmul.f32 %v6036_v8, %v2541_v55  ;;  %v5657_v55 = vmov 16  }
 0x76d   : > { %5194 = vset.pattern.permute.xlu0 %v5657_v55 }
 0x76e   : > { %v2483_v11 = vmul.f32 0.2, %v2479_v16  ;;  %vm2481_vm10 = vcmp.ge.f32.partialorder %v2479_v16, 0.0 }
 0x770   : > { %v2485_v20 = vsel %vm2481_vm10, %v2479_v16, %v2483_v11  ;;  %v2607_v11 = vmul.f32 0.2, %v2603_v17 }
 0x771   : > { %v2487_v51 = vmul.f32 %v6032_v7, %v2485_v20 }
 0x773   : > { %v2489_v2 = vadd.f32 %v2487_v51, %v9355_v58 }
 0x775   : > { %v2491_v30 = vsel %vm768_vm7, %v2489_v2, -inf }
 0x776   : > { %2492 = vmax.xlane.f32.xlu1 %v2491_v30 }
 0x7e9   : > { %v2493_v33 = vpop.xlane.xlu1 %2492 }
 0x7ea   : > { %v2497_v54 = vsub.f32 %v2489_v2, %v2493_v33 }
 0x7ec   : > { %v2499_v44 = vmul.f32 1.442695, %v2497_v54 }
 0x7ee   : > { %5336 = vpow2.f32 %v2499_v44  ;;  %v2609_v44 = vsel %vm2605_vm15, %v2603_v17, %v2607_v11  ;;  %v2567_v11 = vmul.f32 %v7796_v36, %v2566_v10 }
 0x7ef   : > { %5338 = vpow2.f32 %v2501_v32 }
 0x7f4   : > { %v5337_v49 = vpop.eup %5336 }
 0x7f5   : > { %v2503_v63 = vsel %vm768_vm7, %v5337_v49, 0.0  ;;  %v7902_v60 = vpop.eup %5338 }
 0x7f6   : > { %2504 = vadd.xlane.f32.xlu1 %v2503_v63  ;;  %v2506_v53 = vsel %vm768_vm7, %v7902_v60, 0.0 }
 0x7fe   : > { %2507 = vadd.xlane.f32.xlu1 %v2506_v53 }
 0x869   : > { %v2505_v21 = vpop.xlane.xlu1 %2504 }
 0x86a   : > { %5340 = vrcp.f32 %v2505_v21  ;;  %v2520_v46 = vand.u32 2147483648, %v2505_v21  ;;  %v2518_v26 = vand.u32 2147483647, %v2505_v21  ;;  %vm2514_vm12 = vweird.f32 %v2505_v21 }
 0x86c   : > { %v2521_v14 = vor.u32 1.1754944e-38, %v2520_v46  ;;  %vm2519_vm14 = vcmp.eq.f32.partialorder %v2518_v26, 8.507059e+37 }
 0x870   : > { %v5341_v38 = vpop.eup %5340 }
 0x871   : > { %v2510_v23 = vmul.f32 %v5341_v38, %v2505_v21  ;;  %v2508_v52 = vpop.xlane.xlu1 %2507  ;;  %vm2515_vm11 = vweird.f32 %v5341_v38 }
 0x872   : > { %5342 = vrcp.f32 %v2508_v52  ;;  %vm2516_vm13 = vmor %vm2514_vm12, %vm2515_vm11  ;;  %v2535_v30 = vand.u32 2147483648, %v2508_v52  ;;  %v2533_v54 = vand.u32 2147483647, %v2508_v52  ;;  %vm2529_vm2 = vweird.f32 %v2508_v52 }
 0x873   : > { %v2511_v25 = vsub.f32 1.0, %v2510_v23 }
 0x874   : > { %v2536_v53 = vor.u32 1.1754944e-38, %v2535_v30  ;;  %vm2534_vm4 = vcmp.eq.f32.partialorder %v2533_v54, 8.507059e+37 }
 0x875   : > { %v2512_v62 = vmul.f32 %v5341_v38, %v2511_v25 }
 0x877   : > { %v2513_v3 = vadd.f32 %v5341_v38, %v2512_v62 }
 0x878   : > { %v5343_v43 = vpop.eup %5342 }
 0x879   : > { %v2525_v4 = vmul.f32 %v5343_v43, %v2508_v52  ;;  %v2517_v16 = vsel %vm2516_vm13, %v5341_v38, %v2513_v3  ;;  %vm2530_vm0 = vweird.f32 %v5343_v43 }
 0x87a   : > { %v2522_v20 = vsel %vm2519_vm14, %v2521_v14, %v2517_v16  ;;  %vm2531_vm3 = vmor %vm2529_vm2, %vm2530_vm0  ;;  %v629_v14 = vld [vmem:[%s9384_s23 + $0x10] sm:$0xff]  ;;  %vm2685_vm0 = vcmask 130168  }
 0x87b   : > { %v2526_v51 = vsub.f32 1.0, %v2525_v4  ;;  %v2523_v2 = vmul.f32 %v5337_v49, %v2522_v20  ;;  %v2611_v49 = vmul.f32 %v6036_v8, %v2609_v44  ;;  %4845 = vmatmul.msk.f32.gmra.mxu2 %vm631_vm1, %v629_v14  ;;  %v2571_v20 = vmul.f32 %v7802_v12, %v2570_v19 }
 0x87d   : > { %v2527_v33 = vmul.f32 %v5343_v43, %v2526_v51  ;;  %v2539_v27 = vmul.f32 %v6032_v7, %v2523_v2  ;;  %v2613_v13 = vadd.f32 %v2611_v49, %v9364_v57  ;;  %v2573_v51 = vadd.f32 %v2571_v20, %v2567_v11 }
 0x87e   : > { %v2577_v2 = vmul.f32 %v7808_v45, %v2576_v37 }
 0x87f   : > { %v2528_v32 = vadd.f32 %v5343_v43, %v2527_v33  ;;  %v2544_v63 = vmul.f32 %v2542_v29, %v2539_v27  ;;  %v2617_v1 = vsel %vm768_vm7, %v2613_v13, -inf  ;;  %v2583_v29 = vmul.f32 %v7814_v28, %v2582_v48 }
 0x880   : > { %v2579_v30 = vadd.f32 %v2577_v2, %v2573_v51  ;;  %v2588_v27 = vmul.f32 %v6032_v7, %v2587_v31 }
 0x881   : > { %v2546_v22 = vsel %vm768_vm7, %v2544_v63, 0.0  ;;  %v2532_v24 = vsel %vm2531_vm3, %v5343_v43, %v2528_v32 }
 0x882   : > { %2547 = vadd.xlane.f32.xlu0 %v2546_v22  ;;  %v2537_v21 = vsel %vm2534_vm4, %v2536_v53, %v2532_v24  ;;  %v2585_v54 = vadd.f32 %v2583_v29, %v2579_v30 }
 0x883   : > { %v2538_v41 = vmul.f32 %v7902_v60, %v2537_v21  ;;  %v2557_v60 = vstv %s4941_s24  ;;  %s4965_s24 = sld [smem:[#allocation7 + $0x12]] }
 0x885   : > { %v2540_v35 = vmul.f32 %v6036_v8, %v2538_v41 }
 0x887   : > { %v2545_v42 = vmul.f32 %v2543_v61, %v2540_v35 }
 0x889   : > { %v2549_v38 = vsel %vm768_vm7, %v2545_v42, 0.0 }
 0x88a   : > { %2618 = vmax.xlane.f32.xlu0 %v2617_v1  ;;  %2550 = vadd.xlane.f32.xlu1 %v2549_v38 }
 0x8a3   : > { %2591 = vperm.xlu1 %5192, %v9383_v9  }
 0x8ab   : > { %5195 = vset.pattern.permute.xlu1 %v5657_v55 }
 0x8f5   : > { %v2548_v23 = vpop.xlane.xlu0 %2547 }
 0x8f6   : > { %v2554_v52 = vmul.f32 %v2553_v56, %v2548_v23 }
 0x8f8   : > { %v2558_v15 = vadd.f32 %v2557_v60, %v2554_v52 }
 0x8fa   : > { %v2560_v0 = vmax.f32 %v2558_v15, 0.0 }
 0x8fc   : > { %2563 = vst.msk [vmem:[%s7535_s12] sm:$0xff] %vm2562_vm5, %v2560_v0 }
 0x8fd   : > { %v2619_v25 = vpop.xlane.xlu0 %2618  ;;  %v2551_v46 = vpop.xlane.xlu1 %2550 }
 0x8fe   : > { %v2621_v62 = vsub.f32 %v2613_v13, %v2619_v25  ;;  %v2555_v26 = vmul.f32 %v2553_v56, %v2551_v46 }
 0x900   : > { %v2624_v17 = vmul.f32 1.442695, %v2621_v62  ;;  %v2559_v3 = vadd.f32 %v2557_v60, %v2555_v26 }
 0x902   : > { %5344 = vpow2.f32 %v2624_v17  ;;  %v2561_v43 = vmax.f32 %v2559_v3, 0.0 }
 0x904   : > { %2564 = vst.msk [vmem:[%s7535_s12 + $0x8] sm:$0xff] %vm2562_vm5, %v2561_v43  ;;  %v2664_v43 = vperm.slane %v5868_v18, 7 }
 0x906   : > { %v2665_v20 = vmul.f32 %v6032_v7, %v2664_v43 }
 0x908   : > { %v7953_v4 = vpop.eup %5344 }
 0x909   : > { %v2629_v16 = vsel %vm768_vm7, %v7953_v4, 0.0 }
 0x90a   : > { %2630 = vadd.xlane.f32.xlu2 %v2629_v16 }
 0x915   : > { %v2592_v33 = vpop.permute.xlu1 %2591 }
 0x916   : > { %v2598_v44 = vmul.f32 %v9342_v59, %v2592_v33  ;;  %v2666_v33 = vmul.f32 %v6036_v8, %v2664_v43 }
 0x918   : > { %v2600_v10 = vadd.f32 %v2598_v44, %v2588_v27  ;;  %v2676_v27 = vstv %s4946_s14  ;;  %v2680_v44 = vstv %s4947_s6  ;;  %s4972_s14 = sld [smem:[#allocation2 + $0x50]] }
 0x919   : > { %s4973_s6 = sld [smem:[#allocation2 + $0x51]] }
 0x91a   : > { %v2602_v32 = vadd.f32 %v2600_v10, %v2585_v54 }
 0x91c   : > { %v2606_v63 = vmul.f32 0.2, %v2602_v32  ;;  %vm2604_vm6 = vcmp.ge.f32.partialorder %v2602_v32, 0.0 }
 0x91e   : > { %v2608_v19 = vsel %vm2604_vm6, %v2602_v32, %v2606_v63 }
 0x91f   : > { %v2610_v53 = vmul.f32 %v6032_v7, %v2608_v19 }
 0x921   : > { %v2612_v37 = vadd.f32 %v2610_v53, %v9355_v58 }
 0x923   : > { %v2614_v22 = vsel %vm768_vm7, %v2612_v37, -inf }
 0x924   : > { %2615 = vmax.xlane.f32.xlu1 %v2614_v22  ;;  %v2693_v22 = vstv %s4949_s17  ;;  %s4975_s17 = sld [smem:[#allocation2 + $0x53]] }
 0x93d   : > { %2718 = vperm.xlu1 %5195, %v9382_v47  }
 0x97d   : > { %v2631_v21 = vpop.xlane.xlu2 %2630 }
 0x97e   : > { %vm2652_vm9 = vweird.f32 %v2631_v21  ;;  %v2658_v23 = vand.u32 2147483648, %v2631_v21  ;;  %v2656_v15 = vand.u32 2147483647, %v2631_v21 }
 0x980   : > { %v2659_v26 = vor.u32 1.1754944e-38, %v2658_v23  ;;  %vm2657_vm14 = vcmp.eq.f32.partialorder %v2656_v15, 8.507059e+37 }
 0x997   : > { %v2616_v48 = vpop.xlane.xlu1 %2615 }
 0x998   : > { %v2620_v40 = vsub.f32 %v2612_v37, %v2616_v48  ;;  %v2689_v37 = vstv %s4948_s18  ;;  %s4974_s18 = sld [smem:[#allocation2 + $0x52]] }
 0x99a   : > { %v2622_v49 = vmul.f32 1.442695, %v2620_v40 }
 0x99c   : > { %5346 = vpow2.f32 %v2622_v49  ;;  %v2691_v49 = vmul.f32 %v7750_v6, %v2689_v37 }
 0x99d   : > { %5348 = vrcp.f32 %v2631_v21 }
 0x9a2   : > { %v5347_v31 = vpop.eup %5346 }
 0x9a3   : > { %v2626_v24 = vsel %vm768_vm7, %v5347_v31, 0.0  ;;  %v5349_v41 = vpop.eup %5348 }
 0x9a4   : > { %2627 = vadd.xlane.f32.xlu0 %v2626_v24  ;;  %v2648_v13 = vmul.f32 %v5349_v41, %v2631_v21  ;;  %vm2653_vm8 = vweird.f32 %v5349_v41  ;;  %v7990_v24 = vpop.f32.mrf.mxu2  ;;  %v2699_v21 = vstv %s4950_s19  ;;  %s4976_s19 = sld [smem:[#allocation5 + $0x14]] }
 0x9a5   : > { %vm2654_vm11 = vmor %vm2652_vm9, %vm2653_vm8  ;;  %v2700_v6 = vmul.f32 %v7808_v45, %v2699_v21 }
 0x9a6   : > { %v2649_v61 = vsub.f32 1.0, %v2648_v13  ;;  %v2694_v13 = vmul.f32 %v7802_v12, %v2693_v22 }
 0x9a8   : > { %v2650_v42 = vmul.f32 %v5349_v41, %v2649_v61  ;;  %v2701_v61 = vmul.f32 %v7763_v50, %v2699_v21  ;;  %v2812_v21 = vstv %s8016_s29  ;;  %s4978_s29 = sld [smem:[#allocation2 + $0x54]] }
 0x9aa   : > { %v2651_v56 = vadd.f32 %v5349_v41, %v2650_v42  ;;  %v2710_v42 = vperm.slane %v7990_v24, 0 }
 0x9ac   : > { %v2655_v62 = vsel %vm2654_vm11, %v5349_v41, %v2651_v56  ;;  %v2690_v41 = vmul.f32 %v7796_v36, %v2689_v37  ;;  %v2712_v23 = vmul.f32 %v6036_v8, %v2710_v42  ;;  %v2711_v50 = vmul.f32 %v6032_v7, %v2710_v42  ;;  %v8027_v42 = vld [vmem:[%s9310_s1 + $0x8] sm:$0xff] }
 0x9ad   : > { %v2660_v55 = vsel %vm2657_vm14, %v2659_v26, %v2655_v62  ;;  %vm2808_vm14 = vcmask 138368  }
 0x9ae   : > { %v2661_v51 = vmul.f32 %v7953_v4, %v2660_v55  ;;  %v2696_v56 = vadd.f32 %v2694_v13, %v2690_v41  ;;  %v2816_v41 = vstv %s8018_s30  ;;  %s4979_s30 = sld [smem:[#allocation2 + $0x55]] }
 0x9b0   : > { %v2663_v29 = vmul.f32 %v6036_v8, %v2661_v51  ;;  %v2702_v15 = vadd.f32 %v2700_v6, %v2696_v56 }
 0x9b2   : > { %v2668_v54 = vmul.f32 %v2666_v33, %v2663_v29 }
 0x9b4   : > { %v2672_v18 = vsel %vm768_vm7, %v2668_v54, 0.0  ;;  %v5658_v54 = vmov 17  }
 0x9b5   : > { %5197 = vset.pattern.permute.xlu1 %v5658_v54  ;;  %5196 = vset.pattern.permute.xlu2 %v5658_v54 }
 0xa17   : > { %v2628_v35 = vpop.xlane.xlu0 %2627 }
 0xa18   : > { %5350 = vrcp.f32 %v2628_v35  ;;  %v2643_v52 = vand.u32 2147483648, %v2628_v35  ;;  %v2641_v25 = vand.u32 2147483647, %v2628_v35  ;;  %vm2637_vm12 = vweird.f32 %v2628_v35 }
 0xa1a   : > { %v2644_v17 = vor.u32 1.1754944e-38, %v2643_v52  ;;  %vm2642_vm15 = vcmp.eq.f32.partialorder %v2641_v25, 8.507059e+37 }
 0xa1e   : > { %v5351_v1 = vpop.eup %5350 }
 0xa1f   : > { %v2633_v38 = vmul.f32 %v5351_v1, %v2628_v35  ;;  %vm2638_vm10 = vweird.f32 %v5351_v1 }
 0xa20   : > { %vm2639_vm13 = vmor %vm2637_vm12, %vm2638_vm10 }
 0xa21   : > { %v2634_v60 = vsub.f32 1.0, %v2633_v38  ;;  %v2719_v38 = vpop.permute.xlu1 %2718 }
 0xa22   : > { %v2722_v52 = vmul.f32 %v9354_v39, %v2719_v38  ;;  %v8033_v38 = vld [vmem:[%s9310_s1 + $0x18] sm:$0xff] }
 0xa23   : > { %v2635_v0 = vmul.f32 %v5351_v1, %v2634_v60  ;;  %v2818_v56 = vmul.f32 %v8033_v38, %v2816_v41 }
 0xa25   : > { %v2636_v46 = vadd.f32 %v5351_v1, %v2635_v0 }
 0xa27   : > { %v2640_v3 = vsel %vm2639_vm13, %v5351_v1, %v2636_v46  ;;  %v2705_v1 = vstv %s4951_s28  ;;  %v2724_v46 = vadd.f32 %v2722_v52, %v2712_v23  ;;  %v9385_v52 = vld [vmem:[#allocation21_spill] sm:$0xff]  ;;  %s4977_s28 = sld [smem:[#allocation7 + $0x14]] }
 0xa28   : > { %v2645_v14 = vsel %vm2642_vm15, %v2644_v17, %v2640_v3  ;;  %v2706_v0 = vmul.f32 %v7814_v28, %v2705_v1 }
 0xa29   : > { %v2646_v16 = vmul.f32 %v5347_v31, %v2645_v14  ;;  %v2695_v31 = vmul.f32 %v7756_v5, %v2693_v22  ;;  %v2707_v5 = vmul.f32 %v7771_v34, %v2705_v1  ;;  %v2814_v1 = vmul.f32 %v8027_v42, %v2812_v21 }
 0xa2a   : > { %v2708_v26 = vadd.f32 %v2706_v0, %v2702_v15  ;;  %v2787_v15 = vperm.slane %v9385_v52, 0 }
 0xa2b   : > { %v2662_v11 = vmul.f32 %v6032_v7, %v2646_v16  ;;  %v2697_v35 = vadd.f32 %v2695_v31, %v2691_v49 }
 0xa2d   : > { %v2667_v2 = vmul.f32 %v2665_v20, %v2662_v11  ;;  %v2703_v60 = vadd.f32 %v2701_v61, %v2697_v35 }
 0xa2f   : > { %v2669_v30 = vsel %vm768_vm7, %v2667_v2, 0.0  ;;  %v2709_v25 = vadd.f32 %v2707_v5, %v2703_v60  ;;  %v2822_v60 = vstv %s8020_s9  ;;  %s8257_s9 = sld [smem:[#allocation2 + $0x56]] }
 0xa30   : > { %2670 = vadd.xlane.f32.xlu0 %v2669_v30 }
 0xa31   : > { %v2726_v3 = vadd.f32 %v2724_v46, %v2709_v25  ;;  %v2820_v46 = vadd.f32 %v2818_v56, %v2814_v1  ;;  %v2799_v56 = vstv %s4952_s10  ;;  %s4982_s10 = sld [smem:[#allocation5 + $0x15]] }
 0xa33   : > { %v2730_v55 = vmul.f32 0.2, %v2726_v3  ;;  %vm2728_vm3 = vcmp.ge.f32.partialorder %v2726_v3, 0.0 }
 0xa35   : > { %v2732_v20 = vsel %vm2728_vm3, %v2726_v3, %v2730_v55  ;;  %v2828_v3 = vstv %s8024_s26  ;;  %v2788_v55 = vmul.f32 %v6032_v7, %v2787_v15  ;;  %s8259_s26 = sld [smem:[#allocation2 + $0x57]] }
 0xa36   : > { %v2734_v30 = vmul.f32 %v6036_v8, %v2732_v20 }
 0xa38   : > { %2673 = vadd.xlane.f32.xlu0 %v2672_v18  ;;  %v2736_v29 = vadd.f32 %v2734_v30, %v9364_v57  ;;  %v2833_v30 = vperm.slane %v7990_v24, 1 }
 0xa3a   : > { %v2740_v33 = vsel %vm768_vm7, %v2736_v29, -inf }
 0xa4c   : > { %2714 = vperm.xlu0 %5194, %v9383_v9  }
 0xaa3   : > { %v2671_v4 = vpop.xlane.xlu0 %2670 }
 0xaa4   : > { %v2677_v10 = vmul.f32 %v2676_v27, %v2671_v4 }
 0xaa6   : > { %v2681_v32 = vadd.f32 %v2680_v44, %v2677_v10 }
 0xaa8   : > { %v2683_v63 = vmax.f32 %v2681_v32, 0.0 }
 0xaaa   : > { %2686 = vst.msk [vmem:[%s7535_s12] sm:$0xff] %vm2685_vm0, %v2683_v63 }
 0xaab   : > { %v2674_v19 = vpop.xlane.xlu0 %2673 }
 0xaac   : > { %v2678_v53 = vmul.f32 %v2676_v27, %v2674_v19 }
 0xaae   : > { %v2682_v48 = vadd.f32 %v2680_v44, %v2678_v53 }
 0xab0   : > { %v2684_v40 = vmax.f32 %v2682_v48, 0.0 }
 0xab2   : > { %2687 = vst.msk [vmem:[%s7535_s12 + $0x8] sm:$0xff] %vm2685_vm0, %v2684_v40 }
 0xabe   : > { %v2715_v62 = vpop.permute.xlu0 %2714 }
 0xabf   : > { %v2721_v17 = vmul.f32 %v9342_v59, %v2715_v62 }
 0xac1   : > { %v2723_v43 = vadd.f32 %v2721_v17, %v2711_v50  ;;  %v8041_v50 = vld [vmem:[%s9310_s1 + $0x28] sm:$0xff] }
 0xac2   : > { %v2824_v62 = vmul.f32 %v8041_v50, %v2822_v60 }
 0xac3   : > { %v2725_v14 = vadd.f32 %v2723_v43, %v2708_v26 }
 0xac4   : > { %v2826_v20 = vadd.f32 %v2824_v62, %v2820_v46  ;;  %v2813_v46 = vmul.f32 %v7796_v36, %v2812_v21  ;;  %v2817_v62 = vmul.f32 %v7802_v12, %v2816_v41  ;;  %v2834_v36 = vmul.f32 %v6032_v7, %v2833_v30 }
 0xac5   : > { %v2729_v34 = vmul.f32 0.2, %v2725_v14  ;;  %vm2727_vm2 = vcmp.ge.f32.partialorder %v2725_v14, 0.0 }
 0xac7   : > { %v2731_v16 = vsel %vm2727_vm2, %v2725_v14, %v2729_v34 }
 0xac8   : > { %v2733_v11 = vmul.f32 %v6032_v7, %v2731_v16 }
 0xaca   : > { %v2735_v51 = vadd.f32 %v2733_v11, %v9355_v58 }
 0xacc   : > { %v2737_v2 = vsel %vm768_vm7, %v2735_v51, -inf }
 0xacd   : > { %2738 = vmax.xlane.f32.xlu2 %v2737_v2 }
 0xad5   : > { %2741 = vmax.xlane.f32.xlu2 %v2740_v33 }
 0xb40   : > { %v2739_v18 = vpop.xlane.xlu2 %2738 }
 0xb41   : > { %v2743_v27 = vsub.f32 %v2735_v51, %v2739_v18  ;;  %v8050_v51 = vld [vmem:[%s9310_s1 + $0x38] sm:$0xff] }
 0xb42   : > { %v2830_v2 = vmul.f32 %v8050_v51, %v2828_v3 }
 0xb43   : > { %v2745_v44 = vmul.f32 1.442695, %v2743_v27 }
 0xb45   : > { %5352 = vpow2.f32 %v2745_v44 }
 0xb48   : > { %v2742_v4 = vpop.xlane.xlu2 %2741 }
 0xb49   : > { %v2744_v10 = vsub.f32 %v2736_v29, %v2742_v4  ;;  %v2832_v4 = vadd.f32 %v2830_v2, %v2826_v20 }
 0xb4b   : > { %v5353_v32 = vpop.eup %5352  ;;  %v2747_v63 = vmul.f32 1.442695, %v2744_v10  ;;  %v2835_v10 = vmul.f32 %v6036_v8, %v2833_v30  ;;  %v2939_v30 = vstv %s8092_s15  ;;  %s8311_s15 = sld [smem:[#allocation2 + $0x59]] }
 0xb4c   : > { %v2749_v19 = vsel %vm768_vm7, %v5353_v32, 0.0 }
 0xb4d   : > { %5354 = vpow2.f32 %v2747_v63  ;;  %2750 = vadd.xlane.f32.xlu1 %v2749_v19 }
 0xb53   : > { %v8011_v53 = vpop.eup %5354 }
 0xb54   : > { %v2752_v37 = vsel %vm768_vm7, %v8011_v53, 0.0 }
 0xb55   : > { %2753 = vadd.xlane.f32.xlu2 %v2752_v37 }
 0xb66   : > { %2841 = vperm.xlu1 %5197, %v9382_v47  }
 0xbc0   : > { %v2751_v22 = vpop.xlane.xlu1 %2750 }
 0xbc1   : > { %5356 = vrcp.f32 %v2751_v22  ;;  %v2766_v13 = vand.u32 2147483648, %v2751_v22  ;;  %v2764_v61 = vand.u32 2147483647, %v2751_v22  ;;  %vm2760_vm5 = vweird.f32 %v2751_v22 }
 0xbc3   : > { %v2767_v23 = vor.u32 1.1754944e-38, %v2766_v13  ;;  %vm2765_vm8 = vcmp.eq.f32.partialorder %v2764_v61, 8.507059e+37 }
 0xbc7   : > { %v5357_v48 = vpop.eup %5356 }
 0xbc8   : > { %v2756_v40 = vmul.f32 %v5357_v48, %v2751_v22  ;;  %v2754_v49 = vpop.xlane.xlu2 %2753  ;;  %vm2761_vm4 = vweird.f32 %v5357_v48 }
 0xbc9   : > { %5358 = vrcp.f32 %v2754_v49  ;;  %vm2762_vm6 = vmor %vm2760_vm5, %vm2761_vm4  ;;  %v2781_v14 = vand.u32 2147483648, %v2754_v49  ;;  %v2779_v16 = vand.u32 2147483647, %v2754_v49  ;;  %vm2775_vm10 = vweird.f32 %v2754_v49 }
 0xbca   : > { %v2757_v31 = vsub.f32 1.0, %v2756_v40 }
 0xbcb   : > { %v2782_v54 = vor.u32 1.1754944e-38, %v2781_v14  ;;  %vm2780_vm12 = vcmp.eq.f32.partialorder %v2779_v16, 8.507059e+37  ;;  %v2823_v14 = vmul.f32 %v7808_v45, %v2822_v60 }
 0xbcc   : > { %v2758_v35 = vmul.f32 %v5357_v48, %v2757_v31 }
 0xbce   : > { %v2759_v6 = vadd.f32 %v5357_v48, %v2758_v35 }
 0xbcf   : > { %v5359_v5 = vpop.eup %5358 }
 0xbd0   : > { %v2771_v0 = vmul.f32 %v5359_v5, %v2754_v49  ;;  %v2763_v25 = vsel %vm2762_vm6, %v5357_v48, %v2759_v6  ;;  %vm2776_vm9 = vweird.f32 %v5359_v5  ;;  %v2789_v48 = vmul.f32 %v6036_v8, %v2787_v15 }
 0xbd1   : > { %v2768_v26 = vsel %vm2765_vm8, %v2767_v23, %v2763_v25  ;;  %vm2777_vm11 = vmor %vm2775_vm10, %vm2776_vm9  ;;  %v2803_v6 = vstv %s4953_s5  ;;  %v5659_v23 = vmov 18   ;;  %s4983_s5 = sld [smem:[#allocation7 + $0x15]] }
 0xbd2   : > { %v2772_v17 = vsub.f32 1.0, %v2771_v0  ;;  %v2769_v43 = vmul.f32 %v5353_v32, %v2768_v26  ;;  %5198 = vset.pattern.permute.xlu0 %v5659_v23 }
 0xbd4   : > { %v2773_v34 = vmul.f32 %v5359_v5, %v2772_v17  ;;  %v2785_v11 = vmul.f32 %v6032_v7, %v2769_v43  ;;  %v2819_v43 = vadd.f32 %v2817_v62, %v2813_v46 }
 0xbd6   : > { %v2774_v29 = vadd.f32 %v5359_v5, %v2773_v34  ;;  %v2790_v33 = vmul.f32 %v2788_v55, %v2785_v11  ;;  %v2825_v16 = vadd.f32 %v2823_v14, %v2819_v43  ;;  %v2829_v11 = vmul.f32 %v7814_v28, %v2828_v3 }
 0xbd7   : > { %v5660_v28 = vmov 19   ;;  %v2935_v3 = vstv %s8090_s11  ;;  %s8309_s11 = sld [smem:[#allocation2 + $0x58]] }
 0xbd8   : > { %v2842_v18 = vpop.permute.xlu1 %2841  ;;  %v2792_v27 = vsel %vm768_vm7, %v2790_v33, 0.0  ;;  %v2778_v44 = vsel %vm2777_vm11, %v5359_v5, %v2774_v29  ;;  %v2831_v2 = vadd.f32 %v2829_v11, %v2825_v16  ;;  %5200 = vset.pattern.permute.xlu1 %v5660_v28  ;;  %vm2931_vm11 = vcmask 146568  }
 0xbd9   : > { %v2845_v32 = vmul.f32 %v9354_v39, %v2842_v18  ;;  %2793 = vadd.xlane.f32.xlu0 %v2792_v27  ;;  %v2783_v63 = vsel %vm2780_vm12, %v2782_v54, %v2778_v44  ;;  %v2937_v18 = vmul.f32 %v8027_v42, %v2935_v3  ;;  %v2941_v27 = vmul.f32 %v8033_v38, %v2939_v30 }
 0xbda   : > { %v2784_v19 = vmul.f32 %v8011_v53, %v2783_v63  ;;  %v2945_v44 = vstv %s8094_s27  ;;  %s8313_s27 = sld [smem:[#allocation2 + $0x5a]] }
 0xbdb   : > { %v2847_v37 = vadd.f32 %v2845_v32, %v2835_v10  ;;  %v2943_v63 = vadd.f32 %v2941_v27, %v2937_v18 }
 0xbdc   : > { %v2786_v22 = vmul.f32 %v6036_v8, %v2784_v19  ;;  %v2947_v19 = vmul.f32 %v8041_v50, %v2945_v44 }
 0xbdd   : > { %v2849_v40 = vadd.f32 %v2847_v37, %v2832_v4  ;;  %v2951_v37 = vstv %s8098_s25  ;;  %s8317_s25 = sld [smem:[#allocation2 + $0x5b]] }
 0xbde   : > { %v2791_v49 = vmul.f32 %v2789_v48, %v2786_v22 }
 0xbdf   : > { %v2853_v31 = vmul.f32 0.2, %v2849_v40  ;;  %vm2851_vm13 = vcmp.ge.f32.partialorder %v2849_v40, 0.0 }
 0xbe0   : > { %v2795_v13 = vsel %vm768_vm7, %v2791_v49, 0.0  ;;  %v2953_v49 = vmul.f32 %v8050_v51, %v2951_v37 }
 0xbe1   : > { %2796 = vadd.xlane.f32.xlu2 %v2795_v13  ;;  %v2855_v35 = vsel %vm2851_vm13, %v2849_v40, %v2853_v31  ;;  %v2949_v40 = vadd.f32 %v2947_v19, %v2943_v63  ;;  %v2956_v31 = vperm.slane %v7990_v24, 2 }
 0xbe2   : > { %v2857_v61 = vmul.f32 %v6036_v8, %v2855_v35 }
 0xbe4   : > { %v8065_v1 = vadd.f32 %v2857_v61, %v9364_v57  ;;  %v2955_v61 = vadd.f32 %v2953_v49, %v2949_v40 }
 0xbe6   : > { %v2863_v53 = vsel %vm768_vm7, %v8065_v1, -inf }
 0xbe7   : > { %2864 = vmax.xlane.f32.xlu0 %v2863_v53  ;;  %v2958_v53 = vmul.f32 %v6036_v8, %v2956_v31 }
 0xbf9   : > { %2837 = vperm.xlu2 %5196, %v9383_v9  }
 0xc01   : > { %5199 = vset.pattern.permute.xlu2 %v5659_v23 }
 0xc4c   : > { %v2794_v5 = vpop.xlane.xlu0 %2793 }
 0xc4d   : > { %v2800_v15 = vmul.f32 %v2799_v56, %v2794_v5 }
 0xc4f   : > { %v2804_v0 = vadd.f32 %v2803_v6, %v2800_v15 }
 0xc51   : > { %v2806_v25 = vmax.f32 %v2804_v0, 0.0 }
 0xc53   : > { %2809 = vst.msk [vmem:[%s7535_s12] sm:$0xff] %vm2808_vm14, %v2806_v25 }
 0xc54   : > { %v2797_v26 = vpop.xlane.xlu2 %2796 }
 0xc55   : > { %v2801_v17 = vmul.f32 %v2799_v56, %v2797_v26 }
 0xc57   : > { %v2805_v55 = vadd.f32 %v2803_v6, %v2801_v17 }
 0xc59   : > { %v2807_v34 = vmax.f32 %v2805_v55, 0.0 }
 0xc5a   : > { %v2865_v4 = vpop.xlane.xlu0 %2864 }
 0xc5b   : > { %2810 = vst.msk [vmem:[%s7535_s12 + $0x8] sm:$0xff] %vm2808_vm14, %v2807_v34  ;;  %v2867_v22 = vsub.f32 %v8065_v1, %v2865_v4 }
 0xc5c   : > { %v2838_v20 = vpop.permute.xlu2 %2837 }
 0xc5d   : > { %v2844_v12 = vmul.f32 %v9342_v59, %v2838_v20  ;;  %v2870_v13 = vmul.f32 1.442695, %v2867_v22 }
 0xc5f   : > { %v2846_v21 = vadd.f32 %v2844_v12, %v2834_v36 }
 0xc61   : > { %v2848_v41 = vadd.f32 %v2846_v21, %v2831_v2 }
 0xc63   : > { %v2852_v29 = vmul.f32 0.2, %v2848_v41  ;;  %vm2850_vm15 = vcmp.ge.f32.partialorder %v2848_v41, 0.0 }
 0xc65   : > { %v2854_v33 = vsel %vm2850_vm15, %v2848_v41, %v2852_v29  ;;  %v2910_v41 = vperm.slane %v9385_v52, 1 }
 0xc66   : > { %v2856_v45 = vmul.f32 %v6032_v7, %v2854_v33 }
 0xc67   : > { %v2911_v18 = vmul.f32 %v6032_v7, %v2910_v41 }
 0xc68   : > { %v2858_v60 = vadd.f32 %v2856_v45, %v9355_v58 }
 0xc6a   : > { %v2860_v54 = vsel %vm768_vm7, %v2858_v60, -inf }
 0xc6b   : > { %2861 = vmax.xlane.f32.xlu2 %v2860_v54 }
 0xc83   : > { %2964 = vperm.xlu2 %5199, %v9382_v47  }
 0xc8b   : > { %5201 = vset.pattern.permute.xlu2 %v5660_v28 }
 0xcde   : > { %v2862_v10 = vpop.xlane.xlu2 %2861 }
 0xcdf   : > { %v2866_v32 = vsub.f32 %v2858_v60, %v2862_v10 }
 0xce1   : > { %v2868_v48 = vmul.f32 1.442695, %v2866_v32 }
 0xce3   : > { %5360 = vpow2.f32 %v2868_v48 }
 0xce4   : > { %5362 = vpow2.f32 %v2870_v13 }
 0xce6   : > { %v2965_v35 = vpop.permute.xlu2 %2964 }
 0xce7   : > { %v2968_v56 = vmul.f32 %v9354_v39, %v2965_v35  ;;  %v2912_v35 = vmul.f32 %v6036_v8, %v2910_v41  ;;  %v8159_v41 = vld [vmem:[%s9310_s1 + $0x30] sm:$0xff] }
 0xce9   : > { %v5361_v6 = vpop.eup %5360  ;;  %v2970_v1 = vadd.f32 %v2968_v56, %v2958_v53 }
 0xcea   : > { %v2872_v5 = vsel %vm768_vm7, %v5361_v6, 0.0  ;;  %v5363_v0 = vpop.eup %5362 }
 0xceb   : > { %v2972_v23 = vadd.f32 %v2970_v1, %v2955_v61  ;;  %2873 = vadd.xlane.f32.xlu0 %v2872_v5  ;;  %v2875_v62 = vsel %vm768_vm7, %v5363_v0, 0.0 }
 0xced   : > { %v2976_v15 = vmul.f32 0.2, %v2972_v23  ;;  %vm2974_vm0 = vcmp.ge.f32.partialorder %v2972_v23, 0.0 }
 0xcef   : > { %v2978_v25 = vsel %vm2974_vm0, %v2972_v23, %v2976_v15  ;;  %v2922_v15 = vstv %s4958_s20  ;;  %s8346_s20 = sld [smem:[#allocation2 + $0x5c]] }
 0xcf0   : > { %v2980_v46 = vmul.f32 %v6036_v8, %v2978_v25 }
 0xcf2   : > { %v2982_v26 = vadd.f32 %v2980_v46, %v9364_v57 }
 0xcf3   : > { %2876 = vadd.xlane.f32.xlu0 %v2875_v62 }
 0xcf4   : > { %v2986_v17 = vsel %vm768_vm7, %v2982_v26, -inf }
 0xcf5   : > { %2987 = vmax.xlane.f32.xlu2 %v2986_v17 }
 0xd0d   : > { %3087 = vperm.xlu2 %5201, %v9382_v47  }
 0xd5e   : > { %v2874_v43 = vpop.xlane.xlu0 %2873 }
 0xd5f   : > { %5364 = vrcp.f32 %v2874_v43  ;;  %v2889_v11 = vand.u32 2147483648, %v2874_v43  ;;  %v2887_v2 = vand.u32 2147483647, %v2874_v43  ;;  %vm2883_vm3 = vweird.f32 %v2874_v43 }
 0xd61   : > { %v2890_v21 = vor.u32 1.1754944e-38, %v2889_v11  ;;  %vm2888_vm5 = vcmp.eq.f32.partialorder %v2887_v2, 8.507059e+37  ;;  %v8147_v11 = vld [vmem:[%s9310_s1 + $0x10] sm:$0xff] }
 0xd65   : > { %v5365_v14 = vpop.eup %5364 }
 0xd66   : > { %v2879_v55 = vmul.f32 %v5365_v14, %v2874_v43  ;;  %v2877_v34 = vpop.xlane.xlu0 %2876  ;;  %vm2884_vm2 = vweird.f32 %v5365_v14 }
 0xd67   : > { %5366 = vrcp.f32 %v2877_v34  ;;  %vm2885_vm4 = vmor %vm2883_vm3, %vm2884_vm2  ;;  %v2904_v28 = vand.u32 2147483648, %v2877_v34  ;;  %v2902_v4 = vand.u32 2147483647, %v2877_v34  ;;  %vm2898_vm8 = vweird.f32 %v2877_v34 }
 0xd68   : > { %v2880_v16 = vsub.f32 1.0, %v2879_v55  ;;  %v2988_v56 = vpop.xlane.xlu2 %2987 }
 0xd69   : > { %v2905_v19 = vor.u32 1.1754944e-38, %v2904_v28  ;;  %vm2903_vm10 = vcmp.eq.f32.partialorder %v2902_v4, 8.507059e+37 }
 0xd6a   : > { %v2881_v20 = vmul.f32 %v5365_v14, %v2880_v16 }
 0xd6c   : > { %v2882_v36 = vadd.f32 %v5365_v14, %v2881_v20  ;;  %v2940_v20 = vmul.f32 %v8147_v11, %v2939_v30 }
 0xd6d   : > { %v5367_v12 = vpop.eup %5366 }
 0xd6e   : > { %v2894_v29 = vmul.f32 %v5367_v12, %v2877_v34  ;;  %v2886_v33 = vsel %vm2885_vm4, %v5365_v14, %v2882_v36  ;;  %vm2899_vm6 = vweird.f32 %v5367_v12  ;;  %v8141_v34 = vld [vmem:[%s9310_s1] sm:$0xff] }
 0xd6f   : > { %v2891_v45 = vsel %vm2888_vm5, %v2890_v21, %v2886_v33  ;;  %vm2900_vm9 = vmor %vm2898_vm8, %vm2899_vm6  ;;  %v2936_v16 = vmul.f32 %v8141_v34, %v2935_v3  ;;  %v8153_v36 = vld [vmem:[%s9310_s1 + $0x20] sm:$0xff]  ;;  %v2957_v3 = vmul.f32 %v6032_v7, %v2956_v31  ;;  %vm3054_vm8 = vcmask 154768  }
 0xd70   : > { %v2895_v60 = vsub.f32 1.0, %v2894_v29  ;;  %v2892_v54 = vmul.f32 %v5361_v6, %v2891_v45  ;;  %v2990_v6 = vsub.f32 %v2982_v26, %v2988_v56  ;;  %v2952_v29 = vmul.f32 %v8159_v41, %v2951_v37 }
 0xd71   : > { %v2942_v2 = vadd.f32 %v2940_v20, %v2936_v16 }
 0xd72   : > { %v2896_v27 = vmul.f32 %v5367_v12, %v2895_v60  ;;  %v2908_v10 = vmul.f32 %v6032_v7, %v2892_v54  ;;  %v2993_v1 = vmul.f32 1.442695, %v2990_v6 }
 0xd74   : > { %v2897_v32 = vadd.f32 %v5367_v12, %v2896_v27  ;;  %v2913_v63 = vmul.f32 %v2911_v18, %v2908_v10  ;;  %5368 = vpow2.f32 %v2993_v1 }
 0xd76   : > { %v2915_v22 = vsel %vm768_vm7, %v2913_v63, 0.0  ;;  %v2901_v48 = vsel %vm2900_vm9, %v5367_v12, %v2897_v32  ;;  %v2946_v12 = vmul.f32 %v8153_v36, %v2945_v44 }
 0xd77   : > { %2916 = vadd.xlane.f32.xlu1 %v2915_v22  ;;  %v2906_v40 = vsel %vm2903_vm10, %v2905_v19, %v2901_v48 }
 0xd78   : > { %v2907_v49 = vmul.f32 %v5363_v0, %v2906_v40  ;;  %v2926_v0 = vstv %s4959_s2  ;;  %v2948_v21 = vadd.f32 %v2946_v12, %v2942_v2  ;;  %s8348_s2 = sld [smem:[#allocation2 + $0x5d]] }
 0xd7a   : > { %v2909_v13 = vmul.f32 %v6036_v8, %v2907_v49  ;;  %v8134_v5 = vpop.eup %5368  ;;  %v2954_v45 = vadd.f32 %v2952_v29, %v2948_v21 }
 0xd7b   : > { %v2998_v23 = vsel %vm768_vm7, %v8134_v5, 0.0 }
 0xd7c   : > { %v2914_v61 = vmul.f32 %v2912_v35, %v2909_v13 }
 0xd7e   : > { %v2918_v53 = vsel %vm768_vm7, %v2914_v61, 0.0 }
 0xd7f   : > { %2919 = vadd.xlane.f32.xlu0 %v2918_v53 }
 0xd93   : > { %2960 = vperm.xlu0 %5198, %v9383_v9  }
 0xdbd   : > { %2999 = vadd.xlane.f32.xlu0 %v2998_v23 }
 0xdea   : > { %v2917_v25 = vpop.xlane.xlu1 %2916 }
 0xdeb   : > { %v2923_v46 = vmul.f32 %v2922_v15, %v2917_v25 }
 0xded   : > { %v2927_v62 = vadd.f32 %v2926_v0, %v2923_v46 }
 0xdef   : > { %v2929_v26 = vmax.f32 %v2927_v62, 0.0 }
 0xdf1   : > { %2932 = vst.msk [vmem:[%s7535_s12] sm:$0xff] %vm2931_vm11, %v2929_v26 }
 0xdf2   : > { %v2920_v17 = vpop.xlane.xlu0 %2919 }
 0xdf3   : > { %v2924_v43 = vmul.f32 %v2922_v15, %v2920_v17 }
 0xdf5   : > { %v2928_v14 = vadd.f32 %v2926_v0, %v2924_v43  ;;  %v3033_v43 = vperm.slane %v9385_v52, 2 }
 0xdf7   : > { %v2930_v55 = vmax.f32 %v2928_v14, 0.0  ;;  %v3034_v2 = vmul.f32 %v6032_v7, %v3033_v43 }
 0xdf9   : > { %2933 = vst.msk [vmem:[%s7535_s12 + $0x8] sm:$0xff] %vm2931_vm11, %v2930_v55 }
 0xe05   : > { %v2961_v33 = vpop.permute.xlu0 %2960 }
 0xe06   : > { %v2967_v30 = vmul.f32 %v9342_v59, %v2961_v33 }
 0xe08   : > { %v2969_v60 = vadd.f32 %v2967_v30, %v2957_v3 }
 0xe0a   : > { %v2971_v54 = vadd.f32 %v2969_v60, %v2954_v45  ;;  %v3035_v45 = vmul.f32 %v6036_v8, %v3033_v43  ;;  %v3062_v60 = vstv %s8182_s7  ;;  %s8354_s7 = sld [smem:[#allocation2 + $0x5f]] }
 0xe0c   : > { %v2975_v28 = vmul.f32 0.2, %v2971_v54  ;;  %vm2973_vm12 = vcmp.ge.f32.partialorder %v2971_v54, 0.0 }
 0xe0e   : > { %v2977_v18 = vsel %vm2973_vm12, %v2971_v54, %v2975_v28  ;;  %v3064_v28 = vmul.f32 %v8033_v38, %v3062_v60 }
 0xe0f   : > { %v2979_v44 = vmul.f32 %v6032_v7, %v2977_v18  ;;  %v3068_v18 = vstv %s8184_s8  ;;  %s4988_s8 = sld [smem:[#allocation5 + $0x16]] }
 0xe11   : > { %v2981_v27 = vadd.f32 %v2979_v44, %v9355_v58 }
 0xe13   : > { %v2983_v4 = vsel %vm768_vm7, %v2981_v27, -inf }
 0xe14   : > { %2984 = vmax.xlane.f32.xlu1 %v2983_v4  ;;  %v3074_v4 = vstv %s8189_s22  ;;  %s4989_s22 = sld [smem:[#allocation7 + $0x16]] }
 0xe30   : > { %v3000_v19 = vpop.xlane.xlu0 %2999 }
 0xe31   : > { %vm3021_vm14 = vweird.f32 %v3000_v19  ;;  %v3027_v6 = vand.u32 2147483648, %v3000_v19  ;;  %v3025_v23 = vand.u32 2147483647, %v3000_v19 }
 0xe33   : > { %v3028_v62 = vor.u32 1.1754944e-38, %v3027_v6  ;;  %vm3026_vm4 = vcmp.eq.f32.partialorder %v3025_v23, 8.507059e+37  ;;  %v3045_v6 = vstv %s4964_s21  ;;  %s8627_s21 = sld [smem:[#allocation2 + $0x6f]] }
 0xe87   : > { %v2985_v37 = vpop.xlane.xlu1 %2984 }
 0xe88   : > { %v2989_v10 = vsub.f32 %v2981_v27, %v2985_v37  ;;  %v3070_v27 = vmul.f32 %v8041_v50, %v3068_v18  ;;  %v3088_v37 = vpop.permute.xlu2 %3087 }
 0xe8a   : > { %v2991_v32 = vmul.f32 1.442695, %v2989_v10  ;;  %v5661_v10 = vmov 20  }
 0xe8b   : > { %5202 = vset.pattern.permute.xlu0 %v5661_v10 }
 0xe8c   : > { %5370 = vpow2.f32 %v2991_v32  ;;  %v3079_v32 = vperm.slane %v7990_v24, 3 }
 0xe8d   : > { %5372 = vrcp.f32 %v3000_v19 }
 0xe92   : > { %v5371_v63 = vpop.eup %5370 }
 0xe93   : > { %v2995_v31 = vsel %vm768_vm7, %v5371_v63, 0.0  ;;  %v5373_v22 = vpop.eup %5372 }
 0xe94   : > { %2996 = vadd.xlane.f32.xlu1 %v2995_v31  ;;  %v3017_v48 = vmul.f32 %v5373_v22, %v3000_v19  ;;  %vm3022_vm13 = vweird.f32 %v5373_v22  ;;  %v3076_v31 = vmul.f32 %v8050_v51, %v3074_v4  ;;  %v3091_v19 = vmul.f32 %v9354_v39, %v3088_v37 }
 0xe95   : > { %vm3023_vm0 = vmor %vm3021_vm14, %vm3022_vm13 }
 0xe96   : > { %v3018_v49 = vsub.f32 1.0, %v3017_v48 }
 0xe98   : > { %v3019_v13 = vmul.f32 %v5373_v22, %v3018_v49 }
 0xe9a   : > { %v3020_v53 = vadd.f32 %v5373_v22, %v3019_v13 }
 0xe9c   : > { %v3024_v46 = vsel %vm3023_vm0, %v5373_v22, %v3020_v53  ;;  %v3081_v22 = vmul.f32 %v6036_v8, %v3079_v32 }
 0xe9d   : > { %v3029_v55 = vsel %vm3026_vm4, %v3028_v62, %v3024_v46 }
 0xe9e   : > { %v3030_v12 = vmul.f32 %v8134_v5, %v3029_v55  ;;  %v3058_v5 = vstv %s8180_s0  ;;  %s8350_s0 = sld [smem:[#allocation2 + $0x5e]] }
 0xe9f   : > { %v3060_v54 = vmul.f32 %v8027_v42, %v3058_v5  ;;  %v3059_v43 = vmul.f32 %v8141_v34, %v3058_v5 }
 0xea0   : > { %v3032_v33 = vmul.f32 %v6036_v8, %v3030_v12 }
 0xea1   : > { %v3066_v44 = vadd.f32 %v3064_v28, %v3060_v54 }
 0xea2   : > { %v3037_v3 = vmul.f32 %v3035_v45, %v3032_v33 }
 0xea4   : > { %v3041_v30 = vsel %vm768_vm7, %v3037_v3, 0.0 }
 0xf07   : > { %v2997_v40 = vpop.xlane.xlu1 %2996 }
 0xf08   : > { %5374 = vrcp.f32 %v2997_v40  ;;  %v3012_v1 = vand.u32 2147483648, %v2997_v40  ;;  %v3010_v0 = vand.u32 2147483647, %v2997_v40  ;;  %vm3006_vm2 = vweird.f32 %v2997_v40 }
 0xf0a   : > { %v3013_v26 = vor.u32 1.1754944e-38, %v3012_v1  ;;  %vm3011_vm5 = vcmp.eq.f32.partialorder %v3010_v0, 8.507059e+37  ;;  %v3049_v1 = vstv %s4965_s24  ;;  %s8648_s24 = sld [smem:[#allocation2 + $0x78]] }
 0xf0e   : > { %v5375_v35 = vpop.eup %5374 }
 0xf0f   : > { %v3002_v61 = vmul.f32 %v5375_v35, %v2997_v40  ;;  %vm3007_vm15 = vweird.f32 %v5375_v35  ;;  %v3093_v40 = vadd.f32 %v3091_v19, %v3081_v22 }
 0xf10   : > { %vm3008_vm3 = vmor %vm3006_vm2, %vm3007_vm15 }
 0xf11   : > { %v3003_v56 = vsub.f32 1.0, %v3002_v61 }
 0xf13   : > { %v3004_v15 = vmul.f32 %v5375_v35, %v3003_v56 }
 0xf15   : > { %v3005_v25 = vadd.f32 %v5375_v35, %v3004_v15 }
 0xf17   : > { %v3009_v17 = vsel %vm3008_vm3, %v5375_v35, %v3005_v25  ;;  %vm3177_vm3 = vcmask 162968  }
 0xf18   : > { %v3014_v14 = vsel %vm3011_vm5, %v3013_v26, %v3009_v17 }
 0xf19   : > { %v3015_v16 = vmul.f32 %v5371_v63, %v3014_v14  ;;  %v3072_v63 = vadd.f32 %v3070_v27, %v3066_v44  ;;  %v3063_v14 = vmul.f32 %v8147_v11, %v3062_v60 }
 0xf1b   : > { %v3031_v20 = vmul.f32 %v6032_v7, %v3015_v16  ;;  %v3078_v48 = vadd.f32 %v3076_v31, %v3072_v63  ;;  %v3065_v55 = vadd.f32 %v3063_v14, %v3059_v43  ;;  %v3069_v16 = vmul.f32 %v8153_v36, %v3068_v18 }
 0xf1c   : > { %v3156_v14 = vperm.slane %v9385_v52, 3 }
 0xf1d   : > { %v3036_v21 = vmul.f32 %v3034_v2, %v3031_v20  ;;  %v3095_v49 = vadd.f32 %v3093_v40, %v3078_v48  ;;  %v3071_v20 = vadd.f32 %v3069_v16, %v3065_v55  ;;  %v3075_v2 = vmul.f32 %v8159_v41, %v3074_v4 }
 0xf1f   : > { %v3038_v29 = vsel %vm768_vm7, %v3036_v21, 0.0  ;;  %v3099_v13 = vmul.f32 0.2, %v3095_v49  ;;  %vm3097_vm6 = vcmp.ge.f32.partialorder %v3095_v49, 0.0  ;;  %v3077_v21 = vadd.f32 %v3075_v2, %v3071_v20 }
 0xf20   : > { %3039 = vadd.xlane.f32.xlu1 %v3038_v29  ;;  %v3080_v29 = vmul.f32 %v6032_v7, %v3079_v32 }
 0xf21   : > { %v3101_v35 = vsel %vm3097_vm6, %v3095_v49, %v3099_v13 }
 0xf22   : > { %v3103_v61 = vmul.f32 %v6036_v8, %v3101_v35 }
 0xf24   : > { %v3105_v53 = vadd.f32 %v3103_v61, %v9364_v57 }
 0xf26   : > { %v3109_v56 = vsel %vm768_vm7, %v3105_v53, -inf }
 0xf28   : > { %3042 = vadd.xlane.f32.xlu1 %v3041_v30 }
 0xf41   : > { %3083 = vperm.xlu1 %5200, %v9383_v9  }
 0xf49   : > { %5203 = vset.pattern.permute.xlu1 %v5661_v10 }
 0xf6b   : > { %3110 = vmax.xlane.f32.xlu1 %v3109_v56 }
 0xf84   : > { %3210 = vperm.xlu1 %5203, %v9382_v47  }
 0xf93   : > { %v3040_v23 = vpop.xlane.xlu1 %3039 }
 0xf94   : > { %v3046_v15 = vmul.f32 %v3045_v6, %v3040_v23 }
 0xf96   : > { %v3050_v0 = vadd.f32 %v3049_v1, %v3046_v15 }
 0xf98   : > { %v3052_v25 = vmax.f32 %v3050_v0, 0.0 }
 0xf9a   : > { %3055 = vst.msk [vmem:[%s7535_s12] sm:$0xff] %vm3054_vm8, %v3052_v25 }
 0xf9b   : > { %v3043_v46 = vpop.xlane.xlu1 %3042 }
 0xf9c   : > { %v3047_v62 = vmul.f32 %v3045_v6, %v3043_v46 }
 0xf9e   : > { %v3051_v26 = vadd.f32 %v3049_v1, %v3047_v62 }
 0xfa0   : > { %v3053_v17 = vmax.f32 %v3051_v26, 0.0 }
 0xfa2   : > { %3056 = vst.msk [vmem:[%s7535_s12 + $0x8] sm:$0xff] %vm3054_vm8, %v3053_v17 }
 0xfb3   : > { %v3084_v12 = vpop.permute.xlu1 %3083 }
 0xfb4   : > { %v3090_v33 = vmul.f32 %v9342_v59, %v3084_v12  ;;  %v3157_v12 = vmul.f32 %v6032_v7, %v3156_v14 }
 0xfb6   : > { %v3092_v45 = vadd.f32 %v3090_v33, %v3080_v29 }
 0xfb8   : > { %v3094_v3 = vadd.f32 %v3092_v45, %v3077_v21 }
 0xfba   : > { %v3098_v30 = vmul.f32 0.2, %v3094_v3  ;;  %vm3096_vm9 = vcmp.ge.f32.partialorder %v3094_v3, 0.0 }
 0xfbc   : > { %v3100_v54 = vsel %vm3096_vm9, %v3094_v3, %v3098_v30  ;;  %v3158_v3 = vmul.f32 %v6036_v8, %v3156_v14 }
 0xfbd   : > { %v3102_v5 = vmul.f32 %v6032_v7, %v3100_v54 }
 0xfbf   : > { %v3104_v60 = vadd.f32 %v3102_v5, %v9355_v58  ;;  %v3168_v5 = vstv %s4970_s13  ;;  %s4995_s13 = sld [smem:[#allocation7 + $0x17]] }
 0xfc1   : > { %v3106_v28 = vsel %vm768_vm7, %v3104_v60, -inf }
 0xfc2   : > { %3107 = vmax.xlane.f32.xlu0 %v3106_v28 }
 0xfde   : > { %v3111_v18 = vpop.xlane.xlu1 %3110 }
 0xfdf   : > { %v3113_v44 = vsub.f32 %v3105_v53, %v3111_v18 }
 0xfe1   : > { %v3116_v27 = vmul.f32 1.442695, %v3113_v44 }
 0xfe3   : > { %5376 = vpow2.f32 %v3116_v27 }
 0xfe9   : > { %v5377_v4 = vpop.eup %5376 }
 0xfea   : > { %v3121_v37 = vsel %vm768_vm7, %v5377_v4, 0.0 }
 0xfeb   : > { %3122 = vadd.xlane.f32.xlu2 %v3121_v37 }
0x1035   : > { %v3108_v10 = vpop.xlane.xlu0 %3107 }
0x1036   : > { %v3112_v32 = vsub.f32 %v3104_v60, %v3108_v10  ;;  %v3172_v60 = vstv %s4971_s16  ;;  %v3181_v10 = vstv %s4972_s14  ;;  %s4996_s16 = sld [smem:[#allocation2 + $0x60]] }
0x1037   : > { %s4997_s14 = sld [smem:[#allocation2 + $0x61]] }
0x1038   : > { %v3114_v63 = vmul.f32 1.442695, %v3112_v32  ;;  %v3185_v32 = vstv %s4973_s6  ;;  %s4998_s6 = sld [smem:[#allocation2 + $0x62]] }
0x103a   : > { %5378 = vpow2.f32 %v3114_v63 }
0x1040   : > { %v5379_v31 = vpop.eup %5378 }
0x1041   : > { %v3118_v19 = vsel %vm768_vm7, %v5379_v31, 0.0 }
0x1042   : > { %3119 = vadd.xlane.f32.xlu0 %v3118_v19  ;;  %v3183_v19 = vmul.f32 %v8027_v42, %v3181_v10 }
0x105e   : > { %v3123_v22 = vpop.xlane.xlu2 %3122 }
0x105f   : > { %5380 = vrcp.f32 %v3123_v22  ;;  %vm3144_vm11 = vweird.f32 %v3123_v22  ;;  %v3150_v1 = vand.u32 2147483648, %v3123_v22  ;;  %v3148_v15 = vand.u32 2147483647, %v3123_v22 }
0x1061   : > { %v3151_v26 = vor.u32 1.1754944e-38, %v3150_v1  ;;  %vm3149_vm0 = vcmp.eq.f32.partialorder %v3148_v15, 8.507059e+37 }
0x1065   : > { %v5381_v48 = vpop.eup %5380 }
0x1066   : > { %v3140_v40 = vmul.f32 %v5381_v48, %v3123_v22  ;;  %vm3145_vm10 = vweird.f32 %v5381_v48  ;;  %v3187_v22 = vmul.f32 %v8033_v38, %v3185_v32 }
0x1067   : > { %vm3146_vm13 = vmor %vm3144_vm11, %vm3145_vm10 }
0x1068   : > { %v3141_v13 = vsub.f32 1.0, %v3140_v40  ;;  %v3182_v40 = vmul.f32 %v8141_v34, %v3181_v10 }
0x106a   : > { %v3142_v35 = vmul.f32 %v5381_v48, %v3141_v13  ;;  %v3189_v13 = vadd.f32 %v3187_v22, %v3183_v19 }
0x106c   : > { %v3143_v56 = vadd.f32 %v5381_v48, %v3142_v35 }
0x106e   : > { %v3147_v62 = vsel %vm3146_vm13, %v5381_v48, %v3143_v56  ;;  %v3191_v48 = vstv %s4974_s18  ;;  %v3202_v56 = vperm.slane %v7990_v24, 4  ;;  %s4999_s18 = sld [smem:[#allocation2 + $0x63]] }
0x106f   : > { %v3152_v16 = vsel %vm3149_vm0, %v3151_v26, %v3147_v62  ;;  %v3193_v35 = vmul.f32 %v8041_v50, %v3191_v48  ;;  %v3192_v1 = vmul.f32 %v8153_v36, %v3191_v48 }
0x1070   : > { %v3153_v21 = vmul.f32 %v5377_v4, %v3152_v16  ;;  %v3204_v15 = vmul.f32 %v6036_v8, %v3202_v56 }
0x1072   : > { %v3155_v45 = vmul.f32 %v6036_v8, %v3153_v21 }
0x1074   : > { %v3160_v30 = vmul.f32 %v3158_v3, %v3155_v45 }
0x1076   : > { %v3164_v54 = vsel %vm768_vm7, %v3160_v30, 0.0 }
0x10b5   : > { %v3120_v49 = vpop.xlane.xlu0 %3119 }
0x10b6   : > { %5382 = vrcp.f32 %v3120_v49  ;;  %v3135_v23 = vand.u32 2147483648, %v3120_v49  ;;  %v3133_v25 = vand.u32 2147483647, %v3120_v49  ;;  %vm3129_vm14 = vweird.f32 %v3120_v49 }
0x10b8   : > { %v3136_v17 = vor.u32 1.1754944e-38, %v3135_v23  ;;  %vm3134_vm2 = vcmp.eq.f32.partialorder %v3133_v25, 8.507059e+37  ;;  %v3195_v23 = vadd.f32 %v3193_v35, %v3189_v13 }
0x10bc   : > { %v5383_v61 = vpop.eup %5382 }
0x10bd   : > { %v3125_v53 = vmul.f32 %v5383_v61, %v3120_v49  ;;  %vm3130_vm12 = vweird.f32 %v5383_v61  ;;  %v3186_v49 = vmul.f32 %v8147_v11, %v3185_v32 }
0x10be   : > { %vm3131_vm15 = vmor %vm3129_vm14, %vm3130_vm12 }
0x10bf   : > { %v3126_v6 = vsub.f32 1.0, %v3125_v53  ;;  %v3211_v53 = vpop.permute.xlu1 %3210 }
0x10c0   : > { %v3214_v38 = vmul.f32 %v9354_v39, %v3211_v53 }
0x10c1   : > { %v3127_v0 = vmul.f32 %v5383_v61, %v3126_v6  ;;  %v3188_v6 = vadd.f32 %v3186_v49, %v3182_v40 }
0x10c2   : > { %v3216_v62 = vadd.f32 %v3214_v38, %v3204_v15 }
0x10c3   : > { %v3128_v46 = vadd.f32 %v5383_v61, %v3127_v0  ;;  %v3194_v0 = vadd.f32 %v3192_v1, %v3188_v6 }
0x10c5   : > { %v3132_v43 = vsel %vm3131_vm15, %v5383_v61, %v3128_v46  ;;  %v3197_v61 = vstv %s4975_s17  ;;  %vm3300_vm15 = vcmask 171168   ;;  %s8474_s17 = sld [smem:[#allocation2 + $0x64]] }
0x10c6   : > { %v3137_v55 = vsel %vm3134_vm2, %v3136_v17, %v3132_v43  ;;  %v3199_v42 = vmul.f32 %v8050_v51, %v3197_v61  ;;  %v3198_v25 = vmul.f32 %v8159_v41, %v3197_v61  ;;  %v3203_v17 = vmul.f32 %v6032_v7, %v3202_v56 }
0x10c7   : > { %v3138_v20 = vmul.f32 %v5379_v31, %v3137_v55  ;;  %v3279_v56 = vperm.slane %v9385_v52, 4 }
0x10c8   : > { %v3201_v46 = vadd.f32 %v3199_v42, %v3195_v23  ;;  %v3200_v26 = vadd.f32 %v3198_v25, %v3194_v0 }
0x10c9   : > { %v3154_v2 = vmul.f32 %v6032_v7, %v3138_v20  ;;  %v3280_v0 = vmul.f32 %v6032_v7, %v3279_v56 }
0x10ca   : > { %v3218_v14 = vadd.f32 %v3216_v62, %v3201_v46 }
0x10cb   : > { %v3159_v29 = vmul.f32 %v3157_v12, %v3154_v2 }
0x10cc   : > { %v3222_v20 = vmul.f32 0.2, %v3218_v14  ;;  %vm3220_vm5 = vcmp.ge.f32.partialorder %v3218_v14, 0.0 }
0x10cd   : > { %v3161_v33 = vsel %vm768_vm7, %v3159_v29, 0.0 }
0x10ce   : > { %3162 = vadd.xlane.f32.xlu0 %v3161_v33  ;;  %v3224_v21 = vsel %vm3220_vm5, %v3218_v14, %v3222_v20 }
0x10cf   : > { %v3226_v45 = vmul.f32 %v6036_v8, %v3224_v21  ;;  %v3291_v21 = vstv %s4976_s19  ;;  %s8476_s19 = sld [smem:[#allocation2 + $0x65]] }
0x10d1   : > { %v3228_v3 = vadd.f32 %v3226_v45, %v9364_v57 }
0x10d3   : > { %v3232_v30 = vsel %vm768_vm7, %v3228_v3, -inf }
0x10d6   : > { %3165 = vadd.xlane.f32.xlu0 %v3164_v54 }
0x10ea   : > { %3206 = vperm.xlu0 %5202, %v9383_v9  }
0x1141   : > { %v3163_v28 = vpop.xlane.xlu0 %3162 }
0x1142   : > { %v3169_v18 = vmul.f32 %v3168_v5, %v3163_v28 }
0x1144   : > { %v3173_v44 = vadd.f32 %v3172_v60, %v3169_v18 }
0x1146   : > { %v3175_v27 = vmax.f32 %v3173_v44, 0.0 }
0x1148   : > { %3178 = vst.msk [vmem:[%s7535_s12] sm:$0xff] %vm3177_vm3, %v3175_v27 }
0x1149   : > { %v3166_v4 = vpop.xlane.xlu0 %3165 }
0x114a   : > { %v3170_v37 = vmul.f32 %v3168_v5, %v3166_v4 }
0x114c   : > { %v3174_v63 = vadd.f32 %v3172_v60, %v3170_v37 }
0x114e   : > { %v3176_v31 = vmax.f32 %v3174_v63, 0.0  ;;  %v5662_v63 = vmov 21  }
0x114f   : > { %5204 = vset.pattern.permute.xlu2 %v5662_v63 }
0x1150   : > { %3179 = vst.msk [vmem:[%s7535_s12 + $0x8] sm:$0xff] %vm3177_vm3, %v3176_v31 }
0x115c   : > { %v3207_v50 = vpop.permute.xlu0 %3206 }
0x115d   : > { %v3213_v43 = vmul.f32 %v9342_v59, %v3207_v50 }
0x115f   : > { %v3215_v55 = vadd.f32 %v3213_v43, %v3203_v17 }
0x1161   : > { %v3217_v16 = vadd.f32 %v3215_v55, %v3200_v26 }
0x1163   : > { %v3221_v51 = vmul.f32 0.2, %v3217_v16  ;;  %vm3219_vm4 = vcmp.ge.f32.partialorder %v3217_v16, 0.0 }
0x1165   : > { %v3223_v2 = vsel %vm3219_vm4, %v3217_v16, %v3221_v51  ;;  %v3281_v51 = vmul.f32 %v6036_v8, %v3279_v56 }
0x1166   : > { %v3225_v12 = vmul.f32 %v6032_v7, %v3223_v2 }
0x1168   : > { %v3227_v29 = vadd.f32 %v3225_v12, %v9355_v58 }
0x116a   : > { %v3229_v33 = vsel %vm768_vm7, %v3227_v29, -inf }
0x116b   : > { %3230 = vmax.xlane.f32.xlu2 %v3229_v33 }
0x1173   : > { %3233 = vmax.xlane.f32.xlu2 %v3232_v30  ;;  %v3308_v30 = vstv %s4979_s30  ;;  %s5000_s30 = sld [smem:[#allocation5 + $0x18]] }
0x11de   : > { %v3231_v54 = vpop.xlane.xlu2 %3230 }
0x11df   : > { %v3235_v5 = vsub.f32 %v3227_v29, %v3231_v54  ;;  %v3295_v29 = vstv %s4977_s28  ;;  %s8478_s28 = sld [smem:[#allocation2 + $0x66]] }
0x11e1   : > { %v3237_v60 = vmul.f32 1.442695, %v3235_v5 }
0x11e3   : > { %5384 = vpow2.f32 %v3237_v60 }
0x11e6   : > { %v3234_v28 = vpop.xlane.xlu2 %3233 }
0x11e7   : > { %v3236_v18 = vsub.f32 %v3228_v3, %v3234_v28  ;;  %v3304_v3 = vstv %s4978_s29  ;;  %v3309_v28 = vmul.f32 %v8147_v11, %v3308_v30  ;;  %s8482_s29 = sld [smem:[#allocation2 + $0x67]] }
0x11e8   : > { %v3305_v60 = vmul.f32 %v8141_v34, %v3304_v3 }
0x11e9   : > { %v5385_v44 = vpop.eup %5384  ;;  %v3239_v27 = vmul.f32 1.442695, %v3236_v18  ;;  %v3314_v18 = vstv %s8257_s9  ;;  %s5001_s9 = sld [smem:[#allocation7 + $0x18]] }
0x11ea   : > { %v3241_v4 = vsel %vm768_vm7, %v5385_v44, 0.0 }
0x11eb   : > { %5386 = vpow2.f32 %v3239_v27  ;;  %3242 = vadd.xlane.f32.xlu2 %v3241_v4  ;;  %v3311_v4 = vadd.f32 %v3309_v28, %v3305_v60 }
0x11f1   : > { %v5387_v37 = vpop.eup %5386 }
0x11f2   : > { %v3244_v10 = vsel %vm768_vm7, %v5387_v37, 0.0 }
0x11f3   : > { %3245 = vadd.xlane.f32.xlu1 %v3244_v10  ;;  %v3320_v10 = vstv %s8259_s26  ;;  %s5006_s26 = sld [smem:[#allocation5 + $0x19]] }
0x11f4   : > { %v3321_v63 = vmul.f32 %v8159_v41, %v3320_v10 }
0x125e   : > { %v3243_v32 = vpop.xlane.xlu2 %3242 }
0x125f   : > { %5388 = vrcp.f32 %v3243_v32  ;;  %v3258_v40 = vand.u32 2147483648, %v3243_v32  ;;  %v3256_v13 = vand.u32 2147483647, %v3243_v32  ;;  %vm3252_vm8 = vweird.f32 %v3243_v32 }
0x1261   : > { %v3259_v53 = vor.u32 1.1754944e-38, %v3258_v40  ;;  %vm3257_vm10 = vcmp.eq.f32.partialorder %v3256_v13, 8.507059e+37 }
0x1265   : > { %v5389_v31 = vpop.eup %5388 }
0x1266   : > { %v3248_v19 = vmul.f32 %v5389_v31, %v3243_v32  ;;  %v3246_v22 = vpop.xlane.xlu1 %3245  ;;  %vm3253_vm6 = vweird.f32 %v5389_v31 }
0x1267   : > { %5390 = vrcp.f32 %v3246_v22  ;;  %vm3254_vm9 = vmor %vm3252_vm8, %vm3253_vm6  ;;  %v3273_v15 = vand.u32 2147483648, %v3246_v22  ;;  %v3271_v46 = vand.u32 2147483647, %v3246_v22  ;;  %vm3267_vm12 = vweird.f32 %v3246_v22 }
0x1268   : > { %v3249_v48 = vsub.f32 1.0, %v3248_v19 }
0x1269   : > { %v3274_v17 = vor.u32 1.1754944e-38, %v3273_v15  ;;  %vm3272_vm14 = vcmp.eq.f32.partialorder %v3271_v46, 8.507059e+37 }
0x126a   : > { %v3250_v49 = vmul.f32 %v5389_v31, %v3249_v48  ;;  %v8271_v48 = vld [vmem:[%s9310_s1 + $0x8] sm:$0xff] }
0x126b   : > { %v3306_v40 = vmul.f32 %v8271_v48, %v3304_v3 }
0x126c   : > { %v3251_v35 = vadd.f32 %v5389_v31, %v3250_v49  ;;  %v8275_v49 = vld [vmem:[%s9310_s1 + $0x18] sm:$0xff] }
0x126d   : > { %v5391_v61 = vpop.eup %5390  ;;  %v3310_v13 = vmul.f32 %v8275_v49, %v3308_v30 }
0x126e   : > { %v3263_v6 = vmul.f32 %v5391_v61, %v3246_v22  ;;  %v3255_v1 = vsel %vm3254_vm9, %v5389_v31, %v3251_v35  ;;  %vm3268_vm11 = vweird.f32 %v5391_v61  ;;  %v3325_v31 = vperm.slane %v7990_v24, 5 }
0x126f   : > { %v3260_v23 = vsel %vm3257_vm10, %v3259_v53, %v3255_v1  ;;  %vm3269_vm13 = vmor %vm3267_vm12, %vm3268_vm11  ;;  %v8283_v1 = vld [vmem:[%s9310_s1 + $0x28] sm:$0xff]  ;;  %vm3423_vm12 = vcmask 179368  }
0x1270   : > { %v3264_v42 = vsub.f32 1.0, %v3263_v6  ;;  %v3261_v38 = vmul.f32 %v5385_v44, %v3260_v23  ;;  %v3326_v35 = vmul.f32 %v6032_v7, %v3325_v31  ;;  %v3312_v6 = vadd.f32 %v3310_v13, %v3306_v40 }
0x1271   : > { %v3316_v23 = vmul.f32 %v8283_v1, %v3314_v18 }
0x1272   : > { %v3265_v25 = vmul.f32 %v5391_v61, %v3264_v42  ;;  %v3277_v62 = vmul.f32 %v6032_v7, %v3261_v38 }
0x1273   : > { %v3318_v15 = vadd.f32 %v3316_v23, %v3312_v6 }
0x1274   : > { %v3266_v50 = vadd.f32 %v5391_v61, %v3265_v25  ;;  %v3282_v26 = vmul.f32 %v3280_v0, %v3277_v62  ;;  %v8287_v0 = vld [vmem:[%s9310_s1 + $0x38] sm:$0xff] }
0x1275   : > { %v3322_v25 = vmul.f32 %v8287_v0, %v3320_v10 }
0x1276   : > { %v3284_v43 = vsel %vm768_vm7, %v3282_v26, 0.0  ;;  %v3270_v14 = vsel %vm3269_vm13, %v5391_v61, %v3266_v50  ;;  %v3327_v26 = vmul.f32 %v6036_v8, %v3325_v31 }
0x1277   : > { %3285 = vadd.xlane.f32.xlu0 %v3284_v43  ;;  %v3275_v55 = vsel %vm3272_vm14, %v3274_v17, %v3270_v14  ;;  %v3324_v50 = vadd.f32 %v3322_v25, %v3318_v15 }
0x1278   : > { %v3276_v16 = vmul.f32 %v5387_v37, %v3275_v55  ;;  %v3315_v37 = vmul.f32 %v8153_v36, %v3314_v18 }
0x127a   : > { %v3278_v20 = vmul.f32 %v6036_v8, %v3276_v16  ;;  %v3317_v22 = vadd.f32 %v3315_v37, %v3311_v4  ;;  %v5663_v37 = vmov 22  }
0x127b   : > { %5205 = vset.pattern.permute.xlu0 %v5663_v37  ;;  %5206 = vset.pattern.permute.xlu1 %v5663_v37 }
0x127c   : > { %v3283_v2 = vmul.f32 %v3281_v51, %v3278_v20  ;;  %v3323_v53 = vadd.f32 %v3321_v63, %v3317_v22 }
0x127e   : > { %v3287_v12 = vsel %vm768_vm7, %v3283_v2, 0.0 }
0x127f   : > { %3288 = vadd.xlane.f32.xlu2 %v3287_v12 }
0x1297   : > { %3329 = vperm.xlu2 %5204, %v9383_v9  }
0x129f   : > { %3333 = vperm.xlu2 %5204, %v9382_v47  }
0x12ea   : > { %v3286_v33 = vpop.xlane.xlu0 %3285 }
0x12eb   : > { %v3292_v45 = vmul.f32 %v3291_v21, %v3286_v33 }
0x12ed   : > { %v3296_v54 = vadd.f32 %v3295_v29, %v3292_v45 }
0x12ef   : > { %v3298_v5 = vmax.f32 %v3296_v54, 0.0 }
0x12f1   : > { %3301 = vst.msk [vmem:[%s7535_s12] sm:$0xff] %vm3300_vm15, %v3298_v5 }
0x12f2   : > { %v3289_v44 = vpop.xlane.xlu2 %3288 }
0x12f3   : > { %v3293_v27 = vmul.f32 %v3291_v21, %v3289_v44 }
0x12f5   : > { %v3297_v32 = vadd.f32 %v3295_v29, %v3293_v27 }
0x12f7   : > { %v3299_v19 = vmax.f32 %v3297_v32, 0.0 }
0x12f9   : > { %3302 = vst.msk [vmem:[%s7535_s12 + $0x8] sm:$0xff] %vm3300_vm15, %v3299_v19 }
0x12fa   : > { %v3330_v61 = vpop.permute.xlu2 %3329 }
0x12fb   : > { %v3336_v56 = vmul.f32 %v9342_v59, %v3330_v61 }
0x12fd   : > { %v3338_v42 = vadd.f32 %v3336_v56, %v3326_v35 }
0x12ff   : > { %v3340_v38 = vadd.f32 %v3338_v42, %v3323_v53  ;;  %v3402_v53 = vperm.slane %v9385_v52, 5 }
0x1301   : > { %v3344_v46 = vmul.f32 0.2, %v3340_v38  ;;  %vm3342_vm0 = vcmp.ge.f32.partialorder %v3340_v38, 0.0  ;;  %v3403_v25 = vmul.f32 %v6032_v7, %v3402_v53 }
0x1302   : > { %v3334_v62 = vpop.permute.xlu2 %3333 }
0x1303   : > { %v3337_v17 = vmul.f32 %v9354_v39, %v3334_v62  ;;  %v3346_v43 = vsel %vm3342_vm0, %v3340_v38, %v3344_v46 }
0x1304   : > { %v3348_v14 = vmul.f32 %v6032_v7, %v3346_v43 }
0x1305   : > { %v3339_v55 = vadd.f32 %v3337_v17, %v3327_v26 }
0x1306   : > { %v3350_v16 = vadd.f32 %v3348_v14, %v9355_v58 }
0x1307   : > { %v3341_v20 = vadd.f32 %v3339_v55, %v3324_v50 }
0x1308   : > { %v3352_v51 = vsel %vm768_vm7, %v3350_v16, -inf }
0x1309   : > { %v3345_v2 = vmul.f32 0.2, %v3341_v20  ;;  %3353 = vmax.xlane.f32.xlu1 %v3352_v51  ;;  %vm3343_vm2 = vcmp.ge.f32.partialorder %v3341_v20, 0.0 }
0x130b   : > { %v3347_v12 = vsel %vm3343_vm2, %v3341_v20, %v3345_v2  ;;  %v3404_v2 = vmul.f32 %v6036_v8, %v3402_v53 }
0x130c   : > { %v3349_v21 = vmul.f32 %v6036_v8, %v3347_v12 }
0x130e   : > { %v3351_v29 = vadd.f32 %v3349_v21, %v9364_v57 }
0x1310   : > { %v3355_v33 = vsel %vm768_vm7, %v3351_v29, -inf }
0x1311   : > { %3356 = vmax.xlane.f32.xlu0 %v3355_v33  ;;  %v3418_v33 = vstv %s4983_s5  ;;  %s5008_s5 = sld [smem:[#allocation2 + $0x68]] }
0x137c   : > { %v3354_v45 = vpop.xlane.xlu1 %3353 }
0x137d   : > { %v3358_v3 = vsub.f32 %v3350_v16, %v3354_v45 }
0x137f   : > { %v3360_v30 = vmul.f32 1.442695, %v3358_v3 }
0x1381   : > { %5392 = vpow2.f32 %v3360_v30 }
0x1384   : > { %v3357_v54 = vpop.xlane.xlu0 %3356 }
0x1385   : > { %v3359_v5 = vsub.f32 %v3351_v29, %v3357_v54  ;;  %v3414_v29 = vstv %s4982_s10  ;;  %s5007_s10 = sld [smem:[#allocation7 + $0x19]] }
0x1387   : > { %v5393_v60 = vpop.eup %5392  ;;  %v3362_v28 = vmul.f32 1.442695, %v3359_v5  ;;  %v3427_v5 = vstv %s8309_s11  ;;  %s5009_s11 = sld [smem:[#allocation2 + $0x69]] }
0x1388   : > { %v3364_v18 = vsel %vm768_vm7, %v5393_v60, 0.0 }
0x1389   : > { %5394 = vpow2.f32 %v3362_v28  ;;  %3365 = vadd.xlane.f32.xlu2 %v3364_v18  ;;  %v3428_v18 = vmul.f32 %v8141_v34, %v3427_v5 }
0x138f   : > { %v5395_v44 = vpop.eup %5394 }
0x1390   : > { %v3367_v27 = vsel %vm768_vm7, %v5395_v44, 0.0 }
0x1391   : > { %3368 = vadd.xlane.f32.xlu1 %v3367_v27 }
0x13fc   : > { %v3366_v4 = vpop.xlane.xlu2 %3365 }
0x13fd   : > { %5396 = vrcp.f32 %v3366_v4  ;;  %v3381_v19 = vand.u32 2147483648, %v3366_v4  ;;  %v3379_v40 = vand.u32 2147483647, %v3366_v4  ;;  %vm3375_vm4 = vweird.f32 %v3366_v4 }
0x13ff   : > { %v3382_v61 = vor.u32 1.1754944e-38, %v3381_v19  ;;  %vm3380_vm6 = vcmp.eq.f32.partialorder %v3379_v40, 8.507059e+37  ;;  %v3448_v40 = vperm.slane %v7990_v24, 6 }
0x1403   : > { %v5397_v10 = vpop.eup %5396 }
0x1404   : > { %v3371_v32 = vmul.f32 %v5397_v10, %v3366_v4  ;;  %v3369_v63 = vpop.xlane.xlu1 %3368  ;;  %vm3376_vm3 = vweird.f32 %v5397_v10  ;;  %v3437_v4 = vstv %s8313_s27  ;;  %s5011_s27 = sld [smem:[#allocation2 + $0x6b]] }
0x1405   : > { %5398 = vrcp.f32 %v3369_v63  ;;  %vm3377_vm5 = vmor %vm3375_vm4, %vm3376_vm3  ;;  %v3396_v15 = vand.u32 2147483648, %v3369_v63  ;;  %v3394_v62 = vand.u32 2147483647, %v3369_v63  ;;  %vm3390_vm9 = vweird.f32 %v3369_v63 }
0x1406   : > { %v3372_v31 = vsub.f32 1.0, %v3371_v32  ;;  %v3438_v32 = vmul.f32 %v8153_v36, %v3437_v4  ;;  %v3429_v36 = vmul.f32 %v8271_v48, %v3427_v5 }
0x1407   : > { %v3397_v43 = vor.u32 1.1754944e-38, %v3396_v15  ;;  %vm3395_vm11 = vcmp.eq.f32.partialorder %v3394_v62, 8.507059e+37 }
0x1408   : > { %v3373_v22 = vmul.f32 %v5397_v10, %v3372_v31  ;;  %v3443_v31 = vstv %s8317_s25  ;;  %s8603_s25 = sld [smem:[#allocation2 + $0x70]] }
0x140a   : > { %v3374_v13 = vadd.f32 %v5397_v10, %v3373_v22  ;;  %v3444_v22 = vmul.f32 %v8159_v41, %v3443_v31  ;;  %v3439_v41 = vmul.f32 %v8283_v1, %v3437_v4 }
0x140b   : > { %v5399_v35 = vpop.eup %5398 }
0x140c   : > { %v3386_v56 = vmul.f32 %v5399_v35, %v3369_v63  ;;  %v3378_v6 = vsel %vm3377_vm5, %v5397_v10, %v3374_v13  ;;  %vm3391_vm8 = vweird.f32 %v5399_v35  ;;  %v5664_v13 = vmov 23  }
0x140d   : > { %v3383_v23 = vsel %vm3380_vm6, %v3382_v61, %v3378_v6  ;;  %vm3392_vm10 = vmor %vm3390_vm9, %vm3391_vm8  ;;  %5207 = vset.pattern.permute.xlu2 %v5664_v13 }
0x140e   : > { %v3387_v42 = vsub.f32 1.0, %v3386_v56  ;;  %v3384_v38 = vmul.f32 %v5393_v60, %v3383_v23  ;;  %v3431_v60 = vstv %s8311_s15  ;;  %s5010_s15 = sld [smem:[#allocation2 + $0x6a]] }
0x140f   : > { %v3433_v53 = vmul.f32 %v8275_v49, %v3431_v60 }
0x1410   : > { %v3388_v46 = vmul.f32 %v5399_v35, %v3387_v42  ;;  %v3400_v50 = vmul.f32 %v6032_v7, %v3384_v38 }
0x1411   : > { %v3435_v23 = vadd.f32 %v3433_v53, %v3429_v36 }
0x1412   : > { %v3389_v26 = vadd.f32 %v5399_v35, %v3388_v46  ;;  %v3405_v17 = vmul.f32 %v3403_v25, %v3400_v50  ;;  %v3445_v25 = vmul.f32 %v8287_v0, %v3443_v31  ;;  %v3566_v31 = vstv %s8354_s7  ;;  %s8611_s7 = sld [smem:[#allocation2 + $0x6c]] }
0x1413   : > { %v3441_v15 = vadd.f32 %v3439_v41, %v3435_v23 }
0x1414   : > { %v3407_v14 = vsel %vm768_vm7, %v3405_v17, 0.0  ;;  %v3393_v55 = vsel %vm3392_vm10, %v5399_v35, %v3389_v26  ;;  %v3449_v35 = vmul.f32 %v6032_v7, %v3448_v40  ;;  %v3450_v17 = vmul.f32 %v6036_v8, %v3448_v40 }
0x1415   : > { %3408 = vadd.xlane.f32.xlu0 %v3407_v14  ;;  %v3398_v16 = vsel %vm3395_vm11, %v3397_v43, %v3393_v55  ;;  %v3447_v26 = vadd.f32 %v3445_v25, %v3441_v15  ;;  %v3571_v40 = vperm.slane %v7990_v24, 7  ;;  %vm3546_vm10 = vcmask 187568  }
0x1416   : > { %v3399_v20 = vmul.f32 %v5395_v44, %v3398_v16  ;;  %v3432_v44 = vmul.f32 %v8147_v11, %v3431_v60 }
0x1418   : > { %v3401_v51 = vmul.f32 %v6036_v8, %v3399_v20  ;;  %v3434_v10 = vadd.f32 %v3432_v44, %v3428_v18  ;;  %v3554_v18 = vstv %s8348_s2  ;;  %s8607_s2 = sld [smem:[#allocation2 + $0x72]] }
0x141a   : > { %v3406_v12 = vmul.f32 %v3404_v2, %v3401_v51  ;;  %v3440_v19 = vadd.f32 %v3438_v32, %v3434_v10  ;;  %v3560_v10 = vstv %s8350_s0  ;;  %s8609_s0 = sld [smem:[#allocation2 + $0x73]] }
0x141c   : > { %v3410_v21 = vsel %vm768_vm7, %v3406_v12, 0.0  ;;  %v3446_v11 = vadd.f32 %v3444_v22, %v3440_v19  ;;  %v3568_v22 = vmul.f32 %v8287_v0, %v3566_v31 }
0x141d   : > { %3411 = vadd.xlane.f32.xlu1 %v3410_v21 }
0x1429   : > { %3452 = vperm.xlu0 %5205, %v9383_v9  }
0x1436   : > { %3456 = vperm.xlu1 %5206, %v9382_v47  }
0x143e   : > { %5208 = vset.pattern.permute.xlu1 %v5664_v13 }
0x1488   : > { %v3409_v45 = vpop.xlane.xlu0 %3408 }
0x1489   : > { %v3415_v3 = vmul.f32 %v3414_v29, %v3409_v45 }
0x148b   : > { %v3419_v30 = vadd.f32 %v3418_v33, %v3415_v3 }
0x148d   : > { %v3421_v54 = vmax.f32 %v3419_v30, 0.0 }
0x148f   : > { %3424 = vst.msk [vmem:[%s7535_s12] sm:$0xff] %vm3423_vm12, %v3421_v54 }
0x1490   : > { %v3412_v28 = vpop.xlane.xlu1 %3411 }
0x1491   : > { %v3416_v27 = vmul.f32 %v3414_v29, %v3412_v28  ;;  %v3550_v28 = vstv %s8346_s20  ;;  %s8605_s20 = sld [smem:[#allocation2 + $0x71]] }
0x1492   : > { %v3552_v4 = vmul.f32 %v8271_v48, %v3550_v28 }
0x1493   : > { %v3420_v37 = vadd.f32 %v3418_v33, %v3416_v27 }
0x1495   : > { %v3422_v63 = vmax.f32 %v3420_v37, 0.0  ;;  %v3556_v37 = vmul.f32 %v8275_v49, %v3554_v18 }
0x1497   : > { %3425 = vst.msk [vmem:[%s7535_s12 + $0x8] sm:$0xff] %vm3423_vm12, %v3422_v63  ;;  %v3558_v32 = vadd.f32 %v3556_v37, %v3552_v4  ;;  %v3562_v63 = vmul.f32 %v8283_v1, %v3560_v10 }
0x1499   : > { %v3564_v19 = vadd.f32 %v3562_v63, %v3558_v32 }
0x149b   : > { %v3453_v34 = vpop.permute.xlu0 %3452 }
0x149c   : > { %v3459_v61 = vmul.f32 %v9342_v59, %v3453_v34  ;;  %v3570_v34 = vadd.f32 %v3568_v22, %v3564_v19 }
0x149e   : > { %v3461_v56 = vadd.f32 %v3459_v61, %v3449_v35 }
0x14a0   : > { %v3463_v6 = vadd.f32 %v3461_v56, %v3446_v11  ;;  %v3573_v11 = vmul.f32 %v6036_v8, %v3571_v40 }
0x14a2   : > { %v3467_v42 = vmul.f32 0.2, %v3463_v6  ;;  %vm3465_vm13 = vcmp.ge.f32.partialorder %v3463_v6, 0.0 }
0x14a4   : > { %v3469_v38 = vsel %vm3465_vm13, %v3463_v6, %v3467_v42 }
0x14a5   : > { %v3471_v46 = vmul.f32 %v6032_v7, %v3469_v38 }
0x14a7   : > { %v3473_v62 = vadd.f32 %v3471_v46, %v9355_v58 }
0x14a8   : > { %v3457_v50 = vpop.permute.xlu1 %3456 }
0x14a9   : > { %v3460_v43 = vmul.f32 %v9354_v39, %v3457_v50  ;;  %v3475_v14 = vsel %vm768_vm7, %v3473_v62, -inf }
0x14aa   : > { %3476 = vmax.xlane.f32.xlu2 %v3475_v14 }
0x14ab   : > { %v3462_v55 = vadd.f32 %v3460_v43, %v3450_v17 }
0x14ad   : > { %v3464_v16 = vadd.f32 %v3462_v55, %v3447_v26  ;;  %v3525_v55 = vperm.slane %v9385_v52, 6 }
0x14af   : > { %v3468_v20 = vmul.f32 0.2, %v3464_v16  ;;  %vm3466_vm14 = vcmp.ge.f32.partialorder %v3464_v16, 0.0  ;;  %v3527_v63 = vmul.f32 %v6036_v8, %v3525_v55 }
0x14b1   : > { %v3470_v51 = vsel %vm3466_vm14, %v3464_v16, %v3468_v20 }
0x14b2   : > { %v3472_v2 = vmul.f32 %v6036_v8, %v3470_v51 }
0x14b4   : > { %v3474_v12 = vadd.f32 %v3472_v2, %v9364_v57 }
0x14b6   : > { %v3478_v21 = vsel %vm768_vm7, %v3474_v12, -inf }
0x14b7   : > { %3479 = vmax.xlane.f32.xlu1 %v3478_v21 }
0x14d0   : > { %3579 = vperm.xlu1 %5208, %v9382_v47  }
0x151d   : > { %v3477_v29 = vpop.xlane.xlu2 %3476 }
0x151e   : > { %v3481_v33 = vsub.f32 %v3473_v62, %v3477_v29 }
0x1520   : > { %v3483_v45 = vmul.f32 1.442695, %v3481_v33 }
0x1522   : > { %5400 = vpow2.f32 %v3483_v45 }
0x1528   : > { %v5401_v3 = vpop.eup %5400 }
0x1529   : > { %v3487_v30 = vsel %vm768_vm7, %v5401_v3, 0.0 }
0x152a   : > { %v3480_v54 = vpop.xlane.xlu1 %3479  ;;  %3488 = vadd.xlane.f32.xlu2 %v3487_v30 }
0x152b   : > { %v3482_v5 = vsub.f32 %v3474_v12, %v3480_v54  ;;  %v3526_v12 = vmul.f32 %v6032_v7, %v3525_v55 }
0x152d   : > { %v3485_v60 = vmul.f32 1.442695, %v3482_v5 }
0x152f   : > { %5402 = vpow2.f32 %v3485_v60 }
0x1535   : > { %v8356_v44 = vpop.eup %5402 }
0x1536   : > { %v3490_v27 = vsel %vm768_vm7, %v8356_v44, 0.0 }
0x1537   : > { %3491 = vadd.xlane.f32.xlu0 %v3490_v27 }
0x1542   : > { %v3580_v13 = vpop.permute.xlu1 %3579 }
0x1543   : > { %v3583_v35 = vmul.f32 %v9354_v39, %v3580_v13 }
0x1545   : > { %v3585_v61 = vadd.f32 %v3583_v35, %v3573_v11 }
0x1547   : > { %v3587_v36 = vadd.f32 %v3585_v61, %v3570_v34 }
0x1549   : > { %v3591_v53 = vmul.f32 0.2, %v3587_v36  ;;  %vm3589_vm15 = vcmp.ge.f32.partialorder %v3587_v36, 0.0 }
0x154b   : > { %v3593_v56 = vsel %vm3589_vm15, %v3587_v36, %v3591_v53  ;;  %v3537_v36 = vstv %s4988_s8  ;;  %v3541_v53 = vstv %s4989_s22  ;;  %s8613_s8 = sld [smem:[#allocation2 + $0x6d]] }
0x154c   : > { %v3595_v6 = vmul.f32 %v6036_v8, %v3593_v56  ;;  %s8621_s22 = sld [smem:[#allocation2 + $0x6e]] }
0x154e   : > { %v3597_v23 = vadd.f32 %v3595_v6, %v9364_v57 }
0x1550   : > { %v3601_v41 = vsel %vm768_vm7, %v3597_v23, -inf }
0x1551   : > { %3602 = vmax.xlane.f32.xlu0 %v3601_v41 }
0x159d   : > { %v3489_v42 = vpop.xlane.xlu2 %3488 }
0x159e   : > { %5404 = vrcp.f32 %v3489_v42  ;;  %v3504_v46 = vand.u32 2147483648, %v3489_v42  ;;  %v3502_v50 = vand.u32 2147483647, %v3489_v42  ;;  %vm3498_vm2 = vweird.f32 %v3489_v42 }
0x15a0   : > { %v3505_v43 = vor.u32 1.1754944e-38, %v3504_v46  ;;  %vm3503_vm4 = vcmp.eq.f32.partialorder %v3502_v50, 8.507059e+37  ;;  %v5665_v46 = vmov 24  }
0x15a1   : > { %5209 = vset.pattern.permute.xlu0 %v5665_v46 }
0x15a4   : > { %v5405_v38 = vpop.eup %5404 }
0x15a5   : > { %v3494_v15 = vmul.f32 %v5405_v38, %v3489_v42  ;;  %vm3499_vm0 = vweird.f32 %v5405_v38  ;;  %v8402_v42 = vld [vmem:[%s9310_s1] sm:$0xff] }
0x15a6   : > { %vm3500_vm3 = vmor %vm3498_vm2, %vm3499_vm0 }
0x15a7   : > { %v3495_v25 = vsub.f32 1.0, %v3494_v15  ;;  %v8408_v15 = vld [vmem:[%s9310_s1 + $0x10] sm:$0xff] }
0x15a9   : > { %v3496_v62 = vmul.f32 %v5405_v38, %v3495_v25  ;;  %v3555_v25 = vmul.f32 %v8408_v15, %v3554_v18 }
0x15aa   : > { %v3492_v26 = vpop.xlane.xlu0 %3491 }
0x15ab   : > { %v3497_v17 = vadd.f32 %v5405_v38, %v3496_v62  ;;  %5406 = vrcp.f32 %v3492_v26  ;;  %v3519_v45 = vand.u32 2147483648, %v3492_v26  ;;  %v3517_v5 = vand.u32 2147483647, %v3492_v26 }
0x15ac   : > { %vm3513_vm6 = vweird.f32 %v3492_v26 }
0x15ad   : > { %v3501_v14 = vsel %vm3500_vm3, %v5405_v38, %v3497_v17  ;;  %v3520_v27 = vor.u32 1.1754944e-38, %v3519_v45  ;;  %vm3518_vm9 = vcmp.eq.f32.partialorder %v3517_v5, 8.507059e+37  ;;  %v3551_v38 = vmul.f32 %v8402_v42, %v3550_v28  ;;  %v8414_v17 = vld [vmem:[%s9310_s1 + $0x20] sm:$0xff] }
0x15ae   : > { %v3506_v16 = vsel %vm3503_vm4, %v3505_v43, %v3501_v14  ;;  %v3561_v43 = vmul.f32 %v8414_v17, %v3560_v10  ;;  %vm3669_vm4 = vcmask 195768  }
0x15af   : > { %v3507_v20 = vmul.f32 %v5401_v3, %v3506_v16  ;;  %v8420_v16 = vld [vmem:[%s9310_s1 + $0x30] sm:$0xff] }
0x15b1   : > { %v5407_v51 = vpop.eup %5406  ;;  %v3523_v2 = vmul.f32 %v6032_v7, %v3507_v20  ;;  %v3567_v20 = vmul.f32 %v8420_v16, %v3566_v31 }
0x15b2   : > { %v3509_v21 = vmul.f32 %v5407_v51, %v3492_v26  ;;  %vm3514_vm5 = vweird.f32 %v5407_v51  ;;  %v3557_v26 = vadd.f32 %v3555_v25, %v3551_v38  ;;  %v3648_v25 = vperm.slane %v9385_v52, 7 }
0x15b3   : > { %v3528_v29 = vmul.f32 %v3526_v12, %v3523_v2  ;;  %vm3515_vm8 = vmor %vm3513_vm6, %vm3514_vm5  ;;  %v3572_v2 = vmul.f32 %v6032_v7, %v3571_v40 }
0x15b4   : > { %v3510_v33 = vsub.f32 1.0, %v3509_v21  ;;  %v3563_v28 = vadd.f32 %v3561_v43, %v3557_v26  ;;  %v3649_v43 = vmul.f32 %v6032_v7, %v3648_v25 }
0x15b5   : > { %v3530_v30 = vsel %vm768_vm7, %v3528_v29, 0.0 }
0x15b6   : > { %v3511_v54 = vmul.f32 %v5407_v51, %v3510_v33  ;;  %3531 = vadd.xlane.f32.xlu2 %v3530_v30 }
0x15b8   : > { %v3512_v60 = vadd.f32 %v5407_v51, %v3511_v54 }
0x15ba   : > { %v3516_v3 = vsel %vm3515_vm8, %v5407_v51, %v3512_v60  ;;  %v3569_v51 = vadd.f32 %v3567_v20, %v3563_v28 }
0x15bb   : > { %v3521_v4 = vsel %vm3518_vm9, %v3520_v27, %v3516_v3 }
0x15bc   : > { %v3522_v37 = vmul.f32 %v8356_v44, %v3521_v4  ;;  %v630_v44 = vld [vmem:[%s9384_s23 + $0x18] sm:$0xff]  ;;  %s4994_s23 = sld [smem:[#allocation5 + $0x17]] }
0x15bd   : > { %4846 = vmatmul.msk.f32.gmra.mxu2 %vm631_vm1, %v630_v44 }
0x15be   : > { %v3524_v32 = vmul.f32 %v6036_v8, %v3522_v37 }
0x15c0   : > { %v3529_v19 = vmul.f32 %v3527_v63, %v3524_v32 }
0x15c2   : > { %v3533_v22 = vsel %vm768_vm7, %v3529_v19, 0.0 }
0x15c3   : > { %3534 = vadd.xlane.f32.xlu2 %v3533_v22 }
0x15c4   : > { %v3603_v13 = vpop.xlane.xlu0 %3602 }
0x15c5   : > { %v3605_v34 = vsub.f32 %v3597_v23, %v3603_v13 }
0x15c7   : > { %v3608_v11 = vmul.f32 1.442695, %v3605_v34 }
0x15c9   : > { %5408 = vpow2.f32 %v3608_v11 }
0x15cf   : > { %v8390_v35 = vpop.eup %5408 }
0x15d0   : > { %v3613_v61 = vsel %vm768_vm7, %v8390_v35, 0.0 }
0x15d1   : > { %3614 = vadd.xlane.f32.xlu1 %v3613_v61 }
0x15db   : > { %3575 = vperm.xlu2 %5207, %v9383_v9  }
0x15e3   : > { %5210 = vset.pattern.permute.xlu2 %v5665_v46 }
0x1629   : > { %v3532_v56 = vpop.xlane.xlu2 %3531 }
0x162a   : > { %v3538_v6 = vmul.f32 %v3537_v36, %v3532_v56 }
0x162c   : > { %v3542_v23 = vadd.f32 %v3541_v53, %v3538_v6 }
0x162e   : > { %v3544_v41 = vmax.f32 %v3542_v23, 0.0 }
0x1630   : > { %3547 = vst.msk [vmem:[%s7535_s12] sm:$0xff] %vm3546_vm10, %v3544_v41 }
0x1636   : > { %v3535_v62 = vpop.xlane.xlu2 %3534 }
0x1637   : > { %v3539_v50 = vmul.f32 %v3537_v36, %v3535_v62 }
0x1639   : > { %v3543_v14 = vadd.f32 %v3541_v53, %v3539_v50 }
0x163b   : > { %v3545_v55 = vmax.f32 %v3543_v14, 0.0 }
0x163d   : > { %3548 = vst.msk [vmem:[%s7535_s12 + $0x8] sm:$0xff] %vm3546_vm10, %v3545_v55 }
0x163e   : > { %v3576_v18 = vpop.permute.xlu2 %3575 }
0x163f   : > { %v3582_v12 = vmul.f32 %v9342_v59, %v3576_v18  ;;  %v3650_v18 = vmul.f32 %v6036_v8, %v3648_v25 }
0x1641   : > { %v3584_v21 = vadd.f32 %v3582_v12, %v3572_v2  ;;  %v3660_v2 = vstv %s4994_s23  ;;  %v3664_v12 = vstv %s4995_s13  ;;  %s8652_s23 = sld [smem:[#allocation2 + $0x79]] }
0x1642   : > { %s8655_s13 = sld [smem:[#allocation2 + $0x74]] }
0x1643   : > { %v3586_v10 = vadd.f32 %v3584_v21, %v3569_v51 }
0x1644   : > { %v3615_v27 = vpop.xlane.xlu1 %3614 }
0x1645   : > { %v3590_v29 = vmul.f32 0.2, %v3586_v10  ;;  %vm3588_vm1 = vcmp.ge.f32.partialorder %v3586_v10, 0.0  ;;  %vm3636_vm12 = vweird.f32 %v3615_v27  ;;  %v3642_v11 = vand.u32 2147483648, %v3615_v27 }
0x1646   : > { %v3640_v44 = vand.u32 2147483647, %v3615_v27 }
0x1647   : > { %v3592_v33 = vsel %vm3588_vm1, %v3586_v10, %v3590_v29  ;;  %v3643_v23 = vor.u32 1.1754944e-38, %v3642_v11 }
0x1648   : > { %v3594_v45 = vmul.f32 %v6032_v7, %v3592_v33  ;;  %vm3641_vm2 = vcmp.eq.f32.partialorder %v3640_v44, 8.507059e+37 }
0x164a   : > { %v3596_v30 = vadd.f32 %v3594_v45, %v9355_v58 }
0x164c   : > { %v3598_v31 = vsel %vm768_vm7, %v3596_v30, -inf }
0x164d   : > { %3599 = vmax.xlane.f32.xlu2 %v3598_v31  ;;  %v3677_v31 = vstv %s4997_s14  ;;  %s8666_s14 = sld [smem:[#allocation2 + $0x7a]] }
0x1665   : > { %3702 = vperm.xlu2 %5210, %v9382_v47  }
0x16c0   : > { %v3600_v54 = vpop.xlane.xlu2 %3599 }
0x16c1   : > { %v3604_v24 = vsub.f32 %v3596_v30, %v3600_v54  ;;  %v3673_v30 = vstv %s4996_s16  ;;  %s8659_s16 = sld [smem:[#allocation2 + $0x75]] }
0x16c3   : > { %v3606_v5 = vmul.f32 1.442695, %v3604_v24 }
0x16c5   : > { %5410 = vpow2.f32 %v3606_v5  ;;  %v3675_v5 = vmul.f32 %v8271_v48, %v3673_v30 }
0x16c6   : > { %5412 = vrcp.f32 %v3615_v27 }
0x16cb   : > { %v5411_v40 = vpop.eup %5410 }
0x16cc   : > { %v3610_v60 = vsel %vm768_vm7, %v5411_v40, 0.0  ;;  %v5413_v3 = vpop.eup %5412 }
0x16cd   : > { %3611 = vadd.xlane.f32.xlu0 %v3610_v60  ;;  %v3632_v4 = vmul.f32 %v5413_v3, %v3615_v27  ;;  %vm3637_vm11 = vweird.f32 %v5413_v3  ;;  %v8448_v60 = vpop.f32.mrf.mxu2  ;;  %v3683_v27 = vstv %s4998_s6  ;;  %s8670_s6 = sld [smem:[#allocation2 + $0x7b]] }
0x16ce   : > { %vm3638_vm14 = vmor %vm3636_vm12, %vm3637_vm11 }
0x16cf   : > { %v3633_v32 = vsub.f32 1.0, %v3632_v4  ;;  %v3678_v4 = vmul.f32 %v8408_v15, %v3677_v31 }
0x16d1   : > { %v3634_v63 = vmul.f32 %v5413_v3, %v3633_v32  ;;  %v3685_v32 = vmul.f32 %v8283_v1, %v3683_v27 }
0x16d3   : > { %v3635_v13 = vadd.f32 %v5413_v3, %v3634_v63  ;;  %v3694_v63 = vperm.slane %v8448_v60, 0 }
0x16d5   : > { %v3639_v6 = vsel %vm3638_vm14, %v5413_v3, %v3635_v13  ;;  %v3674_v3 = vmul.f32 %v8402_v42, %v3673_v30  ;;  %v3696_v44 = vmul.f32 %v6036_v8, %v3694_v63 }
0x16d6   : > { %v3644_v62 = vsel %vm3641_vm2, %v3643_v23, %v3639_v6 }
0x16d7   : > { %v3645_v14 = vmul.f32 %v8390_v35, %v3644_v62  ;;  %v3680_v13 = vadd.f32 %v3678_v4, %v3674_v3 }
0x16d9   : > { %v3647_v20 = vmul.f32 %v6036_v8, %v3645_v14 }
0x16db   : > { %v3652_v51 = vmul.f32 %v3650_v18, %v3647_v20 }
0x16dd   : > { %v3656_v52 = vsel %vm768_vm7, %v3652_v51, 0.0 }
0x1740   : > { %v3612_v37 = vpop.xlane.xlu0 %3611 }
0x1741   : > { %5414 = vrcp.f32 %v3612_v37  ;;  %v3627_v61 = vand.u32 2147483648, %v3612_v37  ;;  %v3625_v53 = vand.u32 2147483647, %v3612_v37  ;;  %vm3621_vm15 = vweird.f32 %v3612_v37 }
0x1743   : > { %v3628_v41 = vor.u32 1.1754944e-38, %v3627_v61  ;;  %vm3626_vm3 = vcmp.eq.f32.partialorder %v3625_v53, 8.507059e+37 }
0x1747   : > { %v5415_v19 = vpop.eup %5414 }
0x1748   : > { %v3617_v22 = vmul.f32 %v5415_v19, %v3612_v37  ;;  %vm3622_vm13 = vweird.f32 %v5415_v19 }
0x1749   : > { %vm3623_vm0 = vmor %vm3621_vm15, %vm3622_vm13 }
0x174a   : > { %v3618_v34 = vsub.f32 1.0, %v3617_v22  ;;  %v3703_v22 = vpop.permute.xlu2 %3702 }
0x174c   : > { %v3619_v36 = vmul.f32 %v5415_v19, %v3618_v34  ;;  %v3684_v34 = vmul.f32 %v8414_v17, %v3683_v27  ;;  %v3800_v27 = vstv %s8476_s19  ;;  %s8690_s19 = sld [smem:[#allocation2 + $0x7c]] }
0x174d   : > { %v3802_v4 = vmul.f32 %v8275_v49, %v3800_v27 }
0x174e   : > { %v3620_v56 = vadd.f32 %v5415_v19, %v3619_v36  ;;  %v3706_v36 = vmul.f32 %v9354_v39, %v3703_v22  ;;  %v3686_v53 = vadd.f32 %v3684_v34, %v3680_v13  ;;  %v3812_v22 = vstv %s8482_s29  ;;  %s8698_s29 = sld [smem:[#allocation2 + $0x7e]] }
0x174f   : > { %v3814_v34 = vmul.f32 %v8287_v0, %v3812_v22 }
0x1750   : > { %v3624_v38 = vsel %vm3623_vm0, %v5415_v19, %v3620_v56  ;;  %v3689_v19 = vstv %s4999_s18  ;;  %v3708_v23 = vadd.f32 %v3706_v36, %v3696_v44  ;;  %vm3792_vm0 = vcmask 203968   ;;  %s8679_s18 = sld [smem:[#allocation2 + $0x76]] }
0x1751   : > { %v3629_v46 = vsel %vm3626_vm3, %v3628_v41, %v3624_v38  ;;  %v3691_v61 = vmul.f32 %v8287_v0, %v3689_v19  ;;  %v3690_v56 = vmul.f32 %v8420_v16, %v3689_v19  ;;  %v3695_v41 = vmul.f32 %v6032_v7, %v3694_v63 }
0x1752   : > { %v3630_v50 = vmul.f32 %v5411_v40, %v3629_v46  ;;  %v3679_v40 = vmul.f32 %v8275_v49, %v3677_v31 }
0x1753   : > { %v3692_v25 = vadd.f32 %v3690_v56, %v3686_v53 }
0x1754   : > { %v3646_v26 = vmul.f32 %v6032_v7, %v3630_v50  ;;  %v3681_v37 = vadd.f32 %v3679_v40, %v3675_v5  ;;  %v3796_v40 = vstv %s8474_s17  ;;  %s8686_s17 = sld [smem:[#allocation2 + $0x77]] }
0x1755   : > { %v3798_v3 = vmul.f32 %v8271_v48, %v3796_v40 }
0x1756   : > { %v3651_v55 = vmul.f32 %v3649_v43, %v3646_v26  ;;  %v3687_v11 = vadd.f32 %v3685_v32, %v3681_v37  ;;  %v3806_v37 = vstv %s8478_s28  ;;  %s8693_s28 = sld [smem:[#allocation2 + $0x7d]] }
0x1757   : > { %v3804_v63 = vadd.f32 %v3802_v4, %v3798_v3  ;;  %v3808_v19 = vmul.f32 %v8283_v1, %v3806_v37 }
0x1758   : > { %v3653_v28 = vsel %vm768_vm7, %v3651_v55, 0.0  ;;  %v3693_v6 = vadd.f32 %v3691_v61, %v3687_v11  ;;  %v3817_v11 = vperm.slane %v8448_v60, 1 }
0x1759   : > { %3654 = vadd.xlane.f32.xlu0 %v3653_v28  ;;  %v3810_v13 = vadd.f32 %v3808_v19, %v3804_v63 }
0x175a   : > { %v3710_v62 = vadd.f32 %v3708_v23, %v3693_v6  ;;  %v3819_v49 = vmul.f32 %v6036_v8, %v3817_v11 }
0x175b   : > { %v3816_v53 = vadd.f32 %v3814_v34, %v3810_v13 }
0x175c   : > { %v3714_v43 = vmul.f32 0.2, %v3710_v62  ;;  %vm3712_vm6 = vcmp.ge.f32.partialorder %v3710_v62, 0.0 }
0x175e   : > { %v3716_v20 = vsel %vm3712_vm6, %v3710_v62, %v3714_v43 }
0x1761   : > { %3657 = vadd.xlane.f32.xlu0 %v3656_v52  ;;  %v3718_v52 = vmul.f32 %v6036_v8, %v3716_v20 }
0x1775   : > { %3698 = vperm.xlu0 %5209, %v9383_v9  }
0x17cc   : > { %v3655_v35 = vpop.xlane.xlu0 %3654 }
0x17cd   : > { %v3661_v21 = vmul.f32 %v3660_v2, %v3655_v35  ;;  %v5666_v35 = vmov 25  }
0x17ce   : > { %5212 = vset.pattern.permute.xlu2 %v5666_v35  ;;  %5211 = vset.pattern.permute.xlu1 %v5666_v35 }
0x17cf   : > { %v3665_v10 = vadd.f32 %v3664_v12, %v3661_v21 }
0x17d1   : > { %v3667_v29 = vmax.f32 %v3665_v10, 0.0 }
0x17d3   : > { %3670 = vst.msk [vmem:[%s7535_s12] sm:$0xff] %vm3669_vm4, %v3667_v29 }
0x17d4   : > { %v3658_v33 = vpop.xlane.xlu0 %3657 }
0x17d5   : > { %v3662_v45 = vmul.f32 %v3660_v2, %v3658_v33  ;;  %v3720_v2 = vadd.f32 %v3718_v52, %v9364_v57 }
0x17d7   : > { %v3666_v54 = vadd.f32 %v3664_v12, %v3662_v45  ;;  %v3724_v12 = vsel %vm768_vm7, %v3720_v2, -inf }
0x17d9   : > { %v3668_v24 = vmax.f32 %v3666_v54, 0.0 }
0x17db   : > { %3671 = vst.msk [vmem:[%s7535_s12 + $0x8] sm:$0xff] %vm3669_vm4, %v3668_v24 }
0x17e7   : > { %v3699_v38 = vpop.permute.xlu0 %3698 }
0x17e8   : > { %v3705_v46 = vmul.f32 %v9342_v59, %v3699_v38 }
0x17ea   : > { %v3707_v50 = vadd.f32 %v3705_v46, %v3695_v41 }
0x17ec   : > { %v3709_v26 = vadd.f32 %v3707_v50, %v3692_v25 }
0x17ee   : > { %v3713_v14 = vmul.f32 0.2, %v3709_v26  ;;  %vm3711_vm5 = vcmp.ge.f32.partialorder %v3709_v26, 0.0 }
0x17f0   : > { %v3715_v55 = vsel %vm3711_vm5, %v3709_v26, %v3713_v14  ;;  %v9386_v26 = vld [vmem:[#allocation22_spill] sm:$0xff] }
0x17f1   : > { %v3717_v28 = vmul.f32 %v6032_v7, %v3715_v55  ;;  %v3771_v43 = vperm.slane %v9386_v26, 0 }
0x17f3   : > { %v3719_v18 = vadd.f32 %v3717_v28, %v9355_v58  ;;  %v3772_v35 = vmul.f32 %v6032_v7, %v3771_v43  ;;  %v3773_v63 = vmul.f32 %v6036_v8, %v3771_v43  ;;  %v3807_v43 = vmul.f32 %v8414_v17, %v3806_v37 }
0x17f5   : > { %v3721_v51 = vsel %vm768_vm7, %v3719_v18, -inf }
0x17f6   : > { %3722 = vmax.xlane.f32.xlu1 %v3721_v51 }
0x17fe   : > { %3725 = vmax.xlane.f32.xlu1 %v3724_v12 }
0x1869   : > { %v3723_v21 = vpop.xlane.xlu1 %3722 }
0x186a   : > { %v3727_v10 = vsub.f32 %v3719_v18, %v3723_v21 }
0x186c   : > { %v3729_v29 = vmul.f32 1.442695, %v3727_v10 }
0x186e   : > { %5416 = vpow2.f32 %v3729_v29 }
0x1871   : > { %v3726_v33 = vpop.xlane.xlu1 %3725 }
0x1872   : > { %v3728_v45 = vsub.f32 %v3720_v2, %v3726_v33 }
0x1874   : > { %v5417_v30 = vpop.eup %5416  ;;  %v3731_v31 = vmul.f32 1.442695, %v3728_v45 }
0x1875   : > { %v3733_v54 = vsel %vm768_vm7, %v5417_v30, 0.0 }
0x1876   : > { %5418 = vpow2.f32 %v3731_v31  ;;  %3734 = vadd.xlane.f32.xlu2 %v3733_v54 }
0x187c   : > { %v8469_v24 = vpop.eup %5418 }
0x187d   : > { %v3736_v5 = vsel %vm768_vm7, %v8469_v24, 0.0 }
0x187e   : > { %3737 = vadd.xlane.f32.xlu0 %v3736_v5 }
0x188e   : > { %3825 = vperm.xlu2 %5212, %v9382_v47  }
0x18e9   : > { %v3735_v32 = vpop.xlane.xlu2 %3734 }
0x18ea   : > { %5420 = vrcp.f32 %v3735_v32  ;;  %v3750_v6 = vand.u32 2147483648, %v3735_v32  ;;  %v3748_v0 = vand.u32 2147483647, %v3735_v32  ;;  %vm3744_vm9 = vweird.f32 %v3735_v32 }
0x18ec   : > { %v3751_v62 = vor.u32 1.1754944e-38, %v3750_v6  ;;  %vm3749_vm11 = vcmp.eq.f32.partialorder %v3748_v0, 8.507059e+37 }
0x18f0   : > { %v5421_v61 = vpop.eup %5420 }
0x18f1   : > { %v3740_v44 = vmul.f32 %v5421_v61, %v3735_v32  ;;  %v3826_v48 = vpop.permute.xlu2 %3825  ;;  %v3738_v36 = vpop.xlane.xlu0 %3737  ;;  %vm3745_vm8 = vweird.f32 %v5421_v61 }
0x18f2   : > { %v3829_v56 = vmul.f32 %v9354_v39, %v3826_v48  ;;  %5422 = vrcp.f32 %v3738_v36  ;;  %vm3746_vm10 = vmor %vm3744_vm9, %vm3745_vm8  ;;  %v3763_v2 = vand.u32 2147483647, %v3738_v36  ;;  %v3765_v12 = vand.u32 2147483648, %v3738_v36 }
0x18f3   : > { %v3741_v1 = vsub.f32 1.0, %v3740_v44  ;;  %vm3759_vm13 = vweird.f32 %v3738_v36  ;;  %v3787_v48 = vstv %s5001_s9  ;;  %s5013_s9 = sld [smem:[#allocation7 + $0x1a]] }
0x18f4   : > { %v3831_v23 = vadd.f32 %v3829_v56, %v3819_v49  ;;  %v3766_v54 = vor.u32 1.1754944e-38, %v3765_v12  ;;  %vm3764_vm15 = vcmp.eq.f32.partialorder %v3763_v2, 8.507059e+37 }
0x18f5   : > { %v3742_v41 = vmul.f32 %v5421_v61, %v3741_v1 }
0x18f6   : > { %v3833_v38 = vadd.f32 %v3831_v23, %v3816_v53 }
0x18f7   : > { %v3743_v25 = vadd.f32 %v5421_v61, %v3742_v41 }
0x18f8   : > { %v5423_v46 = vpop.eup %5422  ;;  %v3837_v50 = vmul.f32 0.2, %v3833_v38  ;;  %vm3835_vm1 = vcmp.ge.f32.partialorder %v3833_v38, 0.0 }
0x18f9   : > { %v3755_v14 = vmul.f32 %v5423_v46, %v3738_v36  ;;  %v3747_v55 = vsel %vm3746_vm10, %v5421_v61, %v3743_v25  ;;  %vm3760_vm12 = vweird.f32 %v5423_v46  ;;  %v3783_v61 = vstv %s5000_s30  ;;  %s8724_s30 = sld [smem:[#allocation2 + $0x7f]] }
0x18fa   : > { %v3839_v28 = vsel %vm3835_vm1, %v3833_v38, %v3837_v50  ;;  %v3752_v20 = vsel %vm3749_vm11, %v3751_v62, %v3747_v55  ;;  %vm3761_vm14 = vmor %vm3759_vm13, %vm3760_vm12  ;;  %v5667_v25 = vmov 26   ;;  %v3801_v62 = vmul.f32 %v8408_v15, %v3800_v27 }
0x18fb   : > { %v3756_v18 = vsub.f32 1.0, %v3755_v14  ;;  %v3841_v51 = vmul.f32 %v6036_v8, %v3839_v28  ;;  %v3753_v52 = vmul.f32 %v5417_v30, %v3752_v20  ;;  %5213 = vset.pattern.permute.xlu0 %v5667_v25  ;;  %v3813_v55 = vmul.f32 %v8420_v16, %v3812_v22 }
0x18fc   : > { %vm3915_vm11 = vcmask 212168  }
0x18fd   : > { %v3757_v21 = vmul.f32 %v5423_v46, %v3756_v18  ;;  %v3843_v10 = vadd.f32 %v3841_v51, %v9364_v57  ;;  %v3769_v29 = vmul.f32 %v6032_v7, %v3753_v52  ;;  %v3818_v18 = vmul.f32 %v6032_v7, %v3817_v11 }
0x18ff   : > { %v3758_v33 = vadd.f32 %v5423_v46, %v3757_v21  ;;  %v3847_v45 = vsel %vm768_vm7, %v3843_v10, -inf  ;;  %v3774_v31 = vmul.f32 %v3772_v35, %v3769_v29 }
0x1900   : > { %3848 = vmax.xlane.f32.xlu0 %v3847_v45 }
0x1901   : > { %v3776_v30 = vsel %vm768_vm7, %v3774_v31, 0.0  ;;  %v3762_v5 = vsel %vm3761_vm14, %v5423_v46, %v3758_v33  ;;  %v3797_v46 = vmul.f32 %v8402_v42, %v3796_v40 }
0x1902   : > { %3777 = vadd.xlane.f32.xlu1 %v3776_v30  ;;  %v3767_v3 = vsel %vm3764_vm15, %v3766_v54, %v3762_v5 }
0x1903   : > { %v3768_v4 = vmul.f32 %v8469_v24, %v3767_v3  ;;  %v3803_v50 = vadd.f32 %v3801_v62, %v3797_v46 }
0x1905   : > { %v3770_v32 = vmul.f32 %v6036_v8, %v3768_v4  ;;  %v3809_v14 = vadd.f32 %v3807_v43, %v3803_v50 }
0x1907   : > { %v3775_v19 = vmul.f32 %v3773_v63, %v3770_v32  ;;  %v3815_v20 = vadd.f32 %v3813_v55, %v3809_v14 }
0x1909   : > { %v3779_v13 = vsel %vm768_vm7, %v3775_v19, 0.0 }
0x190a   : > { %3780 = vadd.xlane.f32.xlu1 %v3779_v13 }
0x1923   : > { %3821 = vperm.xlu1 %5211, %v9383_v9  }
0x192b   : > { %5214 = vset.pattern.permute.xlu1 %v5667_v25 }
0x1973   : > { %v3849_v34 = vpop.xlane.xlu0 %3848 }
0x1974   : > { %v3851_v44 = vsub.f32 %v3843_v10, %v3849_v34 }
0x1975   : > { %v3778_v36 = vpop.xlane.xlu1 %3777 }
0x1976   : > { %v3854_v24 = vmul.f32 1.442695, %v3851_v44  ;;  %v3784_v53 = vmul.f32 %v3783_v61, %v3778_v36 }
0x1978   : > { %5424 = vpow2.f32 %v3854_v24  ;;  %v3788_v49 = vadd.f32 %v3787_v48, %v3784_v53 }
0x197a   : > { %v3790_v56 = vmax.f32 %v3788_v49, 0.0 }
0x197c   : > { %3793 = vst.msk [vmem:[%s7535_s12] sm:$0xff] %vm3792_vm0, %v3790_v56  ;;  %v3894_v56 = vperm.slane %v9386_v26, 1 }
0x197d   : > { %v3781_v1 = vpop.xlane.xlu1 %3780 }
0x197e   : > { %v8516_v6 = vpop.eup %5424  ;;  %v3785_v23 = vmul.f32 %v3783_v61, %v3781_v1  ;;  %v3896_v43 = vmul.f32 %v6036_v8, %v3894_v56 }
0x197f   : > { %v3859_v41 = vsel %vm768_vm7, %v8516_v6, 0.0 }
0x1980   : > { %v3789_v0 = vadd.f32 %v3787_v48, %v3785_v23  ;;  %3860 = vadd.xlane.f32.xlu2 %v3859_v41 }
0x1982   : > { %v3791_v38 = vmax.f32 %v3789_v0, 0.0 }
0x1984   : > { %3794 = vst.msk [vmem:[%s7535_s12 + $0x8] sm:$0xff] %vm3792_vm0, %v3791_v38  ;;  %v3895_v38 = vmul.f32 %v6032_v7, %v3894_v56 }
0x1995   : > { %v3822_v28 = vpop.permute.xlu1 %3821 }
0x1996   : > { %v3828_v51 = vmul.f32 %v9342_v59, %v3822_v28  ;;  %v3906_v28 = vstv %s5006_s26  ;;  %s8966_s26 = sld [smem:[#allocation5 + $0x1b]] }
0x1998   : > { %v3830_v40 = vadd.f32 %v3828_v51, %v3818_v18 }
0x199a   : > { %v3832_v52 = vadd.f32 %v3830_v40, %v3815_v20  ;;  %v3910_v20 = vstv %s5007_s10  ;;  %s8968_s10 = sld [smem:[#allocation7 + $0x1b]] }
0x199c   : > { %v3836_v2 = vmul.f32 0.2, %v3832_v52  ;;  %vm3834_vm2 = vcmp.ge.f32.partialorder %v3832_v52, 0.0 }
0x199e   : > { %v3838_v27 = vsel %vm3834_vm2, %v3832_v52, %v3836_v2 }
0x199f   : > { %v3840_v12 = vmul.f32 %v6032_v7, %v3838_v27  ;;  %v3919_v27 = vstv %s5008_s5  ;;  %s9006_s5 = sld [smem:[#allocation5 + $0x1d]] }
0x19a1   : > { %v3842_v37 = vadd.f32 %v3840_v12, %v9355_v58  ;;  %v3923_v12 = vstv %s5009_s11  ;;  %s9012_s11 = sld [smem:[#allocation5 + $0x1c]] }
0x19a3   : > { %v3844_v35 = vsel %vm768_vm7, %v3842_v37, -inf }
0x19a4   : > { %3845 = vmax.xlane.f32.xlu1 %v3844_v35 }
0x19bd   : > { %3948 = vperm.xlu1 %5214, %v9382_v47  }
0x19f3   : > { %v3861_v33 = vpop.xlane.xlu2 %3860 }
0x19f4   : > { %vm3882_vm4 = vweird.f32 %v3861_v33  ;;  %v3888_v19 = vand.u32 2147483648, %v3861_v33  ;;  %v3886_v34 = vand.u32 2147483647, %v3861_v33 }
0x19f6   : > { %v3889_v24 = vor.u32 1.1754944e-38, %v3888_v19  ;;  %vm3887_vm10 = vcmp.eq.f32.partialorder %v3886_v34, 8.507059e+37 }
0x1a17   : > { %v3846_v22 = vpop.xlane.xlu1 %3845 }
0x1a18   : > { %v3850_v21 = vsub.f32 %v3842_v37, %v3846_v22  ;;  %v8554_v22 = vld [vmem:[%s9310_s1 + $0x8] sm:$0xff] }
0x1a1a   : > { %v3852_v10 = vmul.f32 1.442695, %v3850_v21  ;;  %v3921_v21 = vmul.f32 %v8554_v22, %v3919_v27 }
0x1a1c   : > { %5426 = vpow2.f32 %v3852_v10  ;;  %v8558_v10 = vld [vmem:[%s9310_s1 + $0x18] sm:$0xff] }
0x1a1d   : > { %5428 = vrcp.f32 %v3861_v33 }
0x1a22   : > { %v5427_v11 = vpop.eup %5426 }
0x1a23   : > { %v3856_v29 = vsel %vm768_vm7, %v5427_v11, 0.0  ;;  %v5429_v45 = vpop.eup %5428 }
0x1a24   : > { %3857 = vadd.xlane.f32.xlu0 %v3856_v29  ;;  %v3878_v31 = vmul.f32 %v5429_v45, %v3861_v33  ;;  %vm3883_vm3 = vweird.f32 %v5429_v45  ;;  %v3929_v29 = vstv %s5010_s15  ;;  %v3920_v33 = vmul.f32 %v8402_v42, %v3919_v27  ;;  %s9014_s15 = sld [smem:[#allocation7 + $0x1d]] }
0x1a25   : > { %vm3884_vm6 = vmor %vm3882_vm4, %vm3883_vm3 }
0x1a26   : > { %v3879_v30 = vsub.f32 1.0, %v3878_v31 }
0x1a28   : > { %v3880_v5 = vmul.f32 %v5429_v45, %v3879_v30 }
0x1a2a   : > { %v3881_v32 = vadd.f32 %v5429_v45, %v3880_v5  ;;  %v3935_v5 = vstv %s5011_s27  ;;  %s9017_s27 = sld [smem:[#allocation7 + $0x1c]] }
0x1a2c   : > { %v3885_v36 = vsel %vm3884_vm6, %v5429_v45, %v3881_v32  ;;  %v3924_v45 = vmul.f32 %v8408_v15, %v3923_v12 }
0x1a2d   : > { %v3890_v23 = vsel %vm3887_vm10, %v3889_v24, %v3885_v36  ;;  %v3936_v36 = vmul.f32 %v8420_v16, %v3935_v5 }
0x1a2e   : > { %v3891_v25 = vmul.f32 %v8516_v6, %v3890_v23  ;;  %v3926_v32 = vadd.f32 %v3924_v45, %v3920_v33  ;;  %v5670_v33 = vmov 30   ;;  %v5671_v45 = vmov 29  }
0x1a30   : > { %v3893_v50 = vmul.f32 %v6036_v8, %v3891_v25 }
0x1a32   : > { %v3898_v14 = vmul.f32 %v3896_v43, %v3893_v50 }
0x1a34   : > { %v3902_v55 = vsel %vm768_vm7, %v3898_v14, 0.0 }
0x1a97   : > { %v3858_v54 = vpop.xlane.xlu0 %3857 }
0x1a98   : > { %5430 = vrcp.f32 %v3858_v54  ;;  %v3873_v13 = vand.u32 2147483648, %v3858_v54  ;;  %v3871_v44 = vand.u32 2147483647, %v3858_v54  ;;  %vm3867_vm8 = vweird.f32 %v3858_v54 }
0x1a9a   : > { %v3874_v53 = vor.u32 1.1754944e-38, %v3873_v13  ;;  %vm3872_vm1 = vcmp.eq.f32.partialorder %v3871_v44, 8.507059e+37  ;;  %v8572_v13 = vld [vmem:[%s9310_s1 + $0x38] sm:$0xff] }
0x1a9b   : > { %v3937_v34 = vmul.f32 %v8572_v13, %v3935_v5  ;;  %v4169_v5 = vstv %s8605_s20  ;;  %s5037_s20 = sld [smem:[#allocation7 + $0x1e]] }
0x1a9e   : > { %v5431_v3 = vpop.eup %5430 }
0x1a9f   : > { %v3863_v4 = vmul.f32 %v5431_v3, %v3858_v54  ;;  %vm3868_vm5 = vweird.f32 %v5431_v3  ;;  %v8566_v54 = vld [vmem:[%s9310_s1 + $0x28] sm:$0xff] }
0x1aa0   : > { %vm3869_vm9 = vmor %vm3867_vm8, %vm3868_vm5  ;;  %v3931_v30 = vmul.f32 %v8566_v54, %v3929_v29 }
0x1aa1   : > { %v3864_v63 = vsub.f32 1.0, %v3863_v4  ;;  %v3940_v4 = vperm.slane %v8448_v60, 2 }
0x1aa3   : > { %v3865_v61 = vmul.f32 %v5431_v3, %v3864_v63  ;;  %v3930_v63 = vmul.f32 %v8414_v17, %v3929_v29  ;;  %v3942_v44 = vmul.f32 %v6036_v8, %v3940_v4 }
0x1aa5   : > { %v3866_v48 = vadd.f32 %v5431_v3, %v3865_v61 }
0x1aa7   : > { %v3870_v49 = vsel %vm3869_vm9, %v5431_v3, %v3866_v48  ;;  %v3949_v3 = vpop.permute.xlu1 %3948  ;;  %v3932_v48 = vadd.f32 %v3930_v63, %v3926_v32  ;;  %v4171_v32 = vmul.f32 %v8558_v10, %v4169_v5 }
0x1aa8   : > { %v3875_v1 = vsel %vm3872_vm1, %v3874_v53, %v3870_v49  ;;  %v3952_v61 = vmul.f32 %v9354_v39, %v3949_v3  ;;  %v4175_v3 = vstv %s8607_s2  ;;  %s9387_s2 = sld [smem:[#allocation16_spill]] }
0x1aa9   : > { %v3876_v41 = vmul.f32 %v5427_v11, %v3875_v1  ;;  %v3925_v11 = vmul.f32 %v8558_v10, %v3923_v12  ;;  %v3938_v56 = vadd.f32 %v3936_v36, %v3932_v48  ;;  %v3941_v1 = vmul.f32 %v6032_v7, %v3940_v4 }
0x1aaa   : > { %v3954_v53 = vadd.f32 %v3952_v61, %v3942_v44  ;;  %v4177_v63 = vmul.f32 %v8566_v54, %v4175_v3 }
0x1aab   : > { %v3892_v0 = vmul.f32 %v6032_v7, %v3876_v41  ;;  %v3927_v31 = vadd.f32 %v3925_v11, %v3921_v21 }
0x1aad   : > { %v3897_v46 = vmul.f32 %v3895_v38, %v3892_v0  ;;  %v3933_v19 = vadd.f32 %v3931_v30, %v3927_v31  ;;  %v5672_v31 = vmov 31  }
0x1aaf   : > { %v3899_v62 = vsel %vm768_vm7, %v3897_v46, 0.0  ;;  %v3939_v24 = vadd.f32 %v3937_v34, %v3933_v19  ;;  %v4181_v19 = vstv %s8609_s0  ;;  %s5042_s0 = sld [smem:[#allocation5 + $0x1f]] }
0x1ab0   : > { %3900 = vadd.xlane.f32.xlu0 %v3899_v62  ;;  %v4183_v61 = vmul.f32 %v8572_v13, %v4181_v19 }
0x1ab1   : > { %v3956_v41 = vadd.f32 %v3954_v53, %v3939_v24  ;;  %v4042_v53 = vstv %s8611_s7  ;;  %s5043_s7 = sld [smem:[#allocation7 + $0x1f]] }
0x1ab3   : > { %v3960_v25 = vmul.f32 0.2, %v3956_v41  ;;  %vm3958_vm13 = vcmp.ge.f32.partialorder %v3956_v41, 0.0 }
0x1ab5   : > { %v3962_v43 = vsel %vm3958_vm13, %v3956_v41, %v3960_v25  ;;  %v4044_v41 = vmul.f32 %v8554_v22, %v4042_v53  ;;  %vm4038_vm13 = vcmask 220368  }
0x1ab8   : > { %3903 = vadd.xlane.f32.xlu0 %v3902_v55 }
0x1acc   : > { %3944 = vperm.xlu0 %5213, %v9383_v9  }
0x1b23   : > { %v3901_v6 = vpop.xlane.xlu0 %3900 }
0x1b24   : > { %v3907_v18 = vmul.f32 %v3906_v28, %v3901_v6 }
0x1b26   : > { %v3911_v51 = vadd.f32 %v3910_v20, %v3907_v18  ;;  %v5668_v18 = vmov 27  }
0x1b27   : > { %5216 = vset.pattern.permute.xlu1 %v5668_v18  ;;  %5215 = vset.pattern.permute.xlu2 %v5668_v18  ;;  %v4170_v18 = vmul.f32 %v8408_v15, %v4169_v5 }
0x1b28   : > { %v3913_v40 = vmax.f32 %v3911_v51, 0.0 }
0x1b2a   : > { %3916 = vst.msk [vmem:[%s7535_s12] sm:$0xff] %vm3915_vm11, %v3913_v40 }
0x1b2b   : > { %v3904_v52 = vpop.xlane.xlu0 %3903 }
0x1b2c   : > { %v3908_v2 = vmul.f32 %v3906_v28, %v3904_v52  ;;  %v3964_v28 = vmul.f32 %v6036_v8, %v3962_v43 }
0x1b2e   : > { %v3912_v37 = vadd.f32 %v3910_v20, %v3908_v2  ;;  %v3966_v20 = vadd.f32 %v3964_v28, %v9364_v57  ;;  %v5669_v2 = vmov 28  }
0x1b2f   : > { %5217 = vset.pattern.permute.xlu0 %v5669_v2 }
0x1b30   : > { %v3914_v35 = vmax.f32 %v3912_v37, 0.0  ;;  %v3970_v6 = vsel %vm768_vm7, %v3966_v20, -inf }
0x1b32   : > { %3917 = vst.msk [vmem:[%s7535_s12 + $0x8] sm:$0xff] %vm3915_vm11, %v3914_v35 }
0x1b3e   : > { %v3945_v49 = vpop.permute.xlu0 %3944 }
0x1b3f   : > { %v3951_v23 = vmul.f32 %v9342_v59, %v3945_v49  ;;  %v4046_v49 = vstv %s8613_s8  ;;  %s5053_s8 = sshll.u32 %s9387_s2, 4 }
0x1b41   : > { %v3953_v0 = vadd.f32 %v3951_v23, %v3941_v1 }
0x1b43   : > { %v3955_v38 = vadd.f32 %v3953_v0, %v3938_v56  ;;  %v4048_v0 = vmul.f32 %v8558_v10, %v4046_v49 }
0x1b45   : > { %v3959_v46 = vmul.f32 0.2, %v3955_v38  ;;  %vm3957_vm12 = vcmp.ge.f32.partialorder %v3955_v38, 0.0 }
0x1b47   : > { %v3961_v62 = vsel %vm3957_vm12, %v3955_v38, %v3959_v46  ;;  %v4052_v38 = vstv %s8621_s22 }
0x1b48   : > { %v3963_v50 = vmul.f32 %v6032_v7, %v3961_v62  ;;  %v4017_v62 = vperm.slane %v9386_v26, 2  ;;  %v4054_v43 = vmul.f32 %v8566_v54, %v4052_v38 }
0x1b4a   : > { %v3965_v14 = vadd.f32 %v3963_v50, %v9355_v58 }
0x1b4c   : > { %v3967_v55 = vsel %vm768_vm7, %v3965_v14, -inf }
0x1b4d   : > { %3968 = vmax.xlane.f32.xlu2 %v3967_v55 }
0x1b55   : > { %3971 = vmax.xlane.f32.xlu2 %v3970_v6 }
0x1bc0   : > { %v3969_v51 = vpop.xlane.xlu2 %3968 }
0x1bc1   : > { %v3973_v40 = vsub.f32 %v3965_v14, %v3969_v51  ;;  %v4058_v14 = vstv %s8627_s21 }
0x1bc3   : > { %v3975_v52 = vmul.f32 1.442695, %v3973_v40 }
0x1bc5   : > { %5432 = vpow2.f32 %v3975_v52  ;;  %v4063_v52 = vperm.slane %v8448_v60, 3 }
0x1bc7   : > { %v4065_v5 = vmul.f32 %v6036_v8, %v4063_v52 }
0x1bc8   : > { %v3972_v27 = vpop.xlane.xlu2 %3971 }
0x1bc9   : > { %v3974_v12 = vsub.f32 %v3966_v20, %v3972_v27  ;;  %v4050_v20 = vadd.f32 %v4048_v0, %v4044_v41  ;;  %v4018_v27 = vmul.f32 %v6032_v7, %v4017_v62  ;;  %v4288_v0 = vstv %s8655_s13 }
0x1bcb   : > { %v8586_v37 = vpop.eup %5432  ;;  %v3977_v35 = vmul.f32 1.442695, %v3974_v12 }
0x1bcc   : > { %v3979_v21 = vsel %vm768_vm7, %v8586_v37, 0.0 }
0x1bcd   : > { %5434 = vpow2.f32 %v3977_v35  ;;  %3980 = vadd.xlane.f32.xlu1 %v3979_v21  ;;  %v4019_v35 = vmul.f32 %v6036_v8, %v4017_v62 }
0x1bd3   : > { %v8590_v11 = vpop.eup %5434 }
0x1bd4   : > { %v3982_v29 = vsel %vm768_vm7, %v8590_v11, 0.0 }
0x1bd5   : > { %3983 = vadd.xlane.f32.xlu0 %v3982_v29  ;;  %v4056_v29 = vadd.f32 %v4054_v43, %v4050_v20 }
0x1be6   : > { %4071 = vperm.xlu1 %5216, %v9382_v47  }
0x1be9   : > { %4190 = vperm.xlu0 %5217, %v9383_v9  }
0x1bee   : > { %5218 = vset.pattern.permute.xlu1 %v5669_v2 }
0x1bef   : > { %4194 = vperm.xlu1 %5218, %v9382_v47  }
0x1bf1   : > { %5221 = vset.pattern.permute.xlu0 %v5670_v33 }
0x1bf2   : > { %4440 = vperm.xlu0 %5221, %v9382_v47  }
0x1bf7   : > { %5219 = vset.pattern.permute.xlu1 %v5671_v45 }
0x1bf8   : > { %4313 = vperm.xlu1 %5219, %v9383_v9  }
0x1bfa   : > { %5223 = vset.pattern.permute.xlu0 %v5672_v31 }
0x1c00   : > { %4317 = vperm.xlu1 %5219, %v9382_v47  }
0x1c08   : > { %5222 = vset.pattern.permute.xlu1 %v5672_v31  ;;  %v4176_v31 = vmul.f32 %v8414_v17, %v4175_v3  ;;  %v4309_v17 = vperm.slane %v8448_v60, 5 }
0x1c09   : > { %4559 = vperm.xlu1 %5222, %v9383_v9  }
0x1c11   : > { %4563 = vperm.xlu1 %5222, %v9382_v47   ;;  %v4165_v47 = vstv %s8603_s25  ;;  %s5036_s25 = sld [smem:[#allocation5 + $0x1e]] }
0x1c12   : > { %v4167_v4 = vmul.f32 %v8554_v22, %v4165_v47  ;;  %v4166_v6 = vmul.f32 %v8402_v42, %v4165_v47  ;;  %v4060_v42 = vmul.f32 %v8572_v13, %v4058_v14 }
0x1c14   : > { %v4173_v34 = vadd.f32 %v4171_v32, %v4167_v4  ;;  %v4172_v45 = vadd.f32 %v4170_v18, %v4166_v6  ;;  %v4186_v4 = vperm.slane %v8448_v60, 4  ;;  %v4432_v32 = vperm.slane %v8448_v60, 6 }
0x1c15   : > { %v4421_v6 = vstv %s8666_s14  ;;  %v4427_v18 = vstv %s8670_s6  ;;  %s4669_s14 = sshll.u32 %s7535_s12, 4  ;;  %s4670_s14 = int_to_ptr.vmem [resolvable:$true] %s4669_s14 }
0x1c16   : > { %v4179_v44 = vadd.f32 %v4177_v63, %v4173_v34  ;;  %v4182_v34 = vmul.f32 %v8420_v16, %v4181_v19 }
0x1c18   : > { %v8633_v56 = vadd.f32 %v4183_v61, %v4179_v44  ;;  %v4178_v44 = vadd.f32 %v4176_v31, %v4172_v45 }
0x1c40   : > { %v3981_v30 = vpop.xlane.xlu1 %3980 }
0x1c41   : > { %5436 = vrcp.f32 %v3981_v30  ;;  %v3996_v23 = vand.u32 2147483648, %v3981_v30  ;;  %v3994_v46 = vand.u32 2147483647, %v3981_v30  ;;  %vm3990_vm15 = vweird.f32 %v3981_v30 }
0x1c43   : > { %v3997_v28 = vor.u32 1.1754944e-38, %v3996_v23  ;;  %vm3995_vm2 = vcmp.eq.f32.partialorder %v3994_v46, 8.507059e+37  ;;  %v4187_v46 = vmul.f32 %v6032_v7, %v4186_v4 }
0x1c47   : > { %v5437_v48 = vpop.eup %5436 }
0x1c48   : > { %v3986_v36 = vmul.f32 %v5437_v48, %v3981_v30  ;;  %v8629_v24 = vpop.xlane.xlu0 %3983  ;;  %vm3991_vm14 = vweird.f32 %v5437_v48 }
0x1c49   : > { %5438 = vrcp.f32 %v8629_v24  ;;  %vm3992_vm0 = vmor %vm3990_vm15, %vm3991_vm14  ;;  %v4011_v21 = vand.u32 2147483648, %v8629_v24  ;;  %v4009_v47 = vand.u32 2147483647, %v8629_v24  ;;  %vm4005_vm4 = vweird.f32 %v8629_v24 }
0x1c4a   : > { %v3987_v1 = vsub.f32 1.0, %v3986_v36  ;;  %v4415_v36 = vstv %s8652_s23 }
0x1c4b   : > { %v4012_v61 = vor.u32 1.1754944e-38, %v4011_v21  ;;  %vm4010_vm6 = vcmp.eq.f32.partialorder %v4009_v47, 8.507059e+37  ;;  %v4417_v43 = vmul.f32 %v8558_v10, %v4415_v36  ;;  %v4434_v21 = vmul.f32 %v6036_v8, %v4432_v32 }
0x1c4c   : > { %v3988_v25 = vmul.f32 %v5437_v48, %v3987_v1  ;;  %v4062_v1 = vadd.f32 %v4060_v42, %v4056_v29  ;;  %v4298_v29 = vstv %s8679_s18  ;;  %v4423_v47 = vmul.f32 %v8566_v54, %v4421_v6  ;;  %s4657_s18 = scalar_lea.sflag [#allocation3], %s501_s4 }
0x1c4e   : > { %v3989_v50 = vadd.f32 %v5437_v48, %v3988_v25  ;;  %v4292_v25 = vstv %s8659_s16 }
0x1c4f   : > { %v5439_v55 = vpop.eup %5438 }
0x1c50   : > { %v4001_v51 = vmul.f32 %v5439_v55, %v8629_v24  ;;  %v3993_v40 = vsel %vm3992_vm0, %v5437_v48, %v3989_v50  ;;  %vm4006_vm3 = vweird.f32 %v5439_v55  ;;  %v4411_v48 = vstv %s8648_s24  ;;  %s9388_s24 = sld [smem:[#allocation64_spill]] }
0x1c51   : > { %v3998_v2 = vsel %vm3995_vm2, %v3997_v28, %v3993_v40  ;;  %vm4007_vm5 = vmor %vm4005_vm4, %vm4006_vm3  ;;  %v4413_v50 = vmul.f32 %v8554_v22, %v4411_v48  ;;  %v4184_v28 = vadd.f32 %v4182_v34, %v4178_v44 }
0x1c52   : > { %v4002_v12 = vsub.f32 1.0, %v4001_v51  ;;  %v3999_v15 = vmul.f32 %v8586_v37, %v3998_v2  ;;  %v8713_v2 = vld [vmem:[%s9310_s1] sm:$0xff] }
0x1c54   : > { %v4003_v30 = vmul.f32 %v5439_v55, %v4002_v12  ;;  %v4015_v37 = vmul.f32 %v6032_v7, %v3999_v15  ;;  %v4188_v15 = vmul.f32 %v6036_v8, %v4186_v4  ;;  %v4304_v4 = vstv %s8686_s17 }
0x1c56   : > { %v4004_v3 = vadd.f32 %v5439_v55, %v4003_v30  ;;  %v4020_v63 = vmul.f32 %v4018_v27, %v4015_v37  ;;  %v8719_v27 = vld [vmem:[%s9310_s1 + $0x10] sm:$0xff]  ;;  %v4419_v30 = vadd.f32 %v4417_v43, %v4413_v50  ;;  %s9389_s13 = smov %s9388_s24  ;;  %s4668_s23 = scalar_lea.hbm %s9388_s24, %s5053_s8 }
0x1c57   : > { %v4293_v12 = vmul.f32 %v8719_v27, %v4292_v25  ;;  %s4671_s6 = sshll.u32 %s4668_s23, 4  ;;  %s4672_s6 = int_to_ptr.hbm [resolvable:$true] %s4671_s6 }
0x1c58   : > { %v4072_v24 = vpop.permute.xlu1 %4071  ;;  %v4022_v23 = vsel %vm768_vm7, %v4020_v63, 0.0  ;;  %v4008_v16 = vsel %vm4007_vm5, %v5439_v55, %v4004_v3  ;;  %s5579_s17 = sshra.s32 %s4672_s6, 4  ;;  %s5580_s17 = int_to_ptr.hbm [resolvable:$true] %s5579_s17 }
0x1c59   : > { %v4075_v19 = vmul.f32 %v9354_v39, %v4072_v24  ;;  %4023 = vadd.xlane.f32.xlu2 %v4022_v23  ;;  %v4013_v41 = vsel %vm4010_vm6, %v4012_v61, %v4008_v16  ;;  %v8740_v61 = vld [vmem:[%s9310_s1 + $0x20] sm:$0xff]  ;;  %v4534_v24 = vstv %s8690_s19  ;;  %v4538_v23 = vstv %s8693_s28  ;;  %s5581_s19 = scalar_lea.hbm %s5580_s17, 16  ;;  %p5586_p3 = scmp.lt.s32.totalorder %s5580_s17, %s9389_s13 }
0x1c5a   : > { %v4014_v62 = vmul.f32 %v8590_v11, %v4013_v41  ;;  %v4289_v11 = vmul.f32 %v8713_v2, %v4288_v0  ;;  %v4544_v16 = vstv %s8698_s29  ;;  %v4536_v50 = vmul.f32 %v8554_v22, %v4534_v24  ;;  %p5582_p0 = scmp.ne.s32.totalorder %s5580_s17, %s5581_s19 }
0x1c5b   : > { %v4077_v55 = vadd.f32 %v4075_v19, %v4065_v5  ;;  %v4191_v20 = vpop.permute.xlu0 %4190  ;;  %v4429_v5 = vmul.f32 %v8572_v13, %v4427_v18  ;;  %v4540_v43 = vmul.f32 %v8558_v10, %v4538_v23 }
0x1c5c   : > { %v4197_v51 = vmul.f32 %v9342_v59, %v4191_v20  ;;  %v4016_v40 = vmul.f32 %v6036_v8, %v4014_v62  ;;  %v4295_v34 = vadd.f32 %v4293_v12, %v4289_v11  ;;  %v4425_v62 = vadd.f32 %v4423_v47, %v4419_v30  ;;  %p5583_p1 = pnand %p5582_p0, %p5778_p5 }
0x1c5d   : > { %v4079_v42 = vadd.f32 %v4077_v55, %v4062_v1  ;;  %v4546_v55 = vmul.f32 %v8566_v54, %v4544_v16  ;;  %v4550_v11 = vstv %s8724_s30  ;;  %s5585_s30 = scalar_lea.hbm %s9389_s13, 32 }
0x1c5e   : > { %v4199_v45 = vadd.f32 %v4197_v51, %v4187_v46  ;;  %v4021_v31 = vmul.f32 %v4019_v35, %v4016_v40  ;;  %v4299_v35 = vmul.f32 %v8740_v61, %v4298_v29  ;;  %p5584_p2 = pneg %p5583_p1  ;;  %p5587_p4 = scmp.lt.s32.totalorder %s5585_s30, %s5581_s19 }
0x1c5f   : > { %v4083_v37 = vmul.f32 0.2, %v4079_v42  ;;  %vm4081_vm8 = vcmp.ge.f32.partialorder %v4079_v42, 0.0 }
0x1c60   : > { %v4201_v3 = vadd.f32 %v4199_v45, %v4184_v28  ;;  %v4025_v63 = vsel %vm768_vm7, %v4021_v31, 0.0  ;;  %v4542_v45 = vadd.f32 %v4540_v43, %v4536_v50  ;;  %v4552_v31 = vmul.f32 %v8572_v13, %v4550_v11  ;;  %p5588_p7 = por %p5587_p4, %p5586_p3 }
0x1c61   : > { %4026 = vadd.xlane.f32.xlu2 %v4025_v63  ;;  %v4195_v44 = vpop.permute.xlu1 %4194  ;;  %v4085_v1 = vsel %vm4081_vm8, %v4079_v42, %v4083_v37  ;;  %v4301_v47 = vadd.f32 %v4299_v35, %v4295_v34  ;;  %v8764_v37 = vld [vmem:[%s9310_s1 + $0x30] sm:$0xff]  ;;  %s5012_s1 = sld [smem:[#allocation5 + $0x1a]] }
0x1c62   : > { %v4205_v19 = vmul.f32 0.2, %v4201_v3  ;;  %v4198_v41 = vmul.f32 %v9354_v39, %v4195_v44  ;;  %v4087_v46 = vmul.f32 %v6036_v8, %v4085_v1  ;;  %vm4203_vm9 = vcmp.ge.f32.partialorder %v4201_v3, 0.0  ;;  %p5589_p8 = pnand %p5588_p7, %p5584_p2 }
0x1c63   : > { %v4305_v63 = vmul.f32 %v8764_v37, %v4304_v4  ;;  %v4290_v44 = vmul.f32 %v8554_v22, %v4288_v0  ;;  %v4294_v1 = vmul.f32 %v8558_v10, %v4292_v25  ;;  %v4300_v10 = vmul.f32 %v8566_v54, %v4298_v29 }
0x1c64   : > { %v4200_v28 = vadd.f32 %v4198_v41, %v4188_v15  ;;  %v4441_v20 = vpop.permute.xlu0 %4440  ;;  %v8752_v51 = vadd.f32 %v4087_v46, %v9364_v57  ;;  %v4207_v40 = vsel %vm4203_vm9, %v4201_v3, %v4205_v19  ;;  %v4431_v19 = vadd.f32 %v4429_v5, %v4425_v62 }
0x1c65   : > { %v4444_v12 = vmul.f32 %v9354_v39, %v4441_v20  ;;  %v4209_v42 = vmul.f32 %v6032_v7, %v4207_v40  ;;  %v4310_v46 = vmul.f32 %v6032_v7, %v4309_v17  ;;  %v4307_v43 = vadd.f32 %v4305_v63, %v4301_v47 }
0x1c66   : > { %v8759_v30 = vadd.f32 %v4200_v28, %v8633_v56  ;;  %v4093_v15 = vsel %vm768_vm7, %v8752_v51, -inf  ;;  %v4548_v56 = vadd.f32 %v4546_v55, %v4542_v45  ;;  %v4296_v0 = vadd.f32 %v4294_v1, %v4290_v44 }
0x1c67   : > { %4094 = vmax.xlane.f32.xlu0 %v4093_v15  ;;  %v8768_v3 = vadd.f32 %v4209_v42, %v9355_v58  ;;  %v4446_v41 = vadd.f32 %v4444_v12, %v4434_v21  ;;  %v4306_v55 = vmul.f32 %v8572_v13, %v4304_v4  ;;  %v4535_v28 = vmul.f32 %v8713_v2, %v4534_v24 }
0x1c68   : > { %v8778_v35 = vadd.f32 %v4552_v31, %v4548_v56  ;;  %v4302_v62 = vadd.f32 %v4300_v10, %v4296_v0  ;;  %v4539_v20 = vmul.f32 %v8719_v27, %v4538_v23  ;;  %v4311_v54 = vmul.f32 %v6036_v8, %v4309_v17 }
0x1c69   : > { %v4213_v34 = vsel %vm768_vm7, %v8768_v3, -inf  ;;  %v4448_v25 = vadd.f32 %v4446_v41, %v4431_v19  ;;  %v4545_v4 = vmul.f32 %v8740_v61, %v4544_v16  ;;  %v4555_v44 = vperm.slane %v8448_v60, 7 }
0x1c6a   : > { %4214 = vmax.xlane.f32.xlu1 %v4213_v34  ;;  %v4314_v50 = vpop.permute.xlu1 %4313  ;;  %v4308_v45 = vadd.f32 %v4306_v55, %v4302_v62  ;;  %v4541_v13 = vadd.f32 %v4539_v20, %v4535_v28  ;;  %v4551_v56 = vmul.f32 %v8764_v37, %v4550_v11  ;;  %vm4204_vm15 = vcmp.ge.f32.partialorder %v8759_v30, 0.0 }
0x1c6b   : > { %v4320_v22 = vmul.f32 %v9342_v59, %v4314_v50  ;;  %v4452_v40 = vmul.f32 0.2, %v4448_v25  ;;  %vm4450_vm1 = vcmp.ge.f32.partialorder %v4448_v25, 0.0  ;;  %v4556_v16 = vmul.f32 %v6032_v7, %v4555_v44 }
0x1c6c   : > { %v4547_v17 = vadd.f32 %v4545_v4, %v4541_v13  ;;  %v4557_v28 = vmul.f32 %v6036_v8, %v4555_v44 }
0x1c6d   : > { %v4322_v5 = vadd.f32 %v4320_v22, %v4310_v46  ;;  %v4454_v23 = vsel %vm4450_vm1, %v4448_v25, %v4452_v40 }
0x1c6e   : > { %v4456_v19 = vmul.f32 %v6036_v8, %v4454_v23  ;;  %v4553_v50 = vadd.f32 %v4551_v56, %v4547_v17 }
0x1c6f   : > { %v4324_v21 = vadd.f32 %v4322_v5, %v4307_v43 }
0x1c70   : > { %v8806_v22 = vadd.f32 %v4456_v19, %v9364_v57 }
0x1c71   : > { %v4328_v12 = vmul.f32 0.2, %v4324_v21  ;;  %vm4326_vm10 = vcmp.ge.f32.partialorder %v4324_v21, 0.0 }
0x1c72   : > { %v4318_v42 = vpop.permute.xlu1 %4317  ;;  %v4462_v5 = vsel %vm768_vm7, %v8806_v22, -inf }
0x1c73   : > { %v4321_v29 = vmul.f32 %v9354_v39, %v4318_v42  ;;  %v4330_v31 = vsel %vm4326_vm10, %v4324_v21, %v4328_v12 }
0x1c74   : > { %v4332_v15 = vmul.f32 %v6032_v7, %v4330_v31 }
0x1c75   : > { %v4323_v24 = vadd.f32 %v4321_v29, %v4311_v54  ;;  %v4033_v29 = vstv %s5013_s9 }
0x1c76   : > { %v8795_v47 = vadd.f32 %v4332_v15, %v9355_v58 }
0x1c77   : > { %v4325_v63 = vadd.f32 %v4323_v24, %v4308_v45  ;;  %v4047_v24 = vmul.f32 %v8719_v27, %v4046_v49 }
0x1c78   : > { %v4336_v1 = vsel %vm768_vm7, %v8795_v47, -inf }
0x1c79   : > { %v4329_v41 = vmul.f32 0.2, %v4325_v63  ;;  %4067 = vperm.xlu2 %5215, %v9383_v9   ;;  %4337 = vmax.xlane.f32.xlu0 %v4336_v1  ;;  %vm4327_vm11 = vcmp.ge.f32.partialorder %v4325_v63, 0.0  ;;  %v4053_v1 = vmul.f32 %v8740_v61, %v4052_v38 }
0x1c7b   : > { %v4560_v34 = vpop.permute.xlu1 %4559  ;;  %v4331_v46 = vsel %vm4327_vm11, %v4325_v63, %v4329_v41  ;;  %v4059_v41 = vmul.f32 %v8764_v37, %v4058_v14 }
0x1c7c   : > { %v4566_v43 = vmul.f32 %v9342_v59, %v4560_v34  ;;  %v4333_v0 = vmul.f32 %v6036_v8, %v4331_v46 }
0x1c7e   : > { %v4568_v11 = vadd.f32 %v4566_v43, %v4556_v16  ;;  %v8810_v10 = vadd.f32 %v4333_v0, %v9364_v57 }
0x1c80   : > { %v4570_v25 = vadd.f32 %v4568_v11, %v4553_v50  ;;  %v4339_v21 = vsel %vm768_vm7, %v8810_v10, -inf  ;;  %v4064_v50 = vmul.f32 %v6032_v7, %v4063_v52 }
0x1c81   : > { %4463 = vmax.xlane.f32.xlu0 %v4462_v5  ;;  %4340 = vmax.xlane.f32.xlu1 %v4339_v21 }
0x1c82   : > { %v4574_v62 = vmul.f32 0.2, %v4570_v25  ;;  %vm4572_vm12 = vcmp.ge.f32.partialorder %v4570_v25, 0.0  ;;  %5220 = vset.pattern.permute.xlu2 %v5670_v33 }
0x1c83   : > { %v4564_v55 = vpop.permute.xlu1 %4563 }
0x1c84   : > { %v4567_v20 = vmul.f32 %v9354_v39, %v4564_v55  ;;  %v4576_v40 = vsel %vm4572_vm12, %v4570_v25, %v4574_v62  ;;  %v4029_v39 = vstv %s5012_s1 }
0x1c85   : > { %v4578_v12 = vmul.f32 %v6032_v7, %v4576_v40 }
0x1c86   : > { %v4569_v42 = vadd.f32 %v4567_v20, %v4557_v28 }
0x1c87   : > { %v8821_v45 = vadd.f32 %v4578_v12, %v9355_v58 }
0x1c88   : > { %v8824_v54 = vadd.f32 %v4569_v42, %v8778_v35  ;;  %v4043_v35 = vmul.f32 %v8713_v2, %v4042_v53 }
0x1c89   : > { %v4582_v33 = vsel %vm768_vm7, %v8821_v45, -inf }
0x1c8a   : > { %4583 = vmax.xlane.f32.xlu1 %v4582_v33  ;;  %v4049_v44 = vadd.f32 %v4047_v24, %v4043_v35  ;;  %v4416_v24 = vmul.f32 %v8719_v27, %v4415_v36  ;;  %vm4573_vm2 = vcmp.ge.f32.partialorder %v8824_v54, 0.0 }
0x1c8c   : > { %v4055_v19 = vadd.f32 %v4053_v1, %v4049_v44  ;;  %v4422_v44 = vmul.f32 %v8740_v61, %v4421_v6 }
0x1c8e   : > { %v4061_v49 = vadd.f32 %v4059_v41, %v4055_v19 }
0x1ccc   : > { %v4024_v31 = vpop.xlane.xlu2 %4023 }
0x1ccd   : > { %v4030_v15 = vmul.f32 %v4029_v39, %v4024_v31 }
0x1ccf   : > { %v4034_v13 = vadd.f32 %v4033_v29, %v4030_v15 }
0x1cd1   : > { %v4036_v4 = vmax.f32 %v4034_v13, 0.0 }
0x1cd3   : > { %4039 = vst.msk [vmem:[%s7535_s12] sm:$0xff] %vm4038_vm13, %v4036_v4 }
0x1cd4   : > { %v4027_v23 = vpop.xlane.xlu2 %4026 }
0x1cd5   : > { %v4031_v63 = vmul.f32 %v4029_v39, %v4027_v23 }
0x1cd7   : > { %v4035_v17 = vadd.f32 %v4033_v29, %v4031_v63 }
0x1cd9   : > { %v4037_v56 = vmax.f32 %v4035_v17, 0.0 }
0x1cda   : > { %v4095_v16 = vpop.xlane.xlu0 %4094 }
0x1cdb   : > { %4040 = vst.msk [vmem:[%s7535_s12 + $0x8] sm:$0xff] %vm4038_vm13, %v4037_v56  ;;  %v4097_v53 = vsub.f32 %v8752_v51, %v4095_v16  ;;  %v4428_v56 = vmul.f32 %v8764_v37, %v4427_v18  ;;  %v4575_v18 = vmul.f32 0.2, %v8824_v54 }
0x1cdc   : > { %v4068_v34 = vpop.permute.xlu2 %4067 }
0x1cdd   : > { %v4100_v46 = vmul.f32 1.442695, %v4097_v53  ;;  %v4074_v43 = vmul.f32 %v9342_v59, %v4068_v34  ;;  %v4215_v4 = vpop.xlane.xlu1 %4214 }
0x1cdf   : > { %5440 = vpow2.f32 %v4100_v46  ;;  %v4076_v38 = vadd.f32 %v4074_v43, %v4064_v50  ;;  %v4219_v46 = vsub.f32 %v8768_v3, %v4215_v4 }
0x1ce1   : > { %v4078_v0 = vadd.f32 %v4076_v38, %v4061_v49 }
0x1ce3   : > { %v4082_v11 = vmul.f32 0.2, %v4078_v0  ;;  %vm4080_vm14 = vcmp.ge.f32.partialorder %v4078_v0, 0.0 }
0x1ce5   : > { %v8847_v25 = vpop.eup %5440  ;;  %v4084_v14 = vsel %vm4080_vm14, %v4078_v0, %v4082_v11  ;;  %v4221_v0 = vmul.f32 1.442695, %v4219_v46 }
0x1ce6   : > { %v4105_v51 = vsel %vm768_vm7, %v8847_v25, 0.0  ;;  %v4086_v5 = vmul.f32 %v6032_v7, %v4084_v14 }
0x1ce7   : > { %4106 = vadd.xlane.f32.xlu1 %v4105_v51 }
0x1ce8   : > { %v4088_v21 = vadd.f32 %v4086_v5, %v9355_v58 }
0x1cea   : > { %v4090_v52 = vsel %vm768_vm7, %v4088_v21, -inf }
0x1ceb   : > { %4091 = vmax.xlane.f32.xlu2 %v4090_v52 }
0x1cec   : > { %v4338_v62 = vpop.xlane.xlu0 %4337 }
0x1ced   : > { %v4342_v55 = vsub.f32 %v8795_v47, %v4338_v62 }
0x1cef   : > { %v4344_v28 = vmul.f32 1.442695, %v4342_v55 }
0x1cf1   : > { %5442 = vpow2.f32 %v4344_v28 }
0x1cf4   : > { %v4464_v20 = vpop.xlane.xlu0 %4463  ;;  %v4341_v35 = vpop.xlane.xlu1 %4340 }
0x1cf5   : > { %v4466_v40 = vsub.f32 %v8806_v22, %v4464_v20  ;;  %v4206_v22 = vmul.f32 0.2, %v8759_v30 }
0x1cf7   : > { %v8856_v12 = vpop.eup %5442  ;;  %v4469_v42 = vmul.f32 1.442695, %v4466_v40  ;;  %v4208_v29 = vsel %vm4204_vm15, %v8759_v30, %v4206_v22 }
0x1cf8   : > { %v4348_v33 = vsel %vm768_vm7, %v8856_v12, 0.0  ;;  %v4210_v31 = vmul.f32 %v6036_v8, %v4208_v29 }
0x1cf9   : > { %5444 = vpow2.f32 %v4469_v42  ;;  %4349 = vadd.xlane.f32.xlu1 %v4348_v33 }
0x1cfa   : > { %v8870_v15 = vadd.f32 %v4210_v31, %v9364_v57 }
0x1cfc   : > { %v4216_v13 = vsel %vm768_vm7, %v8870_v15, -inf }
0x1cfd   : > { %v4584_v19 = vpop.xlane.xlu1 %4583 }
0x1cff   : > { %v8860_v39 = vpop.eup %5444 }
0x1d00   : > { %v4474_v47 = vsel %vm768_vm7, %v8860_v39, 0.0 }
0x1d01   : > { %4475 = vadd.xlane.f32.xlu1 %v4474_v47 }
0x1d03   : > { %4436 = vperm.xlu2 %5220, %v9383_v9   ;;  %v4412_v9 = vmul.f32 %v8713_v2, %v4411_v48  ;;  %v4433_v48 = vmul.f32 %v6032_v7, %v4432_v32 }
0x1d05   : > { %v4418_v63 = vadd.f32 %v4416_v24, %v4412_v9 }
0x1d07   : > { %v4424_v17 = vadd.f32 %v4422_v44, %v4418_v63 }
0x1d09   : > { %v4430_v16 = vadd.f32 %v4428_v56, %v4424_v17  ;;  %v4140_v17 = vperm.slane %v9386_v26, 3 }
0x1d2c   : > { %4217 = vmax.xlane.f32.xlu2 %v4216_v13 }
0x1d5a   : > { %v4107_v53 = vpop.xlane.xlu1 %4106 }
0x1d5b   : > { %v4134_v33 = vand.u32 2147483648, %v4107_v53  ;;  %vm4128_vm4 = vweird.f32 %v4107_v53  ;;  %v4132_v47 = vand.u32 2147483647, %v4107_v53 }
0x1d5d   : > { %vm4133_vm6 = vcmp.eq.f32.partialorder %v4132_v47, 8.507059e+37 }
0x1d5e   : > { %v4092_v23 = vpop.xlane.xlu2 %4091 }
0x1d5f   : > { %v4096_v30 = vsub.f32 %v4088_v21, %v4092_v23 }
0x1d61   : > { %v4098_v1 = vmul.f32 1.442695, %v4096_v30 }
0x1d63   : > { %5446 = vpow2.f32 %v4098_v1 }
0x1d64   : > { %5448 = vrcp.f32 %v4107_v53 }
0x1d66   : > { %v4437_v41 = vpop.permute.xlu2 %4436 }
0x1d67   : > { %v4443_v36 = vmul.f32 %v9342_v59, %v4437_v41  ;;  %v4577_v59 = vsel %vm4573_vm2, %v8824_v54, %v4575_v18  ;;  %v4386_v18 = vperm.slane %v9386_v26, 5 }
0x1d68   : > { %v4579_v43 = vmul.f32 %v6036_v8, %v4577_v59 }
0x1d69   : > { %v8890_v2 = vpop.eup %5446  ;;  %v4445_v27 = vadd.f32 %v4443_v36, %v4433_v48 }
0x1d6a   : > { %v4102_v6 = vsel %vm768_vm7, %v8890_v2, 0.0  ;;  %v5449_v38 = vpop.eup %5448  ;;  %v8906_v11 = vadd.f32 %v4579_v43, %v9364_v57  ;;  %v4588_v57 = vsub.f32 %v8821_v45, %v4584_v19  ;;  %v4135_v45 = vor.u32 1.1754944e-38, %v4134_v33 }
0x1d6b   : > { %v4447_v61 = vadd.f32 %v4445_v27, %v4430_v16  ;;  %4103 = vadd.xlane.f32.xlu0 %v4102_v6  ;;  %v4124_v14 = vmul.f32 %v5449_v38, %v4107_v53  ;;  %vm4129_vm3 = vweird.f32 %v5449_v38 }
0x1d6c   : > { %v4350_v49 = vpop.xlane.xlu1 %4349  ;;  %v4585_v3 = vsel %vm768_vm7, %v8906_v11, -inf  ;;  %v4590_v42 = vmul.f32 1.442695, %v4588_v57  ;;  %vm4130_vm5 = vmor %vm4128_vm4, %vm4129_vm3 }
0x1d6d   : > { %v4451_v37 = vmul.f32 0.2, %v4447_v61  ;;  %vm4449_vm0 = vcmp.ge.f32.partialorder %v4447_v61, 0.0  ;;  %5450 = vrcp.f32 %v4350_v49  ;;  %v4125_v54 = vsub.f32 1.0, %v4124_v14 }
0x1d6e   : > { %5452 = vpow2.f32 %v4221_v0  ;;  %v4365_v23 = vand.u32 2147483648, %v4350_v49  ;;  %vm4359_vm9 = vweird.f32 %v4350_v49  ;;  %v4363_v30 = vand.u32 2147483647, %v4350_v49 }
0x1d6f   : > { %v4453_v60 = vsel %vm4449_vm0, %v4447_v61, %v4451_v37  ;;  %v4126_v62 = vmul.f32 %v5449_v38, %v4125_v54  ;;  %v4509_v14 = vperm.slane %v9386_v26, 6 }
0x1d70   : > { %v4455_v32 = vmul.f32 %v6032_v7, %v4453_v60  ;;  %v4366_v19 = vor.u32 1.1754944e-38, %v4365_v23  ;;  %vm4364_vm1 = vcmp.eq.f32.partialorder %v4363_v30, 8.507059e+37 }
0x1d71   : > { %v4511_v54 = vmul.f32 %v6036_v8, %v4509_v14 }
0x1d72   : > { %v8899_v34 = vadd.f32 %v4455_v32, %v9355_v58  ;;  %v4343_v58 = vsub.f32 %v8810_v10, %v4341_v35  ;;  %v4127_v10 = vadd.f32 %v5449_v38, %v4126_v62 }
0x1d73   : > { %v5451_v5 = vpop.eup %5450 }
0x1d74   : > { %v4459_v50 = vsel %vm768_vm7, %v8899_v34, -inf  ;;  %v4476_v51 = vpop.xlane.xlu1 %4475  ;;  %v4346_v21 = vmul.f32 1.442695, %v4343_v58  ;;  %v8911_v52 = vpop.eup %5452  ;;  %v4355_v55 = vmul.f32 %v5451_v5, %v4350_v49  ;;  %v4131_v13 = vsel %vm4130_vm5, %v5449_v38, %v4127_v10 }
0x1d75   : > { %4460 = vmax.xlane.f32.xlu2 %v4459_v50  ;;  %5454 = vrcp.f32 %v4476_v51  ;;  %v4225_v28 = vsel %vm768_vm7, %v8911_v52, 0.0  ;;  %v4136_v35 = vsel %vm4133_vm6, %v4135_v45, %v4131_v13  ;;  %vm4360_vm8 = vweird.f32 %v5451_v5 }
0x1d76   : > { %5456 = vpow2.f32 %v4346_v21  ;;  %v4356_v20 = vsub.f32 1.0, %v4355_v55  ;;  %v4137_v63 = vmul.f32 %v8847_v25, %v4136_v35  ;;  %vm4361_vm10 = vmor %vm4359_vm9, %vm4360_vm8  ;;  %v4142_v25 = vmul.f32 %v6036_v8, %v4140_v17 }
0x1d77   : > { %5458 = vpow2.f32 %v4590_v42  ;;  %v4503_v27 = vand.u32 2147483648, %v4476_v51  ;;  %vm4497_vm12 = vweird.f32 %v4476_v51  ;;  %v4501_v6 = vand.u32 2147483647, %v4476_v51 }
0x1d78   : > { %v4357_v29 = vmul.f32 %v5451_v5, %v4356_v20  ;;  %v4139_v16 = vmul.f32 %v6036_v8, %v4137_v63  ;;  %v4387_v49 = vmul.f32 %v6032_v7, %v4386_v18 }
0x1d79   : > { %v4504_v60 = vor.u32 1.1754944e-38, %v4503_v27  ;;  %vm4502_vm14 = vcmp.eq.f32.partialorder %v4501_v6, 8.507059e+37 }
0x1d7a   : > { %v4358_v9 = vadd.f32 %v5451_v5, %v4357_v29  ;;  %v4144_v61 = vmul.f32 %v4142_v25, %v4139_v16 }
0x1d7b   : > { %v5455_v40 = vpop.eup %5454 }
0x1d7c   : > { %v8916_v22 = vpop.eup %5456  ;;  %v4493_v31 = vmul.f32 %v5455_v40, %v4476_v51  ;;  %v4362_v56 = vsel %vm4361_vm10, %v5451_v5, %v4358_v9  ;;  %vm4498_vm11 = vweird.f32 %v5455_v40  ;;  %v4148_v32 = vsel %vm768_vm7, %v4144_v61, 0.0 }
0x1d7d   : > { %4586 = vmax.xlane.f32.xlu2 %v4585_v3  ;;  %v4351_v4 = vsel %vm768_vm7, %v8916_v22, 0.0  ;;  %v8921_v44 = vpop.eup %5458  ;;  %v4367_v48 = vsel %vm4364_vm1, %v4366_v19, %v4362_v56  ;;  %vm4499_vm13 = vmor %vm4497_vm12, %vm4498_vm11  ;;  %vm4161_vm12 = vcmask 228568  }
0x1d7e   : > { %v4494_v24 = vsub.f32 1.0, %v4493_v31  ;;  %v4594_v41 = vsel %vm768_vm7, %v8921_v44, 0.0  ;;  %v4368_v53 = vmul.f32 %v8856_v12, %v4367_v48 }
0x1d80   : > { %v4495_v1 = vmul.f32 %v5455_v40, %v4494_v24  ;;  %v4384_v59 = vmul.f32 %v6032_v7, %v4368_v53 }
0x1d82   : > { %v4496_v36 = vadd.f32 %v5455_v40, %v4495_v1  ;;  %v4389_v12 = vmul.f32 %v4387_v49, %v4384_v59 }
0x1d84   : > { %v4500_v37 = vsel %vm4499_vm13, %v5455_v40, %v4496_v36  ;;  %v4391_v58 = vsel %vm768_vm7, %v4389_v12, 0.0 }
0x1d85   : > { %4226 = vadd.xlane.f32.xlu2 %v4225_v28  ;;  %v4505_v46 = vsel %vm4502_vm14, %v4504_v60, %v4500_v37 }
0x1d86   : > { %v4506_v38 = vmul.f32 %v8860_v39, %v4505_v46 }
0x1d88   : > { %v4508_v3 = vmul.f32 %v6036_v8, %v4506_v38 }
0x1d8a   : > { %v4513_v51 = vmul.f32 %v4511_v54, %v4508_v3  ;;  %v4152_v3 = vstv %s8966_s26 }
0x1d8c   : > { %v4517_v39 = vsel %vm768_vm7, %v4513_v51, 0.0 }
0x1d8d   : > { %4352 = vadd.xlane.f32.xlu2 %v4351_v4 }
0x1d95   : > { %4595 = vadd.xlane.f32.xlu2 %v4594_v41 }
0x1d9d   : > { %4149 = vadd.xlane.f32.xlu2 %v4148_v32  ;;  %v4263_v32 = vperm.slane %v9386_v26, 4 }
0x1d9f   : > { %v4218_v50 = vpop.xlane.xlu2 %4217 }
0x1da0   : > { %v4220_v43 = vsub.f32 %v8870_v15, %v4218_v50 }
0x1da2   : > { %v4223_v0 = vmul.f32 1.442695, %v4220_v43 }
0x1da4   : > { %5460 = vpow2.f32 %v4223_v0  ;;  %v4264_v0 = vmul.f32 %v6032_v7, %v4263_v32 }
0x1da5   : > { %4392 = vadd.xlane.f32.xlu2 %v4391_v58 }
0x1daa   : > { %v8945_v5 = vpop.eup %5460 }
0x1dab   : > { %v4228_v15 = vsel %vm768_vm7, %v8945_v5, 0.0 }
0x1dac   : > { %4229 = vadd.xlane.f32.xlu0 %v4228_v15 }
0x1dad   : > { %4518 = vadd.xlane.f32.xlu2 %v4517_v39 }
0x1dde   : > { %v4104_v21 = vpop.xlane.xlu0 %4103 }
0x1ddf   : > { %5462 = vrcp.f32 %v4104_v21  ;;  %v4119_v10 = vand.u32 2147483648, %v4104_v21  ;;  %v4117_v42 = vand.u32 2147483647, %v4104_v21  ;;  %vm4113_vm0 = vweird.f32 %v4104_v21 }
0x1de1   : > { %v4120_v29 = vor.u32 1.1754944e-38, %v4119_v10  ;;  %vm4118_vm3 = vcmp.eq.f32.partialorder %v4117_v42, 8.507059e+37 }
0x1de5   : > { %v5463_v62 = vpop.eup %5462 }
0x1de6   : > { %v4109_v55 = vmul.f32 %v5463_v62, %v4104_v21  ;;  %vm4114_vm15 = vweird.f32 %v5463_v62 }
0x1de7   : > { %vm4115_vm2 = vmor %vm4113_vm0, %vm4114_vm15 }
0x1de8   : > { %v4110_v57 = vsub.f32 1.0, %v4109_v55  ;;  %v4461_v28 = vpop.xlane.xlu2 %4460 }
0x1de9   : > { %v4465_v20 = vsub.f32 %v8899_v34, %v4461_v28  ;;  %v4141_v34 = vmul.f32 %v6032_v7, %v4140_v17 }
0x1dea   : > { %v4111_v40 = vmul.f32 %v5463_v62, %v4110_v57 }
0x1deb   : > { %v4467_v33 = vmul.f32 1.442695, %v4465_v20 }
0x1dec   : > { %v4112_v47 = vadd.f32 %v5463_v62, %v4111_v40 }
0x1ded   : > { %5464 = vpow2.f32 %v4467_v33  ;;  %v4388_v33 = vmul.f32 %v6036_v8, %v4386_v18 }
0x1dee   : > { %v4116_v31 = vsel %vm4115_vm2, %v5463_v62, %v4112_v47 }
0x1def   : > { %v4121_v13 = vsel %vm4118_vm3, %v4120_v29, %v4116_v31 }
0x1df0   : > { %v4587_v45 = vpop.xlane.xlu2 %4586  ;;  %v4122_v4 = vmul.f32 %v8890_v2, %v4121_v13 }
0x1df1   : > { %v4589_v35 = vsub.f32 %v8906_v11, %v4587_v45 }
0x1df2   : > { %v4138_v9 = vmul.f32 %v6032_v7, %v4122_v4 }
0x1df3   : > { %v8957_v24 = vpop.eup %5464  ;;  %v4592_v23 = vmul.f32 1.442695, %v4589_v35 }
0x1df4   : > { %v4471_v30 = vsel %vm768_vm7, %v8957_v24, 0.0  ;;  %v4143_v63 = vmul.f32 %v4141_v34, %v4138_v9  ;;  %v4632_v34 = vperm.slane %v9386_v26, 7  ;;  %v4521_v26 = vstv %s5036_s25 }
0x1df5   : > { %5466 = vpow2.f32 %v4592_v23  ;;  %4472 = vadd.xlane.f32.xlu0 %v4471_v30 }
0x1df6   : > { %v4145_v1 = vsel %vm768_vm7, %v4143_v63, 0.0  ;;  %v4633_v63 = vmul.f32 %v6032_v7, %v4632_v34 }
0x1df7   : > { %4146 = vadd.xlane.f32.xlu1 %v4145_v1 }
0x1df8   : > { %v4227_v2 = vpop.xlane.xlu2 %4226 }
0x1df9   : > { %5468 = vrcp.f32 %v4227_v2  ;;  %v4242_v36 = vand.u32 2147483648, %v4227_v2  ;;  %v4240_v25 = vand.u32 2147483647, %v4227_v2  ;;  %vm4236_vm5 = vweird.f32 %v4227_v2 }
0x1dfb   : > { %v8962_v11 = vpop.eup %5466  ;;  %v4243_v61 = vor.u32 1.1754944e-38, %v4242_v36  ;;  %vm4241_vm8 = vcmp.eq.f32.partialorder %v4240_v25, 8.507059e+37 }
0x1dfc   : > { %v4597_v56 = vsel %vm768_vm7, %v8962_v11, 0.0 }
0x1dfd   : > { %4598 = vadd.xlane.f32.xlu0 %v4597_v56 }
0x1dff   : > { %v5469_v17 = vpop.eup %5468 }
0x1e00   : > { %v4232_v19 = vmul.f32 %v5469_v17, %v4227_v2  ;;  %v4353_v41 = vpop.xlane.xlu2 %4352  ;;  %vm4237_vm4 = vweird.f32 %v5469_v17 }
0x1e01   : > { %5470 = vrcp.f32 %v4353_v41  ;;  %vm4238_vm6 = vmor %vm4236_vm5, %vm4237_vm4  ;;  %v4380_v49 = vand.u32 2147483648, %v4353_v41  ;;  %v4378_v12 = vand.u32 2147483647, %v4353_v41  ;;  %vm4374_vm10 = vweird.f32 %v4353_v41 }
0x1e02   : > { %v4233_v16 = vsub.f32 1.0, %v4232_v19 }
0x1e03   : > { %v4381_v51 = vor.u32 1.1754944e-38, %v4380_v49  ;;  %vm4379_vm11 = vcmp.eq.f32.partialorder %v4378_v12, 8.507059e+37 }
0x1e04   : > { %v4234_v48 = vmul.f32 %v5469_v17, %v4233_v16 }
0x1e06   : > { %v4235_v27 = vadd.f32 %v5469_v17, %v4234_v48 }
0x1e07   : > { %v5471_v6 = vpop.eup %5470 }
0x1e08   : > { %v4370_v53 = vmul.f32 %v5471_v6, %v4353_v41  ;;  %v4596_v37 = vpop.xlane.xlu2 %4595  ;;  %v4239_v60 = vsel %vm4238_vm6, %v5469_v17, %v4235_v27  ;;  %vm4375_vm9 = vweird.f32 %v5471_v6 }
0x1e09   : > { %5472 = vrcp.f32 %v4596_v37  ;;  %v4244_v46 = vsel %vm4241_vm8, %v4243_v61, %v4239_v60  ;;  %vm4376_vm1 = vmor %vm4374_vm10, %vm4375_vm9  ;;  %v4611_v40 = vand.u32 2147483648, %v4596_v37  ;;  %v4609_v29 = vand.u32 2147483647, %v4596_v37 }
0x1e0a   : > { %v4371_v59 = vsub.f32 1.0, %v4370_v53  ;;  %v4245_v50 = vmul.f32 %v8911_v52, %v4244_v46  ;;  %v4156_v52 = vstv %s8968_s10  ;;  %vm4605_vm14 = vweird.f32 %v4596_v37 }
0x1e0b   : > { %v4612_v35 = vor.u32 1.1754944e-38, %v4611_v40  ;;  %vm4610_vm0 = vcmp.eq.f32.partialorder %v4609_v29, 8.507059e+37 }
0x1e0c   : > { %v4372_v43 = vmul.f32 %v5471_v6, %v4371_v59  ;;  %v4261_v38 = vmul.f32 %v6032_v7, %v4245_v50 }
0x1e0e   : > { %v4373_v58 = vadd.f32 %v5471_v6, %v4372_v43  ;;  %v4266_v15 = vmul.f32 %v4264_v0, %v4261_v38 }
0x1e0f   : > { %v5473_v54 = vpop.eup %5472 }
0x1e10   : > { %v4601_v39 = vmul.f32 %v5473_v54, %v4596_v37  ;;  %v4150_v21 = vpop.xlane.xlu2 %4149  ;;  %v4377_v62 = vsel %vm4376_vm1, %v5471_v6, %v4373_v58  ;;  %v4268_v57 = vsel %vm768_vm7, %v4266_v15, 0.0  ;;  %vm4606_vm13 = vweird.f32 %v5473_v54 }
0x1e11   : > { %v4154_v55 = vmul.f32 %v4152_v3, %v4150_v21  ;;  %v4382_v28 = vsel %vm4379_vm11, %v4381_v51, %v4377_v62  ;;  %4269 = vadd.xlane.f32.xlu0 %v4268_v57  ;;  %vm4607_vm15 = vmor %vm4605_vm14, %vm4606_vm13  ;;  %v4265_v37 = vmul.f32 %v6036_v8, %v4263_v32  ;;  %vm4284_vm14 = vcmask 236768  }
0x1e12   : > { %v4602_v10 = vsub.f32 1.0, %v4601_v39  ;;  %v4383_v20 = vmul.f32 %v8916_v22, %v4382_v28 }
0x1e13   : > { %v4158_v42 = vadd.f32 %v4156_v52, %v4154_v55 }
0x1e14   : > { %v4603_v47 = vmul.f32 %v5473_v54, %v4602_v10  ;;  %v4385_v31 = vmul.f32 %v6036_v8, %v4383_v20  ;;  %v4510_v10 = vmul.f32 %v6032_v7, %v4509_v14  ;;  %v4398_v14 = vstv %s9006_s5 }
0x1e15   : > { %v4160_v13 = vmax.f32 %v4158_v42, 0.0 }
0x1e16   : > { %v4604_v45 = vadd.f32 %v5473_v54, %v4603_v47  ;;  %v4390_v4 = vmul.f32 %v4388_v33, %v4385_v31 }
0x1e17   : > { %4163 = vst.msk [vmem:[%s7535_s12 + $0x8] sm:$0xff] %vm4161_vm12, %v4160_v13 }
0x1e18   : > { %v4394_v22 = vsel %vm768_vm7, %v4390_v4, 0.0  ;;  %v4608_v9 = vsel %vm4607_vm15, %v5473_v54, %v4604_v45  ;;  %v4393_v29 = vpop.xlane.xlu2 %4392  ;;  %vm4407_vm15 = vcmask 244968  }
0x1e19   : > { %v4613_v18 = vsel %vm4610_vm0, %v4612_v35, %v4608_v9  ;;  %4395 = vadd.xlane.f32.xlu0 %v4394_v22  ;;  %v4399_v4 = vmul.f32 %v4398_v14, %v4393_v29  ;;  %v4275_v35 = vstv %s9012_s11  ;;  %v4402_v22 = vstv %s9014_s15 }
0x1e1a   : > { %v4614_v23 = vmul.f32 %v8921_v44, %v4613_v18  ;;  %v4634_v18 = vmul.f32 %v6036_v8, %v4632_v34  ;;  %vm4653_vm0 = vcmask 261368  }
0x1e1c   : > { %v4630_v30 = vmul.f32 %v6032_v7, %v4614_v23  ;;  %v4279_v23 = vstv %s9017_s27 }
0x1e1e   : > { %v4635_v1 = vmul.f32 %v4633_v63, %v4630_v30 }
0x1e1f   : > { %v4230_v2 = vpop.xlane.xlu0 %4229 }
0x1e20   : > { %5474 = vrcp.f32 %v4230_v2  ;;  %v4637_v56 = vsel %vm768_vm7, %v4635_v1, 0.0  ;;  %v4257_v16 = vand.u32 2147483648, %v4230_v2  ;;  %v4255_v36 = vand.u32 2147483647, %v4230_v2  ;;  %v4519_v34 = vpop.xlane.xlu2 %4518 }
0x1e21   : > { %4638 = vadd.xlane.f32.xlu0 %v4637_v56  ;;  %vm4251_vm3 = vweird.f32 %v4230_v2 }
0x1e22   : > { %v4258_v25 = vor.u32 1.1754944e-38, %v4257_v16  ;;  %vm4256_vm5 = vcmp.eq.f32.partialorder %v4255_v36, 8.507059e+37  ;;  %v4523_v16 = vmul.f32 %v4521_v26, %v4519_v34 }
0x1e26   : > { %v5475_v17 = vpop.eup %5474 }
0x1e27   : > { %v4247_v19 = vmul.f32 %v5475_v17, %v4230_v2  ;;  %vm4252_vm2 = vweird.f32 %v5475_v17  ;;  %v4403_v2 = vadd.f32 %v4402_v22, %v4399_v4 }
0x1e28   : > { %vm4253_vm4 = vmor %vm4251_vm3, %vm4252_vm2 }
0x1e29   : > { %v4248_v41 = vsub.f32 1.0, %v4247_v19  ;;  %v4405_v19 = vmax.f32 %v4403_v2, 0.0 }
0x1e2b   : > { %v4249_v48 = vmul.f32 %v5475_v17, %v4248_v41 }
0x1e2d   : > { %v4250_v44 = vadd.f32 %v5475_v17, %v4249_v48  ;;  %v4525_v48 = vstv %s5037_s20 }
0x1e2f   : > { %v4254_v27 = vsel %vm4253_vm4, %v5475_v17, %v4250_v44 }
0x1e30   : > { %v4259_v6 = vsel %vm4256_vm5, %v4258_v25, %v4254_v27  ;;  %v4527_v27 = vadd.f32 %v4525_v48, %v4523_v16 }
0x1e31   : > { %v4260_v61 = vmul.f32 %v8945_v5, %v4259_v6 }
0x1e33   : > { %v4262_v53 = vmul.f32 %v6036_v8, %v4260_v61 }
0x1e35   : > { %v4267_v60 = vmul.f32 %v4265_v37, %v4262_v53  ;;  %v4529_v37 = vmax.f32 %v4527_v27, 0.0 }
0x1e37   : > { %v4271_v59 = vsel %vm768_vm7, %v4267_v60, 0.0  ;;  %v4644_v60 = vstv %s5042_s0 }
0x1e38   : > { %4272 = vadd.xlane.f32.xlu1 %v4271_v59 }
0x1e68   : > { %v4473_v46 = vpop.xlane.xlu0 %4472 }
0x1e69   : > { %5476 = vrcp.f32 %v4473_v46  ;;  %v4488_v54 = vand.u32 2147483648, %v4473_v46  ;;  %v4486_v51 = vand.u32 2147483647, %v4473_v46  ;;  %vm4482_vm8 = vweird.f32 %v4473_v46 }
0x1e6a   : > { %v4147_v49 = vpop.xlane.xlu1 %4146 }
0x1e6b   : > { %v4153_v50 = vmul.f32 %v4152_v3, %v4147_v49  ;;  %v4489_v21 = vor.u32 1.1754944e-38, %v4488_v54  ;;  %vm4487_vm10 = vcmp.eq.f32.partialorder %v4486_v51, 8.507059e+37  ;;  %v4648_v49 = vstv %s5043_s7 }
0x1e6d   : > { %v4157_v43 = vadd.f32 %v4156_v52, %v4153_v50 }
0x1e6f   : > { %v5477_v12 = vpop.eup %5476  ;;  %v4159_v38 = vmax.f32 %v4157_v43, 0.0 }
0x1e70   : > { %v4478_v0 = vmul.f32 %v5477_v12, %v4473_v46  ;;  %v4599_v5 = vpop.xlane.xlu0 %4598  ;;  %vm4483_vm6 = vweird.f32 %v5477_v12 }
0x1e71   : > { %4162 = vst.msk [vmem:[%s7535_s12] sm:$0xff] %vm4161_vm12, %v4159_v38  ;;  %5478 = vrcp.f32 %v4599_v5  ;;  %vm4484_vm9 = vmor %vm4482_vm8, %vm4483_vm6  ;;  %v4626_v28 = vand.u32 2147483648, %v4599_v5  ;;  %v4624_v40 = vand.u32 2147483647, %v4599_v5  ;;  %vm4620_vm11 = vweird.f32 %v4599_v5 }
0x1e72   : > { %v4479_v58 = vsub.f32 1.0, %v4478_v0 }
0x1e73   : > { %v4627_v47 = vor.u32 1.1754944e-38, %v4626_v28  ;;  %vm4625_vm13 = vcmp.eq.f32.partialorder %v4624_v40, 8.507059e+37 }
0x1e74   : > { %v4480_v32 = vmul.f32 %v5477_v12, %v4479_v58 }
0x1e76   : > { %v4481_v15 = vadd.f32 %v5477_v12, %v4480_v32 }
0x1e77   : > { %v5479_v39 = vpop.eup %5478 }
0x1e78   : > { %v4616_v3 = vmul.f32 %v5479_v39, %v4599_v5  ;;  %v4485_v52 = vsel %vm4484_vm9, %v5477_v12, %v4481_v15  ;;  %vm4621_vm1 = vweird.f32 %v5479_v39 }
0x1e79   : > { %v4490_v62 = vsel %vm4487_vm10, %v4489_v21, %v4485_v52  ;;  %vm4622_vm12 = vmor %vm4620_vm11, %vm4621_vm1 }
0x1e7a   : > { %v4617_v55 = vsub.f32 1.0, %v4616_v3  ;;  %v4491_v57 = vmul.f32 %v8957_v24, %v4490_v62 }
0x1e7c   : > { %v4618_v20 = vmul.f32 %v5479_v39, %v4617_v55  ;;  %v4507_v42 = vmul.f32 %v6032_v7, %v4491_v57 }
0x1e7e   : > { %v4619_v33 = vadd.f32 %v5479_v39, %v4618_v20  ;;  %v4512_v24 = vmul.f32 %v4510_v10, %v4507_v42 }
0x1e80   : > { %v4514_v31 = vsel %vm768_vm7, %v4512_v24, 0.0  ;;  %v4623_v13 = vsel %vm4622_vm12, %v5479_v39, %v4619_v33 }
0x1e81   : > { %4515 = vadd.xlane.f32.xlu1 %v4514_v31  ;;  %v4628_v45 = vsel %vm4625_vm13, %v4627_v47, %v4623_v13 }
0x1e82   : > { %v4629_v7 = vmul.f32 %v8962_v11, %v4628_v45 }
0x1e84   : > { %v4631_v9 = vmul.f32 %v6036_v8, %v4629_v7  ;;  %v4270_v30 = vpop.xlane.xlu0 %4269 }
0x1e85   : > { %v4276_v63 = vmul.f32 %v4275_v35, %v4270_v30 }
0x1e86   : > { %v4636_v1 = vmul.f32 %v4634_v18, %v4631_v9 }
0x1e87   : > { %v4280_v56 = vadd.f32 %v4279_v23, %v4276_v63 }
0x1e88   : > { %v4640_v17 = vsel %vm768_vm7, %v4636_v1, 0.0  ;;  %vm4530_vm7 = vcmask 253168  }
0x1e89   : > { %4641 = vadd.xlane.f32.xlu1 %v4640_v17  ;;  %v4282_v11 = vmax.f32 %v4280_v56, 0.0 }
0x1e8b   : > { %4285 = vst.msk [vmem:[%s7535_s12] sm:$0xff] %vm4284_vm14, %v4282_v11 }
0x1e8c   : > { %4408 = vst.msk [vmem:[%s7535_s12] sm:$0xff] %vm4407_vm15, %v4405_v19  ;;  %v4396_v8 = vpop.xlane.xlu0 %4395 }
0x1e8d   : > { %v4400_v41 = vmul.f32 %v4398_v14, %v4396_v8 }
0x1e8f   : > { %v4404_v25 = vadd.f32 %v4402_v22, %v4400_v41 }
0x1e91   : > { %v4406_v53 = vmax.f32 %v4404_v25, 0.0 }
0x1e94   : > { %v4639_v59 = vpop.xlane.xlu0 %4638 }
0x1e95   : > { %v4645_v46 = vmul.f32 %v4644_v60, %v4639_v59 }
0x1e97   : > { %v4649_v12 = vadd.f32 %v4648_v49, %v4645_v46 }
0x1e99   : > { %v4651_v5 = vmax.f32 %v4649_v12, 0.0 }
0x1eab   : > { %v4273_v36 = vpop.xlane.xlu1 %4272 }
0x1eac   : > { %v4277_v44 = vmul.f32 %v4275_v35, %v4273_v36 }
0x1eae   : > { %v4281_v6 = vadd.f32 %v4279_v23, %v4277_v44 }
0x1eb0   : > { %v4283_v61 = vmax.f32 %v4281_v6, 0.0 }
0x1eb2   : > { %4286 = vst.msk [vmem:[%s7535_s12 + $0x8] sm:$0xff] %vm4284_vm14, %v4283_v61 }
0x1eb3   : > { %4409 = vst.msk [vmem:[%s7535_s12 + $0x8] sm:$0xff] %vm4407_vm15, %v4406_v53 }
0x1eb4   : > { %4532 = vst.msk [vmem:[%s7535_s12 + $0x8] sm:$0xff] %vm4530_vm7, %v4529_v37 }
0x1ef4   : > { %v4516_v50 = vpop.xlane.xlu1 %4515 }
0x1ef5   : > { %v4522_v43 = vmul.f32 %v4521_v26, %v4516_v50 }
0x1ef7   : > { %v4526_v38 = vadd.f32 %v4525_v48, %v4522_v43 }
0x1ef9   : > { %v4528_v0 = vmax.f32 %v4526_v38, 0.0 }
0x1efb   : > { %4531 = vst.msk [vmem:[%s7535_s12] sm:$0xff] %vm4530_vm7, %v4528_v0 }
0x1efc   : > { %v4642_v58 = vpop.xlane.xlu1 %4641  ;;  %4654 = vst.msk [vmem:[%s7535_s12] sm:$0xff] %vm4653_vm0, %v4651_v5 }
0x1efd   : > { %v4646_v54 = vmul.f32 %v4644_v60, %v4642_v58 }
0x1eff   : > { %v4650_v32 = vadd.f32 %v4648_v49, %v4646_v54 }
0x1f01   : > { %v4652_v51 = vmax.f32 %v4650_v32, 0.0 }
0x1f03   : > { %4655 = vst.msk [vmem:[%s7535_s12 + $0x8] sm:$0xff] %vm4653_vm0, %v4652_v51 }
0x1f04   : > { %5592 = shalt.err (!%p5589_p8)
}
0x1f05   : > { %s5673_s3 = smov 128   ;;  %s5674_s4 = smov 8  }
0x1f06   : > { %5070 = dma.vmem_to_hbm [thread:$0]  (%p5778_p5), %s4670_s14, 256, %s4672_s6, %s4657_s18, %s5673_s3, %s5673_s3, %s5674_s4  }
0x1f07 PF: > { %s9391_s12 = sld [smem:[#allocation15_spill]] }
0x1f08   : > { %s9392_s26 = sld [smem:[#allocation12_spill]] }
0x1f0d   : > { %p5092_p9 = scmp.ge.s32.totalorder %s9391_s12, 2 }
0x1f0e   : > { %s4686_s5 = sand.u32 1, %s9392_s26  }
0x1f0f   : > { %p5083_p10 = pnand %p5092_p9, %p5782_p6  ;;  %s4687_s11 = scalar_lea.sflag [#allocation3], %s4686_s5 }
0x1f11   : > { %p5084_p11 = pneg %p5083_p10 }
0x1f13   : > { %5618 = dma.done.wait (%p5084_p11), %s4687_s11, 256  }
0x1f14   : > { %5620 = vsyncadd (%p5084_p11), %s4687_s11, 4294967040  ;;  %s9394_s24 = sld [smem:[#allocation17_spill]] }
0x1f15   : > { %s9395_s21 = sld [smem:[#allocation13_spill]] }
0x1f16   : > { %s9396_s22 = sld [smem:[#allocation14_spill]] }
0x1f17   : > { %s9397_s23 = sld [smem:[#allocation18_spill]] }
0x1f1a   : > { %p24_p12 = scmp.ge.s32.totalorder %s9394_s24, 4  }
0x1f1c   :  { %26 = sbr.rel (!%p24_p12) target bundleno = 19 (0x13), region = 131 }
0x1f21   :  { %4693 = vsyncpa [#allocation3], 1 }
0x1f22   :  { %4695 = vsyncpa [#allocation3 + $0x1], 1 }
0x1f23   :  { %4696 = vsyncpa [#allocation4], 1 }
0x1f24   :  { %4698 = vsyncpa [#allocation4 + $0x1], 1 }
0x1f25   :  { %4699 = vsyncpa [#allocation6], 1 }

</bundles_post_ra>
